<compile_context>
chip_gen: v7x
topology: tpu7x:2x2x1
jax: 0.10.0
libtpu: 0.0.40
codegen_flags: <defaults>
</compile_context>

<pallas_src>
import math

import jax
import jax.numpy as jnp
from jax.experimental import pallas as pl
from jax.experimental.pallas import tpu as pltpu

# ----------------------------- model config (small) -----------------------------
BATCH = 2
NUM_FRAMES = 16          # T (config.num_frames = 16)
CHANNELS = 3             # C
IMG = 16                 # H = W (small stand-in for 224)
PATCH = 8                # patch size -> 2x2 = 4 patches per frame
TUBELET = 1              # config.tubelet_size = 1
HIDDEN = 32              # config.hidden_size (small stand-in)
NUM_HEADS = 4
HEAD_DIM = HIDDEN // NUM_HEADS
NUM_LAYERS = 2
MLP_DIM = 64
NUM_CLASSES = 5
CLS_PAD = 128            # lane-dense padded classifier output width
LN_EPS = 1e-6

PATCHES_PER_FRAME = (IMG // PATCH) ** 2          # P = 4
SEQ_LEN = NUM_FRAMES * PATCHES_PER_FRAME         # S = 64
PATCH_DIM = CHANNELS * PATCH * PATCH * TUBELET   # 192


# ----------------------------- in-kernel helpers ---------------------------------
def _ln(x, g, b):
    x = x.astype(jnp.float32)
    mu = jnp.mean(x, axis=-1, keepdims=True)
    var = jnp.mean((x - mu) * (x - mu), axis=-1, keepdims=True)
    return (x - mu) * jax.lax.rsqrt(var + LN_EPS) * g + b


def _gelu(y):
    # exact (erf) GELU, matching HF "gelu"
    return 0.5 * y * (1.0 + jax.lax.erf(y * 0.7071067811865476))


# ----------------------------- fused forward kernel ------------------------------
def _fused_kernel(x_ref, patch_w_ref, posb_ref,
                  ln1g_ref, ln1b_ref, wqkv_ref, bqkv_ref, wo_ref, bo_ref,
                  ln2g_ref, ln2b_ref, w1_ref, b1_ref, w2_ref, b2_ref,
                  lnfg_ref, lnfb_ref, pool_ref, clsw_ref, clsb_ref,
                  o_ref):
    # --- patch (tubelet_size=1) embedding + fused (pos_embed + patch bias) add
    x = jnp.dot(x_ref[0], patch_w_ref[...], preferred_element_type=jnp.float32)
    x = x + posb_ref[...]                                   # (S, HIDDEN)

    # --- transformer encoder (pre-LN ViT blocks, VideoMAE style), unrolled
    for li in range(NUM_LAYERS):
        h = _ln(x, ln1g_ref[li], ln1b_ref[li])
        # fused QKV projection (scale already folded into the Q columns)
        qkv = jnp.dot(h, wqkv_ref[li],
                      preferred_element_type=jnp.float32) + bqkv_ref[li]  # (S, 3H)

        a = jnp.zeros((SEQ_LEN, HIDDEN), jnp.float32)
        for hh in range(NUM_HEADS):
            lo = hh * HEAD_DIM
            q_h = qkv[:, lo:lo + HEAD_DIM]                            # (S, d)
            k_h = qkv[:, HIDDEN + lo:HIDDEN + lo + HEAD_DIM]          # (S, d)
            v_h = qkv[:, 2 * HIDDEN + lo:2 * HIDDEN + lo + HEAD_DIM]  # (S, d)
            # scores: contract on d (no explicit k transpose materialized)
            s = jax.lax.dot_general(q_h, k_h, (((1,), (1,)), ((), ())),
                                    preferred_element_type=jnp.float32)  # (S, S)
            s = s - jnp.max(s, axis=-1, keepdims=True)
            p = jnp.exp(s)
            p = p * pl.reciprocal(jnp.sum(p, axis=-1, keepdims=True), approx=True)
            o_h = jnp.dot(p, v_h, preferred_element_type=jnp.float32)    # (S, d)
            # fused output projection: accumulate per-head W_o slice
            a = a + jnp.dot(o_h, wo_ref[li, hh],
                            preferred_element_type=jnp.float32)          # (S, H)
        x = x + a + bo_ref[li]

        h = _ln(x, ln2g_ref[li], ln2b_ref[li])
        h = jnp.dot(h, w1_ref[li], preferred_element_type=jnp.float32) + b1_ref[li]
        h = _gelu(h)
        h = jnp.dot(h, w2_ref[li], preferred_element_type=jnp.float32) + b2_ref[li]
        x = x + h

    # --- final LayerNorm (use_mean_pooling=False -> LN on the sequence output)
    x = _ln(x, lnfg_ref[...], lnfb_ref[...])                 # (S, HIDDEN)

    # --- frame_features = seq.view(T, P, H).mean(dim=1), done as a pooling matmul
    frames = jnp.dot(pool_ref[...], x, preferred_element_type=jnp.float32)  # (T, H)

    # --- classification head (weight zero-padded to 128 lanes -> dense store)
    logits = jnp.dot(frames, clsw_ref[...],
                     preferred_element_type=jnp.float32) + clsb_ref[...]     # (T, 128)
    o_ref[0] = logits.astype(o_ref.dtype)


def _rep_spec(arr):
    """Full-array block, replicated across the batch grid axis."""
    n = arr.ndim
    return pl.BlockSpec(arr.shape, lambda b, _n=n: (0,) * _n)


# ----------------------------- parameter construction ----------------------------
def sinusoid_pos_table(n_position, d_hid):
    # VideoMAE fixed sin-cos position table
    pos = jnp.arange(n_position, dtype=jnp.float32)[:, None]
    dim = jnp.arange(d_hid, dtype=jnp.float32)[None, :]
    angle = pos / jnp.power(10000.0, 2.0 * jnp.floor(dim / 2.0) / d_hid)
    table = jnp.where(jnp.arange(d_hid)[None, :] % 2 == 0,
                      jnp.sin(angle), jnp.cos(angle))
    return table.astype(jnp.float32)


def init_params(key):
    scale = 0.02

    def rnd(key, shape):
        return scale * jax.random.normal(key, shape, dtype=jnp.float32)

    keys = jax.random.split(key, 4 + NUM_LAYERS)
    params = {
        "patch_w": rnd(keys[0], (PATCH_DIM, HIDDEN)),
        "patch_b": jnp.zeros((HIDDEN,), jnp.float32),
        "pos_embed": sinusoid_pos_table(SEQ_LEN, HIDDEN),
        "ln_f_g": jnp.ones((HIDDEN,), jnp.float32),
        "ln_f_b": jnp.zeros((HIDDEN,), jnp.float32),
        "cls_w": rnd(keys[1], (HIDDEN, NUM_CLASSES)),
        "cls_b": jnp.zeros((NUM_CLASSES,), jnp.float32),
        "layers": [],
    }
    for li in range(NUM_LAYERS):
        lk = jax.random.split(keys[4 + li], 8)
        params["layers"].append({
            "ln1_g": jnp.ones((HIDDEN,), jnp.float32),
            "ln1_b": jnp.zeros((HIDDEN,), jnp.float32),
            "wq": rnd(lk[0], (HIDDEN, HIDDEN)),
            "bq": rnd(lk[1], (HIDDEN,)),
            "wk": rnd(lk[2], (HIDDEN, HIDDEN)),
            "bk": jnp.zeros((HIDDEN,), jnp.float32),   # VideoMAE: no k bias
            "wv": rnd(lk[3], (HIDDEN, HIDDEN)),
            "bv": rnd(lk[4], (HIDDEN,)),
            "wo": rnd(lk[5], (HIDDEN, HIDDEN)),
            "bo": jnp.zeros((HIDDEN,), jnp.float32),
            "ln2_g": jnp.ones((HIDDEN,), jnp.float32),
            "ln2_b": jnp.zeros((HIDDEN,), jnp.float32),
            "w1": rnd(lk[6], (HIDDEN, MLP_DIM)),
            "b1": jnp.zeros((MLP_DIM,), jnp.float32),
            "w2": rnd(lk[7], (MLP_DIM, HIDDEN)),
            "b2": jnp.zeros((HIDDEN,), jnp.float32),
        })
    return params


def pack_params(params):
    """Repack synthetic weights into the fused-kernel layout."""
    scale = 1.0 / math.sqrt(HEAD_DIM)
    layers = params["layers"]

    wqkv, bqkv, wo, bo = [], [], [], []
    ln1g, ln1b, ln2g, ln2b = [], [], [], []
    w1, b1, w2, b2 = [], [], [], []
    for l in layers:
        # fold the attention scale into the Q projection
        wqkv.append(jnp.concatenate([l["wq"] * scale, l["wk"], l["wv"]], axis=1))
        bqkv.append(jnp.concatenate([l["bq"] * scale, l["bk"], l["bv"]], axis=0))
        wo.append(l["wo"].reshape(NUM_HEADS, HEAD_DIM, HIDDEN))
        bo.append(l["bo"])
        ln1g.append(l["ln1_g"]); ln1b.append(l["ln1_b"])
        ln2g.append(l["ln2_g"]); ln2b.append(l["ln2_b"])
        w1.append(l["w1"]); b1.append(l["b1"])
        w2.append(l["w2"]); b2.append(l["b2"])

    # pooling matrix: mean over the P patches of each frame, as a matmul
    pool = (jnp.arange(SEQ_LEN)[None, :] // PATCHES_PER_FRAME
            == jnp.arange(NUM_FRAMES)[:, None]).astype(jnp.float32)
    pool = pool / float(PATCHES_PER_FRAME)                      # (T, S)

    # classifier padded to 128 lanes for a lane-dense output store
    cls_w = jnp.zeros((HIDDEN, CLS_PAD), jnp.float32).at[:, :NUM_CLASSES].set(
        params["cls_w"])
    cls_b = jnp.zeros((1, CLS_PAD), jnp.float32).at[0, :NUM_CLASSES].set(
        params["cls_b"])

    L = NUM_LAYERS
    return {
        "patch_w": params["patch_w"],                                       # (192, 32)
        "pos_plus_b": params["pos_embed"] + params["patch_b"][None, :],     # (S, 32)
        "ln1_g": jnp.stack(ln1g).reshape(L, 1, HIDDEN),
        "ln1_b": jnp.stack(ln1b).reshape(L, 1, HIDDEN),
        "wqkv": jnp.stack(wqkv),                                            # (L, 32, 96)
        "bqkv": jnp.stack(bqkv).reshape(L, 1, 3 * HIDDEN),
        "wo": jnp.stack(wo),                                                # (L, NH, d, 32)
        "bo": jnp.stack(bo).reshape(L, 1, HIDDEN),
        "ln2_g": jnp.stack(ln2g).reshape(L, 1, HIDDEN),
        "ln2_b": jnp.stack(ln2b).reshape(L, 1, HIDDEN),
        "w1": jnp.stack(w1),                                                # (L, 32, 64)
        "b1": jnp.stack(b1).reshape(L, 1, MLP_DIM),
        "w2": jnp.stack(w2),                                                # (L, 64, 32)
        "b2": jnp.stack(b2).reshape(L, 1, HIDDEN),
        "ln_f_g": params["ln_f_g"].reshape(1, HIDDEN),
        "ln_f_b": params["ln_f_b"].reshape(1, HIDDEN),
        "pool": pool,                                                       # (T, S)
        "cls_w": cls_w,                                                     # (32, 128)
        "cls_b": cls_b,                                                     # (1, 128)
    }


# ----------------------------- forward pass ---------------------------------------
def videomae_action_detector_forward(packed, video_frames):
    """video_frames: (B, T, C, H, W) -> logits (B, T, num_classes)."""
    B, T, C, H, W = video_frames.shape
    p = PATCH
    ph, pw = H // p, W // p
    P = ph * pw
    S = T * P

    # single host-side patchify (one XLA relayout); kernel sees a contiguous slab
    x = video_frames.reshape(B, T, C, ph, p, pw, p)
    x = x.transpose(0, 1, 3, 5, 2, 4, 6).reshape(B, S, C * p * p)     # (B, S, 192)

    weight_names = ("patch_w", "pos_plus_b",
                    "ln1_g", "ln1_b", "wqkv", "bqkv", "wo", "bo",
                    "ln2_g", "ln2_b", "w1", "b1", "w2", "b2",
                    "ln_f_g", "ln_f_b", "pool", "cls_w", "cls_b")
    weights = [packed[n] for n in weight_names]

    out = pl.pallas_call(
        _fused_kernel,
        out_shape=jax.ShapeDtypeStruct((B, T, CLS_PAD), jnp.float32),
        grid=(B,),
        in_specs=[pl.BlockSpec((1, S, C * p * p), lambda b: (b, 0, 0))]
                 + [_rep_spec(w) for w in weights],
        out_specs=pl.BlockSpec((1, T, CLS_PAD), lambda b: (b, 0, 0)),
        compiler_params=pltpu.CompilerParams(
            dimension_semantics=("parallel",),          # v7x: one batch per TC
            vmem_limit_bytes=64 * 1024 * 1024,
        ),
    )(x, *weights)

    return out[:, :, :NUM_CLASSES]


# ----------------------------- main ------------------------------------------------
if __name__ == "__main__":
    key = jax.random.PRNGKey(0)
    k_param, k_data = jax.random.split(key)

    params = init_params(k_param)
    packed = pack_params(params)
    video = jax.random.normal(
        k_data, (BATCH, NUM_FRAMES, CHANNELS, IMG, IMG), dtype=jnp.float32)

    logits = jax.jit(videomae_action_detector_forward)(packed, video)
    jax.block_until_ready(logits)

    assert logits.shape == (BATCH, NUM_FRAMES, NUM_CLASSES)
    assert bool(jnp.all(jnp.isfinite(logits)))
    print("KERNEL_OK")
</pallas_src>

<mosaic_0001>
module attributes {stable_mosaic.version = 11 : i64} {
  func.func @_fused_kernel(%arg0: i32, %arg1: memref<1x64x192xf32, #tpu.memory_space<vmem>>, %arg2: memref<192x32xf32, #tpu.memory_space<vmem>>, %arg3: memref<64x32xf32, #tpu.memory_space<vmem>>, %arg4: memref<2x1x32xf32, #tpu.memory_space<vmem>>, %arg5: memref<2x1x32xf32, #tpu.memory_space<vmem>>, %arg6: memref<2x32x96xf32, #tpu.memory_space<vmem>>, %arg7: memref<2x1x96xf32, #tpu.memory_space<vmem>>, %arg8: memref<2x4x8x32xf32, #tpu.memory_space<vmem>>, %arg9: memref<2x1x32xf32, #tpu.memory_space<vmem>>, %arg10: memref<2x1x32xf32, #tpu.memory_space<vmem>>, %arg11: memref<2x1x32xf32, #tpu.memory_space<vmem>>, %arg12: memref<2x32x64xf32, #tpu.memory_space<vmem>>, %arg13: memref<2x1x64xf32, #tpu.memory_space<vmem>>, %arg14: memref<2x64x32xf32, #tpu.memory_space<vmem>>, %arg15: memref<2x1x32xf32, #tpu.memory_space<vmem>>, %arg16: memref<1x32xf32, #tpu.memory_space<vmem>>, %arg17: memref<1x32xf32, #tpu.memory_space<vmem>>, %arg18: memref<16x64xf32, #tpu.memory_space<vmem>>, %arg19: memref<32x128xf32, #tpu.memory_space<vmem>>, %arg20: memref<1x128xf32, #tpu.memory_space<vmem>>, %arg21: memref<1x16x128xf32, #tpu.memory_space<vmem>>) attributes {dimension_semantics = [#tpu.dimension_semantics<parallel>], iteration_bounds = array<i64: 2>, scalar_prefetch = 0 : i64, scratch_operands = 0 : i64, tpu.core_type = #tpu.core_type<tc>, window_params = [{transform_indices = @transform_0, window_bounds = array<i64: 1, 64, 192>}, {pipeline_mode = #tpu.pipeline_mode<synchronous>, transform_indices = @transform_1, window_bounds = array<i64: 192, 32>}, {pipeline_mode = #tpu.pipeline_mode<synchronous>, transform_indices = @transform_2, window_bounds = array<i64: 64, 32>}, {pipeline_mode = #tpu.pipeline_mode<synchronous>, transform_indices = @transform_3, window_bounds = array<i64: 2, 1, 32>}, {pipeline_mode = #tpu.pipeline_mode<synchronous>, transform_indices = @transform_4, window_bounds = array<i64: 2, 1, 32>}, {pipeline_mode = #tpu.pipeline_mode<synchronous>, transform_indices = @transform_5, window_bounds = array<i64: 2, 32, 96>}, {pipeline_mode = #tpu.pipeline_mode<synchronous>, transform_indices = @transform_6, window_bounds = array<i64: 2, 1, 96>}, {pipeline_mode = #tpu.pipeline_mode<synchronous>, transform_indices = @transform_7, window_bounds = array<i64: 2, 4, 8, 32>}, {pipeline_mode = #tpu.pipeline_mode<synchronous>, transform_indices = @transform_8, window_bounds = array<i64: 2, 1, 32>}, {pipeline_mode = #tpu.pipeline_mode<synchronous>, transform_indices = @transform_9, window_bounds = array<i64: 2, 1, 32>}, {pipeline_mode = #tpu.pipeline_mode<synchronous>, transform_indices = @transform_10, window_bounds = array<i64: 2, 1, 32>}, {pipeline_mode = #tpu.pipeline_mode<synchronous>, transform_indices = @transform_11, window_bounds = array<i64: 2, 32, 64>}, {pipeline_mode = #tpu.pipeline_mode<synchronous>, transform_indices = @transform_12, window_bounds = array<i64: 2, 1, 64>}, {pipeline_mode = #tpu.pipeline_mode<synchronous>, transform_indices = @transform_13, window_bounds = array<i64: 2, 64, 32>}, {pipeline_mode = #tpu.pipeline_mode<synchronous>, transform_indices = @transform_14, window_bounds = array<i64: 2, 1, 32>}, {pipeline_mode = #tpu.pipeline_mode<synchronous>, transform_indices = @transform_15, window_bounds = array<i64: 1, 32>}, {pipeline_mode = #tpu.pipeline_mode<synchronous>, transform_indices = @transform_16, window_bounds = array<i64: 1, 32>}, {pipeline_mode = #tpu.pipeline_mode<synchronous>, transform_indices = @transform_17, window_bounds = array<i64: 16, 64>}, {pipeline_mode = #tpu.pipeline_mode<synchronous>, transform_indices = @transform_18, window_bounds = array<i64: 32, 128>}, {pipeline_mode = #tpu.pipeline_mode<synchronous>, transform_indices = @transform_19, window_bounds = array<i64: 1, 128>}, {transform_indices = @transform_20, window_bounds = array<i64: 1, 16, 128>}]} {
    %c0 = arith.constant 0 : index
    %c0_0 = arith.constant 0 : index
    %c0_1 = arith.constant 0 : index
    %0 = vector.load %arg1[%c0, %c0_0, %c0_1] : memref<1x64x192xf32, #tpu.memory_space<vmem>>, vector<1x64x192xf32>
    %1 = vector.shape_cast %0 : vector<1x64x192xf32> to vector<64x192xf32>
    %c0_2 = arith.constant 0 : index
    %c0_3 = arith.constant 0 : index
    %2 = vector.load %arg2[%c0_2, %c0_3] : memref<192x32xf32, #tpu.memory_space<vmem>>, vector<192x32xf32>
    %cst = arith.constant dense<0.000000e+00> : vector<64x32xf32>
    %3 = tpu.matmul %1, %2, %cst {dimension_numbers = #tpu.dot_dimension_numbers<[1], [0], [0], [1], [0, 0, 1, 1], [], []>} : vector<64x192xf32>, vector<192x32xf32>, vector<64x32xf32> -> vector<64x32xf32>
    %c0_4 = arith.constant 0 : index
    %c0_5 = arith.constant 0 : index
    %4 = vector.load %arg3[%c0_4, %c0_5] : memref<64x32xf32, #tpu.memory_space<vmem>>, vector<64x32xf32>
    %5 = arith.addf %3, %4 : vector<64x32xf32>
    %c0_6 = arith.constant 0 : index
    %c0_7 = arith.constant 0 : index
    %c0_8 = arith.constant 0 : index
    %6 = vector.load %arg4[%c0_6, %c0_7, %c0_8] : memref<2x1x32xf32, #tpu.memory_space<vmem>>, vector<1x1x32xf32>
    %7 = vector.shape_cast %6 : vector<1x1x32xf32> to vector<1x32xf32>
    %c0_9 = arith.constant 0 : index
    %c0_10 = arith.constant 0 : index
    %c0_11 = arith.constant 0 : index
    %8 = vector.load %arg5[%c0_9, %c0_10, %c0_11] : memref<2x1x32xf32, #tpu.memory_space<vmem>>, vector<1x1x32xf32>
    %9 = vector.shape_cast %8 : vector<1x1x32xf32> to vector<1x32xf32>
    %cst_12 = arith.constant dense<0.000000e+00> : vector<64xf32>
    %10 = vector.multi_reduction <add>, %5, %cst_12 [1] : vector<64x32xf32> to vector<64xf32>
    %11 = vector.shape_cast %10 : vector<64xf32> to vector<64x1xf32>
    %cst_13 = arith.constant 3.200000e+01 : f32
    %12 = vector.broadcast %cst_13 : f32 to vector<64x1xf32>
    %13 = arith.divf %11, %12 : vector<64x1xf32>
    %14 = vector.broadcast %13 : vector<64x1xf32> to vector<64x32xf32>
    %15 = arith.subf %5, %14 : vector<64x32xf32>
    %16 = vector.broadcast %13 : vector<64x1xf32> to vector<64x32xf32>
    %17 = arith.subf %5, %16 : vector<64x32xf32>
    %18 = arith.mulf %15, %17 : vector<64x32xf32>
    %cst_14 = arith.constant dense<0.000000e+00> : vector<64xf32>
    %19 = vector.multi_reduction <add>, %18, %cst_14 [1] : vector<64x32xf32> to vector<64xf32>
    %20 = vector.shape_cast %19 : vector<64xf32> to vector<64x1xf32>
    %cst_15 = arith.constant 3.200000e+01 : f32
    %21 = vector.broadcast %cst_15 : f32 to vector<64x1xf32>
    %22 = arith.divf %20, %21 : vector<64x1xf32>
    %23 = vector.broadcast %13 : vector<64x1xf32> to vector<64x32xf32>
    %24 = arith.subf %5, %23 : vector<64x32xf32>
    %cst_16 = arith.constant 9.99999997E-7 : f32
    %25 = vector.broadcast %cst_16 : f32 to vector<64x1xf32>
    %26 = arith.addf %22, %25 : vector<64x1xf32>
    %27 = math.rsqrt %26 : vector<64x1xf32>
    %28 = vector.broadcast %27 : vector<64x1xf32> to vector<64x32xf32>
    %29 = arith.mulf %24, %28 : vector<64x32xf32>
    %30 = vector.broadcast %7 : vector<1x32xf32> to vector<64x32xf32>
    %31 = arith.mulf %29, %30 : vector<64x32xf32>
    %32 = vector.broadcast %9 : vector<1x32xf32> to vector<64x32xf32>
    %33 = arith.addf %31, %32 : vector<64x32xf32>
    %c0_17 = arith.constant 0 : index
    %c0_18 = arith.constant 0 : index
    %c0_19 = arith.constant 0 : index
    %34 = vector.load %arg6[%c0_17, %c0_18, %c0_19] : memref<2x32x96xf32, #tpu.memory_space<vmem>>, vector<1x32x96xf32>
    %35 = vector.shape_cast %34 : vector<1x32x96xf32> to vector<32x96xf32>
    %cst_20 = arith.constant dense<0.000000e+00> : vector<64x96xf32>
    %36 = tpu.matmul %33, %35, %cst_20 {dimension_numbers = #tpu.dot_dimension_numbers<[1], [0], [0], [1], [0, 0, 1, 1], [], []>} : vector<64x32xf32>, vector<32x96xf32>, vector<64x96xf32> -> vector<64x96xf32>
    %c0_21 = arith.constant 0 : index
    %c0_22 = arith.constant 0 : index
    %c0_23 = arith.constant 0 : index
    %37 = vector.load %arg7[%c0_21, %c0_22, %c0_23] : memref<2x1x96xf32, #tpu.memory_space<vmem>>, vector<1x1x96xf32>
    %38 = vector.shape_cast %37 : vector<1x1x96xf32> to vector<1x96xf32>
    %39 = vector.broadcast %38 : vector<1x96xf32> to vector<64x96xf32>
    %40 = arith.addf %36, %39 : vector<64x96xf32>
    %cst_24 = arith.constant 0.000000e+00 : f32
    %41 = vector.broadcast %cst_24 : f32 to vector<64x32xf32>
    %42 = vector.extract_strided_slice %40 {offsets = [0, 0], sizes = [64, 8], strides = [1, 1]} : vector<64x96xf32> to vector<64x8xf32>
    %43 = vector.extract_strided_slice %40 {offsets = [0, 32], sizes = [64, 8], strides = [1, 1]} : vector<64x96xf32> to vector<64x8xf32>
    %44 = vector.extract_strided_slice %40 {offsets = [0, 64], sizes = [64, 8], strides = [1, 1]} : vector<64x96xf32> to vector<64x8xf32>
    %cst_25 = arith.constant dense<0.000000e+00> : vector<64x64xf32>
    %45 = tpu.matmul %42, %43, %cst_25 {dimension_numbers = #tpu.dot_dimension_numbers<[1], [1], [0], [0], [0, 0, 1, 0], [], []>} : vector<64x8xf32>, vector<64x8xf32>, vector<64x64xf32> -> vector<64x64xf32>
    %cst_26 = arith.constant dense<0xFF800000> : vector<64xf32>
    %46 = vector.multi_reduction <maximumf>, %45, %cst_26 [1] : vector<64x64xf32> to vector<64xf32>
    %47 = vector.shape_cast %46 : vector<64xf32> to vector<64x1xf32>
    %48 = vector.broadcast %47 : vector<64x1xf32> to vector<64x64xf32>
    %49 = arith.subf %45, %48 : vector<64x64xf32>
    %50 = math.exp %49 : vector<64x64xf32>
    %cst_27 = arith.constant dense<0.000000e+00> : vector<64xf32>
    %51 = vector.multi_reduction <add>, %50, %cst_27 [1] : vector<64x64xf32> to vector<64xf32>
    %52 = vector.shape_cast %51 : vector<64xf32> to vector<64x1xf32>
    %53 = tpu.reciprocal %52 {approx = true} : vector<64x1xf32> -> vector<64x1xf32>
    %54 = vector.broadcast %53 : vector<64x1xf32> to vector<64x64xf32>
    %55 = arith.mulf %50, %54 : vector<64x64xf32>
    %cst_28 = arith.constant dense<0.000000e+00> : vector<64x8xf32>
    %56 = tpu.matmul %55, %44, %cst_28 {dimension_numbers = #tpu.dot_dimension_numbers<[1], [0], [0], [1], [0, 0, 1, 1], [], []>} : vector<64x64xf32>, vector<64x8xf32>, vector<64x8xf32> -> vector<64x8xf32>
    %c0_29 = arith.constant 0 : index
    %c0_30 = arith.constant 0 : index
    %c0_31 = arith.constant 0 : index
    %c0_32 = arith.constant 0 : index
    %57 = vector.load %arg8[%c0_29, %c0_30, %c0_31, %c0_32] : memref<2x4x8x32xf32, #tpu.memory_space<vmem>>, vector<1x1x8x32xf32>
    %58 = vector.shape_cast %57 : vector<1x1x8x32xf32> to vector<8x32xf32>
    %cst_33 = arith.constant dense<0.000000e+00> : vector<64x32xf32>
    %59 = tpu.matmul %56, %58, %cst_33 {dimension_numbers = #tpu.dot_dimension_numbers<[1], [0], [0], [1], [0, 0, 1, 1], [], []>} : vector<64x8xf32>, vector<8x32xf32>, vector<64x32xf32> -> vector<64x32xf32>
    %60 = arith.addf %41, %59 : vector<64x32xf32>
    %61 = vector.extract_strided_slice %40 {offsets = [0, 8], sizes = [64, 8], strides = [1, 1]} : vector<64x96xf32> to vector<64x8xf32>
    %62 = vector.extract_strided_slice %40 {offsets = [0, 40], sizes = [64, 8], strides = [1, 1]} : vector<64x96xf32> to vector<64x8xf32>
    %63 = vector.extract_strided_slice %40 {offsets = [0, 72], sizes = [64, 8], strides = [1, 1]} : vector<64x96xf32> to vector<64x8xf32>
    %cst_34 = arith.constant dense<0.000000e+00> : vector<64x64xf32>
    %64 = tpu.matmul %61, %62, %cst_34 {dimension_numbers = #tpu.dot_dimension_numbers<[1], [1], [0], [0], [0, 0, 1, 0], [], []>} : vector<64x8xf32>, vector<64x8xf32>, vector<64x64xf32> -> vector<64x64xf32>
    %cst_35 = arith.constant dense<0xFF800000> : vector<64xf32>
    %65 = vector.multi_reduction <maximumf>, %64, %cst_35 [1] : vector<64x64xf32> to vector<64xf32>
    %66 = vector.shape_cast %65 : vector<64xf32> to vector<64x1xf32>
    %67 = vector.broadcast %66 : vector<64x1xf32> to vector<64x64xf32>
    %68 = arith.subf %64, %67 : vector<64x64xf32>
    %69 = math.exp %68 : vector<64x64xf32>
    %cst_36 = arith.constant dense<0.000000e+00> : vector<64xf32>
    %70 = vector.multi_reduction <add>, %69, %cst_36 [1] : vector<64x64xf32> to vector<64xf32>
    %71 = vector.shape_cast %70 : vector<64xf32> to vector<64x1xf32>
    %72 = tpu.reciprocal %71 {approx = true} : vector<64x1xf32> -> vector<64x1xf32>
    %73 = vector.broadcast %72 : vector<64x1xf32> to vector<64x64xf32>
    %74 = arith.mulf %69, %73 : vector<64x64xf32>
    %cst_37 = arith.constant dense<0.000000e+00> : vector<64x8xf32>
    %75 = tpu.matmul %74, %63, %cst_37 {dimension_numbers = #tpu.dot_dimension_numbers<[1], [0], [0], [1], [0, 0, 1, 1], [], []>} : vector<64x64xf32>, vector<64x8xf32>, vector<64x8xf32> -> vector<64x8xf32>
    %c0_38 = arith.constant 0 : index
    %c1 = arith.constant 1 : index
    %c0_39 = arith.constant 0 : index
    %c0_40 = arith.constant 0 : index
    %76 = vector.load %arg8[%c0_38, %c1, %c0_39, %c0_40] : memref<2x4x8x32xf32, #tpu.memory_space<vmem>>, vector<1x1x8x32xf32>
    %77 = vector.shape_cast %76 : vector<1x1x8x32xf32> to vector<8x32xf32>
    %cst_41 = arith.constant dense<0.000000e+00> : vector<64x32xf32>
    %78 = tpu.matmul %75, %77, %cst_41 {dimension_numbers = #tpu.dot_dimension_numbers<[1], [0], [0], [1], [0, 0, 1, 1], [], []>} : vector<64x8xf32>, vector<8x32xf32>, vector<64x32xf32> -> vector<64x32xf32>
    %79 = arith.addf %60, %78 : vector<64x32xf32>
    %80 = vector.extract_strided_slice %40 {offsets = [0, 16], sizes = [64, 8], strides = [1, 1]} : vector<64x96xf32> to vector<64x8xf32>
    %81 = vector.extract_strided_slice %40 {offsets = [0, 48], sizes = [64, 8], strides = [1, 1]} : vector<64x96xf32> to vector<64x8xf32>
    %82 = vector.extract_strided_slice %40 {offsets = [0, 80], sizes = [64, 8], strides = [1, 1]} : vector<64x96xf32> to vector<64x8xf32>
    %cst_42 = arith.constant dense<0.000000e+00> : vector<64x64xf32>
    %83 = tpu.matmul %80, %81, %cst_42 {dimension_numbers = #tpu.dot_dimension_numbers<[1], [1], [0], [0], [0, 0, 1, 0], [], []>} : vector<64x8xf32>, vector<64x8xf32>, vector<64x64xf32> -> vector<64x64xf32>
    %cst_43 = arith.constant dense<0xFF800000> : vector<64xf32>
    %84 = vector.multi_reduction <maximumf>, %83, %cst_43 [1] : vector<64x64xf32> to vector<64xf32>
    %85 = vector.shape_cast %84 : vector<64xf32> to vector<64x1xf32>
    %86 = vector.broadcast %85 : vector<64x1xf32> to vector<64x64xf32>
    %87 = arith.subf %83, %86 : vector<64x64xf32>
    %88 = math.exp %87 : vector<64x64xf32>
    %cst_44 = arith.constant dense<0.000000e+00> : vector<64xf32>
    %89 = vector.multi_reduction <add>, %88, %cst_44 [1] : vector<64x64xf32> to vector<64xf32>
    %90 = vector.shape_cast %89 : vector<64xf32> to vector<64x1xf32>
    %91 = tpu.reciprocal %90 {approx = true} : vector<64x1xf32> -> vector<64x1xf32>
    %92 = vector.broadcast %91 : vector<64x1xf32> to vector<64x64xf32>
    %93 = arith.mulf %88, %92 : vector<64x64xf32>
    %cst_45 = arith.constant dense<0.000000e+00> : vector<64x8xf32>
    %94 = tpu.matmul %93, %82, %cst_45 {dimension_numbers = #tpu.dot_dimension_numbers<[1], [0], [0], [1], [0, 0, 1, 1], [], []>} : vector<64x64xf32>, vector<64x8xf32>, vector<64x8xf32> -> vector<64x8xf32>
    %c0_46 = arith.constant 0 : index
    %c2 = arith.constant 2 : index
    %c0_47 = arith.constant 0 : index
    %c0_48 = arith.constant 0 : index
    %95 = vector.load %arg8[%c0_46, %c2, %c0_47, %c0_48] : memref<2x4x8x32xf32, #tpu.memory_space<vmem>>, vector<1x1x8x32xf32>
    %96 = vector.shape_cast %95 : vector<1x1x8x32xf32> to vector<8x32xf32>
    %cst_49 = arith.constant dense<0.000000e+00> : vector<64x32xf32>
    %97 = tpu.matmul %94, %96, %cst_49 {dimension_numbers = #tpu.dot_dimension_numbers<[1], [0], [0], [1], [0, 0, 1, 1], [], []>} : vector<64x8xf32>, vector<8x32xf32>, vector<64x32xf32> -> vector<64x32xf32>
    %98 = arith.addf %79, %97 : vector<64x32xf32>
    %99 = vector.extract_strided_slice %40 {offsets = [0, 24], sizes = [64, 8], strides = [1, 1]} : vector<64x96xf32> to vector<64x8xf32>
    %100 = vector.extract_strided_slice %40 {offsets = [0, 56], sizes = [64, 8], strides = [1, 1]} : vector<64x96xf32> to vector<64x8xf32>
    %101 = vector.extract_strided_slice %40 {offsets = [0, 88], sizes = [64, 8], strides = [1, 1]} : vector<64x96xf32> to vector<64x8xf32>
    %cst_50 = arith.constant dense<0.000000e+00> : vector<64x64xf32>
    %102 = tpu.matmul %99, %100, %cst_50 {dimension_numbers = #tpu.dot_dimension_numbers<[1], [1], [0], [0], [0, 0, 1, 0], [], []>} : vector<64x8xf32>, vector<64x8xf32>, vector<64x64xf32> -> vector<64x64xf32>
    %cst_51 = arith.constant dense<0xFF800000> : vector<64xf32>
    %103 = vector.multi_reduction <maximumf>, %102, %cst_51 [1] : vector<64x64xf32> to vector<64xf32>
    %104 = vector.shape_cast %103 : vector<64xf32> to vector<64x1xf32>
    %105 = vector.broadcast %104 : vector<64x1xf32> to vector<64x64xf32>
    %106 = arith.subf %102, %105 : vector<64x64xf32>
    %107 = math.exp %106 : vector<64x64xf32>
    %cst_52 = arith.constant dense<0.000000e+00> : vector<64xf32>
    %108 = vector.multi_reduction <add>, %107, %cst_52 [1] : vector<64x64xf32> to vector<64xf32>
    %109 = vector.shape_cast %108 : vector<64xf32> to vector<64x1xf32>
    %110 = tpu.reciprocal %109 {approx = true} : vector<64x1xf32> -> vector<64x1xf32>
    %111 = vector.broadcast %110 : vector<64x1xf32> to vector<64x64xf32>
    %112 = arith.mulf %107, %111 : vector<64x64xf32>
    %cst_53 = arith.constant dense<0.000000e+00> : vector<64x8xf32>
    %113 = tpu.matmul %112, %101, %cst_53 {dimension_numbers = #tpu.dot_dimension_numbers<[1], [0], [0], [1], [0, 0, 1, 1], [], []>} : vector<64x64xf32>, vector<64x8xf32>, vector<64x8xf32> -> vector<64x8xf32>
    %c0_54 = arith.constant 0 : index
    %c3 = arith.constant 3 : index
    %c0_55 = arith.constant 0 : index
    %c0_56 = arith.constant 0 : index
    %114 = vector.load %arg8[%c0_54, %c3, %c0_55, %c0_56] : memref<2x4x8x32xf32, #tpu.memory_space<vmem>>, vector<1x1x8x32xf32>
    %115 = vector.shape_cast %114 : vector<1x1x8x32xf32> to vector<8x32xf32>
    %cst_57 = arith.constant dense<0.000000e+00> : vector<64x32xf32>
    %116 = tpu.matmul %113, %115, %cst_57 {dimension_numbers = #tpu.dot_dimension_numbers<[1], [0], [0], [1], [0, 0, 1, 1], [], []>} : vector<64x8xf32>, vector<8x32xf32>, vector<64x32xf32> -> vector<64x32xf32>
    %117 = arith.addf %98, %116 : vector<64x32xf32>
    %118 = arith.addf %5, %117 : vector<64x32xf32>
    %c0_58 = arith.constant 0 : index
    %c0_59 = arith.constant 0 : index
    %c0_60 = arith.constant 0 : index
    %119 = vector.load %arg9[%c0_58, %c0_59, %c0_60] : memref<2x1x32xf32, #tpu.memory_space<vmem>>, vector<1x1x32xf32>
    %120 = vector.shape_cast %119 : vector<1x1x32xf32> to vector<1x32xf32>
    %121 = vector.broadcast %120 : vector<1x32xf32> to vector<64x32xf32>
    %122 = arith.addf %118, %121 : vector<64x32xf32>
    %c0_61 = arith.constant 0 : index
    %c0_62 = arith.constant 0 : index
    %c0_63 = arith.constant 0 : index
    %123 = vector.load %arg10[%c0_61, %c0_62, %c0_63] : memref<2x1x32xf32, #tpu.memory_space<vmem>>, vector<1x1x32xf32>
    %124 = vector.shape_cast %123 : vector<1x1x32xf32> to vector<1x32xf32>
    %c0_64 = arith.constant 0 : index
    %c0_65 = arith.constant 0 : index
    %c0_66 = arith.constant 0 : index
    %125 = vector.load %arg11[%c0_64, %c0_65, %c0_66] : memref<2x1x32xf32, #tpu.memory_space<vmem>>, vector<1x1x32xf32>
    %126 = vector.shape_cast %125 : vector<1x1x32xf32> to vector<1x32xf32>
    %cst_67 = arith.constant dense<0.000000e+00> : vector<64xf32>
    %127 = vector.multi_reduction <add>, %122, %cst_67 [1] : vector<64x32xf32> to vector<64xf32>
    %128 = vector.shape_cast %127 : vector<64xf32> to vector<64x1xf32>
    %cst_68 = arith.constant 3.200000e+01 : f32
    %129 = vector.broadcast %cst_68 : f32 to vector<64x1xf32>
    %130 = arith.divf %128, %129 : vector<64x1xf32>
    %131 = vector.broadcast %130 : vector<64x1xf32> to vector<64x32xf32>
    %132 = arith.subf %122, %131 : vector<64x32xf32>
    %133 = vector.broadcast %130 : vector<64x1xf32> to vector<64x32xf32>
    %134 = arith.subf %122, %133 : vector<64x32xf32>
    %135 = arith.mulf %132, %134 : vector<64x32xf32>
    %cst_69 = arith.constant dense<0.000000e+00> : vector<64xf32>
    %136 = vector.multi_reduction <add>, %135, %cst_69 [1] : vector<64x32xf32> to vector<64xf32>
    %137 = vector.shape_cast %136 : vector<64xf32> to vector<64x1xf32>
    %cst_70 = arith.constant 3.200000e+01 : f32
    %138 = vector.broadcast %cst_70 : f32 to vector<64x1xf32>
    %139 = arith.divf %137, %138 : vector<64x1xf32>
    %140 = vector.broadcast %130 : vector<64x1xf32> to vector<64x32xf32>
    %141 = arith.subf %122, %140 : vector<64x32xf32>
    %cst_71 = arith.constant 9.99999997E-7 : f32
    %142 = vector.broadcast %cst_71 : f32 to vector<64x1xf32>
    %143 = arith.addf %139, %142 : vector<64x1xf32>
    %144 = math.rsqrt %143 : vector<64x1xf32>
    %145 = vector.broadcast %144 : vector<64x1xf32> to vector<64x32xf32>
    %146 = arith.mulf %141, %145 : vector<64x32xf32>
    %147 = vector.broadcast %124 : vector<1x32xf32> to vector<64x32xf32>
    %148 = arith.mulf %146, %147 : vector<64x32xf32>
    %149 = vector.broadcast %126 : vector<1x32xf32> to vector<64x32xf32>
    %150 = arith.addf %148, %149 : vector<64x32xf32>
    %c0_72 = arith.constant 0 : index
    %c0_73 = arith.constant 0 : index
    %c0_74 = arith.constant 0 : index
    %151 = vector.load %arg12[%c0_72, %c0_73, %c0_74] : memref<2x32x64xf32, #tpu.memory_space<vmem>>, vector<1x32x64xf32>
    %152 = vector.shape_cast %151 : vector<1x32x64xf32> to vector<32x64xf32>
    %cst_75 = arith.constant dense<0.000000e+00> : vector<64x64xf32>
    %153 = tpu.matmul %150, %152, %cst_75 {dimension_numbers = #tpu.dot_dimension_numbers<[1], [0], [0], [1], [0, 0, 1, 1], [], []>} : vector<64x32xf32>, vector<32x64xf32>, vector<64x64xf32> -> vector<64x64xf32>
    %c0_76 = arith.constant 0 : index
    %c0_77 = arith.constant 0 : index
    %c0_78 = arith.constant 0 : index
    %154 = vector.load %arg13[%c0_76, %c0_77, %c0_78] : memref<2x1x64xf32, #tpu.memory_space<vmem>>, vector<1x1x64xf32>
    %155 = vector.shape_cast %154 : vector<1x1x64xf32> to vector<1x64xf32>
    %156 = vector.broadcast %155 : vector<1x64xf32> to vector<64x64xf32>
    %157 = arith.addf %153, %156 : vector<64x64xf32>
    %cst_79 = arith.constant 5.000000e-01 : f32
    %158 = vector.broadcast %cst_79 : f32 to vector<64x64xf32>
    %159 = arith.mulf %158, %157 : vector<64x64xf32>
    %cst_80 = arith.constant 0.707106769 : f32
    %160 = vector.broadcast %cst_80 : f32 to vector<64x64xf32>
    %161 = arith.mulf %157, %160 : vector<64x64xf32>
    %162 = math.erf %161 : vector<64x64xf32>
    %cst_81 = arith.constant 1.000000e+00 : f32
    %163 = vector.broadcast %cst_81 : f32 to vector<64x64xf32>
    %164 = arith.addf %163, %162 : vector<64x64xf32>
    %165 = arith.mulf %159, %164 : vector<64x64xf32>
    %c0_82 = arith.constant 0 : index
    %c0_83 = arith.constant 0 : index
    %c0_84 = arith.constant 0 : index
    %166 = vector.load %arg14[%c0_82, %c0_83, %c0_84] : memref<2x64x32xf32, #tpu.memory_space<vmem>>, vector<1x64x32xf32>
    %167 = vector.shape_cast %166 : vector<1x64x32xf32> to vector<64x32xf32>
    %cst_85 = arith.constant dense<0.000000e+00> : vector<64x32xf32>
    %168 = tpu.matmul %165, %167, %cst_85 {dimension_numbers = #tpu.dot_dimension_numbers<[1], [0], [0], [1], [0, 0, 1, 1], [], []>} : vector<64x64xf32>, vector<64x32xf32>, vector<64x32xf32> -> vector<64x32xf32>
    %c0_86 = arith.constant 0 : index
    %c0_87 = arith.constant 0 : index
    %c0_88 = arith.constant 0 : index
    %169 = vector.load %arg15[%c0_86, %c0_87, %c0_88] : memref<2x1x32xf32, #tpu.memory_space<vmem>>, vector<1x1x32xf32>
    %170 = vector.shape_cast %169 : vector<1x1x32xf32> to vector<1x32xf32>
    %171 = vector.broadcast %170 : vector<1x32xf32> to vector<64x32xf32>
    %172 = arith.addf %168, %171 : vector<64x32xf32>
    %173 = arith.addf %122, %172 : vector<64x32xf32>
    %c1_89 = arith.constant 1 : index
    %c0_90 = arith.constant 0 : index
    %c0_91 = arith.constant 0 : index
    %174 = vector.load %arg4[%c1_89, %c0_90, %c0_91] : memref<2x1x32xf32, #tpu.memory_space<vmem>>, vector<1x1x32xf32>
    %175 = vector.shape_cast %174 : vector<1x1x32xf32> to vector<1x32xf32>
    %c1_92 = arith.constant 1 : index
    %c0_93 = arith.constant 0 : index
    %c0_94 = arith.constant 0 : index
    %176 = vector.load %arg5[%c1_92, %c0_93, %c0_94] : memref<2x1x32xf32, #tpu.memory_space<vmem>>, vector<1x1x32xf32>
    %177 = vector.shape_cast %176 : vector<1x1x32xf32> to vector<1x32xf32>
    %cst_95 = arith.constant dense<0.000000e+00> : vector<64xf32>
    %178 = vector.multi_reduction <add>, %173, %cst_95 [1] : vector<64x32xf32> to vector<64xf32>
    %179 = vector.shape_cast %178 : vector<64xf32> to vector<64x1xf32>
    %cst_96 = arith.constant 3.200000e+01 : f32
    %180 = vector.broadcast %cst_96 : f32 to vector<64x1xf32>
    %181 = arith.divf %179, %180 : vector<64x1xf32>
    %182 = vector.broadcast %181 : vector<64x1xf32> to vector<64x32xf32>
    %183 = arith.subf %173, %182 : vector<64x32xf32>
    %184 = vector.broadcast %181 : vector<64x1xf32> to vector<64x32xf32>
    %185 = arith.subf %173, %184 : vector<64x32xf32>
    %186 = arith.mulf %183, %185 : vector<64x32xf32>
    %cst_97 = arith.constant dense<0.000000e+00> : vector<64xf32>
    %187 = vector.multi_reduction <add>, %186, %cst_97 [1] : vector<64x32xf32> to vector<64xf32>
    %188 = vector.shape_cast %187 : vector<64xf32> to vector<64x1xf32>
    %cst_98 = arith.constant 3.200000e+01 : f32
    %189 = vector.broadcast %cst_98 : f32 to vector<64x1xf32>
    %190 = arith.divf %188, %189 : vector<64x1xf32>
    %191 = vector.broadcast %181 : vector<64x1xf32> to vector<64x32xf32>
    %192 = arith.subf %173, %191 : vector<64x32xf32>
    %cst_99 = arith.constant 9.99999997E-7 : f32
    %193 = vector.broadcast %cst_99 : f32 to vector<64x1xf32>
    %194 = arith.addf %190, %193 : vector<64x1xf32>
    %195 = math.rsqrt %194 : vector<64x1xf32>
    %196 = vector.broadcast %195 : vector<64x1xf32> to vector<64x32xf32>
    %197 = arith.mulf %192, %196 : vector<64x32xf32>
    %198 = vector.broadcast %175 : vector<1x32xf32> to vector<64x32xf32>
    %199 = arith.mulf %197, %198 : vector<64x32xf32>
    %200 = vector.broadcast %177 : vector<1x32xf32> to vector<64x32xf32>
    %201 = arith.addf %199, %200 : vector<64x32xf32>
    %c1_100 = arith.constant 1 : index
    %c0_101 = arith.constant 0 : index
    %c0_102 = arith.constant 0 : index
    %202 = vector.load %arg6[%c1_100, %c0_101, %c0_102] : memref<2x32x96xf32, #tpu.memory_space<vmem>>, vector<1x32x96xf32>
    %203 = vector.shape_cast %202 : vector<1x32x96xf32> to vector<32x96xf32>
    %cst_103 = arith.constant dense<0.000000e+00> : vector<64x96xf32>
    %204 = tpu.matmul %201, %203, %cst_103 {dimension_numbers = #tpu.dot_dimension_numbers<[1], [0], [0], [1], [0, 0, 1, 1], [], []>} : vector<64x32xf32>, vector<32x96xf32>, vector<64x96xf32> -> vector<64x96xf32>
    %c1_104 = arith.constant 1 : index
    %c0_105 = arith.constant 0 : index
    %c0_106 = arith.constant 0 : index
    %205 = vector.load %arg7[%c1_104, %c0_105, %c0_106] : memref<2x1x96xf32, #tpu.memory_space<vmem>>, vector<1x1x96xf32>
    %206 = vector.shape_cast %205 : vector<1x1x96xf32> to vector<1x96xf32>
    %207 = vector.broadcast %206 : vector<1x96xf32> to vector<64x96xf32>
    %208 = arith.addf %204, %207 : vector<64x96xf32>
    %cst_107 = arith.constant 0.000000e+00 : f32
    %209 = vector.broadcast %cst_107 : f32 to vector<64x32xf32>
    %210 = vector.extract_strided_slice %208 {offsets = [0, 0], sizes = [64, 8], strides = [1, 1]} : vector<64x96xf32> to vector<64x8xf32>
    %211 = vector.extract_strided_slice %208 {offsets = [0, 32], sizes = [64, 8], strides = [1, 1]} : vector<64x96xf32> to vector<64x8xf32>
    %212 = vector.extract_strided_slice %208 {offsets = [0, 64], sizes = [64, 8], strides = [1, 1]} : vector<64x96xf32> to vector<64x8xf32>
    %cst_108 = arith.constant dense<0.000000e+00> : vector<64x64xf32>
    %213 = tpu.matmul %210, %211, %cst_108 {dimension_numbers = #tpu.dot_dimension_numbers<[1], [1], [0], [0], [0, 0, 1, 0], [], []>} : vector<64x8xf32>, vector<64x8xf32>, vector<64x64xf32> -> vector<64x64xf32>
    %cst_109 = arith.constant dense<0xFF800000> : vector<64xf32>
    %214 = vector.multi_reduction <maximumf>, %213, %cst_109 [1] : vector<64x64xf32> to vector<64xf32>
    %215 = vector.shape_cast %214 : vector<64xf32> to vector<64x1xf32>
    %216 = vector.broadcast %215 : vector<64x1xf32> to vector<64x64xf32>
    %217 = arith.subf %213, %216 : vector<64x64xf32>
    %218 = math.exp %217 : vector<64x64xf32>
    %cst_110 = arith.constant dense<0.000000e+00> : vector<64xf32>
    %219 = vector.multi_reduction <add>, %218, %cst_110 [1] : vector<64x64xf32> to vector<64xf32>
    %220 = vector.shape_cast %219 : vector<64xf32> to vector<64x1xf32>
    %221 = tpu.reciprocal %220 {approx = true} : vector<64x1xf32> -> vector<64x1xf32>
    %222 = vector.broadcast %221 : vector<64x1xf32> to vector<64x64xf32>
    %223 = arith.mulf %218, %222 : vector<64x64xf32>
    %cst_111 = arith.constant dense<0.000000e+00> : vector<64x8xf32>
    %224 = tpu.matmul %223, %212, %cst_111 {dimension_numbers = #tpu.dot_dimension_numbers<[1], [0], [0], [1], [0, 0, 1, 1], [], []>} : vector<64x64xf32>, vector<64x8xf32>, vector<64x8xf32> -> vector<64x8xf32>
    %c1_112 = arith.constant 1 : index
    %c0_113 = arith.constant 0 : index
    %c0_114 = arith.constant 0 : index
    %c0_115 = arith.constant 0 : index
    %225 = vector.load %arg8[%c1_112, %c0_113, %c0_114, %c0_115] : memref<2x4x8x32xf32, #tpu.memory_space<vmem>>, vector<1x1x8x32xf32>
    %226 = vector.shape_cast %225 : vector<1x1x8x32xf32> to vector<8x32xf32>
    %cst_116 = arith.constant dense<0.000000e+00> : vector<64x32xf32>
    %227 = tpu.matmul %224, %226, %cst_116 {dimension_numbers = #tpu.dot_dimension_numbers<[1], [0], [0], [1], [0, 0, 1, 1], [], []>} : vector<64x8xf32>, vector<8x32xf32>, vector<64x32xf32> -> vector<64x32xf32>
    %228 = arith.addf %209, %227 : vector<64x32xf32>
    %229 = vector.extract_strided_slice %208 {offsets = [0, 8], sizes = [64, 8], strides = [1, 1]} : vector<64x96xf32> to vector<64x8xf32>
    %230 = vector.extract_strided_slice %208 {offsets = [0, 40], sizes = [64, 8], strides = [1, 1]} : vector<64x96xf32> to vector<64x8xf32>
    %231 = vector.extract_strided_slice %208 {offsets = [0, 72], sizes = [64, 8], strides = [1, 1]} : vector<64x96xf32> to vector<64x8xf32>
    %cst_117 = arith.constant dense<0.000000e+00> : vector<64x64xf32>
    %232 = tpu.matmul %229, %230, %cst_117 {dimension_numbers = #tpu.dot_dimension_numbers<[1], [1], [0], [0], [0, 0, 1, 0], [], []>} : vector<64x8xf32>, vector<64x8xf32>, vector<64x64xf32> -> vector<64x64xf32>
    %cst_118 = arith.constant dense<0xFF800000> : vector<64xf32>
    %233 = vector.multi_reduction <maximumf>, %232, %cst_118 [1] : vector<64x64xf32> to vector<64xf32>
    %234 = vector.shape_cast %233 : vector<64xf32> to vector<64x1xf32>
    %235 = vector.broadcast %234 : vector<64x1xf32> to vector<64x64xf32>
    %236 = arith.subf %232, %235 : vector<64x64xf32>
    %237 = math.exp %236 : vector<64x64xf32>
    %cst_119 = arith.constant dense<0.000000e+00> : vector<64xf32>
    %238 = vector.multi_reduction <add>, %237, %cst_119 [1] : vector<64x64xf32> to vector<64xf32>
    %239 = vector.shape_cast %238 : vector<64xf32> to vector<64x1xf32>
    %240 = tpu.reciprocal %239 {approx = true} : vector<64x1xf32> -> vector<64x1xf32>
    %241 = vector.broadcast %240 : vector<64x1xf32> to vector<64x64xf32>
    %242 = arith.mulf %237, %241 : vector<64x64xf32>
    %cst_120 = arith.constant dense<0.000000e+00> : vector<64x8xf32>
    %243 = tpu.matmul %242, %231, %cst_120 {dimension_numbers = #tpu.dot_dimension_numbers<[1], [0], [0], [1], [0, 0, 1, 1], [], []>} : vector<64x64xf32>, vector<64x8xf32>, vector<64x8xf32> -> vector<64x8xf32>
    %c1_121 = arith.constant 1 : index
    %c1_122 = arith.constant 1 : index
    %c0_123 = arith.constant 0 : index
    %c0_124 = arith.constant 0 : index
    %244 = vector.load %arg8[%c1_121, %c1_122, %c0_123, %c0_124] : memref<2x4x8x32xf32, #tpu.memory_space<vmem>>, vector<1x1x8x32xf32>
    %245 = vector.shape_cast %244 : vector<1x1x8x32xf32> to vector<8x32xf32>
    %cst_125 = arith.constant dense<0.000000e+00> : vector<64x32xf32>
    %246 = tpu.matmul %243, %245, %cst_125 {dimension_numbers = #tpu.dot_dimension_numbers<[1], [0], [0], [1], [0, 0, 1, 1], [], []>} : vector<64x8xf32>, vector<8x32xf32>, vector<64x32xf32> -> vector<64x32xf32>
    %247 = arith.addf %228, %246 : vector<64x32xf32>
    %248 = vector.extract_strided_slice %208 {offsets = [0, 16], sizes = [64, 8], strides = [1, 1]} : vector<64x96xf32> to vector<64x8xf32>
    %249 = vector.extract_strided_slice %208 {offsets = [0, 48], sizes = [64, 8], strides = [1, 1]} : vector<64x96xf32> to vector<64x8xf32>
    %250 = vector.extract_strided_slice %208 {offsets = [0, 80], sizes = [64, 8], strides = [1, 1]} : vector<64x96xf32> to vector<64x8xf32>
    %cst_126 = arith.constant dense<0.000000e+00> : vector<64x64xf32>
    %251 = tpu.matmul %248, %249, %cst_126 {dimension_numbers = #tpu.dot_dimension_numbers<[1], [1], [0], [0], [0, 0, 1, 0], [], []>} : vector<64x8xf32>, vector<64x8xf32>, vector<64x64xf32> -> vector<64x64xf32>
    %cst_127 = arith.constant dense<0xFF800000> : vector<64xf32>
    %252 = vector.multi_reduction <maximumf>, %251, %cst_127 [1] : vector<64x64xf32> to vector<64xf32>
    %253 = vector.shape_cast %252 : vector<64xf32> to vector<64x1xf32>
    %254 = vector.broadcast %253 : vector<64x1xf32> to vector<64x64xf32>
    %255 = arith.subf %251, %254 : vector<64x64xf32>
    %256 = math.exp %255 : vector<64x64xf32>
    %cst_128 = arith.constant dense<0.000000e+00> : vector<64xf32>
    %257 = vector.multi_reduction <add>, %256, %cst_128 [1] : vector<64x64xf32> to vector<64xf32>
    %258 = vector.shape_cast %257 : vector<64xf32> to vector<64x1xf32>
    %259 = tpu.reciprocal %258 {approx = true} : vector<64x1xf32> -> vector<64x1xf32>
    %260 = vector.broadcast %259 : vector<64x1xf32> to vector<64x64xf32>
    %261 = arith.mulf %256, %260 : vector<64x64xf32>
    %cst_129 = arith.constant dense<0.000000e+00> : vector<64x8xf32>
    %262 = tpu.matmul %261, %250, %cst_129 {dimension_numbers = #tpu.dot_dimension_numbers<[1], [0], [0], [1], [0, 0, 1, 1], [], []>} : vector<64x64xf32>, vector<64x8xf32>, vector<64x8xf32> -> vector<64x8xf32>
    %c1_130 = arith.constant 1 : index
    %c2_131 = arith.constant 2 : index
    %c0_132 = arith.constant 0 : index
    %c0_133 = arith.constant 0 : index
    %263 = vector.load %arg8[%c1_130, %c2_131, %c0_132, %c0_133] : memref<2x4x8x32xf32, #tpu.memory_space<vmem>>, vector<1x1x8x32xf32>
    %264 = vector.shape_cast %263 : vector<1x1x8x32xf32> to vector<8x32xf32>
    %cst_134 = arith.constant dense<0.000000e+00> : vector<64x32xf32>
    %265 = tpu.matmul %262, %264, %cst_134 {dimension_numbers = #tpu.dot_dimension_numbers<[1], [0], [0], [1], [0, 0, 1, 1], [], []>} : vector<64x8xf32>, vector<8x32xf32>, vector<64x32xf32> -> vector<64x32xf32>
    %266 = arith.addf %247, %265 : vector<64x32xf32>
    %267 = vector.extract_strided_slice %208 {offsets = [0, 24], sizes = [64, 8], strides = [1, 1]} : vector<64x96xf32> to vector<64x8xf32>
    %268 = vector.extract_strided_slice %208 {offsets = [0, 56], sizes = [64, 8], strides = [1, 1]} : vector<64x96xf32> to vector<64x8xf32>
    %269 = vector.extract_strided_slice %208 {offsets = [0, 88], sizes = [64, 8], strides = [1, 1]} : vector<64x96xf32> to vector<64x8xf32>
    %cst_135 = arith.constant dense<0.000000e+00> : vector<64x64xf32>
    %270 = tpu.matmul %267, %268, %cst_135 {dimension_numbers = #tpu.dot_dimension_numbers<[1], [1], [0], [0], [0, 0, 1, 0], [], []>} : vector<64x8xf32>, vector<64x8xf32>, vector<64x64xf32> -> vector<64x64xf32>
    %cst_136 = arith.constant dense<0xFF800000> : vector<64xf32>
    %271 = vector.multi_reduction <maximumf>, %270, %cst_136 [1] : vector<64x64xf32> to vector<64xf32>
    %272 = vector.shape_cast %271 : vector<64xf32> to vector<64x1xf32>
    %273 = vector.broadcast %272 : vector<64x1xf32> to vector<64x64xf32>
    %274 = arith.subf %270, %273 : vector<64x64xf32>
    %275 = math.exp %274 : vector<64x64xf32>
    %cst_137 = arith.constant dense<0.000000e+00> : vector<64xf32>
    %276 = vector.multi_reduction <add>, %275, %cst_137 [1] : vector<64x64xf32> to vector<64xf32>
    %277 = vector.shape_cast %276 : vector<64xf32> to vector<64x1xf32>
    %278 = tpu.reciprocal %277 {approx = true} : vector<64x1xf32> -> vector<64x1xf32>
    %279 = vector.broadcast %278 : vector<64x1xf32> to vector<64x64xf32>
    %280 = arith.mulf %275, %279 : vector<64x64xf32>
    %cst_138 = arith.constant dense<0.000000e+00> : vector<64x8xf32>
    %281 = tpu.matmul %280, %269, %cst_138 {dimension_numbers = #tpu.dot_dimension_numbers<[1], [0], [0], [1], [0, 0, 1, 1], [], []>} : vector<64x64xf32>, vector<64x8xf32>, vector<64x8xf32> -> vector<64x8xf32>
    %c1_139 = arith.constant 1 : index
    %c3_140 = arith.constant 3 : index
    %c0_141 = arith.constant 0 : index
    %c0_142 = arith.constant 0 : index
    %282 = vector.load %arg8[%c1_139, %c3_140, %c0_141, %c0_142] : memref<2x4x8x32xf32, #tpu.memory_space<vmem>>, vector<1x1x8x32xf32>
    %283 = vector.shape_cast %282 : vector<1x1x8x32xf32> to vector<8x32xf32>
    %cst_143 = arith.constant dense<0.000000e+00> : vector<64x32xf32>
    %284 = tpu.matmul %281, %283, %cst_143 {dimension_numbers = #tpu.dot_dimension_numbers<[1], [0], [0], [1], [0, 0, 1, 1], [], []>} : vector<64x8xf32>, vector<8x32xf32>, vector<64x32xf32> -> vector<64x32xf32>
    %285 = arith.addf %266, %284 : vector<64x32xf32>
    %286 = arith.addf %173, %285 : vector<64x32xf32>
    %c1_144 = arith.constant 1 : index
    %c0_145 = arith.constant 0 : index
    %c0_146 = arith.constant 0 : index
    %287 = vector.load %arg9[%c1_144, %c0_145, %c0_146] : memref<2x1x32xf32, #tpu.memory_space<vmem>>, vector<1x1x32xf32>
    %288 = vector.shape_cast %287 : vector<1x1x32xf32> to vector<1x32xf32>
    %289 = vector.broadcast %288 : vector<1x32xf32> to vector<64x32xf32>
    %290 = arith.addf %286, %289 : vector<64x32xf32>
    %c1_147 = arith.constant 1 : index
    %c0_148 = arith.constant 0 : index
    %c0_149 = arith.constant 0 : index
    %291 = vector.load %arg10[%c1_147, %c0_148, %c0_149] : memref<2x1x32xf32, #tpu.memory_space<vmem>>, vector<1x1x32xf32>
    %292 = vector.shape_cast %291 : vector<1x1x32xf32> to vector<1x32xf32>
    %c1_150 = arith.constant 1 : index
    %c0_151 = arith.constant 0 : index
    %c0_152 = arith.constant 0 : index
    %293 = vector.load %arg11[%c1_150, %c0_151, %c0_152] : memref<2x1x32xf32, #tpu.memory_space<vmem>>, vector<1x1x32xf32>
    %294 = vector.shape_cast %293 : vector<1x1x32xf32> to vector<1x32xf32>
    %cst_153 = arith.constant dense<0.000000e+00> : vector<64xf32>
    %295 = vector.multi_reduction <add>, %290, %cst_153 [1] : vector<64x32xf32> to vector<64xf32>
    %296 = vector.shape_cast %295 : vector<64xf32> to vector<64x1xf32>
    %cst_154 = arith.constant 3.200000e+01 : f32
    %297 = vector.broadcast %cst_154 : f32 to vector<64x1xf32>
    %298 = arith.divf %296, %297 : vector<64x1xf32>
    %299 = vector.broadcast %298 : vector<64x1xf32> to vector<64x32xf32>
    %300 = arith.subf %290, %299 : vector<64x32xf32>
    %301 = vector.broadcast %298 : vector<64x1xf32> to vector<64x32xf32>
    %302 = arith.subf %290, %301 : vector<64x32xf32>
    %303 = arith.mulf %300, %302 : vector<64x32xf32>
    %cst_155 = arith.constant dense<0.000000e+00> : vector<64xf32>
    %304 = vector.multi_reduction <add>, %303, %cst_155 [1] : vector<64x32xf32> to vector<64xf32>
    %305 = vector.shape_cast %304 : vector<64xf32> to vector<64x1xf32>
    %cst_156 = arith.constant 3.200000e+01 : f32
    %306 = vector.broadcast %cst_156 : f32 to vector<64x1xf32>
    %307 = arith.divf %305, %306 : vector<64x1xf32>
    %308 = vector.broadcast %298 : vector<64x1xf32> to vector<64x32xf32>
    %309 = arith.subf %290, %308 : vector<64x32xf32>
    %cst_157 = arith.constant 9.99999997E-7 : f32
    %310 = vector.broadcast %cst_157 : f32 to vector<64x1xf32>
    %311 = arith.addf %307, %310 : vector<64x1xf32>
    %312 = math.rsqrt %311 : vector<64x1xf32>
    %313 = vector.broadcast %312 : vector<64x1xf32> to vector<64x32xf32>
    %314 = arith.mulf %309, %313 : vector<64x32xf32>
    %315 = vector.broadcast %292 : vector<1x32xf32> to vector<64x32xf32>
    %316 = arith.mulf %314, %315 : vector<64x32xf32>
    %317 = vector.broadcast %294 : vector<1x32xf32> to vector<64x32xf32>
    %318 = arith.addf %316, %317 : vector<64x32xf32>
    %c1_158 = arith.constant 1 : index
    %c0_159 = arith.constant 0 : index
    %c0_160 = arith.constant 0 : index
    %319 = vector.load %arg12[%c1_158, %c0_159, %c0_160] : memref<2x32x64xf32, #tpu.memory_space<vmem>>, vector<1x32x64xf32>
    %320 = vector.shape_cast %319 : vector<1x32x64xf32> to vector<32x64xf32>
    %cst_161 = arith.constant dense<0.000000e+00> : vector<64x64xf32>
    %321 = tpu.matmul %318, %320, %cst_161 {dimension_numbers = #tpu.dot_dimension_numbers<[1], [0], [0], [1], [0, 0, 1, 1], [], []>} : vector<64x32xf32>, vector<32x64xf32>, vector<64x64xf32> -> vector<64x64xf32>
    %c1_162 = arith.constant 1 : index
    %c0_163 = arith.constant 0 : index
    %c0_164 = arith.constant 0 : index
    %322 = vector.load %arg13[%c1_162, %c0_163, %c0_164] : memref<2x1x64xf32, #tpu.memory_space<vmem>>, vector<1x1x64xf32>
    %323 = vector.shape_cast %322 : vector<1x1x64xf32> to vector<1x64xf32>
    %324 = vector.broadcast %323 : vector<1x64xf32> to vector<64x64xf32>
    %325 = arith.addf %321, %324 : vector<64x64xf32>
    %cst_165 = arith.constant 5.000000e-01 : f32
    %326 = vector.broadcast %cst_165 : f32 to vector<64x64xf32>
    %327 = arith.mulf %326, %325 : vector<64x64xf32>
    %cst_166 = arith.constant 0.707106769 : f32
    %328 = vector.broadcast %cst_166 : f32 to vector<64x64xf32>
    %329 = arith.mulf %325, %328 : vector<64x64xf32>
    %330 = math.erf %329 : vector<64x64xf32>
    %cst_167 = arith.constant 1.000000e+00 : f32
    %331 = vector.broadcast %cst_167 : f32 to vector<64x64xf32>
    %332 = arith.addf %331, %330 : vector<64x64xf32>
    %333 = arith.mulf %327, %332 : vector<64x64xf32>
    %c1_168 = arith.constant 1 : index
    %c0_169 = arith.constant 0 : index
    %c0_170 = arith.constant 0 : index
    %334 = vector.load %arg14[%c1_168, %c0_169, %c0_170] : memref<2x64x32xf32, #tpu.memory_space<vmem>>, vector<1x64x32xf32>
    %335 = vector.shape_cast %334 : vector<1x64x32xf32> to vector<64x32xf32>
    %cst_171 = arith.constant dense<0.000000e+00> : vector<64x32xf32>
    %336 = tpu.matmul %333, %335, %cst_171 {dimension_numbers = #tpu.dot_dimension_numbers<[1], [0], [0], [1], [0, 0, 1, 1], [], []>} : vector<64x64xf32>, vector<64x32xf32>, vector<64x32xf32> -> vector<64x32xf32>
    %c1_172 = arith.constant 1 : index
    %c0_173 = arith.constant 0 : index
    %c0_174 = arith.constant 0 : index
    %337 = vector.load %arg15[%c1_172, %c0_173, %c0_174] : memref<2x1x32xf32, #tpu.memory_space<vmem>>, vector<1x1x32xf32>
    %338 = vector.shape_cast %337 : vector<1x1x32xf32> to vector<1x32xf32>
    %339 = vector.broadcast %338 : vector<1x32xf32> to vector<64x32xf32>
    %340 = arith.addf %336, %339 : vector<64x32xf32>
    %341 = arith.addf %290, %340 : vector<64x32xf32>
    %c0_175 = arith.constant 0 : index
    %c0_176 = arith.constant 0 : index
    %342 = vector.load %arg16[%c0_175, %c0_176] : memref<1x32xf32, #tpu.memory_space<vmem>>, vector<1x32xf32>
    %c0_177 = arith.constant 0 : index
    %c0_178 = arith.constant 0 : index
    %343 = vector.load %arg17[%c0_177, %c0_178] : memref<1x32xf32, #tpu.memory_space<vmem>>, vector<1x32xf32>
    %cst_179 = arith.constant dense<0.000000e+00> : vector<64xf32>
    %344 = vector.multi_reduction <add>, %341, %cst_179 [1] : vector<64x32xf32> to vector<64xf32>
    %345 = vector.shape_cast %344 : vector<64xf32> to vector<64x1xf32>
    %cst_180 = arith.constant 3.200000e+01 : f32
    %346 = vector.broadcast %cst_180 : f32 to vector<64x1xf32>
    %347 = arith.divf %345, %346 : vector<64x1xf32>
    %348 = vector.broadcast %347 : vector<64x1xf32> to vector<64x32xf32>
    %349 = arith.subf %341, %348 : vector<64x32xf32>
    %350 = vector.broadcast %347 : vector<64x1xf32> to vector<64x32xf32>
    %351 = arith.subf %341, %350 : vector<64x32xf32>
    %352 = arith.mulf %349, %351 : vector<64x32xf32>
    %cst_181 = arith.constant dense<0.000000e+00> : vector<64xf32>
    %353 = vector.multi_reduction <add>, %352, %cst_181 [1] : vector<64x32xf32> to vector<64xf32>
    %354 = vector.shape_cast %353 : vector<64xf32> to vector<64x1xf32>
    %cst_182 = arith.constant 3.200000e+01 : f32
    %355 = vector.broadcast %cst_182 : f32 to vector<64x1xf32>
    %356 = arith.divf %354, %355 : vector<64x1xf32>
    %357 = vector.broadcast %347 : vector<64x1xf32> to vector<64x32xf32>
    %358 = arith.subf %341, %357 : vector<64x32xf32>
    %cst_183 = arith.constant 9.99999997E-7 : f32
    %359 = vector.broadcast %cst_183 : f32 to vector<64x1xf32>
    %360 = arith.addf %356, %359 : vector<64x1xf32>
    %361 = math.rsqrt %360 : vector<64x1xf32>
    %362 = vector.broadcast %361 : vector<64x1xf32> to vector<64x32xf32>
    %363 = arith.mulf %358, %362 : vector<64x32xf32>
    %364 = vector.broadcast %342 : vector<1x32xf32> to vector<64x32xf32>
    %365 = arith.mulf %363, %364 : vector<64x32xf32>
    %366 = vector.broadcast %343 : vector<1x32xf32> to vector<64x32xf32>
    %367 = arith.addf %365, %366 : vector<64x32xf32>
    %c0_184 = arith.constant 0 : index
    %c0_185 = arith.constant 0 : index
    %368 = vector.load %arg18[%c0_184, %c0_185] : memref<16x64xf32, #tpu.memory_space<vmem>>, vector<16x64xf32>
    %cst_186 = arith.constant dense<0.000000e+00> : vector<16x32xf32>
    %369 = tpu.matmul %368, %367, %cst_186 {dimension_numbers = #tpu.dot_dimension_numbers<[1], [0], [0], [1], [0, 0, 1, 1], [], []>} : vector<16x64xf32>, vector<64x32xf32>, vector<16x32xf32> -> vector<16x32xf32>
    %c0_187 = arith.constant 0 : index
    %c0_188 = arith.constant 0 : index
    %370 = vector.load %arg19[%c0_187, %c0_188] : memref<32x128xf32, #tpu.memory_space<vmem>>, vector<32x128xf32>
    %cst_189 = arith.constant dense<0.000000e+00> : vector<16x128xf32>
    %371 = tpu.matmul %369, %370, %cst_189 {dimension_numbers = #tpu.dot_dimension_numbers<[1], [0], [0], [1], [0, 0, 1, 1], [], []>} : vector<16x32xf32>, vector<32x128xf32>, vector<16x128xf32> -> vector<16x128xf32>
    %c0_190 = arith.constant 0 : index
    %c0_191 = arith.constant 0 : index
    %372 = vector.load %arg20[%c0_190, %c0_191] : memref<1x128xf32, #tpu.memory_space<vmem>>, vector<1x128xf32>
    %373 = vector.broadcast %372 : vector<1x128xf32> to vector<16x128xf32>
    %374 = arith.addf %371, %373 : vector<16x128xf32>
    %c0_192 = arith.constant 0 : index
    %c0_193 = arith.constant 0 : index
    %c0_194 = arith.constant 0 : index
    %375 = vector.load %arg21[%c0_192, %c0_193, %c0_194] : memref<1x16x128xf32, #tpu.memory_space<vmem>>, vector<1x16x128xf32>
    %376 = vector.shape_cast %375 : vector<1x16x128xf32> to vector<16x128xf32>
    %377 = vector.shape_cast %374 : vector<16x128xf32> to vector<1x16x128xf32>
    tpu.vector_store %arg21[%c0_192, %c0_193, %c0_194], %377 {strides = array<i32>} : memref<1x16x128xf32, #tpu.memory_space<vmem>>, vector<1x16x128xf32>,
    return
  }
  func.func @transform_0(%arg0: i32) -> (i32, i32, i32) {
    %c0_i32 = arith.constant 0 : i32
    %c0_i32_0 = arith.constant 0 : i32
    %c0_i32_1 = arith.constant 0 : i32
    return %arg0, %c0_i32, %c0_i32_0 : i32, i32, i32
  }
  func.func @transform_1(%arg0: i32) -> (i32, i32) {
    %c0_i32 = arith.constant 0 : i32
    %c0_i32_0 = arith.constant 0 : i32
    %c0_i32_1 = arith.constant 0 : i32
    return %c0_i32, %c0_i32_0 : i32, i32
  }
  func.func @transform_2(%arg0: i32) -> (i32, i32) {
    %c0_i32 = arith.constant 0 : i32
    %c0_i32_0 = arith.constant 0 : i32
    %c0_i32_1 = arith.constant 0 : i32
    return %c0_i32, %c0_i32_0 : i32, i32
  }
  func.func @transform_3(%arg0: i32) -> (i32, i32, i32) {
    %c0_i32 = arith.constant 0 : i32
    %c0_i32_0 = arith.constant 0 : i32
    %c0_i32_1 = arith.constant 0 : i32
    %c0_i32_2 = arith.constant 0 : i32
    return %c0_i32, %c0_i32_0, %c0_i32_1 : i32, i32, i32
  }
  func.func @transform_4(%arg0: i32) -> (i32, i32, i32) {
    %c0_i32 = arith.constant 0 : i32
    %c0_i32_0 = arith.constant 0 : i32
    %c0_i32_1 = arith.constant 0 : i32
    %c0_i32_2 = arith.constant 0 : i32
    return %c0_i32, %c0_i32_0, %c0_i32_1 : i32, i32, i32
  }
  func.func @transform_5(%arg0: i32) -> (i32, i32, i32) {
    %c0_i32 = arith.constant 0 : i32
    %c0_i32_0 = arith.constant 0 : i32
    %c0_i32_1 = arith.constant 0 : i32
    %c0_i32_2 = arith.constant 0 : i32
    return %c0_i32, %c0_i32_0, %c0_i32_1 : i32, i32, i32
  }
  func.func @transform_6(%arg0: i32) -> (i32, i32, i32) {
    %c0_i32 = arith.constant 0 : i32
    %c0_i32_0 = arith.constant 0 : i32
    %c0_i32_1 = arith.constant 0 : i32
    %c0_i32_2 = arith.constant 0 : i32
    return %c0_i32, %c0_i32_0, %c0_i32_1 : i32, i32, i32
  }
  func.func @transform_7(%arg0: i32) -> (i32, i32, i32, i32) {
    %c0_i32 = arith.constant 0 : i32
    %c0_i32_0 = arith.constant 0 : i32
    %c0_i32_1 = arith.constant 0 : i32
    %c0_i32_2 = arith.constant 0 : i32
    %c0_i32_3 = arith.constant 0 : i32
    return %c0_i32, %c0_i32_0, %c0_i32_1, %c0_i32_2 : i32, i32, i32, i32
  }
  func.func @transform_8(%arg0: i32) -> (i32, i32, i32) {
    %c0_i32 = arith.constant 0 : i32
    %c0_i32_0 = arith.constant 0 : i32
    %c0_i32_1 = arith.constant 0 : i32
    %c0_i32_2 = arith.constant 0 : i32
    return %c0_i32, %c0_i32_0, %c0_i32_1 : i32, i32, i32
  }
  func.func @transform_9(%arg0: i32) -> (i32, i32, i32) {
    %c0_i32 = arith.constant 0 : i32
    %c0_i32_0 = arith.constant 0 : i32
    %c0_i32_1 = arith.constant 0 : i32
    %c0_i32_2 = arith.constant 0 : i32
    return %c0_i32, %c0_i32_0, %c0_i32_1 : i32, i32, i32
  }
  func.func @transform_10(%arg0: i32) -> (i32, i32, i32) {
    %c0_i32 = arith.constant 0 : i32
    %c0_i32_0 = arith.constant 0 : i32
    %c0_i32_1 = arith.constant 0 : i32
    %c0_i32_2 = arith.constant 0 : i32
    return %c0_i32, %c0_i32_0, %c0_i32_1 : i32, i32, i32
  }
  func.func @transform_11(%arg0: i32) -> (i32, i32, i32) {
    %c0_i32 = arith.constant 0 : i32
    %c0_i32_0 = arith.constant 0 : i32
    %c0_i32_1 = arith.constant 0 : i32
    %c0_i32_2 = arith.constant 0 : i32
    return %c0_i32, %c0_i32_0, %c0_i32_1 : i32, i32, i32
  }
  func.func @transform_12(%arg0: i32) -> (i32, i32, i32) {
    %c0_i32 = arith.constant 0 : i32
    %c0_i32_0 = arith.constant 0 : i32
    %c0_i32_1 = arith.constant 0 : i32
    %c0_i32_2 = arith.constant 0 : i32
    return %c0_i32, %c0_i32_0, %c0_i32_1 : i32, i32, i32
  }
  func.func @transform_13(%arg0: i32) -> (i32, i32, i32) {
    %c0_i32 = arith.constant 0 : i32
    %c0_i32_0 = arith.constant 0 : i32
    %c0_i32_1 = arith.constant 0 : i32
    %c0_i32_2 = arith.constant 0 : i32
    return %c0_i32, %c0_i32_0, %c0_i32_1 : i32, i32, i32
  }
  func.func @transform_14(%arg0: i32) -> (i32, i32, i32) {
    %c0_i32 = arith.constant 0 : i32
    %c0_i32_0 = arith.constant 0 : i32
    %c0_i32_1 = arith.constant 0 : i32
    %c0_i32_2 = arith.constant 0 : i32
    return %c0_i32, %c0_i32_0, %c0_i32_1 : i32, i32, i32
  }
  func.func @transform_15(%arg0: i32) -> (i32, i32) {
    %c0_i32 = arith.constant 0 : i32
    %c0_i32_0 = arith.constant 0 : i32
    %c0_i32_1 = arith.constant 0 : i32
    return %c0_i32, %c0_i32_0 : i32, i32
  }
  func.func @transform_16(%arg0: i32) -> (i32, i32) {
    %c0_i32 = arith.constant 0 : i32
    %c0_i32_0 = arith.constant 0 : i32
    %c0_i32_1 = arith.constant 0 : i32
    return %c0_i32, %c0_i32_0 : i32, i32
  }
  func.func @transform_17(%arg0: i32) -> (i32, i32) {
    %c0_i32 = arith.constant 0 : i32
    %c0_i32_0 = arith.constant 0 : i32
    %c0_i32_1 = arith.constant 0 : i32
    return %c0_i32, %c0_i32_0 : i32, i32
  }
  func.func @transform_18(%arg0: i32) -> (i32, i32) {
    %c0_i32 = arith.constant 0 : i32
    %c0_i32_0 = arith.constant 0 : i32
    %c0_i32_1 = arith.constant 0 : i32
    return %c0_i32, %c0_i32_0 : i32, i32
  }
  func.func @transform_19(%arg0: i32) -> (i32, i32) {
    %c0_i32 = arith.constant 0 : i32
    %c0_i32_0 = arith.constant 0 : i32
    %c0_i32_1 = arith.constant 0 : i32
    return %c0_i32, %c0_i32_0 : i32, i32
  }
  func.func @transform_20(%arg0: i32) -> (i32, i32, i32) {
    %c0_i32 = arith.constant 0 : i32
    %c0_i32_0 = arith.constant 0 : i32
    %c0_i32_1 = arith.constant 0 : i32
    return %arg0, %c0_i32, %c0_i32_0 : i32, i32, i32
  }
}

</mosaic_0001>

<bundles_post_ra>
// kernel: videomae_action_detector_forward.1
= control target key start
LH: loop header
LB: loop body
LE: loop exit
PB: predicated region body
PF: predicated region fallthrough
CT: control target
= control target key end

     0   :  { %s13756_s0 = inlined_call_operand.hbm [shape: f32[2,64,192], index: 0, kind: input, shape index: {}]   ;;  %s13757_s1 = inlined_call_operand.hbm [shape: f32[192,32], index: 1, kind: input, shape index: {}]   ;;  %s13758_s2 = inlined_call_operand.hbm [shape: f32[64,32], index: 2, kind: input, shape index: {}]   ;;  %s13759_s3 = inlined_call_operand.hbm [shape: f32[2,1,32], index: 3, kind: input, shape index: {}]   ;;  %s13760_s4 = inlined_call_operand.hbm [shape: f32[2,1,32], index: 4, kind: input, shape index: {}]   ;;  %s13761_s5 = inlined_call_operand.hbm [shape: f32[2,32,96], index: 5, kind: input, shape index: {}]   ;;  %s13762_s6 = inlined_call_operand.hbm [shape: f32[2,1,96], index: 6, kind: input, shape index: {}]   ;;  %s13763_s7 = inlined_call_operand.hbm [shape: f32[2,4,8,32], index: 7, kind: input, shape index: {}]   ;;  %s13764_s8 = inlined_call_operand.hbm [shape: f32[2,1,32], index: 8, kind: input, shape index: {}]   ;;  %s13765_s9 = inlined_call_operand.hbm [shape: f32[2,1,32], index: 9, kind: input, shape index: {}]   ;;  %s13766_s10 = inlined_call_operand.hbm [shape: f32[2,1,32], index: 10, kind: input, shape index: {}]   ;;  %s13767_s11 = inlined_call_operand.hbm [shape: f32[2,32,64], index: 11, kind: input, shape index: {}]   ;;  %s13768_s12 = inlined_call_operand.hbm [shape: f32[2,1,64], index: 12, kind: input, shape index: {}]   ;;  %s13769_s13 = inlined_call_operand.hbm [shape: f32[2,64,32], index: 13, kind: input, shape index: {}]   ;;  %s13770_s14 = inlined_call_operand.hbm [shape: f32[2,1,32], index: 14, kind: input, shape index: {}]   ;;  %s13771_s15 = inlined_call_operand.hbm [shape: f32[1,32], index: 15, kind: input, shape index: {}]   ;;  %s13772_s16 = inlined_call_operand.hbm [shape: f32[1,32], index: 16, kind: input, shape index: {}]   ;;  %s13773_s17 = inlined_call_operand.hbm [shape: f32[16,64], index: 17, kind: input, shape index: {}]   ;;  %s13774_s18 = inlined_call_operand.hbm [shape: f32[32,128], index: 18, kind: input, shape index: {}]   ;;  %s13775_s19 = inlined_call_operand.hbm [shape: f32[1,128], index: 19, kind: input, shape index: {}]   ;;  %s13776_s20 = inlined_call_operand.hbm [shape: f32[2,16,128], index: 20, kind: output, shape index: {}]  }
   0x1   :  { %13807 = sst [smem:[#allocation53_spill]] %s13756_s0 }
   0x2   :  { %13808 = sst [smem:[#allocation54_spill]] %s13757_s1 }
   0x3   :  { %13809 = sst [smem:[#allocation55_spill]] %s13758_s2 }
   0x4   :  { %13810 = sst [smem:[#allocation56_spill]] %s13759_s3 }
   0x5   :  { %13811 = sst [smem:[#allocation57_spill]] %s13760_s4 }
   0x6   :  { %13812 = sst [smem:[#allocation58_spill]] %s13761_s5 }
   0x7   :  { %13813 = sst [smem:[#allocation59_spill]] %s13762_s6 }
   0x8   :  { %13814 = sst [smem:[#allocation60_spill]] %s13763_s7 }
   0x9   :  { %13815 = sst [smem:[#allocation61_spill]] %s13764_s8 }
   0xa   :  { %13816 = sst [smem:[#allocation62_spill]] %s13765_s9 }
   0xb   :  { %13817 = sst [smem:[#allocation63_spill]] %s13772_s16 }
   0xc   :  { %13818 = sst [smem:[#allocation64_spill]] %s13774_s18 }
   0xd   :  { %13819 = sst [smem:[#allocation65_spill]] %s13775_s19 }
   0xe   :  { %13820 = sst [smem:[#allocation66_spill]] %s13776_s20 }
   0xf   :  { %25 = vsyncpa [#allocation3], 0 }
  0x10   :  { %27 = vsyncpa [#allocation3 + $0x1], 0 }
  0x11   :  { %28 = vsyncpa [#allocation6], 0 }
  0x12   :  { %29 = vsyncpa [#allocation9], 0 }
  0x13   :  { %30 = vsyncpa [#allocation12], 0 }
  0x14   :  { %31 = vsyncpa [#allocation15], 0 }
  0x15   :  { %32 = vsyncpa [#allocation18], 0 }
  0x16   :  { %33 = vsyncpa [#allocation21], 0 }
  0x17   :  { %34 = vsyncpa [#allocation24], 0 }
  0x18   :  { %35 = vsyncpa [#allocation27], 0 }
  0x19   :  { %36 = vsyncpa [#allocation30], 0 }
  0x1a   :  { %37 = vsyncpa [#allocation33], 0 }
  0x1b   :  { %38 = vsyncpa [#allocation4], 0 }
  0x1c   :  { %40 = vsyncpa [#allocation4 + $0x1], 0  ;;  %s11348_s1 = smov 0   ;;  %s11350_s22 = smov 0  }
  0x1d   :  { %s11352_s23 = smov 0   ;;  %s11354_s24 = smov 0  }
  0x1e LB: > { %13821 = sst [smem:[#allocation47_spill]] %s11189_s1  ;;  %s11203_s2 = smov [#allocation5]   ;;  %s11201_s24 = sphi %s11354_s24, %s13893_s24   ;;  %s11197_s23 = sphi %s11352_s23, %s13892_s23   ;;  %s11193_s22 = sphi %s11350_s22, %s13891_s22   ;;  %s11189_s1 = sphi %s11348_s1, %s13890_s1  }
  0x1f   : > { %13822 = sst [smem:[#allocation48_spill]] %s11193_s22  ;;  %s514_s25 = sshll.u32 %s11203_s2, 4  ;;  %s11374_s25 = int_to_ptr.vmem [resolvable:$true] %s514_s25 }
  0x20   : > { %13823 = sst [smem:[#allocation49_spill]] %s11197_s23  ;;  %s11369_s3 = sadd.s32 4294967295, %s11201_s24  }
  0x21   : > { %13824 = sst [smem:[#allocation50_spill]] %s11201_s24  ;;  %p7559_p0 = scmp.ge.s32.totalorder %s11201_s24, 1 }
  0x22   : > { %13825 = sst [smem:[#allocation51_spill]] %s11369_s3  ;;  %p13794_p1 = scmp.eq.s32.totalorder %s11369_s3, 0 }
  0x23   : > { %p502_p2 = scmp.lt.s32.totalorder %s11201_s24, 3  ;;  %s11204_s27 = smov [#allocation8]  }
  0x24   : > { %s540_s28 = sshll.u32 %s11204_s27, 4  ;;  %s11205_s29 = smov [#allocation11]   ;;  %s11389_s28 = int_to_ptr.vmem [resolvable:$true] %s540_s28 }
  0x25   : > { %p11376_p3 = pnand %p7559_p0, %p502_p2  ;;  %s11391_s30 = sshll.u32 %s11205_s29, 4  ;;  %s567_s30 = int_to_ptr.vmem [resolvable:$true] %s11391_s30 }
  0x26   : > { %s13829_s2 = sld [smem:[#allocation54_spill]] }
  0x27   : > { %s13826_s26 = scalar_select %p11376_p3, 1, 0 }
  0x28   : > { %p9669_p5 = pneg %p11376_p3 }
  0x29   : > { %13827 = sst [smem:[#allocation52_spill]] %s13826_s26 }
  0x2a   : > { %p11385_p6 = pnand %p9669_p5, %p13794_p1 }
  0x2c   : > { %s10533_s20 = scalar_lea.hbm %s13829_s2, 3072  ;;  %p11401_p8 = pneg %p11385_p6 }
  0x2d   : > { %p10534_p7 = scmp.ne.s32.totalorder %s13829_s2, %s10533_s20  ;;  %p10540_p11 = scmp.lt.u32.totalorder %s10533_s20, %s13829_s2 }
  0x2f   : > { %p10536_p9 = pnand %p11401_p8, %p10534_p7 }
  0x31   : > { %p10537_p10 = pneg %p10536_p9 }
  0x33   : > { %p10542_p12 = pnand %p10540_p11, %p10537_p10 }
  0x35   : > { %10545 = shalt.err (!%p10542_p12)
}
  0x36   : > { %s10546_s1 = scalar_lea.vmem %s11374_s25, 3072  ;;  %p10554_p5 = scmp.lt.s32.totalorder %s11374_s25, %s11374_s25 }
  0x37   : > { %p10547_p13 = scmp.ne.s32.totalorder %s11374_s25, %s10546_s1  ;;  %p10555_p4 = scmp.lt.s32.totalorder %s10546_s1, %s10546_s1 }
  0x39   : > { %p10549_p0 = pnand %p10547_p13, %p11401_p8  ;;  %p10556_p7 = por %p10555_p4, %p10554_p5 }
  0x3b   : > { %p10550_p2 = pneg %p10549_p0 }
  0x3d   : > { %p10557_p9 = pnand %p10556_p7, %p10550_p2 }
  0x3f   : > { %10560 = shalt.err (!%p10557_p9)
}
  0x40   : > { %s13800_s26 = smov 128   ;;  %s13802_s20 = smov 8  }
  0x41   : > { %9672 = dma.hbm_to_vmem [thread:$0]  (!%p11385_p6), %s13829_s2, 3072, %s11374_s25, [#allocation6], %s13800_s26, %s13800_s26, %s13802_s20  }
  0x42   : > { %s13831_s22 = sld [smem:[#allocation56_spill]] }
  0x48   : > { %s13832_s19 = smov %s13831_s22  ;;  %s10561_s1 = scalar_lea.hbm %s13831_s22, 32 }
  0x49   : > { %p10562_p4 = scmp.ne.s32.totalorder %s13832_s19, %s10561_s1  ;;  %p10568_p12 = scmp.lt.u32.totalorder %s10561_s1, %s13832_s19 }
  0x4b   : > { %p10564_p10 = pnand %p10562_p4, %p11401_p8 }
  0x4d   : > { %p10565_p11 = pneg %p10564_p10 }
  0x4f   : > { %p10570_p13 = pnand %p10568_p12, %p10565_p11 }
  0x51   : > { %10573 = shalt.err (!%p10570_p13)
}
  0x52   : > { %s10574_s25 = scalar_lea.vmem %s11389_s28, 32  ;;  %p10582_p7 = scmp.lt.s32.totalorder %s11389_s28, %s11389_s28 }
  0x53   : > { %p10575_p0 = scmp.ne.s32.totalorder %s11389_s28, %s10574_s25  ;;  %p10583_p9 = scmp.lt.s32.totalorder %s10574_s25, %s10574_s25 }
  0x55   : > { %p10577_p2 = pnand %p10575_p0, %p11401_p8  ;;  %p10584_p4 = por %p10583_p9, %p10582_p7 }
  0x57   : > { %p10578_p5 = pneg %p10577_p2 }
  0x59   : > { %p10585_p10 = pnand %p10584_p4, %p10578_p5 }
  0x5b   : > { %10588 = shalt.err (!%p10585_p10)
}
  0x5c   : > { %s13796_s22 = smov 16   ;;  %s13798_s16 = smov 1  }
  0x5d   : > { %9678 = dma.hbm_to_vmem [thread:$0]  (!%p11385_p6), %s13832_s19, 32, %s11389_s28, [#allocation9], %s13796_s22, %s13796_s22, %s13798_s16  }
  0x5e   : > { %s13833_s5 = sld [smem:[#allocation58_spill]] }
  0x64   : > { %s10589_s0 = scalar_lea.hbm %s13833_s5, 1024 }
  0x65   : > { %p10590_p11 = scmp.ne.s32.totalorder %s13833_s5, %s10589_s0  ;;  %p10596_p0 = scmp.lt.u32.totalorder %s10589_s0, %s13833_s5 }
  0x67   : > { %p10592_p12 = pnand %p10590_p11, %p11401_p8 }
  0x69   : > { %p10593_p13 = pneg %p10592_p12 }
  0x6b   : > { %p10598_p2 = pnand %p10596_p0, %p10593_p13 }
  0x6d   : > { %10601 = shalt.err (!%p10598_p2)
}
  0x6e   : > { %s10602_s18 = scalar_lea.vmem %s567_s30, 1024  ;;  %p10610_p4 = scmp.lt.s32.totalorder %s567_s30, %s567_s30 }
  0x6f   : > { %p10603_p5 = scmp.ne.s32.totalorder %s567_s30, %s10602_s18  ;;  %p10611_p10 = scmp.lt.s32.totalorder %s10602_s18, %s10602_s18 }
  0x71   : > { %p10605_p7 = pnand %p10603_p5, %p11401_p8  ;;  %p10612_p1 = por %p10611_p10, %p10610_p4 }
  0x73   : > { %p10606_p9 = pneg %p10605_p7 }
  0x75   : > { %p10613_p3 = pnand %p10612_p1, %p10606_p9 }
  0x77   : > { %10616 = shalt.err (!%p10613_p3)
}
  0x78   : > { %9684 = dma.hbm_to_vmem [thread:$0]  (!%p11385_p6), %s13833_s5, 1024, %s567_s30, [#allocation12], %s13800_s26, %s13800_s26, %s13802_s20  }
  0x79   : > { %s11210_s24 = smov [#allocation14]   ;;  %s11211_s0 = smov [#allocation17]  }
  0x7a   : > { %s592_s3 = sshll.u32 %s11210_s24, 4  ;;  %s618_s21 = sshll.u32 %s11211_s0, 4  ;;  %s593_s3 = int_to_ptr.vmem [resolvable:$true] %s592_s3  ;;  %s619_s21 = int_to_ptr.vmem [resolvable:$true] %s618_s21 }
  0x7b   : > { %s13834_s7 = sld [smem:[#allocation60_spill]] }
  0x81   : > { %s10617_s25 = scalar_lea.hbm %s13834_s7, 1024 }
  0x82   : > { %p10618_p1 = scmp.ne.s32.totalorder %s13834_s7, %s10617_s25  ;;  %p10624_p12 = scmp.lt.u32.totalorder %s10617_s25, %s13834_s7 }
  0x84   : > { %p10620_p3 = pnand %p10618_p1, %p11401_p8 }
  0x86   : > { %p10621_p11 = pneg %p10620_p3 }
  0x88   : > { %p10626_p13 = pnand %p10624_p12, %p10621_p11 }
  0x8a   : > { %10629 = shalt.err (!%p10626_p13)
}
  0x8b   : > { %s10630_s30 = scalar_lea.vmem %s593_s3, 1024  ;;  %p10638_p7 = scmp.lt.s32.totalorder %s593_s3, %s593_s3 }
  0x8c   : > { %p10631_p0 = scmp.ne.s32.totalorder %s593_s3, %s10630_s30  ;;  %p10639_p9 = scmp.lt.s32.totalorder %s10630_s30, %s10630_s30 }
  0x8e   : > { %p10633_p2 = pnand %p10631_p0, %p11401_p8  ;;  %p10640_p4 = por %p10639_p9, %p10638_p7 }
  0x90   : > { %p10634_p5 = pneg %p10633_p2 }
  0x92   : > { %p10641_p10 = pnand %p10640_p4, %p10634_p5 }
  0x94   : > { %10644 = shalt.err (!%p10641_p10)
}
  0x95   : > { %9690 = dma.hbm_to_vmem [thread:$0]  (!%p11385_p6), %s13834_s7, 1024, %s593_s3, [#allocation15], %s13800_s26, %s13800_s26, %s13802_s20  }
  0x96   : > { %s13835_s9 = sld [smem:[#allocation62_spill]] }
  0x9c   : > { %s10645_s0 = scalar_lea.hbm %s13835_s9, 32 }
  0x9d   : > { %p10646_p1 = scmp.ne.s32.totalorder %s13835_s9, %s10645_s0  ;;  %p10652_p12 = scmp.lt.u32.totalorder %s10645_s0, %s13835_s9 }
  0x9f   : > { %p10648_p3 = pnand %p10646_p1, %p11401_p8 }
  0xa1   : > { %p10649_p11 = pneg %p10648_p3 }
  0xa3   : > { %p10654_p13 = pnand %p10652_p12, %p10649_p11 }
  0xa5   : > { %10657 = shalt.err (!%p10654_p13)
}
  0xa6   : > { %s10658_s28 = scalar_lea.vmem %s619_s21, 32  ;;  %p10666_p7 = scmp.lt.s32.totalorder %s619_s21, %s619_s21 }
  0xa7   : > { %p10659_p0 = scmp.ne.s32.totalorder %s619_s21, %s10658_s28  ;;  %p10667_p9 = scmp.lt.s32.totalorder %s10658_s28, %s10658_s28 }
  0xa9   : > { %p10661_p2 = pnand %p10659_p0, %p11401_p8  ;;  %p10668_p4 = por %p10667_p9, %p10666_p7 }
  0xab   : > { %p10662_p5 = pneg %p10661_p2 }
  0xad   : > { %p10669_p10 = pnand %p10668_p4, %p10662_p5 }
  0xaf   : > { %10672 = shalt.err (!%p10669_p10)
}
  0xb0   : > { %s13836_s3 = smov 1   ;;  %s13837_s30 = smov 16  }
  0xb1   : > { %9696 = dma.hbm_to_vmem [thread:$0]  (!%p11385_p6), %s13835_s9, 32, %s619_s21, [#allocation18], %s13837_s30, %s13837_s30, %s13836_s3  }
  0xb2   : > { %s11212_s23 = smov [#allocation20]   ;;  %s11213_s0 = smov [#allocation23]  }
  0xb3   : > { %s644_s24 = sshll.u32 %s11212_s23, 4  ;;  %s670_s29 = sshll.u32 %s11213_s0, 4  ;;  %s645_s24 = int_to_ptr.vmem [resolvable:$true] %s644_s24  ;;  %s671_s29 = int_to_ptr.vmem [resolvable:$true] %s670_s29 }
  0xb4   : > { %s10673_s18 = scalar_lea.hbm %s13767_s11, 1024 }
  0xb5   : > { %p10674_p1 = scmp.ne.s32.totalorder %s13767_s11, %s10673_s18  ;;  %p10680_p12 = scmp.lt.u32.totalorder %s10673_s18, %s13767_s11 }
  0xb7   : > { %p10676_p3 = pnand %p10674_p1, %p11401_p8 }
  0xb9   : > { %p10677_p11 = pneg %p10676_p3 }
  0xbb   : > { %p10682_p13 = pnand %p10680_p12, %p10677_p11 }
  0xbd   : > { %10685 = shalt.err (!%p10682_p13)
}
  0xbe   : > { %s10686_s21 = scalar_lea.vmem %s645_s24, 1024  ;;  %p10694_p7 = scmp.lt.s32.totalorder %s645_s24, %s645_s24 }
  0xbf   : > { %p10687_p0 = scmp.ne.s32.totalorder %s645_s24, %s10686_s21  ;;  %p10695_p9 = scmp.lt.s32.totalorder %s10686_s21, %s10686_s21 }
  0xc1   : > { %p10689_p2 = pnand %p10687_p0, %p11401_p8  ;;  %p10696_p4 = por %p10695_p9, %p10694_p7 }
  0xc3   : > { %p10690_p5 = pneg %p10689_p2 }
  0xc5   : > { %p10697_p10 = pnand %p10696_p4, %p10690_p5 }
  0xc7   : > { %10700 = shalt.err (!%p10697_p10)
}
  0xc8   : > { %s13838_s26 = smov 8   ;;  %s13839_s16 = smov 128  }
  0xc9   : > { %9702 = dma.hbm_to_vmem [thread:$0]  (!%p11385_p6), %s13767_s11, 1024, %s645_s24, [#allocation21], %s13839_s16, %s13839_s16, %s13838_s26  }
  0xca   : > { %s10701_s25 = scalar_lea.hbm %s13769_s13, 2048 }
  0xcb   : > { %p10702_p1 = scmp.ne.s32.totalorder %s13769_s13, %s10701_s25  ;;  %p10708_p12 = scmp.lt.u32.totalorder %s10701_s25, %s13769_s13 }
  0xcd   : > { %p10704_p3 = pnand %p10702_p1, %p11401_p8 }
  0xcf   : > { %p10705_p11 = pneg %p10704_p3 }
  0xd1   : > { %p10710_p13 = pnand %p10708_p12, %p10705_p11 }
  0xd3   : > { %10713 = shalt.err (!%p10710_p13)
}
  0xd4   : > { %s10714_s20 = scalar_lea.vmem %s671_s29, 2048  ;;  %p10722_p7 = scmp.lt.s32.totalorder %s671_s29, %s671_s29 }
  0xd5   : > { %p10715_p0 = scmp.ne.s32.totalorder %s671_s29, %s10714_s20  ;;  %p10723_p9 = scmp.lt.s32.totalorder %s10714_s20, %s10714_s20 }
  0xd7   : > { %p10717_p2 = pnand %p10715_p0, %p11401_p8  ;;  %p10724_p4 = por %p10723_p9, %p10722_p7 }
  0xd9   : > { %p10718_p5 = pneg %p10717_p2 }
  0xdb   : > { %p10725_p10 = pnand %p10724_p4, %p10718_p5 }
  0xdd   : > { %10728 = shalt.err (!%p10725_p10)
}
  0xde   : > { %9708 = dma.hbm_to_vmem [thread:$0]  (!%p11385_p6), %s13769_s13, 2048, %s671_s29, [#allocation24], %s13839_s16, %s13839_s16, %s13838_s26  }
  0xdf   : > { %s11214_s0 = smov [#allocation26]   ;;  %s11215_s25 = smov [#allocation29]  }
  0xe0   : > { %s697_s1 = sshll.u32 %s11214_s0, 4  ;;  %s718_s18 = sshll.u32 %s11215_s25, 4  ;;  %s698_s1 = int_to_ptr.vmem [resolvable:$true] %s697_s1  ;;  %s719_s18 = int_to_ptr.vmem [resolvable:$true] %s718_s18 }
  0xe1   : > { %s10729_s21 = scalar_lea.hbm %s13771_s15, 16 }
  0xe2   : > { %p10730_p1 = scmp.ne.s32.totalorder %s13771_s15, %s10729_s21  ;;  %p10736_p12 = scmp.lt.u32.totalorder %s10729_s21, %s13771_s15 }
  0xe4   : > { %p10732_p3 = pnand %p10730_p1, %p11401_p8 }
  0xe6   : > { %p10733_p11 = pneg %p10732_p3 }
  0xe8   : > { %p10738_p13 = pnand %p10736_p12, %p10733_p11 }
  0xea   : > { %10741 = shalt.err (!%p10738_p13)
}
  0xeb   : > { %s10742_s29 = scalar_lea.vmem %s698_s1, 16  ;;  %s10749_s23 = scalar_lea.vmem %s698_s1, 32 }
  0xec   : > { %p10743_p0 = scmp.ne.s32.totalorder %s698_s1, %s10742_s29  ;;  %p10750_p7 = scmp.lt.s32.totalorder %s698_s1, %s698_s1 }
  0xed   : > { %p10751_p9 = scmp.lt.s32.totalorder %s10749_s23, %s10742_s29 }
  0xee   : > { %p10745_p2 = pnand %p10743_p0, %p11401_p8 }
  0xef   : > { %p10752_p4 = por %p10751_p9, %p10750_p7 }
  0xf0   : > { %p10746_p5 = pneg %p10745_p2 }
  0xf2   : > { %p10753_p10 = pnand %p10752_p4, %p10746_p5 }
  0xf4   : > { %10756 = shalt.err (!%p10753_p10)
}
  0xf5   : > { %9714 = dma.hbm_to_vmem [thread:$0]  (!%p11385_p6), %s13771_s15, 16, %s698_s1, [#allocation27]  }
  0xf6   : > { %s10757_s28 = scalar_lea.hbm %s13773_s17, 256 }
  0xf7   : > { %p10758_p1 = scmp.ne.s32.totalorder %s13773_s17, %s10757_s28  ;;  %p10764_p12 = scmp.lt.u32.totalorder %s10757_s28, %s13773_s17 }
  0xf9   : > { %p10760_p3 = pnand %p10758_p1, %p11401_p8 }
  0xfb   : > { %p10761_p11 = pneg %p10760_p3 }
  0xfd   : > { %p10766_p13 = pnand %p10764_p12, %p10761_p11 }
  0xff   : > { %10769 = shalt.err (!%p10766_p13)
}
 0x100   : > { %s10770_s29 = scalar_lea.vmem %s719_s18, 256  ;;  %p10778_p7 = scmp.lt.s32.totalorder %s719_s18, %s719_s18 }
 0x101   : > { %p10771_p0 = scmp.ne.s32.totalorder %s719_s18, %s10770_s29  ;;  %p10779_p9 = scmp.lt.s32.totalorder %s10770_s29, %s10770_s29 }
 0x103   : > { %p10773_p2 = pnand %p10771_p0, %p11401_p8  ;;  %p10780_p4 = por %p10779_p9, %p10778_p7 }
 0x105   : > { %p10774_p5 = pneg %p10773_p2 }
 0x107   : > { %p10781_p10 = pnand %p10780_p4, %p10774_p5 }
 0x109   : > { %10784 = shalt.err (!%p10781_p10)
}
 0x10a   : > { %9720 = dma.hbm_to_vmem [thread:$0]  (!%p11385_p6), %s13773_s17, 256, %s719_s18, [#allocation30], %s13839_s16, %s13839_s16, %s13838_s26  }
 0x10b   : > { %s11216_s2 = smov [#allocation7]   ;;  %s11217_s5 = smov [#allocation10]  }
 0x10c   : > { %s527_s0 = sshll.u32 %s11216_s2, 4  ;;  %s553_s25 = sshll.u32 %s11217_s5, 4  ;;  %s528_s0 = int_to_ptr.vmem [resolvable:$true] %s527_s0  ;;  %s554_s25 = int_to_ptr.vmem [resolvable:$true] %s553_s25 }
 0x10d   : > { %s13840_s21 = sld [smem:[#allocation55_spill]] }
 0x113   : > { %s10785_s20 = scalar_lea.hbm %s13840_s21, 1024 }
 0x114   : > { %p10786_p1 = scmp.ne.s32.totalorder %s13840_s21, %s10785_s20  ;;  %p10792_p12 = scmp.lt.u32.totalorder %s10785_s20, %s13840_s21 }
 0x116   : > { %p10788_p3 = pnand %p10786_p1, %p11401_p8 }
 0x118   : > { %p10789_p11 = pneg %p10788_p3 }
 0x11a   : > { %p10794_p13 = pnand %p10792_p12, %p10789_p11 }
 0x11c   : > { %10797 = shalt.err (!%p10794_p13)
}
 0x11d   : > { %s10798_s18 = scalar_lea.vmem %s528_s0, 1024  ;;  %p10806_p7 = scmp.lt.s32.totalorder %s528_s0, %s528_s0 }
 0x11e   : > { %p10799_p0 = scmp.ne.s32.totalorder %s528_s0, %s10798_s18  ;;  %p10807_p9 = scmp.lt.s32.totalorder %s10798_s18, %s10798_s18 }
 0x120   : > { %p10801_p2 = pnand %p10799_p0, %p11401_p8  ;;  %p10808_p4 = por %p10807_p9, %p10806_p7 }
 0x122   : > { %p10802_p5 = pneg %p10801_p2 }
 0x124   : > { %p10809_p10 = pnand %p10808_p4, %p10802_p5 }
 0x126   : > { %10812 = shalt.err (!%p10809_p10)
}
 0x127   : > { %9675 = dma.hbm_to_vmem [thread:$0]  (!%p11385_p6), %s13840_s21, 1024, %s528_s0, [#allocation6], %s13839_s16, %s13839_s16, %s13838_s26  }
 0x128   : > { %s13841_s28 = sld [smem:[#allocation57_spill]] }
 0x12e   : > { %s10813_s22 = scalar_lea.hbm %s13841_s28, 32 }
 0x12f   : > { %p10814_p1 = scmp.ne.s32.totalorder %s13841_s28, %s10813_s22  ;;  %p10820_p12 = scmp.lt.u32.totalorder %s10813_s22, %s13841_s28 }
 0x131   : > { %p10816_p3 = pnand %p10814_p1, %p11401_p8 }
 0x133   : > { %p10817_p11 = pneg %p10816_p3 }
 0x135   : > { %p10822_p13 = pnand %p10820_p12, %p10817_p11 }
 0x137   : > { %10825 = shalt.err (!%p10822_p13)
}
 0x138   : > { %s10826_s18 = scalar_lea.vmem %s554_s25, 32  ;;  %p10834_p7 = scmp.lt.s32.totalorder %s554_s25, %s554_s25 }
 0x139   : > { %p10827_p0 = scmp.ne.s32.totalorder %s554_s25, %s10826_s18  ;;  %p10835_p9 = scmp.lt.s32.totalorder %s10826_s18, %s10826_s18 }
 0x13b   : > { %p10829_p2 = pnand %p10827_p0, %p11401_p8  ;;  %p10836_p4 = por %p10835_p9, %p10834_p7 }
 0x13d   : > { %p10830_p5 = pneg %p10829_p2 }
 0x13f   : > { %p10837_p10 = pnand %p10836_p4, %p10830_p5 }
 0x141   : > { %10840 = shalt.err (!%p10837_p10)
}
 0x142   : > { %9681 = dma.hbm_to_vmem [thread:$0]  (!%p11385_p6), %s13841_s28, 32, %s554_s25, [#allocation9], %s13837_s30, %s13837_s30, %s13836_s3  }
 0x143   : > { %s11218_s23 = smov [#allocation13]   ;;  %s11219_s5 = smov [#allocation16]  }
 0x144   : > { %s579_s2 = sshll.u32 %s11218_s23, 4  ;;  %s605_s22 = sshll.u32 %s11219_s5, 4  ;;  %s580_s2 = int_to_ptr.vmem [resolvable:$true] %s579_s2  ;;  %s606_s22 = int_to_ptr.vmem [resolvable:$true] %s605_s22 }
 0x145   : > { %s13842_s6 = sld [smem:[#allocation59_spill]] }
 0x14b   : > { %s10841_s29 = scalar_lea.hbm %s13842_s6, 32 }
 0x14c   : > { %p10842_p1 = scmp.ne.s32.totalorder %s13842_s6, %s10841_s29  ;;  %p10848_p12 = scmp.lt.u32.totalorder %s10841_s29, %s13842_s6 }
 0x14e   : > { %p10844_p3 = pnand %p10842_p1, %p11401_p8 }
 0x150   : > { %p10845_p11 = pneg %p10844_p3 }
 0x152   : > { %p10850_p13 = pnand %p10848_p12, %p10845_p11 }
 0x154   : > { %10853 = shalt.err (!%p10850_p13)
}
 0x155   : > { %s10854_s25 = scalar_lea.vmem %s580_s2, 32  ;;  %p10862_p7 = scmp.lt.s32.totalorder %s580_s2, %s580_s2 }
 0x156   : > { %p10855_p0 = scmp.ne.s32.totalorder %s580_s2, %s10854_s25  ;;  %p10863_p9 = scmp.lt.s32.totalorder %s10854_s25, %s10854_s25 }
 0x158   : > { %p10857_p2 = pnand %p10855_p0, %p11401_p8  ;;  %p10864_p4 = por %p10863_p9, %p10862_p7 }
 0x15a   : > { %p10858_p5 = pneg %p10857_p2 }
 0x15c   : > { %p10865_p10 = pnand %p10864_p4, %p10858_p5 }
 0x15e   : > { %10868 = shalt.err (!%p10865_p10)
}
 0x15f   : > { %9687 = dma.hbm_to_vmem [thread:$0]  (!%p11385_p6), %s13842_s6, 32, %s580_s2, [#allocation12], %s13837_s30, %s13837_s30, %s13836_s3  }
 0x160   : > { %s13843_s8 = sld [smem:[#allocation61_spill]] }
 0x166   : > { %s10869_s20 = scalar_lea.hbm %s13843_s8, 32 }
 0x167   : > { %p10870_p1 = scmp.ne.s32.totalorder %s13843_s8, %s10869_s20  ;;  %p10876_p12 = scmp.lt.u32.totalorder %s10869_s20, %s13843_s8 }
 0x169   : > { %p10872_p3 = pnand %p10870_p1, %p11401_p8 }
 0x16b   : > { %p10873_p11 = pneg %p10872_p3 }
 0x16d   : > { %p10878_p13 = pnand %p10876_p12, %p10873_p11 }
 0x16f   : > { %10881 = shalt.err (!%p10878_p13)
}
 0x170   : > { %s10882_s0 = scalar_lea.vmem %s606_s22, 32  ;;  %p10890_p7 = scmp.lt.s32.totalorder %s606_s22, %s606_s22 }
 0x171   : > { %p10883_p0 = scmp.ne.s32.totalorder %s606_s22, %s10882_s0  ;;  %p10891_p9 = scmp.lt.s32.totalorder %s10882_s0, %s10882_s0 }
 0x173   : > { %p10885_p2 = pnand %p10883_p0, %p11401_p8  ;;  %p10892_p4 = por %p10891_p9, %p10890_p7 }
 0x175   : > { %p10886_p5 = pneg %p10885_p2 }
 0x177   : > { %p10893_p10 = pnand %p10892_p4, %p10886_p5 }
 0x179   : > { %10896 = shalt.err (!%p10893_p10)
}
 0x17a   : > { %9693 = dma.hbm_to_vmem [thread:$0]  (!%p11385_p6), %s13843_s8, 32, %s606_s22, [#allocation15], %s13837_s30, %s13837_s30, %s13836_s3  }
 0x17b   : > { %s11220_s9 = smov [#allocation19]   ;;  %s11221_s23 = smov [#allocation22]  }
 0x17c   : > { %s631_s7 = sshll.u32 %s11220_s9, 4  ;;  %s657_s5 = sshll.u32 %s11221_s23, 4  ;;  %s632_s7 = int_to_ptr.vmem [resolvable:$true] %s631_s7  ;;  %s658_s5 = int_to_ptr.vmem [resolvable:$true] %s657_s5 }
 0x17d   : > { %s10897_s29 = scalar_lea.hbm %s13766_s10, 32 }
 0x17e   : > { %p10898_p1 = scmp.ne.s32.totalorder %s13766_s10, %s10897_s29  ;;  %p10904_p12 = scmp.lt.u32.totalorder %s10897_s29, %s13766_s10 }
 0x180   : > { %p10900_p3 = pnand %p10898_p1, %p11401_p8 }
 0x182   : > { %p10901_p11 = pneg %p10900_p3 }
 0x184   : > { %p10906_p13 = pnand %p10904_p12, %p10901_p11 }
 0x186   : > { %10909 = shalt.err (!%p10906_p13)
}
 0x187   : > { %s10910_s22 = scalar_lea.vmem %s632_s7, 32  ;;  %p10918_p7 = scmp.lt.s32.totalorder %s632_s7, %s632_s7 }
 0x188   : > { %p10911_p0 = scmp.ne.s32.totalorder %s632_s7, %s10910_s22  ;;  %p10919_p9 = scmp.lt.s32.totalorder %s10910_s22, %s10910_s22 }
 0x18a   : > { %p10913_p2 = pnand %p10911_p0, %p11401_p8  ;;  %p10920_p4 = por %p10919_p9, %p10918_p7 }
 0x18c   : > { %p10914_p5 = pneg %p10913_p2 }
 0x18e   : > { %p10921_p10 = pnand %p10920_p4, %p10914_p5 }
 0x190   : > { %10924 = shalt.err (!%p10921_p10)
}
 0x191   : > { %9699 = dma.hbm_to_vmem [thread:$0]  (!%p11385_p6), %s13766_s10, 32, %s632_s7, [#allocation18], %s13837_s30, %s13837_s30, %s13836_s3  }
 0x192   : > { %s10925_s24 = scalar_lea.hbm %s13768_s12, 32 }
 0x193   : > { %p10926_p1 = scmp.ne.s32.totalorder %s13768_s12, %s10925_s24  ;;  %p10932_p12 = scmp.lt.u32.totalorder %s10925_s24, %s13768_s12 }
 0x195   : > { %p10928_p3 = pnand %p10926_p1, %p11401_p8 }
 0x197   : > { %p10929_p11 = pneg %p10928_p3 }
 0x199   : > { %p10934_p13 = pnand %p10932_p12, %p10929_p11 }
 0x19b   : > { %10937 = shalt.err (!%p10934_p13)
}
 0x19c   : > { %s10938_s2 = scalar_lea.vmem %s658_s5, 32  ;;  %p10946_p7 = scmp.lt.s32.totalorder %s658_s5, %s658_s5 }
 0x19d   : > { %p10939_p0 = scmp.ne.s32.totalorder %s658_s5, %s10938_s2  ;;  %p10947_p9 = scmp.lt.s32.totalorder %s10938_s2, %s10938_s2 }
 0x19f   : > { %p10941_p2 = pnand %p10939_p0, %p11401_p8  ;;  %p10948_p4 = por %p10947_p9, %p10946_p7 }
 0x1a1   : > { %p10942_p5 = pneg %p10941_p2 }
 0x1a3   : > { %p10949_p10 = pnand %p10948_p4, %p10942_p5 }
 0x1a5   : > { %10952 = shalt.err (!%p10949_p10)
}
 0x1a6   : > { %9705 = dma.hbm_to_vmem [thread:$0]  (!%p11385_p6), %s13768_s12, 32, %s658_s5, [#allocation21], %s13837_s30, %s13837_s30, %s13836_s3  }
 0x1a7   : > { %s11222_s25 = smov [#allocation25]   ;;  %s11223_s23 = smov [#allocation28]  }
 0x1a8   : > { %s683_s9 = sshll.u32 %s11222_s25, 4  ;;  %s708_s20 = sshll.u32 %s11223_s23, 4  ;;  %s684_s9 = int_to_ptr.vmem [resolvable:$true] %s683_s9  ;;  %s709_s20 = int_to_ptr.vmem [resolvable:$true] %s708_s20 }
 0x1a9   : > { %s10953_s1 = scalar_lea.hbm %s13770_s14, 32 }
 0x1aa   : > { %p10954_p1 = scmp.ne.s32.totalorder %s13770_s14, %s10953_s1  ;;  %p10960_p12 = scmp.lt.u32.totalorder %s10953_s1, %s13770_s14 }
 0x1ac   : > { %p10956_p3 = pnand %p10954_p1, %p11401_p8 }
 0x1ae   : > { %p10957_p11 = pneg %p10956_p3 }
 0x1b0   : > { %p10962_p13 = pnand %p10960_p12, %p10957_p11 }
 0x1b2   : > { %10965 = shalt.err (!%p10962_p13)
}
 0x1b3   : > { %s10966_s5 = scalar_lea.vmem %s684_s9, 32  ;;  %p10974_p7 = scmp.lt.s32.totalorder %s684_s9, %s684_s9 }
 0x1b4   : > { %p10967_p0 = scmp.ne.s32.totalorder %s684_s9, %s10966_s5  ;;  %p10975_p9 = scmp.lt.s32.totalorder %s10966_s5, %s10966_s5 }
 0x1b6   : > { %p10969_p2 = pnand %p10967_p0, %p11401_p8  ;;  %p10976_p4 = por %p10975_p9, %p10974_p7 }
 0x1b8   : > { %p10970_p5 = pneg %p10969_p2 }
 0x1ba   : > { %p10977_p10 = pnand %p10976_p4, %p10970_p5 }
 0x1bc   : > { %10980 = shalt.err (!%p10977_p10)
}
 0x1bd   : > { %9711 = dma.hbm_to_vmem [thread:$0]  (!%p11385_p6), %s13770_s14, 32, %s684_s9, [#allocation24], %s13837_s30, %s13837_s30, %s13836_s3  }
 0x1be   : > { %s13844_s29 = sld [smem:[#allocation63_spill]] }
 0x1c4   : > { %s10981_s1 = scalar_lea.hbm %s13844_s29, 16 }
 0x1c5   : > { %p10982_p1 = scmp.ne.s32.totalorder %s13844_s29, %s10981_s1  ;;  %p10988_p12 = scmp.lt.u32.totalorder %s10981_s1, %s13844_s29 }
 0x1c7   : > { %p10984_p3 = pnand %p10982_p1, %p11401_p8 }
 0x1c9   : > { %p10985_p11 = pneg %p10984_p3 }
 0x1cb   : > { %p10990_p13 = pnand %p10988_p12, %p10985_p11 }
 0x1cd   : > { %10993 = shalt.err (!%p10990_p13)
}
 0x1ce   : > { %s10994_s5 = scalar_lea.vmem %s709_s20, 16  ;;  %s11001_s3 = scalar_lea.vmem %s709_s20, 32 }
 0x1cf   : > { %p10995_p0 = scmp.ne.s32.totalorder %s709_s20, %s10994_s5  ;;  %p11002_p7 = scmp.lt.s32.totalorder %s709_s20, %s709_s20 }
 0x1d0   : > { %p11003_p9 = scmp.lt.s32.totalorder %s11001_s3, %s10994_s5 }
 0x1d1   : > { %p10997_p2 = pnand %p10995_p0, %p11401_p8 }
 0x1d2   : > { %p11004_p4 = por %p11003_p9, %p11002_p7 }
 0x1d3   : > { %p10998_p5 = pneg %p10997_p2 }
 0x1d5   : > { %p11005_p10 = pnand %p11004_p4, %p10998_p5 }
 0x1d7   : > { %11008 = shalt.err (!%p11005_p10)
}
 0x1d8   : > { %9717 = dma.hbm_to_vmem [thread:$0]  (!%p11385_p6), %s13844_s29, 16, %s709_s20, [#allocation27]  }
 0x1d9   : > { %s11224_s25 = smov [#allocation31]   ;;  %s11225_s24 = smov [#allocation32]  }
 0x1da   : > { %s731_s23 = sshll.u32 %s11224_s25, 4  ;;  %s745_s1 = sshll.u32 %s11225_s24, 4  ;;  %s732_s23 = int_to_ptr.vmem [resolvable:$true] %s731_s23  ;;  %s746_s1 = int_to_ptr.vmem [resolvable:$true] %s745_s1 }
 0x1db   : > { %s13845_s2 = sld [smem:[#allocation64_spill]] }
 0x1e1   : > { %s11009_s7 = scalar_lea.hbm %s13845_s2, 512 }
 0x1e2   : > { %p11010_p1 = scmp.ne.s32.totalorder %s13845_s2, %s11009_s7  ;;  %p11016_p12 = scmp.lt.u32.totalorder %s11009_s7, %s13845_s2 }
 0x1e4   : > { %p11012_p3 = pnand %p11010_p1, %p11401_p8 }
 0x1e6   : > { %p11013_p11 = pneg %p11012_p3 }
 0x1e8   : > { %p11018_p13 = pnand %p11016_p12, %p11013_p11 }
 0x1ea   : > { %11021 = shalt.err (!%p11018_p13)
}
 0x1eb   : > { %s11022_s20 = scalar_lea.vmem %s732_s23, 512  ;;  %p11030_p7 = scmp.lt.s32.totalorder %s732_s23, %s732_s23 }
 0x1ec   : > { %p11023_p0 = scmp.ne.s32.totalorder %s732_s23, %s11022_s20  ;;  %p11031_p9 = scmp.lt.s32.totalorder %s11022_s20, %s11022_s20 }
 0x1ee   : > { %p11025_p2 = pnand %p11023_p0, %p11401_p8  ;;  %p11032_p4 = por %p11031_p9, %p11030_p7 }
 0x1f0   : > { %p11026_p5 = pneg %p11025_p2 }
 0x1f2   : > { %p11033_p10 = pnand %p11032_p4, %p11026_p5 }
 0x1f4   : > { %11036 = shalt.err (!%p11033_p10)
}
 0x1f5   : > { %9723 = dma.hbm_to_vmem [thread:$0]  (!%p11385_p6), %s13845_s2, 512, %s732_s23, [#allocation30], %s13839_s16, %s13839_s16, %s13838_s26  }
 0x1f6   : > { %s13846_s18 = sld [smem:[#allocation65_spill]] }
 0x1fc   : > { %s11037_s0 = scalar_lea.hbm %s13846_s18, 16 }
 0x1fd   : > { %p11038_p1 = scmp.ne.s32.totalorder %s13846_s18, %s11037_s0  ;;  %p11044_p12 = scmp.lt.u32.totalorder %s11037_s0, %s13846_s18 }
 0x1ff   : > { %p11040_p3 = pnand %p11038_p1, %p11401_p8 }
 0x201   : > { %p11041_p11 = pneg %p11040_p3 }
 0x203   : > { %p11046_p13 = pnand %p11044_p12, %p11041_p11 }
 0x205   : > { %11049 = shalt.err (!%p11046_p13)
}
 0x206   : > { %s11050_s20 = scalar_lea.vmem %s746_s1, 16  ;;  %s11057_s26 = scalar_lea.vmem %s746_s1, 32 }
 0x207   : > { %p11051_p0 = scmp.ne.s32.totalorder %s746_s1, %s11050_s20  ;;  %p11058_p7 = scmp.lt.s32.totalorder %s746_s1, %s746_s1 }
 0x208   : > { %p11059_p9 = scmp.lt.s32.totalorder %s11057_s26, %s11050_s20 }
 0x209   : > { %p11053_p2 = pnand %p11051_p0, %p11401_p8 }
 0x20a   : > { %p11060_p4 = por %p11059_p9, %p11058_p7 }
 0x20b   : > { %p11054_p5 = pneg %p11053_p2 }
 0x20d   : > { %p11061_p10 = pnand %p11060_p4, %p11054_p5 }
 0x20f   : > { %11064 = shalt.err (!%p11061_p10)
}
 0x210   : > { %s13847_s6 = sld [smem:[#allocation50_spill]]  ;;  %s13848_s22 = sld [smem:[#allocation49_spill]] }
 0x211   : > { %s13849_s25 = sld [smem:[#allocation48_spill]]  ;;  %s13850_s27 = sld [smem:[#allocation47_spill]] }
 0x212   : > { %s13851_s24 = sld [smem:[#allocation51_spill]] }
 0x213   : > { %9726 = dma.hbm_to_vmem [thread:$0]  (!%p11385_p6), %s13846_s18, 16, %s746_s1, [#allocation33]  }
 0x216   : > { %s7558_s0 = sadd.s32 4294967294, %s13847_s6   ;;  %s11802_s4 = sadd.s32 1, %s13847_s6  }
 0x217   : > { %s53_s7 = sadd.s32 1, %s13848_s22  ;;  %s50_s5 = ssub.s32 %s13847_s6, %s11802_s4 }
 0x218   : > { %p60_p8 = scmp.ne.s32.totalorder %s13848_s22, %s13849_s25  ;;  %p51_p1 = scmp.eq.s32.totalorder %s50_s5, 0 }
 0x219   : > { %p61_p3 = scmp.eq.s32.totalorder %s13847_s6, 0  ;;  %p66_p11 = scmp.ne.s32.totalorder %s13849_s25, %s13850_s27 }
 0x21a   : > { %p489_p12 = scmp.eq.s32.totalorder %s13851_s24, 1  ;;  %p13852_p0 = scmp.eq.s32.totalorder %s13851_s24, 0 }
 0x21b   : > { %s11814_s3 = scalar_select %p51_p1, %s13848_s22, %s53_s7  }
 0x21c   : > { %p62_p13 = por %p61_p3, %p60_p8  ;;  %p11818_p2 = por %p13852_p0, %p66_p11 }
 0x21d   : > { %p11822_p6 = por %p489_p12, %p60_p8  ;;  %p495_p5 = scmp.eq.s32.totalorder %s7558_s0, 1 }
 0x21e   : > { %p9754_p7 = scmp.lt.s32.totalorder %s13847_s6, 2  ;;  %s756_s20 = sand.u32 1, %s13848_s22  }
 0x21f   : > { %s13854_s1 = scalar_select %p11822_p6, 1, 0 }
 0x220   : > { %p11828_p9 = por %p495_p5, %p66_p11  ;;  %s7580_s16 = sshll.u32 %s756_s20, 7 }
 0x221   : > { %s7945_s23 = sshll.u32 %s13847_s6, 11  ;;  %s13856_s24 = sld [smem:[#allocation53_spill]] }
 0x222   : > { %s13855_s26 = scalar_select %p11828_p9, 1, 0 }
 0x223   : > { %s760_s2 = scalar_lea.vmem [#allocation2], %s7580_s16  ;;  %p11838_p4 = pnand %p9754_p7, %p62_p13 }
 0x224   : > { %s767_s8 = sshll.u32 %s760_s2, 4  ;;  %s11844_s6 = scalar_lea.sflag [#allocation3], %s756_s20  ;;  %s11842_s8 = int_to_ptr.vmem [resolvable:$true] %s767_s8 }
 0x225   : > { %p11067_p8 = pneg %p11838_p4 }
 0x227   : > { %s13857_s7 = smov %s13856_s24  ;;  %s11836_s5 = scalar_lea.hbm %s13856_s24, %s7945_s23 }
 0x228   : > { %s11065_s22 = scalar_lea.hbm %s11836_s5, 2048  ;;  %s11070_s23 = scalar_lea.hbm %s13857_s7, 4096 }
 0x229   : > { %p11066_p10 = scmp.ne.s32.totalorder %s11836_s5, %s11065_s22  ;;  %p11071_p11 = scmp.lt.u32.totalorder %s11836_s5, %s13857_s7 }
 0x22a   : > { %p11072_p12 = scmp.lt.u32.totalorder %s11070_s23, %s11065_s22  ;;  %p11074_p0 = scmp.lt.u32.totalorder %s11065_s22, %s11836_s5 }
 0x22b   : > { %p11068_p1 = pnand %p11067_p8, %p11066_p10 }
 0x22c   : > { %p11073_p13 = por %p11072_p12, %p11071_p11 }
 0x22d   : > { %p11069_p3 = pneg %p11068_p1 }
 0x22e   : > { %p11075_p5 = por %p11074_p0, %p11073_p13 }
 0x230   : > { %p11076_p7 = pnand %p11075_p5, %p11069_p3 }
 0x232   : > { %11079 = shalt.err (!%p11076_p7)
}
 0x233   : > { %s11080_s20 = scalar_lea.vmem %s11842_s8, 2048  ;;  %s11226_s24 = smov [#allocation2]  }
 0x234   : > { %p11081_p10 = scmp.ne.s32.totalorder %s11842_s8, %s11080_s20  ;;  %s11085_s16 = sshll.u32 %s11226_s24, 4  ;;  %s11086_s16 = int_to_ptr.vmem [resolvable:$false] %s11085_s16 }
 0x235   : > { %s11087_s2 = scalar_lea.vmem %s11086_s16, 4096  ;;  %p11088_p6 = scmp.lt.s32.totalorder %s11842_s8, %s11086_s16 }
 0x236   : > { %p11083_p1 = pnand %p11081_p10, %p11067_p8  ;;  %p11089_p11 = scmp.lt.s32.totalorder %s11087_s2, %s11080_s20 }
 0x238   : > { %p11084_p9 = pneg %p11083_p1  ;;  %p11090_p12 = por %p11089_p11, %p11088_p6 }
 0x23a   : > { %p11091_p13 = pnand %p11090_p12, %p11084_p9 }
 0x23c   : > { %11094 = shalt.err (!%p11091_p13)
}
 0x23d   : > { %s11227_s22 = smov 256   ;;  %s13859_s23 = sld [smem:[#allocation52_spill]] }
 0x23e   : > { %9730 = dma.hbm_to_vmem [thread:$0]  (!%p11838_p4), %s11836_s5, 2048, %s11842_s8, %s11844_s6, %s11227_s22, %s11227_s22, %s13837_s30  }
 0x243   : > { %p13860_p8 = scmp.ne.s32.totalorder %s13859_s23, 0 }
 0x244   : > { %s13861_s25 = sld [smem:[#allocation48_spill]] (!%p13860_p8) }
 0x245   : > { %779 = sbr.rel (%p13860_p8) target bundleno = 8341 (0x2095), region = 100 }
 0x24a   : > { %s11876_s27 = sand.u32 (!%p13860_p8), 1, %s13861_s25  }
 0x24b   : > { %s7584_s20 = sshll.u32 (!%p13860_p8), %s11876_s27, 7  ;;  %s782_s24 = scalar_lea.sflag (!%p13860_p8), [#allocation3], %s11876_s27 }
 0x24c   : > { %s11880_s16 = scalar_lea.vmem [#allocation2], %s7584_s20 }
 0x24d   : > { %11140 = dma.done.wait (%p11818_p2), %s782_s24, 2048  }
 0x24e   : > { %11142 = vsyncadd (%p11818_p2), %s782_s24, 4294965248  ;;  %s13862_s0 = sld [smem:[#allocation51_spill]] }
 0x254   : > { %p13863_p6 = scmp.eq.s32.totalorder %s13862_s0, 0 }
 0x256   : > { %11144 = dma.done.wait (%p13863_p6), [#allocation6], 4096   ;;  %p13864_p9 = pmov %p13863_p6 }
 0x257   : > { %p13865_p4 = pmov %p13863_p6 }
 0x258   : > { %11146 = vsyncadd (%p13864_p9), [#allocation6], 4294963200 }
 0x259   : > { %11148 = dma.done.wait (%p13865_p4), [#allocation9], 64   ;;  %p13866_p3 = pmov %p13865_p4 }
 0x25b   : > { %11150 = vsyncadd (%p13866_p3), [#allocation9], 4294967232  ;;  %p13867_p0 = pmov %p13866_p3 }
 0x25d   : > { %11152 = dma.done.wait (%p13867_p0), [#allocation12], 1056   ;;  %p13868_p5 = pmov %p13867_p0 }
 0x25e   : > { %p13869_p2 = pmov %p13867_p0 }
 0x25f   : > { %11154 = vsyncadd (%p13868_p5), [#allocation12], 4294966240 }
 0x260   : > { %11156 = dma.done.wait (%p13869_p2), [#allocation15], 1056   ;;  %p13870_p7 = pmov %p13867_p0 }
 0x261   : > { %p13871_p10 = pmov %p13867_p0 }
 0x262   : > { %11158 = vsyncadd (%p13870_p7), [#allocation15], 4294966240 }
 0x263   : > { %11160 = dma.done.wait (%p13871_p10), [#allocation18], 64   ;;  %p13872_p1 = pmov %p13867_p0 }
 0x264   : > { %p13873_p11 = pmov %p13867_p0 }
 0x265   : > { %11162 = vsyncadd (%p13872_p1), [#allocation18], 4294967232 }
 0x266   : > { %11164 = dma.done.wait (%p13873_p11), [#allocation21], 1056   ;;  %p13874_p12 = pmov %p13867_p0 }
 0x267   : > { %p13875_p13 = pmov %p13867_p0 }
 0x268   : > { %11166 = vsyncadd (%p13874_p12), [#allocation21], 4294966240 }
 0x269   : > { %11168 = dma.done.wait (%p13875_p13), [#allocation24], 2080   ;;  %p13876_p8 = pmov %p13867_p0 }
 0x26a   : > { %p13877_p6 = pmov %p13867_p0 }
 0x26b   : > { %11170 = vsyncadd (%p13876_p8), [#allocation24], 4294965216 }
 0x26c   : > { %11172 = dma.done.wait (%p13877_p6), [#allocation27], 32   ;;  %p13878_p9 = pmov %p13867_p0 }
 0x26d   : > { %p13879_p4 = pmov %p13867_p0 }
 0x26e   : > { %11174 = vsyncadd (%p13878_p9), [#allocation27], 4294967264 }
 0x26f   : > { %11176 = dma.done.wait (%p13879_p4), [#allocation30], 768   ;;  %p13880_p3 = pmov %p13867_p0 }
 0x271   : > { %11178 = vsyncadd (%p13880_p3), [#allocation30], 4294966528 }
 0x272   : > { %11180 = dma.done.wait (%p13867_p0), [#allocation33], 16   ;;  %p13881_p5 = pmov %p13867_p0 }
 0x273   : > { %v11228_v0 = vmov 0.0|0.0   ;;  %v934_v1 = vld [vmem:[#allocation5] sm:$0xff]  ;;  %v935_v2 = vld [vmem:[#allocation5 + $0x8] sm:$0xff]  ;;  %v936_v3 = vld [vmem:[#allocation5 + $0x10] sm:$0xff]  ;;  %vm966_vm0 = vcmask 523264   ;;  %vm1098_vm1 = vcmask 261120  }
 0x274   : > { %11182 = vsyncadd (%p13881_p5), [#allocation33], 4294967280  ;;  %9097 = vmatprep.subr.bf16.mxu0 %v11228_v0  ;;  %v9098_v4 = vpack.c.bf16 %v935_v2, %v934_v1  ;;  %v937_v5 = vld [vmem:[#allocation5 + $0x18] sm:$0xff]  ;;  %v938_v7 = vld [vmem:[#allocation5 + $0x20] sm:$0xff]  ;;  %vm1396_vm2 = vcmask 64512   ;;  %s11229_s8 = smov 96  }
 0x275   : > { %v9101_v6 = vpack.c.bf16 %v937_v5, %v936_v3  ;;  %v939_v8 = vld [vmem:[#allocation5 + $0x28] sm:$0xff]  ;;  %v940_v10 = vld [vmem:[#allocation5 + $0x30] sm:$0xff]  ;;  %v941_v11 = vld [vmem:[#allocation5 + $0x38] sm:$0xff]  ;;  %s11230_s30 = smov 88   ;;  %s11231_s9 = smov 120  }
 0x276   : > { %9099 = vmatpush1.bf16.msra.mxu0 %v9098_v4  ;;  %v9104_v9 = vpack.c.bf16 %v939_v8, %v938_v7  ;;  %v919_v12 = vld [vmem:[%s11880_s16 + $0x8] sm:$0xff]  ;;  %v9107_v13 = vpack.c.bf16 %v941_v11, %v940_v10  ;;  %v942_v14 = vld [vmem:[#allocation5 + $0x40] sm:$0xff]  ;;  %v944_v17 = vld [vmem:[#allocation5 + $0x50] sm:$0xff]  ;;  %s11232_s5 = smov 80   ;;  %s11233_s6 = smov 112  }
 0x277   : > { %9100 = vmatprep.subr.bf16.mxu0 %v11228_v0  ;;  %7605 = vmatprep.mubr.msk.f32.mxu0 %vm966_vm0, %v919_v12  ;;  %v943_v15 = vld [vmem:[#allocation5 + $0x48] sm:$0xff]  ;;  %v945_v18 = vld [vmem:[#allocation5 + $0x58] sm:$0xff]  ;;  %v946_v20 = vld [vmem:[#allocation5 + $0x60] sm:$0xff]  ;;  %s11234_s2 = smov 64   ;;  %s11235_s22 = smov 56  }
 0x278   : > { %v9110_v16 = vpack.c.bf16 %v943_v15, %v942_v14  ;;  %v9113_v19 = vpack.c.bf16 %v945_v18, %v944_v17  ;;  %v947_v21 = vld [vmem:[#allocation5 + $0x68] sm:$0xff]  ;;  %v948_v23 = vld [vmem:[#allocation5 + $0x70] sm:$0xff]  ;;  %v949_v24 = vld [vmem:[#allocation5 + $0x78] sm:$0xff]  ;;  %s11236_s23 = smov 72   ;;  %s11237_s25 = smov 104  }
 0x279   : > { %v9116_v22 = vpack.c.bf16 %v947_v21, %v946_v20  ;;  %v9119_v25 = vpack.c.bf16 %v949_v24, %v948_v23  ;;  %v950_v26 = vld [vmem:[#allocation5 + $0x80] sm:$0xff]  ;;  %v951_v27 = vld [vmem:[#allocation5 + $0x88] sm:$0xff]  ;;  %v952_v29 = vld [vmem:[#allocation5 + $0x90] sm:$0xff]  ;;  %s11238_s20 = smov 48   ;;  %s11239_s24 = smov 40  }
 0x27a   : > { %9102 = vmatpush1.bf16.msra.mxu0 %v9101_v6  ;;  %v9122_v28 = vpack.c.bf16 %v951_v27, %v950_v26  ;;  %v953_v30 = vld [vmem:[#allocation5 + $0x98] sm:$0xff]  ;;  %v954_v32 = vld [vmem:[#allocation5 + $0xa0] sm:$0xff]  ;;  %v955_v33 = vld [vmem:[#allocation5 + $0xa8] sm:$0xff]  ;;  %p13885_p7 = scmp.ne.s32.totalorder %s13854_s1, 0 }
 0x27b   : > { %9103 = vmatprep.subr.bf16.mxu0 %v11228_v0  ;;  %v9125_v31 = vpack.c.bf16 %v953_v30, %v952_v29  ;;  %v9128_v34 = vpack.c.bf16 %v955_v33, %v954_v32  ;;  %v956_v35 = vld [vmem:[#allocation5 + $0xb0] sm:$0xff]  ;;  %v957_v36 = vld [vmem:[#allocation5 + $0xb8] sm:$0xff]  ;;  %v918_v38 = vld [vmem:[%s11880_s16] sm:$0xff] }
 0x27c   : > { %v9131_v37 = vpack.c.bf16 %v957_v36, %v956_v35  ;;  %v921_v39 = vld [vmem:[%s11880_s16 + $0x18] sm:$0xff]  ;;  %v920_v40 = vld [vmem:[%s11880_s16 + $0x10] sm:$0xff]  ;;  %v923_v41 = vld [vmem:[%s11880_s16 + $0x28] sm:$0xff] }
 0x27d   : > { %v922_v42 = vld [vmem:[%s11880_s16 + $0x20] sm:$0xff]  ;;  %v925_v43 = vld [vmem:[%s11880_s16 + $0x38] sm:$0xff]  ;;  %v924_v44 = vld [vmem:[%s11880_s16 + $0x30] sm:$0xff] }
 0x27e   : > { %9105 = vmatpush1.bf16.msra.mxu0 %v9104_v9  ;;  %v927_v45 = vld [vmem:[%s11880_s16 + $0x48] sm:$0xff]  ;;  %v926_v46 = vld [vmem:[%s11880_s16 + $0x40] sm:$0xff]  ;;  %v929_v47 = vld [vmem:[%s11880_s16 + $0x58] sm:$0xff] }
 0x27f   : > { %9106 = vmatprep.subr.bf16.mxu0 %v11228_v0  ;;  %v928_v48 = vld [vmem:[%s11880_s16 + $0x50] sm:$0xff]  ;;  %v931_v49 = vld [vmem:[%s11880_s16 + $0x68] sm:$0xff]  ;;  %v930_v50 = vld [vmem:[%s11880_s16 + $0x60] sm:$0xff] }
 0x280   : > { %v933_v51 = vld [vmem:[%s11880_s16 + $0x78] sm:$0xff]  ;;  %v932_v52 = vld [vmem:[%s11880_s16 + $0x70] sm:$0xff]  ;;  %v958_v53 = vld [vmem:[#allocation7] sm:$0xff]  ;;  %s7604_s16 = sshll.u32 %s11876_s27, 4 }
 0x281   : > { %v959_v57 = vld [vmem:[#allocation7 + $0x8] sm:$0xff]  ;;  %v960_v62 = vld [vmem:[#allocation7 + $0x10] sm:$0xff]  ;;  %v961_v3 = vld [vmem:[#allocation7 + $0x18] sm:$0xff] }
 0x282   : > { %9108 = vmatpush1.bf16.msra.mxu0 %v9107_v13  ;;  %v962_v8 = vld [vmem:[#allocation7 + $0x20] sm:$0xff]  ;;  %v963_v13 = vld [vmem:[#allocation7 + $0x28] sm:$0xff]  ;;  %v964_v18 = vld [vmem:[#allocation7 + $0x30] sm:$0xff] }
 0x283   : > { %9109 = vmatprep.subr.bf16.mxu0 %v11228_v0  ;;  %v965_v23 = vld [vmem:[#allocation7 + $0x38] sm:$0xff]  ;;  %vm12144_vm3 = vmpackc.low %vm1396_vm2, %vm1396_vm2 }
 0x286   : > { %9111 = vmatpush1.bf16.msra.mxu0 %v9110_v16 }
 0x287   : > { %9112 = vmatprep.subr.bf16.mxu0 %v11228_v0 }
 0x28a   : > { %9114 = vmatpush1.bf16.msra.mxu0 %v9113_v19 }
 0x28b   : > { %9115 = vmatprep.subr.bf16.mxu0 %v11228_v0 }
 0x28e   : > { %9117 = vmatpush1.bf16.msra.mxu0 %v9116_v22 }
 0x28f   : > { %9118 = vmatprep.subr.bf16.mxu0 %v11228_v0 }
 0x292   : > { %9120 = vmatpush1.bf16.msra.mxu0 %v9119_v25 }
 0x293   : > { %9121 = vmatprep.subr.bf16.mxu0 %v11228_v0 }
 0x296   : > { %9123 = vmatpush1.bf16.msra.mxu0 %v9122_v28 }
 0x297   : > { %9124 = vmatprep.subr.bf16.mxu0 %v11228_v0 }
 0x29a   : > { %9126 = vmatpush1.bf16.msra.mxu0 %v9125_v31 }
 0x29b   : > { %9127 = vmatprep.subr.bf16.mxu0 %v11228_v0 }
 0x29e   : > { %9129 = vmatpush1.bf16.msra.mxu0 %v9128_v34 }
 0x29f   : > { %9130 = vmatprep.subr.bf16.mxu0 %v11228_v0 }
 0x2a2   : > { %9132 = vmatpush1.bf16.msra.mxu0 %v9131_v37 }
 0x2a5   : > { %1056 = vmatmul.mubr.f32.vlgmr.msra.gmra.mrb[0].mxu0 %v918_v38 }
 0x2a6   : > { %7606 = vmatprep.mubr.msk.f32.mxu0 %vm966_vm0, %v921_v39 }
 0x2a9   : > { %1061 = vmatmul.mubr.f32.gmra.mrb[2].mxu0 %v920_v40 }
 0x2aa   : > { %7607 = vmatprep.mubr.msk.f32.mxu0 %vm966_vm0, %v923_v41 }
 0x2ad   : > { %1066 = vmatmul.mubr.f32.gmra.mrb[4].mxu0 %v922_v42 }
 0x2ae   : > { %7608 = vmatprep.mubr.msk.f32.mxu0 %vm966_vm0, %v925_v43 }
 0x2b1   : > { %1071 = vmatmul.mubr.f32.gmra.mrb[6].mxu0 %v924_v44 }
 0x2b2   : > { %7609 = vmatprep.mubr.msk.f32.mxu0 %vm966_vm0, %v927_v45 }
 0x2b5   : > { %1076 = vmatmul.mubr.f32.gmra.mrb[8].mxu0 %v926_v46 }
 0x2b6   : > { %7610 = vmatprep.mubr.msk.f32.mxu0 %vm966_vm0, %v929_v47 }
 0x2b9   : > { %1081 = vmatmul.mubr.f32.gmra.mrb[10].mxu0 %v928_v48 }
 0x2ba   : > { %7611 = vmatprep.mubr.msk.f32.mxu0 %vm966_vm0, %v931_v49 }
 0x2bd   : > { %1086 = vmatmul.mubr.f32.gmra.mrb[12].mxu0 %v930_v50 }
 0x2be   : > { %7612 = vmatprep.mubr.msk.f32.mxu0 %vm966_vm0, %v933_v51 }
 0x2c1   : > { %1091 = vmatmul.mubr.f32.gmra.mrb[14].mxu0 %v932_v52 }
 0x378   : > { %v1057_v54 = vpop.f32.mrb[0].mxu0 }
 0x379   : > { %v11950_v55 = vadd.f32 %v1057_v54, %v958_v53  ;;  %v1059_v56 = vpop.f32.mrb[1].mxu0 }
 0x37b   : > { %v1099_v58 = vsel %vm1098_vm1, %v11950_v55, 0.0 }
 0x37c   : > { %v1062_v59 = vpop.f32.mrb[2].mxu0  ;;  %1100 = vadd.xlane.f32.xlu0 %v1099_v58 }
 0x37d   : > { %v11954_v60 = vadd.f32 %v1062_v59, %v959_v57  ;;  %v1064_v61 = vpop.f32.mrb[3].mxu0 }
 0x37f   : > { %v1102_v63 = vsel %vm1098_vm1, %v11954_v60, 0.0 }
 0x380   : > { %v1067_v0 = vpop.f32.mrb[4].mxu0  ;;  %1103 = vadd.xlane.f32.xlu0 %v1102_v63 }
 0x381   : > { %v11958_v1 = vadd.f32 %v1067_v0, %v960_v62  ;;  %v1069_v2 = vpop.f32.mrb[5].mxu0 }
 0x383   : > { %v1105_v4 = vsel %vm1098_vm1, %v11958_v1, 0.0 }
 0x384   : > { %v1072_v5 = vpop.f32.mrb[6].mxu0  ;;  %1106 = vadd.xlane.f32.xlu1 %v1105_v4 }
 0x385   : > { %v11962_v6 = vadd.f32 %v1072_v5, %v961_v3  ;;  %v1074_v7 = vpop.f32.mrb[7].mxu0 }
 0x387   : > { %v1108_v9 = vsel %vm1098_vm1, %v11962_v6, 0.0 }
 0x388   : > { %v1077_v10 = vpop.f32.mrb[8].mxu0  ;;  %1109 = vadd.xlane.f32.xlu1 %v1108_v9  ;;  %v1232_v9 = vld [vmem:[#allocation11] sm:$0xff] }
 0x389   : > { %v11966_v11 = vadd.f32 %v1077_v10, %v962_v8  ;;  %v1079_v12 = vpop.f32.mrb[9].mxu0  ;;  %v1233_v10 = vld [vmem:[#allocation11 + $0x8] sm:$0xff] }
 0x38a   : > { %v9133_v12 = vpack.c.bf16 %v1233_v10, %v1232_v9 }
 0x38b   : > { %v1111_v14 = vsel %vm1098_vm1, %v11966_v11, 0.0 }
 0x38c   : > { %v1082_v15 = vpop.f32.mrb[10].mxu0  ;;  %1112 = vadd.xlane.f32.xlu0 %v1111_v14  ;;  %9134 = vmatprep.subr.bf16.mxu1 %v9133_v12  ;;  %v1235_v14 = vld [vmem:[#allocation11 + $0x18] sm:$0xff] }
 0x38d   : > { %v11970_v16 = vadd.f32 %v1082_v15, %v963_v13  ;;  %v1084_v17 = vpop.f32.mrb[11].mxu0  ;;  %9136 = vmatpush3.bf16.msra.mxu1 %v9133_v12  ;;  %v1234_v13 = vld [vmem:[#allocation11 + $0x10] sm:$0xff] }
 0x38e   : > { %v9137_v15 = vpack.c.bf16 %v1235_v14, %v1234_v13 }
 0x38f   : > { %v1114_v19 = vsel %vm1098_vm1, %v11970_v16, 0.0 }
 0x390   : > { %v1087_v20 = vpop.f32.mrb[12].mxu0  ;;  %1115 = vadd.xlane.f32.xlu1 %v1114_v19  ;;  %9138 = vmatprep.subr.bf16.mxu1 %v9137_v15 }
 0x391   : > { %v11974_v21 = vadd.f32 %v1087_v20, %v964_v18  ;;  %v1089_v22 = vpop.f32.mrb[13].mxu0  ;;  %9140 = vmatpush3.bf16.msra.mxu1 %v9137_v15 }
 0x393   : > { %v1117_v24 = vsel %vm1098_vm1, %v11974_v21, 0.0 }
 0x394   : > { %v1092_v25 = vpop.f32.mrb[14].mxu0  ;;  %1118 = vadd.xlane.f32.xlu0 %v1117_v24 }
 0x395   : > { %v11978_v26 = vadd.f32 %v1092_v25, %v965_v23  ;;  %v1094_v27 = vpop.f32.mrb[15].mxu0 }
 0x397   : > { %v1120_v28 = vsel %vm1098_vm1, %v11978_v26, 0.0 }
 0x398   : > { %1121 = vadd.xlane.f32.xlu1 %v1120_v28 }
 0x409   : > { %v1101_v29 = vpop.xlane.xlu0 %1100 }
 0x40a   : > { %v1124_v30 = vmul.f32 0.03125, %v1101_v29 }
 0x40c   : > { %v11983_v31 = vsub.f32 %v11950_v55, %v1124_v30 }
 0x40d   : > { %v1104_v32 = vpop.xlane.xlu0 %1103 }
 0x40e   : > { %v1125_v33 = vmul.f32 0.03125, %v1104_v32  ;;  %v1140_v34 = vmul.f32 %v11983_v31, %v11983_v31 }
 0x410   : > { %v11988_v35 = vsub.f32 %v11954_v60, %v1125_v33  ;;  %v1148_v36 = vsel %vm1098_vm1, %v1140_v34, 0.0  ;;  %v7613_v33 = vld [vmem:[#allocation8] ss:$0 sm:$0xff] }
 0x411   : > { %v1107_v37 = vpop.xlane.xlu1 %1106  ;;  %1149 = vadd.xlane.f32.xlu0 %v1148_v36 }
 0x412   : > { %v1126_v38 = vmul.f32 0.03125, %v1107_v37  ;;  %v1141_v39 = vmul.f32 %v11988_v35, %v11988_v35 }
 0x414   : > { %v11994_v40 = vsub.f32 %v11958_v1, %v1126_v38  ;;  %v1151_v41 = vsel %vm1098_vm1, %v1141_v39, 0.0  ;;  %v7614_v38 = vld [vmem:[#allocation10] ss:$0 sm:$0xff] }
 0x415   : > { %v1110_v42 = vpop.xlane.xlu1 %1109  ;;  %1152 = vadd.xlane.f32.xlu1 %v1151_v41 }
 0x416   : > { %v1127_v43 = vmul.f32 0.03125, %v1110_v42  ;;  %v1142_v44 = vmul.f32 %v11994_v40, %v11994_v40 }
 0x418   : > { %v12000_v45 = vsub.f32 %v11962_v6, %v1127_v43  ;;  %v1154_v46 = vsel %vm1098_vm1, %v1142_v44, 0.0 }
 0x419   : > { %1155 = vadd.xlane.f32.xlu0 %v1154_v46  ;;  %v1113_v47 = vpop.xlane.xlu0 %1112 }
 0x41a   : > { %v1128_v48 = vmul.f32 0.03125, %v1113_v47  ;;  %v1143_v49 = vmul.f32 %v12000_v45, %v12000_v45 }
 0x41c   : > { %v12006_v50 = vsub.f32 %v11966_v11, %v1128_v48  ;;  %v1157_v51 = vsel %vm1098_vm1, %v1143_v49, 0.0 }
 0x41d   : > { %v1116_v52 = vpop.xlane.xlu1 %1115  ;;  %1158 = vadd.xlane.f32.xlu1 %v1157_v51 }
 0x41e   : > { %v1129_v53 = vmul.f32 0.03125, %v1116_v52  ;;  %v1144_v54 = vmul.f32 %v12006_v50, %v12006_v50 }
 0x420   : > { %v12012_v56 = vsub.f32 %v11970_v16, %v1129_v53  ;;  %v1160_v57 = vsel %vm1098_vm1, %v1144_v54, 0.0 }
 0x421   : > { %1161 = vadd.xlane.f32.xlu0 %v1160_v57  ;;  %v1119_v58 = vpop.xlane.xlu0 %1118 }
 0x422   : > { %v1130_v59 = vmul.f32 0.03125, %v1119_v58  ;;  %v1145_v61 = vmul.f32 %v12012_v56, %v12012_v56 }
 0x424   : > { %v12018_v62 = vsub.f32 %v11974_v21, %v1130_v59  ;;  %v1163_v63 = vsel %vm1098_vm1, %v1145_v61, 0.0 }
 0x425   : > { %v1122_v0 = vpop.xlane.xlu1 %1121  ;;  %1164 = vadd.xlane.f32.xlu1 %v1163_v63 }
 0x426   : > { %v1131_v2 = vmul.f32 0.03125, %v1122_v0  ;;  %v1146_v3 = vmul.f32 %v12018_v62, %v12018_v62 }
 0x428   : > { %v12024_v4 = vsub.f32 %v11978_v26, %v1131_v2  ;;  %v1166_v5 = vsel %vm1098_vm1, %v1146_v3, 0.0 }
 0x429   : > { %1167 = vadd.xlane.f32.xlu0 %v1166_v5 }
 0x42a   : > { %v1147_v7 = vmul.f32 %v12024_v4, %v12024_v4 }
 0x42c   : > { %v1169_v8 = vsel %vm1098_vm1, %v1147_v7, 0.0 }
 0x42d   : > { %1170 = vadd.xlane.f32.xlu1 %v1169_v8 }
 0x49e   : > { %v1150_v17 = vpop.xlane.xlu0 %1149 }
 0x49f   : > { %v1172_v18 = vmul.f32 0.03125, %v1150_v17 }
 0x4a1   : > { %v1180_v19 = vadd.f32 1e-06, %v1172_v18 }
 0x4a2   : > { %v1153_v20 = vpop.xlane.xlu1 %1152 }
 0x4a3   : > { %10165 = vrsqrt.f32 %v1180_v19  ;;  %v1173_v22 = vmul.f32 0.03125, %v1153_v20 }
 0x4a5   : > { %v1181_v23 = vadd.f32 1e-06, %v1173_v22 }
 0x4a6   : > { %v1156_v24 = vpop.xlane.xlu0 %1155 }
 0x4a7   : > { %10167 = vrsqrt.f32 %v1181_v23  ;;  %v1174_v25 = vmul.f32 0.03125, %v1156_v24 }
 0x4a9   : > { %v1182_v27 = vadd.f32 1e-06, %v1174_v25 }
 0x4aa   : > { %v1159_v28 = vpop.xlane.xlu1 %1158 }
 0x4ab   : > { %10169 = vrsqrt.f32 %v1182_v27  ;;  %v1175_v29 = vmul.f32 0.03125, %v1159_v28 }
 0x4ad   : > { %v10166_v30 = vpop.eup %10165  ;;  %v1183_v32 = vadd.f32 1e-06, %v1175_v29 }
 0x4ae   : > { %v1162_v34 = vpop.xlane.xlu0 %1161  ;;  %v1196_v36 = vmul.f32 %v10166_v30, %v11983_v31 }
 0x4af   : > { %10171 = vrsqrt.f32 %v1183_v32  ;;  %v1176_v37 = vmul.f32 0.03125, %v1162_v34 }
 0x4b0   : > { %v1210_v39 = vmul.f32 %v7613_v33, %v1196_v36 }
 0x4b1   : > { %v10168_v41 = vpop.eup %10167  ;;  %v1184_v42 = vadd.f32 1e-06, %v1176_v37 }
 0x4b2   : > { %v1165_v43 = vpop.xlane.xlu1 %1164  ;;  %v1224_v44 = vadd.f32 %v7614_v38, %v1210_v39  ;;  %v1197_v46 = vmul.f32 %v10168_v41, %v11988_v35 }
 0x4b3   : > { %10173 = vrsqrt.f32 %v1184_v42  ;;  %v1177_v47 = vmul.f32 0.03125, %v1165_v43 }
 0x4b4   : > { %8379 = vmatprep.mubr.msk.f32.mxu1 %vm1098_vm1, %v1224_v44  ;;  %v1211_v48 = vmul.f32 %v7613_v33, %v1197_v46 }
 0x4b5   : > { %v10170_v49 = vpop.eup %10169  ;;  %v1185_v51 = vadd.f32 1e-06, %v1177_v47 }
 0x4b6   : > { %v1168_v52 = vpop.xlane.xlu0 %1167  ;;  %v1225_v53 = vadd.f32 %v7614_v38, %v1211_v48  ;;  %v1198_v31 = vmul.f32 %v10170_v49, %v11994_v40 }
 0x4b7   : > { %10175 = vrsqrt.f32 %v1185_v51  ;;  %v1178_v54 = vmul.f32 0.03125, %v1168_v52 }
 0x4b8   : > { %8380 = vmatmul.mubr.msk.f32.vlgmr.msra.gmra.mrb[0].mxu1 %vm1098_vm1, %v1225_v53  ;;  %v1212_v57 = vmul.f32 %v7613_v33, %v1198_v31 }
 0x4b9   : > { %v10172_v58 = vpop.eup %10171  ;;  %v1186_v59 = vadd.f32 1e-06, %v1178_v54 }
 0x4ba   : > { %v1171_v61 = vpop.xlane.xlu1 %1170  ;;  %v1226_v35 = vadd.f32 %v7614_v38, %v1212_v57  ;;  %v1199_v63 = vmul.f32 %v10172_v58, %v12000_v45 }
 0x4bb   : > { %10177 = vrsqrt.f32 %v1186_v59  ;;  %v1179_v0 = vmul.f32 0.03125, %v1171_v61 }
 0x4bc   : > { %8382 = vmatprep.mubr.msk.f32.mxu1 %vm1098_vm1, %v1226_v35  ;;  %v1213_v2 = vmul.f32 %v7613_v33, %v1199_v63 }
 0x4bd   : > { %v10174_v3 = vpop.eup %10173  ;;  %v1187_v5 = vadd.f32 1e-06, %v1179_v0 }
 0x4be   : > { %v1227_v7 = vadd.f32 %v7614_v38, %v1213_v2  ;;  %v1200_v40 = vmul.f32 %v10174_v3, %v12006_v50 }
 0x4bf   : > { %10179 = vrsqrt.f32 %v1187_v5 }
 0x4c0   : > { %8383 = vmatmul.mubr.msk.f32.gmra.mrb[2].mxu1 %vm1098_vm1, %v1227_v7  ;;  %v1214_v8 = vmul.f32 %v7613_v33, %v1200_v40 }
 0x4c1   : > { %v10176_v9 = vpop.eup %10175 }
 0x4c2   : > { %v1228_v10 = vadd.f32 %v7614_v38, %v1214_v8  ;;  %v1201_v12 = vmul.f32 %v10176_v9, %v12012_v56  ;;  %v7615_v56 = vld [vmem:[#allocation13] ss:$0 sm:$0xff] }
 0x4c4   : > { %8385 = vmatprep.mubr.msk.f32.mxu1 %vm1098_vm1, %v1228_v10  ;;  %v1215_v45 = vmul.f32 %v7613_v33, %v1201_v12 }
 0x4c5   : > { %v10178_v13 = vpop.eup %10177 }
 0x4c6   : > { %v1229_v14 = vadd.f32 %v7614_v38, %v1215_v45  ;;  %v1202_v15 = vmul.f32 %v10178_v13, %v12018_v62 }
 0x4c8   : > { %8386 = vmatmul.mubr.msk.f32.gmra.mrb[4].mxu1 %vm1098_vm1, %v1229_v14  ;;  %v1216_v17 = vmul.f32 %v7613_v33, %v1202_v15 }
 0x4c9   : > { %v10180_v18 = vpop.eup %10179 }
 0x4ca   : > { %v1230_v50 = vadd.f32 %v7614_v38, %v1216_v17  ;;  %v1203_v19 = vmul.f32 %v10180_v18, %v12024_v4 }
 0x4cc   : > { %8388 = vmatprep.mubr.msk.f32.mxu1 %vm1098_vm1, %v1230_v50  ;;  %v1217_v20 = vmul.f32 %v7613_v33, %v1203_v19 }
 0x4ce   : > { %v1231_v22 = vadd.f32 %v7614_v38, %v1217_v20 }
 0x4d0   : > { %8389 = vmatmul.mubr.msk.f32.gmra.mrb[6].mxu1 %vm1098_vm1, %v1231_v22 }
 0x58b   : > { %v8381_v23 = vpop.f32.mrb[0].mxu1 }
 0x58c   : > { %v12046_v24 = vadd.f32 %v8381_v23, %v7615_v56  ;;  %v1333_v25 = vpop.f32.mrb[1].mxu1 }
 0x58d   : > { %v12048_v62 = vadd.f32 %v7615_v56, %v1333_v25 }
 0x58f   : > { %8407 = vmatprep.mubr.msk.f32.mxu1 %vm1396_vm2, %v12048_v62  ;;  %v12054_v4 = vpack.i.bf16 %v12046_v24, %v12048_v62 }
 0x591   : > { %9846 = vrot.lane.b32.xlu0 %v12054_v4, %s11229_s8 }
 0x593   : > { %v8384_v27 = vpop.f32.mrb[2].mxu1 }
 0x594   : > { %v12058_v28 = vadd.f32 %v8384_v27, %v7615_v56  ;;  %v1343_v29 = vpop.f32.mrb[3].mxu1 }
 0x595   : > { %v12060_v30 = vadd.f32 %v7615_v56, %v1343_v29 }
 0x597   : > { %v12064_v32 = vpack.i.bf16 %v12058_v28, %v12060_v30 }
 0x599   : > { %9851 = vrot.lane.b32.xlu1 %v12064_v32, %s11229_s8 }
 0x59b   : > { %v8387_v33 = vpop.f32.mrb[4].mxu1 }
 0x59c   : > { %v12068_v34 = vadd.f32 %v8387_v33, %v7615_v56  ;;  %v1353_v36 = vpop.f32.mrb[5].mxu1 }
 0x59d   : > { %v12070_v37 = vadd.f32 %v7615_v56, %v1353_v36 }
 0x59f   : > { %v12074_v38 = vpack.i.bf16 %v12068_v34, %v12070_v37 }
 0x5a1   : > { %9856 = vrot.lane.b32.xlu1 %v12074_v38, %s11229_s8 }
 0x5a3   : > { %v8390_v39 = vpop.f32.mrb[6].mxu1 }
 0x5a4   : > { %v12078_v41 = vadd.f32 %v8390_v39, %v7615_v56  ;;  %v1363_v42 = vpop.f32.mrb[7].mxu1 }
 0x5a5   : > { %v12080_v43 = vadd.f32 %v7615_v56, %v1363_v42  ;;  %9861 = vrot.lane.b32.xlu1 %v12054_v4, %s11230_s30 }
 0x5a7   : > { %v12086_v44 = vpack.i.bf16 %v12078_v41, %v12080_v43 }
 0x5a9   : > { %9871 = vrot.lane.b32.xlu1 %v12064_v32, %s11230_s30  ;;  %9866 = vrot.lane.b32.xlu0 %v12086_v44, %s11229_s8 }
 0x5ad   : > { %9881 = vrot.lane.b32.xlu1 %v12086_v44, %s11230_s30  ;;  %9876 = vrot.lane.b32.xlu0 %v12074_v38, %s11230_s30 }
 0x5b1   : > { %1778 = vrot.lane.b32.xlu1 %v12046_v24, %s11231_s9  ;;  %1776 = vrot.lane.b32.xlu0 %v12048_v62, %s11231_s9 }
 0x5b5   : > { %1782 = vrot.lane.b32.xlu1 %v12058_v28, %s11231_s9  ;;  %1780 = vrot.lane.b32.xlu0 %v12060_v30, %s11231_s9 }
 0x5b9   : > { %1786 = vrot.lane.b32.xlu1 %v12068_v34, %s11231_s9  ;;  %1784 = vrot.lane.b32.xlu0 %v12070_v37, %s11231_s9 }
 0x5bd   : > { %1790 = vrot.lane.b32.xlu1 %v12078_v41, %s11231_s9  ;;  %1788 = vrot.lane.b32.xlu0 %v12080_v43, %s11231_s9 }
 0x5c1   : > { %9891 = vrot.lane.b32.xlu1 %v12064_v32, %s11232_s5  ;;  %9886 = vrot.lane.b32.xlu0 %v12054_v4, %s11232_s5 }
 0x5c5   : > { %2448 = vrot.lane.b32.xlu1 %v12046_v24, %s11233_s6  ;;  %9896 = vrot.lane.b32.xlu0 %v12074_v38, %s11232_s5 }
 0x5c9   : > { %2452 = vrot.lane.b32.xlu1 %v12058_v28, %s11233_s6  ;;  %2446 = vrot.lane.b32.xlu0 %v12048_v62, %s11233_s6 }
 0x5cd   : > { %2456 = vrot.lane.b32.xlu1 %v12068_v34, %s11233_s6  ;;  %2450 = vrot.lane.b32.xlu0 %v12060_v30, %s11233_s6 }
 0x5d1   : > { %2460 = vrot.lane.b32.xlu1 %v12078_v41, %s11233_s6  ;;  %2454 = vrot.lane.b32.xlu0 %v12070_v37, %s11233_s6 }
 0x5d5   : > { %9906 = vrot.lane.b32.xlu1 %v12064_v32, %s11234_s2  ;;  %9901 = vrot.lane.b32.xlu0 %v12054_v4, %s11234_s2 }
 0x5d9   : > { %9916 = vrot.lane.b32.xlu1 %v12086_v44, %s11232_s5  ;;  %9911 = vrot.lane.b32.xlu0 %v12074_v38, %s11234_s2 }
 0x5dd   : > { %2458 = vrot.lane.b32.xlu0 %v12080_v43, %s11233_s6 }
 0x603   : > { %v9847_v46 = vpop.permute.xlu0 %9846 }
 0x604   : > { %v9849_v47 = vunpack.i.h.bf16 %v9847_v46  ;;  %v9848_v48 = vunpack.i.l.bf16 %v9847_v46 }
 0x606   : > { %v9141_v51 = vpack.c.bf16 %v9849_v47, %v9848_v48 }
 0x608   : > { %9143 = vmatprep.subr.msk.bf16.mxu1 %vm12144_vm3, %v9141_v51 }
 0x609   : > { %9146 = vmatpush3.bf16.xpose.msk.msra.mxu1 %vm12144_vm3, %v9141_v51 }
 0x60b   : > { %v9852_v52 = vpop.permute.xlu1 %9851 }
 0x60c   : > { %v9854_v53 = vunpack.i.h.bf16 %v9852_v52  ;;  %v9853_v31 = vunpack.i.l.bf16 %v9852_v52 }
 0x60e   : > { %v9147_v54 = vpack.c.bf16 %v9854_v53, %v9853_v31 }
 0x610   : > { %9149 = vmatprep.subr.msk.bf16.mxu1 %vm12144_vm3, %v9147_v54 }
 0x611   : > { %9152 = vmatpush3.bf16.xpose.msk.msra.mxu1 %vm12144_vm3, %v9147_v54 }
 0x613   : > { %v9857_v57 = vpop.permute.xlu1 %9856 }
 0x614   : > { %v9859_v58 = vunpack.i.h.bf16 %v9857_v57  ;;  %v9858_v59 = vunpack.i.l.bf16 %v9857_v57 }
 0x616   : > { %v9153_v61 = vpack.c.bf16 %v9859_v58, %v9858_v59 }
 0x617   : > { %v9862_v35 = vpop.permute.xlu1 %9861 }
 0x618   : > { %v9864_v63 = vunpack.i.h.bf16 %v9862_v35  ;;  %v9863_v0 = vunpack.i.l.bf16 %v9862_v35  ;;  %9155 = vmatprep.subr.msk.bf16.mxu1 %vm12144_vm3, %v9153_v61 }
 0x619   : > { %9158 = vmatpush3.bf16.xpose.msk.msra.mxu1 %vm12144_vm3, %v9153_v61 }
 0x61a   : > { %v9181_v2 = vpack.c.bf16 %v9864_v63, %v9863_v0 }
 0x61b   : > { %v9872_v3 = vpop.permute.xlu1 %9871  ;;  %v9867_v5 = vpop.permute.xlu0 %9866 }
 0x61c   : > { %v9874_v7 = vunpack.i.h.bf16 %v9872_v3  ;;  %v9873_v40 = vunpack.i.l.bf16 %v9872_v3  ;;  %v9869_v8 = vunpack.i.h.bf16 %v9867_v5  ;;  %v9868_v9 = vunpack.i.l.bf16 %v9867_v5  ;;  %9183 = vmatprep.subr.msk.bf16.mxu0 %vm12144_vm3, %v9181_v2 }
 0x61d   : > { %9186 = vmatpush3.bf16.xpose.msk.msra.mxu0 %vm12144_vm3, %v9181_v2 }
 0x61e   : > { %v9187_v10 = vpack.c.bf16 %v9874_v7, %v9873_v40  ;;  %v9159_v12 = vpack.c.bf16 %v9869_v8, %v9868_v9 }
 0x61f   : > { %v9882_v45 = vpop.permute.xlu1 %9881  ;;  %v9877_v13 = vpop.permute.xlu0 %9876 }
 0x620   : > { %v9879_v14 = vunpack.i.h.bf16 %v9877_v13  ;;  %v9878_v15 = vunpack.i.l.bf16 %v9877_v13  ;;  %9161 = vmatprep.subr.msk.bf16.mxu1 %vm12144_vm3, %v9159_v12  ;;  %9189 = vmatprep.subr.msk.bf16.mxu0 %vm12144_vm3, %v9187_v10  ;;  %v9884_v22 = vunpack.i.h.bf16 %v9882_v45  ;;  %v9883_v56 = vunpack.i.l.bf16 %v9882_v45 }
 0x621   : > { %9164 = vmatpush3.bf16.xpose.msk.msra.mxu1 %vm12144_vm3, %v9159_v12 }
 0x622   : > { %v9193_v50 = vpack.c.bf16 %v9879_v14, %v9878_v15  ;;  %v9199_v27 = vpack.c.bf16 %v9884_v22, %v9883_v56 }
 0x623   : > { %v1779_v17 = vpop.permute.xlu1 %1778  ;;  %v1777_v18 = vpop.permute.xlu0 %1776 }
 0x624   : > { %8463 = vmatprep.mubr.msk.f32.mxu0 %vm1396_vm2, %v1777_v18 }
 0x625   : > { %9192 = vmatpush3.bf16.xpose.msk.msra.mxu0 %vm12144_vm3, %v9187_v10 }
 0x626   : > { %9195 = vmatprep.subr.msk.bf16.mxu0 %vm12144_vm3, %v9193_v50 }
 0x627   : > { %v1783_v19 = vpop.permute.xlu1 %1782  ;;  %v1781_v20 = vpop.permute.xlu0 %1780 }
 0x628   : > { %8408 = vmatmul.mubr.msk.f32.vlgmr.msra.gmra.mrb[8].mxu1 %vm1396_vm2, %v12046_v24 }
 0x629   : > { %8410 = vmatprep.mubr.msk.f32.mxu1 %vm1396_vm2, %v12060_v30 }
 0x62b   : > { %v1787_v23 = vpop.permute.xlu1 %1786  ;;  %v1785_v25 = vpop.permute.xlu0 %1784 }
 0x62c   : > { %8411 = vmatmul.mubr.msk.f32.gmra.mrb[10].mxu1 %vm1396_vm2, %v12058_v28 }
 0x62d   : > { %8413 = vmatprep.mubr.msk.f32.mxu1 %vm1396_vm2, %v12070_v37  ;;  %9198 = vmatpush3.bf16.xpose.msk.msra.mxu0 %vm12144_vm3, %v9193_v50 }
 0x62e   : > { %9201 = vmatprep.subr.msk.bf16.mxu0 %vm12144_vm3, %v9199_v27 }
 0x62f   : > { %v1791_v29 = vpop.permute.xlu1 %1790  ;;  %v1789_v33 = vpop.permute.xlu0 %1788 }
 0x630   : > { %8414 = vmatmul.mubr.msk.f32.gmra.mrb[12].mxu1 %vm1396_vm2, %v12068_v34 }
 0x631   : > { %8416 = vmatprep.mubr.msk.f32.mxu1 %vm1396_vm2, %v12080_v43 }
 0x633   : > { %v9892_v36 = vpop.permute.xlu1 %9891  ;;  %v9887_v39 = vpop.permute.xlu0 %9886 }
 0x634   : > { %v9889_v42 = vunpack.i.h.bf16 %v9887_v39  ;;  %v9888_v46 = vunpack.i.l.bf16 %v9887_v39  ;;  %8417 = vmatmul.mubr.msk.f32.gmra.mrb[14].mxu1 %vm1396_vm2, %v12078_v41  ;;  %v9894_v52 = vunpack.i.h.bf16 %v9892_v36  ;;  %v9893_v53 = vunpack.i.l.bf16 %v9892_v36 }
 0x635   : > { %9204 = vmatpush3.bf16.xpose.msk.msra.mxu0 %vm12144_vm3, %v9199_v27 }
 0x636   : > { %v9221_v47 = vpack.c.bf16 %v9889_v42, %v9888_v46  ;;  %v9227_v57 = vpack.c.bf16 %v9894_v52, %v9893_v53 }
 0x637   : > { %v2449_v48 = vpop.permute.xlu1 %2448  ;;  %v9897_v51 = vpop.permute.xlu0 %9896 }
 0x638   : > { %9223 = vmatprep.subr.msk.bf16.mxu0 %vm12144_vm3, %v9221_v47  ;;  %v9899_v61 = vunpack.i.h.bf16 %v9897_v51  ;;  %v9898_v35 = vunpack.i.l.bf16 %v9897_v51 }
 0x63a   : > { %v9233_v2 = vpack.c.bf16 %v9899_v61, %v9898_v35 }
 0x63b   : > { %v2453_v31 = vpop.permute.xlu1 %2452  ;;  %v2447_v54 = vpop.permute.xlu0 %2446 }
 0x63c   : > { %8464 = vmatmul.mubr.msk.f32.vlgmr.msra.gmra.mrb[16].mxu0 %vm1396_vm2, %v1779_v17 }
 0x63d   : > { %8466 = vmatprep.mubr.msk.f32.mxu0 %vm1396_vm2, %v1781_v20  ;;  %9226 = vmatpush3.bf16.xpose.msk.msra.mxu0 %vm12144_vm3, %v9221_v47 }
 0x63e   : > { %9229 = vmatprep.subr.msk.bf16.mxu0 %vm12144_vm3, %v9227_v57 }
 0x63f   : > { %v2457_v58 = vpop.permute.xlu1 %2456  ;;  %v2451_v59 = vpop.permute.xlu0 %2450 }
 0x640   : > { %8467 = vmatmul.mubr.msk.f32.gmra.mrb[18].mxu0 %vm1396_vm2, %v1783_v19 }
 0x641   : > { %8469 = vmatprep.mubr.msk.f32.mxu0 %vm1396_vm2, %v1785_v25 }
 0x643   : > { %v2461_v63 = vpop.permute.xlu1 %2460  ;;  %v2455_v0 = vpop.permute.xlu0 %2454 }
 0x644   : > { %8470 = vmatmul.mubr.msk.f32.gmra.mrb[20].mxu0 %vm1396_vm2, %v1787_v23 }
 0x645   : > { %8472 = vmatprep.mubr.msk.f32.mxu0 %vm1396_vm2, %v1789_v33  ;;  %9232 = vmatpush3.bf16.xpose.msk.msra.mxu0 %vm12144_vm3, %v9227_v57 }
 0x646   : > { %9235 = vmatprep.subr.msk.bf16.mxu0 %vm12144_vm3, %v9233_v2 }
 0x647   : > { %v9907_v3 = vpop.permute.xlu1 %9906  ;;  %v9902_v5 = vpop.permute.xlu0 %9901 }
 0x648   : > { %v9909_v7 = vunpack.i.h.bf16 %v9907_v3  ;;  %v9908_v40 = vunpack.i.l.bf16 %v9907_v3  ;;  %v9904_v8 = vunpack.i.h.bf16 %v9902_v5  ;;  %v9903_v9 = vunpack.i.l.bf16 %v9902_v5  ;;  %8473 = vmatmul.mubr.msk.f32.gmra.mrb[22].mxu0 %vm1396_vm2, %v1791_v29 }
 0x649   : > { %8547 = vmatprep.mubr.msk.f32.mxu0 %vm1396_vm2, %v2447_v54 }
 0x64a   : > { %v9165_v10 = vpack.c.bf16 %v9904_v8, %v9903_v9  ;;  %v9169_v13 = vpack.c.bf16 %v9909_v7, %v9908_v40 }
 0x64b   : > { %v9917_v12 = vpop.permute.xlu1 %9916  ;;  %v9912_v45 = vpop.permute.xlu0 %9911 }
 0x64c   : > { %v9919_v14 = vunpack.i.h.bf16 %v9917_v12  ;;  %v9918_v15 = vunpack.i.l.bf16 %v9917_v12  ;;  %v9914_v17 = vunpack.i.h.bf16 %v9912_v45  ;;  %v9913_v18 = vunpack.i.l.bf16 %v9912_v45  ;;  %9166 = vmatprep.subr.bf16.mxu1 %v9165_v10 }
 0x64d   : > { %9168 = vmatpush3.bf16.msra.mxu1 %v9165_v10  ;;  %9238 = vmatpush3.bf16.xpose.msk.msra.mxu0 %vm12144_vm3, %v9233_v2 }
 0x64e   : > { %v9239_v50 = vpack.c.bf16 %v9919_v14, %v9918_v15  ;;  %9170 = vmatprep.subr.bf16.mxu1 %v9169_v13  ;;  %v9173_v19 = vpack.c.bf16 %v9914_v17, %v9913_v18 }
 0x64f   : > { %v2459_v20 = vpop.permute.xlu0 %2458 }
 0x650   : > { %9241 = vmatprep.subr.msk.bf16.mxu0 %vm12144_vm3, %v9239_v50 }
 0x651   : > { %9172 = vmatpush3.bf16.msra.mxu1 %v9169_v13 }
 0x652   : > { %9174 = vmatprep.subr.bf16.mxu1 %v9173_v19 }
 0x655   : > { %9176 = vmatpush3.bf16.msra.mxu1 %v9173_v19  ;;  %9244 = vmatpush3.bf16.xpose.msk.msra.mxu0 %vm12144_vm3, %v9239_v50 }
 0x65c   : > { %8548 = vmatmul.mubr.msk.f32.vlgmr.msra.gmra.mrb[24].mxu0 %vm1396_vm2, %v2449_v48 }
 0x65d   : > { %8550 = vmatprep.mubr.msk.f32.mxu0 %vm1396_vm2, %v2451_v59 }
 0x660   : > { %8551 = vmatmul.mubr.msk.f32.gmra.mrb[26].mxu0 %vm1396_vm2, %v2453_v31 }
 0x661   : > { %8553 = vmatprep.mubr.msk.f32.mxu0 %vm1396_vm2, %v2455_v0 }
 0x664   : > { %8554 = vmatmul.mubr.msk.f32.gmra.mrb[28].mxu0 %vm1396_vm2, %v2457_v58 }
 0x665   : > { %8556 = vmatprep.mubr.msk.f32.mxu0 %vm1396_vm2, %v2459_v20 }
 0x668   : > { %8557 = vmatmul.mubr.msk.f32.gmra.mrb[30].mxu0 %vm1396_vm2, %v2461_v63 }
 0x6fb   : > { %v12226_v22 = vpop.f32.mrb[8].mxu1 }
 0x6fc   : > { %v12228_v56 = vpop.f32.mrb[9].mxu1  ;;  %v1537_v23 = vsel %vm966_vm0, %v12226_v22, -inf }
 0x6fd   : > { %1538 = vmax.xlane.f32.xlu1 %v1537_v23  ;;  %v1534_v25 = vsel %vm966_vm0, %v12228_v56, -inf }
 0x6fe   : > { %1535 = vmax.xlane.f32.xlu0 %v1534_v25 }
 0x6ff   : > { %v12234_v27 = vpop.f32.mrb[10].mxu1 }
 0x700   : > { %v12236_v29 = vpop.f32.mrb[11].mxu1  ;;  %v1543_v31 = vsel %vm966_vm0, %v12234_v27, -inf }
 0x701   : > { %v1540_v54 = vsel %vm966_vm0, %v12236_v29, -inf }
 0x703   : > { %v12238_v33 = vpop.f32.mrb[12].mxu1 }
 0x704   : > { %v12240_v36 = vpop.f32.mrb[13].mxu1  ;;  %v1549_v2 = vsel %vm966_vm0, %v12238_v33, -inf }
 0x705   : > { %v1546_v5 = vsel %vm966_vm0, %v12240_v36, -inf }
 0x707   : > { %v12242_v39 = vpop.f32.mrb[14].mxu1 }
 0x708   : > { %v12244_v42 = vpop.f32.mrb[15].mxu1  ;;  %v1555_v3 = vsel %vm966_vm0, %v12242_v39, -inf }
 0x709   : > { %v1552_v8 = vsel %vm966_vm0, %v12244_v42, -inf }
 0x70f   : > { %v12246_v46 = vpop.f32.mrb[16].mxu0 }
 0x710   : > { %v12248_v47 = vpop.f32.mrb[17].mxu0  ;;  %v1948_v48 = vsel %vm966_vm0, %v12246_v46, -inf }
 0x711   : > { %1949 = vmax.xlane.f32.xlu1 %v1948_v48  ;;  %v1945_v51 = vsel %vm966_vm0, %v12248_v47, -inf }
 0x712   : > { %1946 = vmax.xlane.f32.xlu0 %v1945_v51 }
 0x713   : > { %v12254_v52 = vpop.f32.mrb[18].mxu0 }
 0x714   : > { %v12256_v53 = vpop.f32.mrb[19].mxu0  ;;  %v1954_v59 = vsel %vm966_vm0, %v12254_v52, -inf }
 0x715   : > { %1544 = vmax.xlane.f32.xlu1 %v1543_v31  ;;  %v1951_v61 = vsel %vm966_vm0, %v12256_v53, -inf }
 0x716   : > { %1541 = vmax.xlane.f32.xlu0 %v1540_v54 }
 0x717   : > { %v12262_v57 = vpop.f32.mrb[20].mxu0 }
 0x718   : > { %v12264_v58 = vpop.f32.mrb[21].mxu0  ;;  %v1960_v0 = vsel %vm966_vm0, %v12262_v57, -inf }
 0x719   : > { %1955 = vmax.xlane.f32.xlu1 %v1954_v59  ;;  %v1957_v40 = vsel %vm966_vm0, %v12264_v58, -inf }
 0x71a   : > { %1952 = vmax.xlane.f32.xlu0 %v1951_v61 }
 0x71b   : > { %v12270_v35 = vpop.f32.mrb[22].mxu0 }
 0x71c   : > { %v12272_v63 = vpop.f32.mrb[23].mxu0  ;;  %v1966_v7 = vsel %vm966_vm0, %v12270_v35, -inf }
 0x71d   : > { %1961 = vmax.xlane.f32.xlu1 %v1960_v0  ;;  %v1963_v18 = vsel %vm966_vm0, %v12272_v63, -inf }
 0x71e   : > { %1550 = vmax.xlane.f32.xlu0 %v1549_v2 }
 0x721   : > { %1556 = vmax.xlane.f32.xlu1 %v1555_v3 }
 0x722   : > { %1547 = vmax.xlane.f32.xlu0 %v1546_v5 }
 0x725   : > { %1967 = vmax.xlane.f32.xlu1 %v1966_v7 }
 0x726   : > { %1958 = vmax.xlane.f32.xlu0 %v1957_v40 }
 0x72a   : > { %1553 = vmax.xlane.f32.xlu0 %v1552_v8 }
 0x72f   : > { %v12288_v9 = vpop.f32.mrb[24].mxu0 }
 0x730   : > { %v12290_v10 = vpop.f32.mrb[25].mxu0 }
 0x733   : > { %v12292_v12 = vpop.f32.mrb[26].mxu0 }
 0x734   : > { %v12294_v45 = vpop.f32.mrb[27].mxu0 }
 0x736   : > { %9921 = vrot.lane.b32.xlu1 %v12086_v44, %s11234_s2 }
 0x737   : > { %v12298_v13 = vpop.f32.mrb[28].mxu0 }
 0x738   : > { %v12300_v14 = vpop.f32.mrb[29].mxu0 }
 0x73b   : > { %v12302_v15 = vpop.f32.mrb[30].mxu0 }
 0x73c   : > { %v12304_v17 = vpop.f32.mrb[31].mxu0 }
 0x740   : > { %9926 = vrot.lane.b32.xlu0 %v12054_v4, %s11235_s22 }
 0x75f   : > { %1964 = vmax.xlane.f32.xlu0 %v1963_v18 }
 0x775   : > { %9931 = vrot.lane.b32.xlu0 %v12064_v32, %s11235_s22 }
 0x78a   : > { %v1539_v50 = vpop.xlane.xlu1 %1538 }
 0x78b   : > { %v1559_v19 = vsub.f32 %v12226_v22, %v1539_v50  ;;  %v1536_v20 = vpop.xlane.xlu0 %1535 }
 0x78c   : > { %v1558_v23 = vsub.f32 %v12228_v56, %v1536_v20 }
 0x78d   : > { %v1568_v25 = vmul.f32 1.442695, %v1559_v19 }
 0x78e   : > { %v1566_v48 = vmul.f32 1.442695, %v1558_v23 }
 0x78f   : > { %10181 = vpow2.f32 %v1568_v25 }
 0x790   : > { %10183 = vpow2.f32 %v1566_v48 }
 0x799   : > { %v12314_v51 = vpop.eup %10181 }
 0x79a   : > { %v12316_v31 = vpop.eup %10183  ;;  %v1585_v54 = vsel %vm966_vm0, %v12314_v51, 0.0 }
 0x79b   : > { %1586 = vadd.xlane.f32.xlu1 %v1585_v54  ;;  %v1582_v59 = vsel %vm966_vm0, %v12316_v31, 0.0 }
 0x79c   : > { %1583 = vadd.xlane.f32.xlu0 %v1582_v59 }
 0x79e   : > { %v1950_v22 = vpop.xlane.xlu1 %1949 }
 0x79f   : > { %v1970_v61 = vsub.f32 %v12246_v46, %v1950_v22  ;;  %v1947_v56 = vpop.xlane.xlu0 %1946 }
 0x7a0   : > { %v1969_v0 = vsub.f32 %v12248_v47, %v1947_v56 }
 0x7a1   : > { %v1979_v2 = vmul.f32 1.442695, %v1970_v61 }
 0x7a2   : > { %v1977_v3 = vmul.f32 1.442695, %v1969_v0  ;;  %v1545_v5 = vpop.xlane.xlu1 %1544 }
 0x7a3   : > { %10185 = vpow2.f32 %v1979_v2  ;;  %v1561_v7 = vsub.f32 %v12234_v27, %v1545_v5  ;;  %v1542_v40 = vpop.xlane.xlu0 %1541 }
 0x7a4   : > { %10187 = vpow2.f32 %v1977_v3  ;;  %v1560_v8 = vsub.f32 %v12236_v29, %v1542_v40 }
 0x7a5   : > { %v1572_v18 = vmul.f32 1.442695, %v1561_v7 }
 0x7a6   : > { %v1570_v50 = vmul.f32 1.442695, %v1560_v8  ;;  %v1956_v19 = vpop.xlane.xlu1 %1955 }
 0x7a7   : > { %10189 = vpow2.f32 %v1572_v18  ;;  %v1972_v20 = vsub.f32 %v12254_v52, %v1956_v19  ;;  %v1953_v46 = vpop.xlane.xlu0 %1952 }
 0x7a8   : > { %10191 = vpow2.f32 %v1570_v50  ;;  %v1971_v47 = vsub.f32 %v12256_v53, %v1953_v46 }
 0x7a9   : > { %v1983_v23 = vmul.f32 1.442695, %v1972_v20 }
 0x7aa   : > { %v1981_v25 = vmul.f32 1.442695, %v1971_v47  ;;  %v1962_v48 = vpop.xlane.xlu1 %1961 }
 0x7ab   : > { %10193 = vpow2.f32 %v1983_v23  ;;  %v1551_v54 = vpop.xlane.xlu0 %1550  ;;  %v1974_v29 = vsub.f32 %v12262_v57, %v1962_v48 }
 0x7ac   : > { %v1563_v27 = vsub.f32 %v12238_v33, %v1551_v54  ;;  %10195 = vpow2.f32 %v1981_v25 }
 0x7ad   : > { %v12329_v59 = vpop.eup %10185  ;;  %v1987_v3 = vmul.f32 1.442695, %v1974_v29 }
 0x7ae   : > { %v12332_v22 = vpop.eup %10187  ;;  %v1576_v61 = vmul.f32 1.442695, %v1563_v27  ;;  %v1557_v52 = vpop.xlane.xlu1 %1556  ;;  %v1996_v56 = vsel %vm966_vm0, %v12329_v59, 0.0 }
 0x7af   : > { %v1548_v53 = vpop.xlane.xlu0 %1547  ;;  %1997 = vadd.xlane.f32.xlu1 %v1996_v56  ;;  %v1993_v0 = vsel %vm966_vm0, %v12332_v22, 0.0  ;;  %v1565_v57 = vsub.f32 %v12242_v39, %v1557_v52 }
 0x7b0   : > { %v1562_v2 = vsub.f32 %v12240_v36, %v1548_v53  ;;  %1994 = vadd.xlane.f32.xlu0 %v1993_v0  ;;  %10197 = vpow2.f32 %v1576_v61 }
 0x7b1   : > { %v12339_v33 = vpop.eup %10189  ;;  %v1580_v39 = vmul.f32 1.442695, %v1565_v57 }
 0x7b2   : > { %v12342_v5 = vpop.eup %10191  ;;  %v1574_v7 = vmul.f32 1.442695, %v1562_v2  ;;  %v1968_v40 = vpop.xlane.xlu1 %1967  ;;  %v1591_v8 = vsel %vm966_vm0, %v12339_v33, 0.0 }
 0x7b3   : > { %v1959_v18 = vpop.xlane.xlu0 %1958  ;;  %1592 = vadd.xlane.f32.xlu1 %v1591_v8  ;;  %v1588_v50 = vsel %vm966_vm0, %v12342_v5, 0.0  ;;  %v1976_v20 = vsub.f32 %v12270_v35, %v1968_v40 }
 0x7b4   : > { %10199 = vpow2.f32 %v1574_v7  ;;  %v1973_v36 = vsub.f32 %v12264_v58, %v1959_v18  ;;  %1589 = vadd.xlane.f32.xlu0 %v1588_v50 }
 0x7b5   : > { %v12349_v19 = vpop.eup %10193  ;;  %10201 = vpow2.f32 %v1987_v3  ;;  %v1991_v58 = vmul.f32 1.442695, %v1976_v20 }
 0x7b6   : > { %v1985_v46 = vmul.f32 1.442695, %v1973_v36  ;;  %v9922_v47 = vpop.permute.xlu1 %9921  ;;  %v2002_v23 = vsel %vm966_vm0, %v12349_v19, 0.0  ;;  %v12354_v25 = vpop.eup %10195 }
 0x7b7   : > { %v9924_v48 = vunpack.i.h.bf16 %v9922_v47  ;;  %v9923_v54 = vunpack.i.l.bf16 %v9922_v47  ;;  %2003 = vadd.xlane.f32.xlu1 %v2002_v23  ;;  %v1554_v27 = vpop.xlane.xlu0 %1553  ;;  %v1999_v35 = vsel %vm966_vm0, %v12354_v25, 0.0 }
 0x7b8   : > { %10203 = vpow2.f32 %v1985_v46  ;;  %v1564_v29 = vsub.f32 %v12244_v42, %v1554_v27 }
 0x7b9   : > { %10205 = vpow2.f32 %v1580_v39  ;;  %v9177_v61 = vpack.c.bf16 %v9924_v48, %v9923_v54 }
 0x7ba   : > { %v12359_v52 = vpop.eup %10197  ;;  %10207 = vpow2.f32 %v1991_v58  ;;  %v1578_v2 = vmul.f32 1.442695, %v1564_v29 }
 0x7bb   : > { %2000 = vadd.xlane.f32.xlu1 %v1999_v35  ;;  %9178 = vmatprep.subr.bf16.mxu1 %v9177_v61  ;;  %v9927_v56 = vpop.permute.xlu0 %9926  ;;  %v1597_v57 = vsel %vm966_vm0, %v12359_v52, 0.0 }
 0x7bc   : > { %v9929_v53 = vunpack.i.h.bf16 %v9927_v56  ;;  %v9928_v0 = vunpack.i.l.bf16 %v9927_v56  ;;  %9180 = vmatpush3.bf16.msra.mxu1 %v9177_v61  ;;  %10209 = vpow2.f32 %v1578_v2 }
 0x7be   : > { %v12361_v3 = vpop.eup %10199  ;;  %v12365_v42 = vpack.c.bf16 %v9929_v53, %v9928_v0 }
 0x7bf   : > { %v12367_v7 = vpop.eup %10201  ;;  %1598 = vadd.xlane.f32.xlu1 %v1597_v57  ;;  %v1594_v40 = vsel %vm966_vm0, %v12361_v3, 0.0 }
 0x7c0   : > { %1595 = vadd.xlane.f32.xlu0 %v1594_v40  ;;  %9206 = vmatprep.subr.bf16.mxu1 %v12365_v42  ;;  %v2008_v18 = vsel %vm966_vm0, %v12367_v7, 0.0 }
 0x7c2   : > { %v12372_v8 = vpop.eup %10203 }
 0x7c3   : > { %v12376_v50 = vpop.eup %10205  ;;  %2009 = vadd.xlane.f32.xlu1 %v2008_v18  ;;  %v2005_v36 = vsel %vm966_vm0, %v12372_v8, 0.0 }
 0x7c4   : > { %2006 = vadd.xlane.f32.xlu0 %v2005_v36  ;;  %v1603_v39 = vsel %vm966_vm0, %v12376_v50, 0.0  ;;  %v12382_v20 = vpop.eup %10207  ;;  %v2618_v36 = vsel %vm966_vm0, %v12288_v9, -inf }
 0x7c5   : > { %v2014_v46 = vsel %vm966_vm0, %v12382_v20, 0.0 }
 0x7c6   : > { %v12386_v47 = vpop.eup %10209 }
 0x7c7   : > { %1604 = vadd.xlane.f32.xlu1 %v1603_v39  ;;  %v1600_v23 = vsel %vm966_vm0, %v12386_v47, 0.0  ;;  %v2630_v39 = vsel %vm966_vm0, %v12298_v13, -inf }
 0x7cb   : > { %2015 = vadd.xlane.f32.xlu1 %v2014_v46 }
 0x7cf   : > { %1601 = vadd.xlane.f32.xlu1 %v1600_v23 }
 0x7da   : > { %9941 = vrot.lane.b32.xlu0 %v12086_v44, %s11235_s22 }
 0x7de   : > { %9946 = vrot.lane.b32.xlu0 %v12054_v4, %s11236_s23 }
 0x7e2   : > { %9951 = vrot.lane.b32.xlu0 %v12064_v32, %s11236_s23 }
 0x7e6   : > { %9956 = vrot.lane.b32.xlu0 %v12074_v38, %s11236_s23 }
 0x7ea   : > { %2995 = vrot.lane.b32.xlu0 %v12048_v62, %s11237_s25  ;;  %v2615_v62 = vsel %vm966_vm0, %v12290_v10, -inf }
 0x7ec   : > { %v1965_v48 = vpop.xlane.xlu0 %1964 }
 0x7ed   : > { %v1975_v54 = vsub.f32 %v12272_v63, %v1965_v48 }
 0x7ee   : > { %2999 = vrot.lane.b32.xlu0 %v12060_v30, %s11237_s25  ;;  %v2621_v30 = vsel %vm966_vm0, %v12294_v45, -inf }
 0x7ef   : > { %v1989_v27 = vmul.f32 1.442695, %v1975_v54 }
 0x7f0   : > { %v9932_v63 = vpop.permute.xlu0 %9931 }
 0x7f1   : > { %10211 = vpow2.f32 %v1989_v27  ;;  %v9934_v53 = vunpack.i.h.bf16 %v9932_v63  ;;  %v2636_v27 = vsel %vm966_vm0, %v12302_v15, -inf }
 0x7f2   : > { %3003 = vrot.lane.b32.xlu0 %v12070_v37, %s11237_s25  ;;  %v2624_v37 = vsel %vm966_vm0, %v12292_v12, -inf }
 0x7f6   : > { %3007 = vrot.lane.b32.xlu0 %v12080_v43, %s11237_s25  ;;  %v2627_v43 = vsel %vm966_vm0, %v12300_v14, -inf }
 0x7fb   : > { %v12407_v58 = vpop.eup %10211 }
 0x7fc   : > { %v2011_v29 = vsel %vm966_vm0, %v12407_v58, 0.0 }
 0x7fd   : > { %2012 = vadd.xlane.f32.xlu1 %v2011_v29 }
 0x80e   : > { %9936 = vrot.lane.b32.xlu1 %v12074_v38, %s11235_s22 }
 0x812   : > { %9961 = vrot.lane.b32.xlu1 %v12086_v44, %s11236_s23 }
 0x815   : > { %2616 = vmax.xlane.f32.xlu0 %v2615_v62 }
 0x816   : > { %2997 = vrot.lane.b32.xlu1 %v12046_v24, %s11237_s25  ;;  %v2633_v24 = vsel %vm966_vm0, %v12304_v17, -inf }
 0x819   : > { %2622 = vmax.xlane.f32.xlu0 %v2621_v30 }
 0x81a   : > { %3001 = vrot.lane.b32.xlu1 %v12058_v28, %s11237_s25 }
 0x81d   : > { %2625 = vmax.xlane.f32.xlu0 %v2624_v37 }
 0x81e   : > { %3005 = vrot.lane.b32.xlu1 %v12068_v34, %s11237_s25  ;;  %v9933_v34 = vunpack.i.l.bf16 %v9932_v63 }
 0x821   : > { %2628 = vmax.xlane.f32.xlu0 %v2627_v43 }
 0x822   : > { %3009 = vrot.lane.b32.xlu1 %v12078_v41, %s11237_s25  ;;  %v9209_v41 = vpack.c.bf16 %v9934_v53, %v9933_v34 }
 0x825   : > { %2634 = vmax.xlane.f32.xlu0 %v2633_v24 }
 0x828   : > { %v1587_v28 = vpop.xlane.xlu1 %1586 }
 0x829   : > { %10213 = vrcp.f32 %v1587_v28  ;;  %v1584_v61 = vpop.xlane.xlu0 %1583 }
 0x82a   : > { %10215 = vrcp.f32 %v1584_v61 }
 0x833   : > { %v10214_v35 = vpop.eup %10213 }
 0x834   : > { %v10216_v56 = vpop.eup %10215  ;;  %v1615_v2 = vmul.f32 %v10214_v35, %v12314_v51 }
 0x835   : > { %v1614_v0 = vmul.f32 %v10216_v56, %v12316_v31 }
 0x837   : > { %8435 = vmatprep.mubr.msk.f32.mxu1 %vm966_vm0, %v1614_v0 }
 0x838   : > { %8436 = vmatmul.mubr.msk.f32.vlgmr.msra.gmra.mrb[16].mxu1 %vm966_vm0, %v1615_v2 }
 0x839   : > { %9208 = vmatpush3.bf16.msra.mxu1 %v12365_v42 }
 0x83a   : > { %9210 = vmatprep.subr.bf16.mxu1 %v9209_v41 }
 0x83b   : > { %9966 = vrot.lane.b32.xlu0 %v12054_v4, %s11238_s20 }
 0x83c   : > { %v12440_v57 = vpop.xlane.xlu1 %1997 }
 0x83d   : > { %9212 = vmatpush3.bf16.msra.mxu1 %v9209_v41  ;;  %v1995_v40 = vpop.xlane.xlu0 %1994 }
 0x840   : > { %v1593_v18 = vpop.xlane.xlu1 %1592 }
 0x841   : > { %10217 = vrcp.f32 %v1593_v18  ;;  %v1590_v31 = vpop.xlane.xlu0 %1589 }
 0x842   : > { %10219 = vrcp.f32 %v1590_v31 }
 0x844   : > { %v12442_v51 = vpop.xlane.xlu1 %2003 }
 0x846   : > { %2619 = vmax.xlane.f32.xlu1 %v2618_v36 }
 0x848   : > { %v2001_v42 = vpop.xlane.xlu1 %2000 }
 0x84a   : > { %2631 = vmax.xlane.f32.xlu1 %v2630_v39 }
 0x84b   : > { %v10218_v46 = vpop.eup %10217 }
 0x84c   : > { %v10220_v23 = vpop.eup %10219  ;;  %v1599_v48 = vpop.xlane.xlu1 %1598  ;;  %v1617_v62 = vmul.f32 %v10218_v46, %v12339_v33 }
 0x84d   : > { %10221 = vrcp.f32 %v1599_v48  ;;  %v1596_v54 = vpop.xlane.xlu0 %1595  ;;  %v1616_v29 = vmul.f32 %v10220_v23, %v12342_v5 }
 0x84e   : > { %10223 = vrcp.f32 %v1596_v54  ;;  %2637 = vmax.xlane.f32.xlu1 %v2636_v27 }
 0x84f   : > { %8438 = vmatprep.mubr.msk.f32.mxu1 %vm966_vm0, %v1616_v29  ;;  %10225 = vrcp.f32 %v1995_v40 }
 0x850   : > { %v12453_v30 = vpop.xlane.xlu1 %2009  ;;  %8439 = vmatmul.mubr.msk.f32.gmra.mrb[18].mxu1 %vm966_vm0, %v1617_v62 }
 0x851   : > { %v2007_v37 = vpop.xlane.xlu0 %2006 }
 0x854   : > { %v1605_v43 = vpop.xlane.xlu1 %1604 }
 0x855   : > { %v9942_v24 = vpop.permute.xlu0 %9941  ;;  %10227 = vrcp.f32 %v1605_v43 }
 0x857   : > { %v10222_v63 = vpop.eup %10221 }
 0x858   : > { %v10224_v28 = vpop.eup %10223  ;;  %v12456_v61 = vpop.xlane.xlu1 %2015  ;;  %v1619_v33 = vmul.f32 %v10222_v63, %v12359_v52  ;;  %v9944_v63 = vunpack.i.h.bf16 %v9942_v24 }
 0x859   : > { %v9947_v35 = vpop.permute.xlu0 %9946  ;;  %v1618_v5 = vmul.f32 %v10224_v28, %v12361_v3  ;;  %v10226_v36 = vpop.eup %10225 }
 0x85a   : > { %v9949_v56 = vunpack.i.h.bf16 %v9947_v35  ;;  %v9948_v53 = vunpack.i.l.bf16 %v9947_v35  ;;  %v2025_v29 = vmul.f32 %v10226_v36, %v12332_v22 }
 0x85b   : > { %8441 = vmatprep.mubr.msk.f32.mxu1 %vm966_vm0, %v1618_v5 }
 0x85c   : > { %v9261_v34 = vpack.c.bf16 %v9949_v56, %v9948_v53  ;;  %v1602_v0 = vpop.xlane.xlu1 %1601  ;;  %8442 = vmatmul.mubr.msk.f32.gmra.mrb[20].mxu1 %vm966_vm0, %v1619_v33 }
 0x85d   : > { %10229 = vrcp.f32 %v1602_v0  ;;  %v9952_v2 = vpop.permute.xlu0 %9951 }
 0x85e   : > { %v9954_v41 = vunpack.i.h.bf16 %v9952_v2  ;;  %v9953_v18 = vunpack.i.l.bf16 %v9952_v2  ;;  %9263 = vmatprep.subr.msk.bf16.mxu0 %vm12144_vm3, %v9261_v34  ;;  %10231 = vrcp.f32 %v12440_v57 }
 0x85f   : > { %9971 = vrot.lane.b32.xlu1 %v12064_v32, %s11238_s20  ;;  %9266 = vmatpush3.bf16.xpose.msk.msra.mxu0 %vm12144_vm3, %v9261_v34  ;;  %v10228_v46 = vpop.eup %10227  ;;  %10233 = vrcp.f32 %v2001_v42 }
 0x860   : > { %v9267_v52 = vpack.c.bf16 %v9954_v41, %v9953_v18  ;;  %v1621_v27 = vmul.f32 %v10228_v46, %v12376_v50  ;;  %10235 = vrcp.f32 %v12442_v51 }
 0x861   : > { %v9957_v3 = vpop.permute.xlu0 %9956  ;;  %10237 = vrcp.f32 %v2007_v37 }
 0x862   : > { %v9959_v40 = vunpack.i.h.bf16 %v9957_v3  ;;  %v9958_v31 = vunpack.i.l.bf16 %v9957_v3  ;;  %9269 = vmatprep.subr.msk.bf16.mxu0 %vm12144_vm3, %v9267_v52  ;;  %10239 = vrcp.f32 %v12453_v30 }
 0x864   : > { %v9273_v23 = vpack.c.bf16 %v9959_v40, %v9958_v31 }
 0x865   : > { %v2996_v39 = vpop.permute.xlu0 %2995 }
 0x866   : > { %8617 = vmatprep.mubr.msk.f32.mxu0 %vm1396_vm2, %v2996_v39 }
 0x867   : > { %v10230_v48 = vpop.eup %10229  ;;  %9272 = vmatpush3.bf16.xpose.msk.msra.mxu0 %vm12144_vm3, %v9267_v52 }
 0x868   : > { %9275 = vmatprep.subr.msk.bf16.mxu0 %vm12144_vm3, %v9273_v23  ;;  %v1620_v54 = vmul.f32 %v10230_v48, %v12386_v47  ;;  %v9943_v47 = vunpack.i.l.bf16 %v9942_v24  ;;  %v10232_v42 = vpop.eup %10231 }
 0x869   : > { %v3000_v35 = vpop.permute.xlu0 %2999  ;;  %v10234_v24 = vpop.eup %10233  ;;  %v2026_v34 = vmul.f32 %v10232_v42, %v12329_v59 }
 0x86a   : > { %8444 = vmatprep.mubr.msk.f32.mxu1 %vm966_vm0, %v1620_v54  ;;  %v9217_v33 = vpack.c.bf16 %v9944_v63, %v9943_v47  ;;  %v10236_v30 = vpop.eup %10235  ;;  %v2027_v0 = vmul.f32 %v10234_v24, %v12354_v25 }
 0x86b   : > { %8445 = vmatmul.mubr.msk.f32.gmra.mrb[22].mxu1 %vm966_vm0, %v1621_v27  ;;  %v10238_v2 = vpop.eup %10237  ;;  %v2028_v41 = vmul.f32 %v10236_v30, %v12349_v19 }
 0x86c   : > { %8491 = vmatprep.mubr.msk.f32.mxu1 %vm966_vm0, %v2025_v29  ;;  %v10240_v18 = vpop.eup %10239  ;;  %v2029_v3 = vmul.f32 %v10238_v2, %v12372_v8 }
 0x86d   : > { %v3004_v51 = vpop.permute.xlu0 %3003  ;;  %v2030_v59 = vmul.f32 %v10240_v18, %v12367_v7  ;;  %v1775_v18 = vld [vmem:[#allocation14] sm:$0xff] }
 0x86f   : > { %9278 = vmatpush3.bf16.xpose.msk.msra.mxu0 %vm12144_vm3, %v9273_v23 }
 0x88a   : > { %v2013_v62 = vpop.xlane.xlu1 %2012 }
 0x88b   : > { %10241 = vrcp.f32 %v2013_v62 }
 0x88c   : > { %10243 = vrcp.f32 %v12456_v61  ;;  %v3008_v61 = vpop.permute.xlu0 %3007 }
 0x88e   : > { %v9937_v43 = vpop.permute.xlu1 %9936 }
 0x88f   : > { %v9939_v28 = vunpack.i.h.bf16 %v9937_v43  ;;  %v9938_v50 = vunpack.i.l.bf16 %v9937_v43 }
 0x891   : > { %v9213_v22 = vpack.c.bf16 %v9939_v28, %v9938_v50 }
 0x892   : > { %v9962_v5 = vpop.permute.xlu1 %9961 }
 0x893   : > { %v9964_v56 = vunpack.i.h.bf16 %v9962_v5  ;;  %v9963_v53 = vunpack.i.l.bf16 %v9962_v5  ;;  %9214 = vmatprep.subr.bf16.mxu1 %v9213_v22 }
 0x894   : > { %9216 = vmatpush3.bf16.msra.mxu1 %v9213_v22 }
 0x895   : > { %v9279_v57 = vpack.c.bf16 %v9964_v56, %v9963_v53  ;;  %9218 = vmatprep.subr.bf16.mxu1 %v9217_v33  ;;  %v10242_v40 = vpop.eup %10241 }
 0x896   : > { %v2998_v37 = vpop.permute.xlu1 %2997  ;;  %v10244_v25 = vpop.eup %10243  ;;  %v2031_v19 = vmul.f32 %v10242_v40, %v12407_v58 }
 0x897   : > { %9281 = vmatprep.subr.msk.bf16.mxu0 %vm12144_vm3, %v9279_v57  ;;  %v2032_v46 = vmul.f32 %v10244_v25, %v12382_v20 }
 0x898   : > { %9220 = vmatpush3.bf16.msra.mxu1 %v9217_v33  ;;  %9284 = vmatpush3.bf16.xpose.msk.msra.mxu0 %vm12144_vm3, %v9279_v57 }
 0x89a   : > { %v3002_v52 = vpop.permute.xlu1 %3001 }
 0x89b   : > { %8492 = vmatmul.mubr.msk.f32.vlgmr.msra.gmra.mrb[24].mxu1 %vm966_vm0, %v2026_v34 }
 0x89c   : > { %8494 = vmatprep.mubr.msk.f32.mxu1 %vm966_vm0, %v2027_v0  ;;  %v2187_v0 = vld [vmem:[#allocation14 + $0x8] sm:$0xff] }
 0x89d   : > { %8503 = vmatprep.subr.mxu1 %v2187_v0 }
 0x89e   : > { %v3006_v8 = vpop.permute.xlu1 %3005  ;;  %8504 = vmatpush3.msra.mxu1 %v2187_v0 }
 0x89f   : > { %8495 = vmatmul.mubr.msk.f32.gmra.mrb[26].mxu1 %vm966_vm0, %v2028_v41  ;;  %8618 = vmatmul.mubr.msk.f32.vlgmr.msra.gmra.mrb[32].mxu0 %vm1396_vm2, %v2998_v37 }
 0x8a0   : > { %8497 = vmatprep.mubr.msk.f32.mxu1 %vm966_vm0, %v2029_v3  ;;  %8620 = vmatprep.mubr.msk.f32.mxu0 %vm1396_vm2, %v3000_v35 }
 0x8a1   : > { %8517 = vmatprep.subr.mxu1 %v1775_v18 }
 0x8a2   : > { %v2617_v31 = vpop.xlane.xlu0 %2616  ;;  %v3010_v58 = vpop.permute.xlu1 %3009 }
 0x8a3   : > { %v2639_v36 = vsub.f32 %v12290_v10, %v2617_v31  ;;  %8498 = vmatmul.mubr.msk.f32.gmra.mrb[28].mxu1 %vm966_vm0, %v2030_v59  ;;  %8621 = vmatmul.mubr.msk.f32.gmra.mrb[34].mxu0 %vm1396_vm2, %v3002_v52 }
 0x8a4   : > { %8500 = vmatprep.mubr.msk.f32.mxu1 %vm966_vm0, %v2031_v19  ;;  %8623 = vmatprep.mubr.msk.f32.mxu0 %vm1396_vm2, %v3004_v51 }
 0x8a5   : > { %v2647_v39 = vmul.f32 1.442695, %v2639_v36 }
 0x8a6   : > { %v2623_v23 = vpop.xlane.xlu0 %2622 }
 0x8a7   : > { %10245 = vpow2.f32 %v2647_v39  ;;  %v2641_v7 = vsub.f32 %v12294_v45, %v2623_v23  ;;  %8501 = vmatmul.mubr.msk.f32.gmra.mrb[30].mxu1 %vm966_vm0, %v2032_v46  ;;  %8624 = vmatmul.mubr.msk.f32.gmra.mrb[36].mxu0 %vm1396_vm2, %v3006_v8 }
 0x8a8   : > { %8626 = vmatprep.mubr.msk.f32.mxu0 %vm1396_vm2, %v3008_v61 }
 0x8a9   : > { %v2651_v10 = vmul.f32 1.442695, %v2641_v7 }
 0x8aa   : > { %v2626_v48 = vpop.xlane.xlu0 %2625 }
 0x8ab   : > { %10247 = vpow2.f32 %v2651_v10  ;;  %8627 = vmatmul.mubr.msk.f32.gmra.mrb[38].mxu0 %vm1396_vm2, %v3010_v58 }
 0x8ae   : > { %v2629_v54 = vpop.xlane.xlu0 %2628 }
 0x8af   : > { %v2643_v27 = vsub.f32 %v12300_v14, %v2629_v54  ;;  %v2642_v14 = vsub.f32 %v12292_v12, %v2626_v48 }
 0x8b1   : > { %v12515_v20 = vpop.eup %10245  ;;  %v2655_v29 = vmul.f32 1.442695, %v2643_v27  ;;  %v2653_v22 = vmul.f32 1.442695, %v2642_v14 }
 0x8b2   : > { %v2663_v45 = vsel %vm966_vm0, %v12515_v20, 0.0  ;;  %v2635_v33 = vpop.xlane.xlu0 %2634 }
 0x8b3   : > { %10249 = vpow2.f32 %v2655_v29  ;;  %2664 = vadd.xlane.f32.xlu0 %v2663_v45  ;;  %v2645_v12 = vsub.f32 %v12304_v17, %v2635_v33 }
 0x8b5   : > { %v12519_v62 = vpop.eup %10247  ;;  %v2659_v51 = vmul.f32 1.442695, %v2645_v12 }
 0x8b6   : > { %v2669_v43 = vsel %vm966_vm0, %v12519_v62, 0.0  ;;  %v9967_v8 = vpop.permute.xlu0 %9966 }
 0x8b7   : > { %2670 = vadd.xlane.f32.xlu0 %v2669_v43  ;;  %v9969_v39 = vunpack.i.h.bf16 %v9967_v8  ;;  %v9968_v46 = vunpack.i.l.bf16 %v9967_v8 }
 0x8b9   : > { %v9245_v54 = vpack.c.bf16 %v9969_v39, %v9968_v46 }
 0x8bd   : > { %v12523_v63 = vpop.eup %10249 }
 0x8be   : > { %v2675_v47 = vsel %vm966_vm0, %v12523_v63, 0.0 }
 0x8bf   : > { %2676 = vadd.xlane.f32.xlu0 %v2675_v47 }
 0x8d3   : > { %v2620_v28 = vpop.xlane.xlu1 %2619 }
 0x8d4   : > { %v2640_v50 = vsub.f32 %v12288_v9, %v2620_v28 }
 0x8d5   : > { %9976 = vrot.lane.b32.xlu0 %v12074_v38, %s11238_s20 }
 0x8d6   : > { %v2649_v35 = vmul.f32 1.442695, %v2640_v50 }
 0x8d7   : > { %v2632_v5 = vpop.xlane.xlu1 %2631 }
 0x8d8   : > { %10251 = vpow2.f32 %v2649_v35  ;;  %v2644_v56 = vsub.f32 %v12298_v13, %v2632_v5 }
 0x8d9   : > { %10253 = vpow2.f32 %v2653_v22 }
 0x8da   : > { %v2657_v53 = vmul.f32 1.442695, %v2644_v56 }
 0x8db   : > { %v2638_v57 = vpop.xlane.xlu1 %2637 }
 0x8dc   : > { %v2646_v42 = vsub.f32 %v12302_v15, %v2638_v57  ;;  %10255 = vpow2.f32 %v2657_v53 }
 0x8de   : > { %v2661_v24 = vmul.f32 1.442695, %v2646_v42 }
 0x8df   : > { %v9972_v23 = vpop.permute.xlu1 %9971 }
 0x8e0   : > { %10257 = vpow2.f32 %v2661_v24  ;;  %v9973_v0 = vunpack.i.l.bf16 %v9972_v23 }
 0x8e1   : > { %10259 = vpow2.f32 %v2659_v51 }
 0x8e2   : > { %v12534_v9 = vpop.eup %10251 }
 0x8e3   : > { %v2666_v37 = vsel %vm966_vm0, %v12534_v9, 0.0  ;;  %v12538_v34 = vpop.eup %10253 }
 0x8e4   : > { %2667 = vadd.xlane.f32.xlu1 %v2666_v37  ;;  %v2672_v13 = vsel %vm966_vm0, %v12538_v34, 0.0 }
 0x8e6   : > { %v12542_v30 = vpop.eup %10255 }
 0x8e7   : > { %v2678_v15 = vsel %vm966_vm0, %v12542_v30, 0.0 }
 0x8e8   : > { %2673 = vadd.xlane.f32.xlu1 %v2672_v13 }
 0x8ea   : > { %v12546_v17 = vpop.eup %10257 }
 0x8eb   : > { %v2684_v2 = vsel %vm966_vm0, %v12546_v17, 0.0  ;;  %v12550_v41 = vpop.eup %10259 }
 0x8ec   : > { %2679 = vadd.xlane.f32.xlu1 %v2678_v15  ;;  %v2681_v61 = vsel %vm966_vm0, %v12550_v41, 0.0  ;;  %v9974_v15 = vunpack.i.h.bf16 %v9972_v23 }
 0x8f0   : > { %2685 = vadd.xlane.f32.xlu1 %v2684_v2 }
 0x8f4   : > { %2682 = vadd.xlane.f32.xlu1 %v2681_v61 }
 0x905   : > { %9981 = vrot.lane.b32.xlu1 %v12086_v44, %s11238_s20 }
 0x90b   : > { %v12556_v52 = vpop.f32.mrb[16].mxu1 }
 0x90c   : > { %v1736_v3 = vpop.f32.mrb[17].mxu1 }
 0x923   : > { %v12558_v40 = vpop.f32.mrb[18].mxu1 }
 0x924   : > { %v12560_v59 = vpop.f32.mrb[19].mxu1 }
 0x92f   : > { %v12562_v25 = vpop.f32.mrb[20].mxu1 }
 0x930   : > { %v12564_v31 = vpop.f32.mrb[21].mxu1 }
 0x93e   : > { %v12566_v19 = vpop.f32.mrb[22].mxu1 }
 0x93f   : > { %v12568_v36 = vpop.f32.mrb[23].mxu1 }
 0x940   : > { %v2665_v7 = vpop.xlane.xlu0 %2664 }
 0x941   : > { %10261 = vrcp.f32 %v2665_v7 }
 0x944   : > { %v2671_v14 = vpop.xlane.xlu0 %2670 }
 0x94c   : > { %v2677_v53 = vpop.xlane.xlu0 %2676 }
 0x96e   : > { %v8493_v10 = vpop.f32.mrb[24].mxu1 }
 0x96f   : > { %v2147_v58 = vpop.f32.mrb[25].mxu1 }
 0x970   : > { %8505 = vmatprep.mubr.msk.f32.mxu1 %vm1396_vm2, %v2147_v58 }
 0x971   : > { %v2668_v48 = vpop.xlane.xlu1 %2667  ;;  %8506 = vmatmul.mubr.msk.f32.vlgmr.msra.gmra.mrb[32].mxu1 %vm1396_vm2, %v8493_v10 }
 0x972   : > { %8518 = vmatpush3.msra.mxu1 %v1775_v18  ;;  %v8496_v27 = vpop.f32.mrb[26].mxu1  ;;  %v12572_v29 = vpop.f32.mrb[32].mxu0  ;;  %10263 = vrcp.f32 %v2668_v48 }
 0x973   : > { %9246 = vmatprep.subr.bf16.mxu1 %v9245_v54  ;;  %v2157_v45 = vpop.f32.mrb[27].mxu1  ;;  %v12574_v43 = vpop.f32.mrb[33].mxu0  ;;  %v3167_v47 = vsel %vm966_vm0, %v12572_v29, -inf  ;;  %10265 = vrcp.f32 %v2671_v14 }
 0x974   : > { %3168 = vmax.xlane.f32.xlu1 %v3167_v47  ;;  %8508 = vmatprep.mubr.msk.f32.mxu1 %vm1396_vm2, %v2157_v45  ;;  %v3164_v28 = vsel %vm966_vm0, %v12574_v43, -inf  ;;  %v9977_v18 = vpop.permute.xlu0 %9976  ;;  %v10262_v48 = vpop.eup %10261 }
 0x975   : > { %v2674_v50 = vpop.xlane.xlu1 %2673  ;;  %3165 = vmax.xlane.f32.xlu0 %v3164_v28  ;;  %8509 = vmatmul.mubr.msk.f32.gmra.mrb[34].mxu1 %vm1396_vm2, %v8496_v27  ;;  %v9979_v23 = vunpack.i.h.bf16 %v9977_v18  ;;  %v9978_v10 = vunpack.i.l.bf16 %v9977_v18 }
 0x976   : > { %v8499_v22 = vpop.f32.mrb[28].mxu1  ;;  %v12582_v35 = vpop.f32.mrb[34].mxu0  ;;  %10267 = vrcp.f32 %v2674_v50 }
 0x977   : > { %v2167_v5 = vpop.f32.mrb[29].mxu1  ;;  %v12584_v56 = vpop.f32.mrb[35].mxu0  ;;  %v3173_v13 = vsel %vm966_vm0, %v12582_v35, -inf  ;;  %v9253_v45 = vpack.c.bf16 %v9979_v23, %v9978_v10  ;;  %10269 = vrcp.f32 %v2677_v53 }
 0x978   : > { %8511 = vmatprep.mubr.msk.f32.mxu1 %vm1396_vm2, %v2167_v5  ;;  %v3170_v33 = vsel %vm966_vm0, %v12584_v56, -inf }
 0x979   : > { %v2680_v57 = vpop.xlane.xlu1 %2679  ;;  %3171 = vmax.xlane.f32.xlu0 %v3170_v33  ;;  %8512 = vmatmul.mubr.msk.f32.gmra.mrb[36].mxu1 %vm1396_vm2, %v8499_v22 }
 0x97a   : > { %v8502_v42 = vpop.f32.mrb[30].mxu1  ;;  %v12590_v12 = vpop.f32.mrb[36].mxu0  ;;  %10271 = vrcp.f32 %v2680_v57 }
 0x97b   : > { %v2177_v24 = vpop.f32.mrb[31].mxu1  ;;  %v12592_v51 = vpop.f32.mrb[37].mxu0  ;;  %v3179_v37 = vsel %vm966_vm0, %v12590_v12, -inf }
 0x97c   : > { %3180 = vmax.xlane.f32.xlu1 %v3179_v37  ;;  %8514 = vmatprep.mubr.msk.f32.mxu1 %vm1396_vm2, %v2177_v24  ;;  %v3176_v46 = vsel %vm966_vm0, %v12592_v51, -inf }
 0x97d   : > { %v2686_v2 = vpop.xlane.xlu1 %2685  ;;  %3174 = vmax.xlane.f32.xlu0 %v3173_v13  ;;  %8515 = vmatmul.mubr.msk.f32.gmra.mrb[38].mxu1 %vm1396_vm2, %v8502_v42 }
 0x97e   : > { %8519 = vmatprep.mubr.msk.f32.mxu1 %vm1396_vm2, %v1736_v3  ;;  %v12601_v61 = vpop.f32.mrb[38].mxu0  ;;  %v9249_v3 = vpack.c.bf16 %v9974_v15, %v9973_v0 }
 0x97f   : > { %v12603_v8 = vpop.f32.mrb[39].mxu0  ;;  %v3185_v39 = vsel %vm966_vm0, %v12601_v61, -inf }
 0x980   : > { %3186 = vmax.xlane.f32.xlu1 %v3185_v39  ;;  %v3182_v7 = vsel %vm966_vm0, %v12603_v8, -inf }
 0x981   : > { %v2683_v58 = vpop.xlane.xlu1 %2682  ;;  %3177 = vmax.xlane.f32.xlu0 %v3176_v46  ;;  %8520 = vmatmul.mubr.msk.f32.vlgmr.msra.gmra.mrb[32].mxu1 %vm1396_vm2, %v12556_v52 }
 0x982   : > { %9248 = vmatpush3.bf16.msra.mxu1 %v9245_v54  ;;  %8522 = vmatprep.mubr.msk.f32.mxu1 %vm1396_vm2, %v12560_v59  ;;  %10273 = vrcp.f32 %v2683_v58  ;;  %v2695_v54 = vmul.f32 %v10262_v48, %v12515_v20 }
 0x983   : > { %9250 = vmatprep.subr.bf16.mxu1 %v9249_v3  ;;  %10275 = vrcp.f32 %v2686_v2 }
 0x985   : > { %v9982_v27 = vpop.permute.xlu1 %9981  ;;  %3183 = vmax.xlane.f32.xlu0 %v3182_v7  ;;  %8523 = vmatmul.mubr.msk.f32.gmra.mrb[34].mxu1 %vm1396_vm2, %v12558_v40  ;;  %v10264_v40 = vpop.eup %10263 }
 0x986   : > { %v9984_v47 = vunpack.i.h.bf16 %v9982_v27  ;;  %v9983_v52 = vunpack.i.l.bf16 %v9982_v27  ;;  %9252 = vmatpush3.bf16.msra.mxu1 %v9249_v3  ;;  %8525 = vmatprep.mubr.msk.f32.mxu1 %vm1396_vm2, %v12564_v31  ;;  %v10266_v14 = vpop.eup %10265 }
 0x987   : > { %9254 = vmatprep.subr.bf16.mxu1 %v9253_v45  ;;  %v10268_v31 = vpop.eup %10267  ;;  %v2697_v28 = vmul.f32 %v10266_v14, %v12519_v62 }
 0x988   : > { %v9257_v59 = vpack.c.bf16 %v9984_v47, %v9983_v52  ;;  %v10270_v50 = vpop.eup %10269  ;;  %v2698_v20 = vmul.f32 %v10268_v31, %v12538_v34 }
 0x989   : > { %8526 = vmatmul.mubr.msk.f32.gmra.mrb[36].mxu1 %vm1396_vm2, %v12562_v25  ;;  %v2696_v25 = vmul.f32 %v10264_v40, %v12534_v9  ;;  %v2857_v9 = vld [vmem:[#allocation14 + $0x10] sm:$0xff] }
 0x98a   : > { %9256 = vmatpush3.bf16.msra.mxu1 %v9253_v45  ;;  %8528 = vmatprep.mubr.msk.f32.mxu1 %vm1396_vm2, %v12568_v36  ;;  %v2699_v36 = vmul.f32 %v10270_v50, %v12523_v63 }
 0x98b   : > { %9258 = vmatprep.subr.bf16.mxu1 %v9257_v59 }
 0x98d   : > { %8529 = vmatmul.mubr.msk.f32.gmra.mrb[38].mxu1 %vm1396_vm2, %v12566_v19  ;;  %v10272_v19 = vpop.eup %10271 }
 0x98e   : > { %9260 = vmatpush3.bf16.msra.mxu1 %v9257_v59  ;;  %8575 = vmatprep.mubr.msk.f32.mxu1 %vm966_vm0, %v2695_v54  ;;  %v10274_v22 = vpop.eup %10273  ;;  %v2700_v62 = vmul.f32 %v10272_v19, %v12542_v30 }
 0x98f   : > { %v10276_v5 = vpop.eup %10275  ;;  %8587 = vmatprep.subr.mxu1 %v2857_v9 }
 0x990   : > { %v2702_v63 = vmul.f32 %v10276_v5, %v12546_v17 }
 0x991   : > { %9991 = vrot.lane.b32.xlu1 %v12064_v32, %s11239_s24  ;;  %8576 = vmatmul.mubr.msk.f32.vlgmr.msra.gmra.mrb[40].mxu1 %vm966_vm0, %v2696_v25  ;;  %v2701_v32 = vmul.f32 %v10274_v22, %v12550_v41 }
 0x992   : > { %8578 = vmatprep.mubr.msk.f32.mxu1 %vm966_vm0, %v2697_v28  ;;  %8588 = vmatpush3.msra.mxu1 %v2857_v9 }
 0x995   : > { %8579 = vmatmul.mubr.msk.f32.gmra.mrb[42].mxu1 %vm966_vm0, %v2698_v20 }
 0x996   : > { %8581 = vmatprep.mubr.msk.f32.mxu1 %vm966_vm0, %v2699_v36 }
 0x999   : > { %8582 = vmatmul.mubr.msk.f32.gmra.mrb[44].mxu1 %vm966_vm0, %v2700_v62 }
 0x99a   : > { %8584 = vmatprep.mubr.msk.f32.mxu1 %vm966_vm0, %v2701_v32 }
 0x99b   : > { %9986 = vrot.lane.b32.xlu0 %v12054_v4, %s11239_s24 }
 0x99d   : > { %8585 = vmatmul.mubr.msk.f32.gmra.mrb[46].mxu1 %vm966_vm0, %v2702_v63 }
 0xa01   : > { %v3169_v34 = vpop.xlane.xlu1 %3168 }
 0xa02   : > { %v3189_v30 = vsub.f32 %v12572_v29, %v3169_v34  ;;  %v3166_v53 = vpop.xlane.xlu0 %3165 }
 0xa03   : > { %v3188_v33 = vsub.f32 %v12574_v43, %v3166_v53 }
 0xa04   : > { %v3198_v41 = vmul.f32 1.442695, %v3189_v30 }
 0xa05   : > { %v3196_v57 = vmul.f32 1.442695, %v3188_v33 }
 0xa06   : > { %10277 = vpow2.f32 %v3198_v41  ;;  %v3172_v42 = vpop.xlane.xlu0 %3171 }
 0xa07   : > { %10279 = vpow2.f32 %v3196_v57  ;;  %v3190_v24 = vsub.f32 %v12584_v56, %v3172_v42 }
 0xa09   : > { %v3200_v37 = vmul.f32 1.442695, %v3190_v24  ;;  %v3181_v13 = vpop.xlane.xlu1 %3180 }
 0xa0a   : > { %v3193_v4 = vsub.f32 %v12590_v12, %v3181_v13  ;;  %v3175_v17 = vpop.xlane.xlu0 %3174 }
 0xa0b   : > { %10281 = vpow2.f32 %v3200_v37  ;;  %v3191_v15 = vsub.f32 %v12582_v35, %v3175_v17 }
 0xa0c   : > { %v3206_v0 = vmul.f32 1.442695, %v3193_v4 }
 0xa0d   : > { %v3202_v29 = vmul.f32 1.442695, %v3191_v15  ;;  %v3187_v40 = vpop.xlane.xlu1 %3186 }
 0xa0e   : > { %10283 = vpow2.f32 %v3206_v0  ;;  %v3178_v2 = vpop.xlane.xlu0 %3177  ;;  %v3195_v54 = vsub.f32 %v12601_v61, %v3187_v40 }
 0xa0f   : > { %10285 = vpow2.f32 %v3202_v29  ;;  %v3192_v43 = vsub.f32 %v12592_v51, %v3178_v2 }
 0xa10   : > { %v12651_v18 = vpop.eup %10277  ;;  %v3210_v14 = vmul.f32 1.442695, %v3195_v54 }
 0xa11   : > { %v12653_v39 = vpop.eup %10279  ;;  %v3204_v56 = vmul.f32 1.442695, %v3192_v43  ;;  %v3215_v46 = vsel %vm966_vm0, %v12651_v18, 0.0 }
 0xa12   : > { %3216 = vadd.xlane.f32.xlu1 %v3215_v46  ;;  %v3184_v12 = vpop.xlane.xlu0 %3183  ;;  %v3212_v35 = vsel %vm966_vm0, %v12653_v39, 0.0 }
 0xa13   : > { %10287 = vpow2.f32 %v3204_v56  ;;  %3213 = vadd.xlane.f32.xlu0 %v3212_v35  ;;  %v3194_v25 = vsub.f32 %v12603_v8, %v3184_v12 }
 0xa14   : > { %10289 = vpow2.f32 %v3210_v14 }
 0xa15   : > { %v12659_v23 = vpop.eup %10281  ;;  %v3208_v31 = vmul.f32 1.442695, %v3194_v25 }
 0xa16   : > { %v9987_v10 = vpop.permute.xlu0 %9986  ;;  %v3218_v51 = vsel %vm966_vm0, %v12659_v23, 0.0 }
 0xa17   : > { %v9989_v58 = vunpack.i.h.bf16 %v9987_v10  ;;  %v9988_v3 = vunpack.i.l.bf16 %v9987_v10  ;;  %3219 = vadd.xlane.f32.xlu0 %v3218_v51  ;;  %10291 = vpow2.f32 %v3208_v31 }
 0xa18   : > { %v12663_v7 = vpop.eup %10283 }
 0xa19   : > { %v12665_v27 = vpop.eup %10285  ;;  %v3227_v45 = vsel %vm966_vm0, %v12663_v7, 0.0  ;;  %v9285_v47 = vpack.c.bf16 %v9989_v58, %v9988_v3 }
 0xa1a   : > { %v3221_v52 = vsel %vm966_vm0, %v12665_v27, 0.0 }
 0xa1b   : > { %3222 = vadd.xlane.f32.xlu1 %v3221_v52  ;;  %3228 = vadd.xlane.f32.xlu0 %v3227_v45 }
 0xa1c   : > { %9286 = vmatprep.subr.bf16.mxu1 %v9285_v47 }
 0xa1d   : > { %v12671_v59 = vpop.eup %10287 }
 0xa1e   : > { %v3224_v48 = vsel %vm966_vm0, %v12671_v59, 0.0  ;;  %v12681_v28 = vpop.eup %10289 }
 0xa1f   : > { %3225 = vadd.xlane.f32.xlu1 %v3224_v48  ;;  %v3233_v50 = vsel %vm966_vm0, %v12681_v28, 0.0 }
 0xa21   : > { %v12685_v20 = vpop.eup %10291 }
 0xa30   : > { %10001 = vrot.lane.b32.xlu1 %v12086_v44, %s11239_s24  ;;  %v9992_v44 = vpop.permute.xlu1 %9991 }
 0xa31   : > { %9996 = vrot.lane.b32.xlu0 %v12074_v38, %s11239_s24  ;;  %v3230_v38 = vsel %vm966_vm0, %v12685_v20, 0.0  ;;  %v9994_v61 = vunpack.i.h.bf16 %v9992_v44  ;;  %v9993_v19 = vunpack.i.l.bf16 %v9992_v44 }
 0xa33   : > { %v9289_v22 = vpack.c.bf16 %v9994_v61, %v9993_v19 }
 0xa50   : > { %3234 = vadd.xlane.f32.xlu0 %v3233_v50 }
 0xa54   : > { %3231 = vadd.xlane.f32.xlu1 %v3230_v38  ;;  %v7752_v38 = vld [vmem:[#allocation16] ss:$0 sm:$0xff] }
 0xa64   : > { %v8577_v36 = vpop.f32.mrb[40].mxu1 }
 0xa65   : > { %v2817_v8 = vpop.f32.mrb[41].mxu1 }
 0xa66   : > { %8589 = vmatprep.mubr.msk.f32.mxu1 %vm1396_vm2, %v2817_v8 }
 0xa67   : > { %8590 = vmatmul.mubr.msk.f32.vlgmr.msra.gmra.mrb[32].mxu1 %vm1396_vm2, %v8577_v36 }
 0xa68   : > { %9288 = vmatpush3.bf16.msra.mxu1 %v9285_v47  ;;  %v8580_v62 = vpop.f32.mrb[42].mxu1 }
 0xa69   : > { %9290 = vmatprep.subr.bf16.mxu1 %v9289_v22  ;;  %v2827_v9 = vpop.f32.mrb[43].mxu1 }
 0xa6a   : > { %8592 = vmatprep.mubr.msk.f32.mxu1 %vm1396_vm2, %v2827_v9 }
 0xa6b   : > { %8593 = vmatmul.mubr.msk.f32.gmra.mrb[34].mxu1 %vm1396_vm2, %v8580_v62 }
 0xa6c   : > { %9292 = vmatpush3.bf16.msra.mxu1 %v9289_v22  ;;  %v8583_v5 = vpop.f32.mrb[44].mxu1 }
 0xa6d   : > { %v2837_v32 = vpop.f32.mrb[45].mxu1 }
 0xa6e   : > { %8595 = vmatprep.mubr.msk.f32.mxu1 %vm1396_vm2, %v2837_v32 }
 0xa6f   : > { %8596 = vmatmul.mubr.msk.f32.gmra.mrb[36].mxu1 %vm1396_vm2, %v8583_v5 }
 0xa70   : > { %v8586_v63 = vpop.f32.mrb[46].mxu1 }
 0xa71   : > { %v2847_v34 = vpop.f32.mrb[47].mxu1 }
 0xa72   : > { %8598 = vmatprep.mubr.msk.f32.mxu1 %vm1396_vm2, %v2847_v34 }
 0xa73   : > { %8599 = vmatmul.mubr.msk.f32.gmra.mrb[38].mxu1 %vm1396_vm2, %v8586_v63 }
 0xa9f   : > { %v3217_v53 = vpop.xlane.xlu1 %3216 }
 0xaa0   : > { %v3214_v30 = vpop.xlane.xlu0 %3213 }
 0xaa1   : > { %10293 = vrcp.f32 %v3214_v30 }
 0xaa2   : > { %10295 = vrcp.f32 %v3217_v53 }
 0xaa4   : > { %v3220_v33 = vpop.xlane.xlu0 %3219 }
 0xaa5   : > { %10297 = vrcp.f32 %v3220_v33 }
 0xaa8   : > { %v3223_v41 = vpop.xlane.xlu1 %3222  ;;  %v3229_v57 = vpop.xlane.xlu0 %3228 }
 0xaa9   : > { %10299 = vrcp.f32 %v3223_v41 }
 0xaab   : > { %v10294_v42 = vpop.eup %10293 }
 0xaac   : > { %v3226_v24 = vpop.xlane.xlu1 %3225  ;;  %v9997_v37 = vpop.permute.xlu0 %9996  ;;  %v3244_v13 = vmul.f32 %v10294_v42, %v12653_v39 }
 0xaad   : > { %v9999_v4 = vunpack.i.h.bf16 %v9997_v37  ;;  %v9998_v17 = vunpack.i.l.bf16 %v9997_v37  ;;  %10301 = vrcp.f32 %v3226_v24  ;;  %v10296_v56 = vpop.eup %10295 }
 0xaae   : > { %8645 = vmatprep.mubr.msk.f32.mxu1 %vm966_vm0, %v3244_v13  ;;  %10303 = vrcp.f32 %v3229_v57  ;;  %v3245_v39 = vmul.f32 %v10296_v56, %v12651_v18 }
 0xaaf   : > { %v9293_v15 = vpack.c.bf16 %v9999_v4, %v9998_v17  ;;  %v10298_v46 = vpop.eup %10297 }
 0xab0   : > { %v10002_v0 = vpop.permute.xlu1 %10001  ;;  %v3246_v35 = vmul.f32 %v10298_v46, %v12659_v23 }
 0xab1   : > { %v10004_v29 = vunpack.i.h.bf16 %v10002_v0  ;;  %v10003_v2 = vunpack.i.l.bf16 %v10002_v0  ;;  %9294 = vmatprep.subr.bf16.mxu1 %v9293_v15 }
 0xab2   : > { %9296 = vmatpush3.bf16.msra.mxu1 %v9293_v15 }
 0xab3   : > { %v9297_v43 = vpack.c.bf16 %v10004_v29, %v10003_v2  ;;  %v10300_v12 = vpop.eup %10299 }
 0xab4   : > { %v3247_v51 = vmul.f32 %v10300_v12, %v12665_v27 }
 0xab5   : > { %9298 = vmatprep.subr.bf16.mxu1 %v9297_v43 }
 0xab6   : > { %9300 = vmatpush3.bf16.msra.mxu1 %v9297_v43 }
 0xab7   : > { %v10302_v10 = vpop.eup %10301 }
 0xab8   : > { %v10304_v58 = vpop.eup %10303  ;;  %v3248_v3 = vmul.f32 %v10302_v10, %v12671_v59  ;;  %v3406_v59 = vld [vmem:[#allocation14 + $0x18] sm:$0xff] }
 0xab9   : > { %8646 = vmatmul.mubr.msk.f32.vlgmr.msra.gmra.mrb[48].mxu1 %vm966_vm0, %v3245_v39  ;;  %v3249_v45 = vmul.f32 %v10304_v58, %v12663_v7  ;;  %8657 = vmatprep.subr.mxu1 %v3406_v59 }
 0xaba   : > { %8648 = vmatprep.mubr.msk.f32.mxu1 %vm966_vm0, %v3246_v35  ;;  %8658 = vmatpush3.msra.mxu1 %v3406_v59 }
 0xabd   : > { %8649 = vmatmul.mubr.msk.f32.gmra.mrb[50].mxu1 %vm966_vm0, %v3247_v51 }
 0xabe   : > { %8651 = vmatprep.mubr.msk.f32.mxu1 %vm966_vm0, %v3248_v3 }
 0xac1   : > { %8652 = vmatmul.mubr.msk.f32.gmra.mrb[52].mxu1 %vm966_vm0, %v3249_v45 }
 0xadd   : > { %v3235_v18 = vpop.xlane.xlu0 %3234 }
 0xade   : > { %10305 = vrcp.f32 %v3235_v18 }
 0xae1   : > { %v3232_v23 = vpop.xlane.xlu1 %3231 }
 0xae2   : > { %10307 = vrcp.f32 %v3232_v23 }
 0xae8   : > { %v10306_v47 = vpop.eup %10305 }
 0xae9   : > { %v3251_v27 = vmul.f32 %v10306_v47, %v12681_v28 }
 0xaec   : > { %v10308_v52 = vpop.eup %10307 }
 0xaed   : > { %v3250_v48 = vmul.f32 %v10308_v52, %v12685_v20 }
 0xaef   : > { %8654 = vmatprep.mubr.msk.f32.mxu1 %vm966_vm0, %v3250_v48 }
 0xaf0   : > { %8655 = vmatmul.mubr.msk.f32.gmra.mrb[54].mxu1 %vm966_vm0, %v3251_v27 }
 0xb8c   : > { %v8647_v7 = vpop.f32.mrb[48].mxu1 }
 0xb8d   : > { %v3366_v40 = vpop.f32.mrb[49].mxu1 }
 0xb8e   : > { %8659 = vmatprep.mubr.msk.f32.mxu1 %vm1396_vm2, %v3366_v40 }
 0xb8f   : > { %8660 = vmatmul.mubr.msk.f32.vlgmr.msra.gmra.mrb[32].mxu1 %vm1396_vm2, %v8647_v7 }
 0xb90   : > { %v8650_v54 = vpop.f32.mrb[50].mxu1 }
 0xb91   : > { %v3376_v14 = vpop.f32.mrb[51].mxu1 }
 0xb92   : > { %8662 = vmatprep.mubr.msk.f32.mxu1 %vm1396_vm2, %v3376_v14 }
 0xb93   : > { %8663 = vmatmul.mubr.msk.f32.gmra.mrb[34].mxu1 %vm1396_vm2, %v8650_v54 }
 0xb94   : > { %v8653_v25 = vpop.f32.mrb[52].mxu1 }
 0xb95   : > { %v3386_v31 = vpop.f32.mrb[53].mxu1 }
 0xb96   : > { %8665 = vmatprep.mubr.msk.f32.mxu1 %vm1396_vm2, %v3386_v31 }
 0xb97   : > { %8666 = vmatmul.mubr.msk.f32.gmra.mrb[36].mxu1 %vm1396_vm2, %v8653_v25 }
 0xbc3   : > { %v8656_v28 = vpop.f32.mrb[54].mxu1 }
 0xbc4   : > { %v3396_v50 = vpop.f32.mrb[55].mxu1 }
 0xbc5   : > { %8668 = vmatprep.mubr.msk.f32.mxu1 %vm1396_vm2, %v3396_v50 }
 0xbc6   : > { %8669 = vmatmul.mubr.msk.f32.gmra.mrb[38].mxu1 %vm1396_vm2, %v8656_v28 }
 0xc62   : > { %v8661_v20 = vpop.f32.mrb[32].mxu1 }
 0xc63   : > { %v3545_v44 = vadd.f32 %v8661_v20, %v11954_v60  ;;  %v3497_v61 = vpop.f32.mrb[33].mxu1  ;;  %v3701_v20 = vld [vmem:[#allocation20] sm:$0xff] }
 0xc64   : > { %v3544_v19 = vadd.f32 %v3497_v61, %v11950_v55  ;;  %v3703_v61 = vld [vmem:[#allocation20 + $0x10] sm:$0xff] }
 0xc65   : > { %v12723_v36 = vadd.f32 %v7752_v38, %v3545_v44 }
 0xc66   : > { %v12725_v8 = vadd.f32 %v7752_v38, %v3544_v19  ;;  %v8664_v22 = vpop.f32.mrb[34].mxu1  ;;  %v3704_v19 = vld [vmem:[#allocation20 + $0x18] sm:$0xff] }
 0xc67   : > { %v3547_v62 = vadd.f32 %v8664_v22, %v11962_v6  ;;  %v3507_v9 = vpop.f32.mrb[35].mxu1  ;;  %v3572_v5 = vsel %vm1098_vm1, %v12723_v36, 0.0  ;;  %v9305_v22 = vpack.c.bf16 %v3704_v19, %v3703_v61 }
 0xc68   : > { %v3546_v32 = vadd.f32 %v3507_v9, %v11958_v1  ;;  %3573 = vadd.xlane.f32.xlu1 %v3572_v5  ;;  %v3569_v60 = vsel %vm1098_vm1, %v12725_v8, 0.0 }
 0xc69   : > { %v12733_v63 = vadd.f32 %v7752_v38, %v3547_v62  ;;  %3570 = vadd.xlane.f32.xlu0 %v3569_v60 }
 0xc6a   : > { %v12735_v55 = vadd.f32 %v7752_v38, %v3546_v32  ;;  %v8667_v34 = vpop.f32.mrb[36].mxu1 }
 0xc6b   : > { %v3549_v30 = vadd.f32 %v8667_v34, %v11970_v16  ;;  %v3517_v53 = vpop.f32.mrb[37].mxu1  ;;  %v3578_v6 = vsel %vm1098_vm1, %v12733_v63, 0.0 }
 0xc6c   : > { %v3548_v33 = vadd.f32 %v3517_v53, %v11966_v11  ;;  %3579 = vadd.xlane.f32.xlu1 %v3578_v6  ;;  %v3575_v1 = vsel %vm1098_vm1, %v12735_v55, 0.0 }
 0xc6d   : > { %v12743_v41 = vadd.f32 %v7752_v38, %v3549_v30  ;;  %3576 = vadd.xlane.f32.xlu0 %v3575_v1 }
 0xc6e   : > { %v12745_v57 = vadd.f32 %v7752_v38, %v3548_v33 }
 0xc6f   : > { %v3584_v42 = vsel %vm1098_vm1, %v12743_v41, 0.0 }
 0xc70   : > { %3585 = vadd.xlane.f32.xlu1 %v3584_v42  ;;  %v3581_v16 = vsel %vm1098_vm1, %v12745_v57, 0.0 }
 0xc71   : > { %3582 = vadd.xlane.f32.xlu0 %v3581_v16 }
 0xc99   : > { %v8670_v24 = vpop.f32.mrb[38].mxu1 }
 0xc9a   : > { %v3551_v11 = vadd.f32 %v8670_v24, %v11978_v26  ;;  %v3527_v37 = vpop.f32.mrb[39].mxu1 }
 0xc9b   : > { %v3550_v13 = vadd.f32 %v3527_v37, %v11974_v21 }
 0xc9c   : > { %v12753_v4 = vadd.f32 %v7752_v38, %v3551_v11 }
 0xc9d   : > { %v12755_v17 = vadd.f32 %v7752_v38, %v3550_v13  ;;  %v3702_v38 = vld [vmem:[#allocation20 + $0x8] sm:$0xff] }
 0xc9e   : > { %v3590_v15 = vsel %vm1098_vm1, %v12753_v4, 0.0  ;;  %v9301_v44 = vpack.c.bf16 %v3702_v38, %v3701_v20 }
 0xc9f   : > { %3591 = vadd.xlane.f32.xlu1 %v3590_v15  ;;  %v3587_v0 = vsel %vm1098_vm1, %v12755_v17, 0.0 }
 0xca0   : > { %3588 = vadd.xlane.f32.xlu0 %v3587_v0  ;;  %9302 = vmatprep.subr.bf16.mxu0 %v9301_v44 }
 0xca1   : > { %9304 = vmatpush3.bf16.msra.mxu0 %v9301_v44 }
 0xca2   : > { %9306 = vmatprep.subr.bf16.mxu0 %v9305_v22 }
 0xca5   : > { %9308 = vmatpush3.bf16.msra.mxu0 %v9305_v22 }
 0xcf5   : > { %v3574_v29 = vpop.xlane.xlu1 %3573 }
 0xcf6   : > { %v3594_v2 = vmul.f32 0.03125, %v3574_v29  ;;  %v3571_v43 = vpop.xlane.xlu0 %3570 }
 0xcf7   : > { %v3593_v56 = vmul.f32 0.03125, %v3571_v43 }
 0xcf8   : > { %v12762_v26 = vsub.f32 %v12723_v36, %v3594_v2 }
 0xcf9   : > { %v12765_v21 = vsub.f32 %v12725_v8, %v3593_v56  ;;  %v3580_v46 = vpop.xlane.xlu1 %3579 }
 0xcfa   : > { %v3596_v39 = vmul.f32 0.03125, %v3580_v46  ;;  %v3577_v12 = vpop.xlane.xlu0 %3576  ;;  %v3610_v35 = vmul.f32 %v12762_v26, %v12762_v26 }
 0xcfb   : > { %v3595_v10 = vmul.f32 0.03125, %v3577_v12  ;;  %v3609_v51 = vmul.f32 %v12765_v21, %v12765_v21 }
 0xcfc   : > { %v12772_v58 = vsub.f32 %v12733_v63, %v3596_v39  ;;  %v3620_v3 = vsel %vm1098_vm1, %v3610_v35, 0.0 }
 0xcfd   : > { %v12776_v45 = vsub.f32 %v12735_v55, %v3595_v10  ;;  %v3586_v18 = vpop.xlane.xlu1 %3585  ;;  %3621 = vadd.xlane.f32.xlu1 %v3620_v3  ;;  %v3617_v23 = vsel %vm1098_vm1, %v3609_v51, 0.0  ;;  %v7753_v3 = vld [vmem:[#allocation17] ss:$0 sm:$0xff] }
 0xcfe   : > { %v3598_v47 = vmul.f32 0.03125, %v3586_v18  ;;  %v3583_v52 = vpop.xlane.xlu0 %3582  ;;  %3618 = vadd.xlane.f32.xlu0 %v3617_v23  ;;  %v3612_v48 = vmul.f32 %v12772_v58, %v12772_v58 }
 0xcff   : > { %v3597_v27 = vmul.f32 0.03125, %v3583_v52  ;;  %v3611_v59 = vmul.f32 %v12776_v45, %v12776_v45 }
 0xd00   : > { %v12784_v7 = vsub.f32 %v12743_v41, %v3598_v47  ;;  %v3626_v40 = vsel %vm1098_vm1, %v3612_v48, 0.0  ;;  %v7754_v48 = vld [vmem:[#allocation19] ss:$0 sm:$0xff] }
 0xd01   : > { %v12788_v54 = vsub.f32 %v12745_v57, %v3597_v27  ;;  %3627 = vadd.xlane.f32.xlu1 %v3626_v40  ;;  %v3623_v14 = vsel %vm1098_vm1, %v3611_v59, 0.0 }
 0xd02   : > { %3624 = vadd.xlane.f32.xlu0 %v3623_v14  ;;  %v3614_v25 = vmul.f32 %v12784_v7, %v12784_v7 }
 0xd03   : > { %v3613_v31 = vmul.f32 %v12788_v54, %v12788_v54 }
 0xd04   : > { %v3632_v28 = vsel %vm1098_vm1, %v3614_v25, 0.0 }
 0xd05   : > { %3633 = vadd.xlane.f32.xlu1 %v3632_v28  ;;  %v3629_v50 = vsel %vm1098_vm1, %v3613_v31, 0.0 }
 0xd06   : > { %3630 = vadd.xlane.f32.xlu0 %v3629_v50 }
 0xd2c   : > { %v3592_v62 = vpop.xlane.xlu1 %3591 }
 0xd2d   : > { %v3600_v9 = vmul.f32 0.03125, %v3592_v62  ;;  %v3589_v5 = vpop.xlane.xlu0 %3588 }
 0xd2e   : > { %v3599_v32 = vmul.f32 0.03125, %v3589_v5 }
 0xd2f   : > { %v12798_v60 = vsub.f32 %v12753_v4, %v3600_v9 }
 0xd30   : > { %v12801_v34 = vsub.f32 %v12755_v17, %v3599_v32 }
 0xd31   : > { %v3616_v30 = vmul.f32 %v12798_v60, %v12798_v60 }
 0xd32   : > { %v3615_v53 = vmul.f32 %v12801_v34, %v12801_v34 }
 0xd33   : > { %v3638_v6 = vsel %vm1098_vm1, %v3616_v30, 0.0 }
 0xd34   : > { %3639 = vadd.xlane.f32.xlu1 %v3638_v6  ;;  %v3635_v33 = vsel %vm1098_vm1, %v3615_v53, 0.0 }
 0xd35   : > { %3636 = vadd.xlane.f32.xlu0 %v3635_v33 }
 0xd8a   : > { %v3622_v1 = vpop.xlane.xlu1 %3621 }
 0xd8b   : > { %v3642_v42 = vmul.f32 0.03125, %v3622_v1  ;;  %v3619_v16 = vpop.xlane.xlu0 %3618 }
 0xd8c   : > { %v3641_v24 = vmul.f32 0.03125, %v3619_v16 }
 0xd8d   : > { %v3650_v11 = vadd.f32 1e-06, %v3642_v42 }
 0xd8e   : > { %v3649_v37 = vadd.f32 1e-06, %v3641_v24  ;;  %v3628_v13 = vpop.xlane.xlu1 %3627 }
 0xd8f   : > { %10309 = vrsqrt.f32 %v3650_v11  ;;  %v3644_v15 = vmul.f32 0.03125, %v3628_v13  ;;  %v3625_v0 = vpop.xlane.xlu0 %3624  ;;  %v3882_v13 = vld [vmem:[#allocation23 + $0x8] sm:$0xff] }
 0xd90   : > { %10311 = vrsqrt.f32 %v3649_v37  ;;  %v3643_v29 = vmul.f32 0.03125, %v3625_v0  ;;  %v3881_v37 = vld [vmem:[#allocation23] sm:$0xff]  ;;  %v3883_v0 = vld [vmem:[#allocation23 + $0x10] sm:$0xff] }
 0xd91   : > { %v3652_v2 = vadd.f32 1e-06, %v3644_v15  ;;  %v9309_v15 = vpack.c.bf16 %v3882_v13, %v3881_v37 }
 0xd92   : > { %v3651_v43 = vadd.f32 1e-06, %v3643_v29  ;;  %v3634_v56 = vpop.xlane.xlu1 %3633  ;;  %v3884_v29 = vld [vmem:[#allocation23 + $0x18] sm:$0xff] }
 0xd93   : > { %10313 = vrsqrt.f32 %v3652_v2  ;;  %v3646_v46 = vmul.f32 0.03125, %v3634_v56  ;;  %v3631_v39 = vpop.xlane.xlu0 %3630  ;;  %9310 = vmatprep.subr.bf16.mxu0 %v9309_v15  ;;  %v9313_v2 = vpack.c.bf16 %v3884_v29, %v3883_v0  ;;  %v3887_v56 = vld [vmem:[#allocation23 + $0x30] sm:$0xff] }
 0xd94   : > { %10315 = vrsqrt.f32 %v3651_v43  ;;  %v3645_v12 = vmul.f32 0.03125, %v3631_v39 }
 0xd95   : > { %v3654_v35 = vadd.f32 1e-06, %v3646_v46  ;;  %v3888_v46 = vld [vmem:[#allocation23 + $0x38] sm:$0xff] }
 0xd96   : > { %v3653_v10 = vadd.f32 1e-06, %v3645_v12  ;;  %v9321_v39 = vpack.c.bf16 %v3888_v46, %v3887_v56  ;;  %v7755_v12 = vld [vmem:[#allocation22] ss:$0 sm:$0xff] }
 0xd97   : > { %10317 = vrsqrt.f32 %v3654_v35 }
 0xd98   : > { %10319 = vrsqrt.f32 %v3653_v10 }
 0xd99   : > { %v10310_v51 = vpop.eup %10309 }
 0xd9a   : > { %v10312_v18 = vpop.eup %10311  ;;  %v3666_v23 = vmul.f32 %v10310_v51, %v12762_v26 }
 0xd9b   : > { %v3665_v47 = vmul.f32 %v10312_v18, %v12765_v21 }
 0xd9c   : > { %v3680_v52 = vmul.f32 %v7753_v3, %v3666_v23 }
 0xd9d   : > { %v10314_v27 = vpop.eup %10313  ;;  %v3679_v59 = vmul.f32 %v7753_v3, %v3665_v47 }
 0xd9e   : > { %v10316_v40 = vpop.eup %10315  ;;  %v3668_v14 = vmul.f32 %v10314_v27, %v12772_v58  ;;  %v3694_v28 = vadd.f32 %v7754_v48, %v3680_v52 }
 0xd9f   : > { %v3693_v25 = vadd.f32 %v7754_v48, %v3679_v59  ;;  %v3667_v31 = vmul.f32 %v10316_v40, %v12776_v45 }
 0xda0   : > { %v3682_v50 = vmul.f32 %v7753_v3, %v3668_v14 }
 0xda1   : > { %v10318_v20 = vpop.eup %10317  ;;  %8679 = vmatprep.mubr.msk.f32.mxu0 %vm1098_vm1, %v3693_v25  ;;  %v3681_v38 = vmul.f32 %v7753_v3, %v3667_v31 }
 0xda2   : > { %v10320_v44 = vpop.eup %10319  ;;  %8680 = vmatmul.mubr.msk.f32.vlgmr.msra.gmra.mrb[40].mxu0 %vm1098_vm1, %v3694_v28  ;;  %v3670_v26 = vmul.f32 %v10318_v20, %v12784_v7  ;;  %v3696_v19 = vadd.f32 %v7754_v48, %v3682_v50 }
 0xda3   : > { %v3695_v21 = vadd.f32 %v7754_v48, %v3681_v38  ;;  %v3669_v61 = vmul.f32 %v10320_v44, %v12788_v54  ;;  %9312 = vmatpush3.bf16.msra.mxu0 %v9309_v15 }
 0xda4   : > { %v3684_v22 = vmul.f32 %v7753_v3, %v3670_v26  ;;  %9314 = vmatprep.subr.bf16.mxu0 %v9313_v2 }
 0xda5   : > { %8682 = vmatprep.mubr.msk.f32.mxu0 %vm1098_vm1, %v3695_v21  ;;  %v3683_v58 = vmul.f32 %v7753_v3, %v3669_v61 }
 0xda6   : > { %8683 = vmatmul.mubr.msk.f32.gmra.mrb[42].mxu0 %vm1098_vm1, %v3696_v19  ;;  %v3698_v62 = vadd.f32 %v7754_v48, %v3684_v22 }
 0xda7   : > { %v3697_v45 = vadd.f32 %v7754_v48, %v3683_v58  ;;  %9316 = vmatpush3.bf16.msra.mxu0 %v9313_v2 }
 0xda9   : > { %8685 = vmatprep.mubr.msk.f32.mxu0 %vm1098_vm1, %v3697_v45 }
 0xdaa   : > { %8686 = vmatmul.mubr.msk.f32.gmra.mrb[44].mxu0 %vm1098_vm1, %v3698_v62 }
 0xdc1   : > { %v3640_v9 = vpop.xlane.xlu1 %3639 }
 0xdc2   : > { %v3648_v5 = vmul.f32 0.03125, %v3640_v9  ;;  %v3637_v32 = vpop.xlane.xlu0 %3636 }
 0xdc3   : > { %v3647_v7 = vmul.f32 0.03125, %v3637_v32 }
 0xdc4   : > { %v3656_v30 = vadd.f32 1e-06, %v3648_v5 }
 0xdc5   : > { %v3655_v53 = vadd.f32 1e-06, %v3647_v7 }
 0xdc6   : > { %10321 = vrsqrt.f32 %v3656_v30 }
 0xdc7   : > { %10323 = vrsqrt.f32 %v3655_v53 }
 0xdd0   : > { %v10322_v54 = vpop.eup %10321 }
 0xdd1   : > { %v10324_v6 = vpop.eup %10323  ;;  %v3672_v33 = vmul.f32 %v10322_v54, %v12798_v60  ;;  %v3885_v60 = vld [vmem:[#allocation23 + $0x20] sm:$0xff] }
 0xdd2   : > { %v3671_v1 = vmul.f32 %v10324_v6, %v12801_v34  ;;  %v3886_v34 = vld [vmem:[#allocation23 + $0x28] sm:$0xff] }
 0xdd3   : > { %v3686_v42 = vmul.f32 %v7753_v3, %v3672_v33  ;;  %v9317_v43 = vpack.c.bf16 %v3886_v34, %v3885_v60 }
 0xdd4   : > { %v3685_v16 = vmul.f32 %v7753_v3, %v3671_v1 }
 0xdd5   : > { %v3700_v11 = vadd.f32 %v7754_v48, %v3686_v42  ;;  %9318 = vmatprep.subr.bf16.mxu0 %v9317_v43 }
 0xdd6   : > { %v3699_v24 = vadd.f32 %v7754_v48, %v3685_v16  ;;  %9320 = vmatpush3.bf16.msra.mxu0 %v9317_v43 }
 0xdd7   : > { %9322 = vmatprep.subr.bf16.mxu0 %v9321_v39 }
 0xdd8   : > { %8688 = vmatprep.mubr.msk.f32.mxu0 %vm1098_vm1, %v3699_v24 }
 0xdd9   : > { %8689 = vmatmul.mubr.msk.f32.gmra.mrb[46].mxu0 %vm1098_vm1, %v3700_v11 }
 0xdda   : > { %9324 = vmatpush3.bf16.msra.mxu0 %v9321_v39 }
 0xe75   : > { %v8681_v35 = vpop.f32.mrb[40].mxu0 }
 0xe76   : > { %v3808_v10 = vadd.f32 %v8681_v35, %v7755_v12  ;;  %v3802_v51 = vpop.f32.mrb[41].mxu0 }
 0xe77   : > { %v3803_v3 = vadd.f32 %v7755_v12, %v3802_v51  ;;  %v7764_v51 = vld [vmem:[#allocation25] ss:$0 sm:$0xff] }
 0xe78   : > { %v3850_v18 = vmul.f32 0.70710677, %v3808_v10  ;;  %v3842_v19 = vmul.f32 0.5, %v3808_v10 }
 0xe79   : > { %v3849_v23 = vmul.f32 0.70710677, %v3803_v3  ;;  %v8684_v47 = vpop.f32.mrb[42].mxu0  ;;  %v3841_v21 = vmul.f32 0.5, %v3803_v3 }
 0xe7a   : > { %10325 = verf.f32 %v3850_v18  ;;  %v3818_v52 = vadd.f32 %v8684_v47, %v7755_v12  ;;  %v3812_v48 = vpop.f32.mrb[43].mxu0 }
 0xe7b   : > { %10327 = verf.f32 %v3849_v23  ;;  %v3813_v27 = vadd.f32 %v7755_v12, %v3812_v48 }
 0xe7c   : > { %v3852_v59 = vmul.f32 0.70710677, %v3818_v52  ;;  %v3844_v7 = vmul.f32 0.5, %v3818_v52 }
 0xe7d   : > { %v3851_v40 = vmul.f32 0.70710677, %v3813_v27  ;;  %v8687_v14 = vpop.f32.mrb[44].mxu0  ;;  %v3843_v5 = vmul.f32 0.5, %v3813_v27 }
 0xe7e   : > { %10329 = verf.f32 %v3852_v59  ;;  %v3828_v25 = vadd.f32 %v8687_v14, %v7755_v12  ;;  %v3822_v31 = vpop.f32.mrb[45].mxu0 }
 0xe7f   : > { %10331 = verf.f32 %v3851_v40  ;;  %v3823_v28 = vadd.f32 %v7755_v12, %v3822_v31 }
 0xe80   : > { %v3854_v50 = vmul.f32 0.70710677, %v3828_v25  ;;  %v3846_v16 = vmul.f32 0.5, %v3828_v25 }
 0xe81   : > { %v3853_v20 = vmul.f32 0.70710677, %v3823_v28  ;;  %v3845_v1 = vmul.f32 0.5, %v3823_v28 }
 0xe82   : > { %10333 = verf.f32 %v3854_v50 }
 0xe83   : > { %10335 = verf.f32 %v3853_v20 }
 0xe84   : > { %v10326_v38 = vpop.eup %10325 }
 0xe85   : > { %v10328_v44 = vpop.eup %10327  ;;  %v3866_v26 = vadd.f32 1.0, %v10326_v38 }
 0xe86   : > { %v3865_v61 = vadd.f32 1.0, %v10328_v44 }
 0xe87   : > { %v3874_v62 = vmul.f32 %v3866_v26, %v3842_v19 }
 0xe88   : > { %v10330_v22 = vpop.eup %10329  ;;  %v3873_v58 = vmul.f32 %v3865_v61, %v3841_v21 }
 0xe89   : > { %v10332_v45 = vpop.eup %10331  ;;  %v3868_v9 = vadd.f32 1.0, %v10330_v22 }
 0xe8a   : > { %v3867_v32 = vadd.f32 1.0, %v10332_v45  ;;  %8707 = vmatprep.mubr.msk.f32.mxu0 %vm966_vm0, %v3873_v58 }
 0xe8b   : > { %8708 = vmatmul.mubr.msk.f32.vlgmr.msra.gmra.mrb[48].mxu0 %vm966_vm0, %v3874_v62  ;;  %v3876_v6 = vmul.f32 %v3868_v9, %v3844_v7 }
 0xe8c   : > { %v10334_v30 = vpop.eup %10333  ;;  %v3875_v53 = vmul.f32 %v3867_v32, %v3843_v5 }
 0xe8d   : > { %v10336_v54 = vpop.eup %10335  ;;  %v3870_v33 = vadd.f32 1.0, %v10334_v30 }
 0xe8e   : > { %v3869_v42 = vadd.f32 1.0, %v10336_v54  ;;  %8710 = vmatprep.mubr.msk.f32.mxu0 %vm966_vm0, %v3875_v53 }
 0xe8f   : > { %8711 = vmatmul.mubr.msk.f32.gmra.mrb[50].mxu0 %vm966_vm0, %v3876_v6  ;;  %v3878_v11 = vmul.f32 %v3870_v33, %v3846_v16 }
 0xe90   : > { %v3877_v24 = vmul.f32 %v3869_v42, %v3845_v1 }
 0xe92   : > { %8713 = vmatprep.mubr.msk.f32.mxu0 %vm966_vm0, %v3877_v24 }
 0xe93   : > { %8714 = vmatmul.mubr.msk.f32.gmra.mrb[52].mxu0 %vm966_vm0, %v3878_v11 }
 0xeac   : > { %v8690_v37 = vpop.f32.mrb[46].mxu0 }
 0xead   : > { %v3838_v13 = vadd.f32 %v8690_v37, %v7755_v12  ;;  %v3832_v15 = vpop.f32.mrb[47].mxu0 }
 0xeae   : > { %v3833_v0 = vadd.f32 %v7755_v12, %v3832_v15 }
 0xeaf   : > { %v3856_v29 = vmul.f32 0.70710677, %v3838_v13  ;;  %v3848_v39 = vmul.f32 0.5, %v3838_v13 }
 0xeb0   : > { %v3855_v2 = vmul.f32 0.70710677, %v3833_v0  ;;  %v3847_v56 = vmul.f32 0.5, %v3833_v0 }
 0xeb1   : > { %10337 = verf.f32 %v3856_v29 }
 0xeb2   : > { %10339 = verf.f32 %v3855_v2 }
 0xebb   : > { %v10338_v60 = vpop.eup %10337 }
 0xebc   : > { %v10340_v34 = vpop.eup %10339  ;;  %v3872_v43 = vadd.f32 1.0, %v10338_v60 }
 0xebd   : > { %v3871_v46 = vadd.f32 1.0, %v10340_v34 }
 0xebe   : > { %v3880_v10 = vmul.f32 %v3872_v43, %v3848_v39 }
 0xebf   : > { %v3879_v35 = vmul.f32 %v3871_v46, %v3847_v56 }
 0xec1   : > { %8716 = vmatprep.mubr.msk.f32.mxu0 %vm966_vm0, %v3879_v35 }
 0xec2   : > { %8717 = vmatmul.mubr.msk.f32.gmra.mrb[54].mxu0 %vm966_vm0, %v3880_v10 }
 0xf5e   : > { %v8709_v3 = vpop.f32.mrb[48].mxu0 }
 0xf5f   : > { %v3992_v18 = vadd.f32 %v8709_v3, %v7764_v51  ;;  %v3986_v12 = vpop.f32.mrb[49].mxu0  ;;  %v4171_v3 = vld [vmem:[#allocation11 + $0x28] sm:$0xff] }
 0xf60   : > { %v3987_v23 = vadd.f32 %v7764_v51, %v3986_v12  ;;  %v4172_v12 = vld [vmem:[#allocation11 + $0x30] sm:$0xff] }
 0xf61   : > { %v12834_v47 = vadd.f32 %v3992_v18, %v12723_v36 }
 0xf62   : > { %v12837_v52 = vadd.f32 %v3987_v23, %v12725_v8  ;;  %v8712_v48 = vpop.f32.mrb[50].mxu0  ;;  %v4173_v23 = vld [vmem:[#allocation11 + $0x38] sm:$0xff] }
 0xf63   : > { %v4002_v27 = vadd.f32 %v8712_v48, %v7764_v51  ;;  %v3996_v59 = vpop.f32.mrb[51].mxu0  ;;  %v4040_v40 = vsel %vm1098_vm1, %v12834_v47, 0.0  ;;  %v9329_v48 = vpack.c.bf16 %v4173_v23, %v4172_v12 }
 0xf64   : > { %v3997_v14 = vadd.f32 %v7764_v51, %v3996_v59  ;;  %4041 = vadd.xlane.f32.xlu1 %v4040_v40  ;;  %v4037_v25 = vsel %vm1098_vm1, %v12837_v52, 0.0 }
 0xf65   : > { %v12844_v31 = vadd.f32 %v4002_v27, %v12733_v63  ;;  %4038 = vadd.xlane.f32.xlu0 %v4037_v25 }
 0xf66   : > { %v12847_v36 = vadd.f32 %v3997_v14, %v12735_v55  ;;  %v8715_v8 = vpop.f32.mrb[52].mxu0 }
 0xf67   : > { %v4012_v28 = vadd.f32 %v8715_v8, %v7764_v51  ;;  %v4006_v50 = vpop.f32.mrb[53].mxu0  ;;  %v4046_v20 = vsel %vm1098_vm1, %v12844_v31, 0.0 }
 0xf68   : > { %v4007_v38 = vadd.f32 %v7764_v51, %v4006_v50  ;;  %4047 = vadd.xlane.f32.xlu1 %v4046_v20  ;;  %v4043_v44 = vsel %vm1098_vm1, %v12847_v36, 0.0 }
 0xf69   : > { %v12854_v26 = vadd.f32 %v4012_v28, %v12743_v41  ;;  %4044 = vadd.xlane.f32.xlu0 %v4043_v44 }
 0xf6a   : > { %v12857_v63 = vadd.f32 %v4007_v38, %v12745_v57 }
 0xf6b   : > { %v4052_v55 = vsel %vm1098_vm1, %v12854_v26, 0.0 }
 0xf6c   : > { %4053 = vadd.xlane.f32.xlu1 %v4052_v55  ;;  %v4049_v21 = vsel %vm1098_vm1, %v12857_v63, 0.0 }
 0xf6d   : > { %4050 = vadd.xlane.f32.xlu0 %v4049_v21 }
 0xf95   : > { %v8718_v61 = vpop.f32.mrb[54].mxu0 }
 0xf96   : > { %v4022_v19 = vadd.f32 %v8718_v61, %v7764_v51  ;;  %v4016_v22 = vpop.f32.mrb[55].mxu0 }
 0xf97   : > { %v4017_v58 = vadd.f32 %v7764_v51, %v4016_v22  ;;  %v4170_v51 = vld [vmem:[#allocation11 + $0x20] sm:$0xff] }
 0xf98   : > { %v12864_v45 = vadd.f32 %v4022_v19, %v12753_v4  ;;  %v9325_v18 = vpack.c.bf16 %v4171_v3, %v4170_v51 }
 0xf99   : > { %v12867_v41 = vadd.f32 %v4017_v58, %v12755_v17 }
 0xf9a   : > { %v4058_v57 = vsel %vm1098_vm1, %v12864_v45, 0.0  ;;  %9326 = vmatprep.subr.bf16.mxu1 %v9325_v18 }
 0xf9b   : > { %4059 = vadd.xlane.f32.xlu1 %v4058_v57  ;;  %v4055_v62 = vsel %vm1098_vm1, %v12867_v41, 0.0  ;;  %9328 = vmatpush3.bf16.msra.mxu1 %v9325_v18 }
 0xf9c   : > { %4056 = vadd.xlane.f32.xlu0 %v4055_v62  ;;  %9330 = vmatprep.subr.bf16.mxu1 %v9329_v48 }
 0xf9f   : > { %9332 = vmatpush3.bf16.msra.mxu1 %v9329_v48 }
 0xff1   : > { %v4042_v9 = vpop.xlane.xlu1 %4041 }
 0xff2   : > { %v4062_v5 = vmul.f32 0.03125, %v4042_v9  ;;  %v4039_v32 = vpop.xlane.xlu0 %4038 }
 0xff3   : > { %v4061_v7 = vmul.f32 0.03125, %v4039_v32 }
 0xff4   : > { %v12874_v30 = vsub.f32 %v12834_v47, %v4062_v5 }
 0xff5   : > { %v12877_v4 = vsub.f32 %v12837_v52, %v4061_v7  ;;  %v4048_v17 = vpop.xlane.xlu1 %4047 }
 0xff6   : > { %v4064_v53 = vmul.f32 0.03125, %v4048_v17  ;;  %v4045_v54 = vpop.xlane.xlu0 %4044  ;;  %v4078_v6 = vmul.f32 %v12874_v30, %v12874_v30 }
 0xff7   : > { %v4063_v33 = vmul.f32 0.03125, %v4045_v54  ;;  %v4077_v1 = vmul.f32 %v12877_v4, %v12877_v4 }
 0xff8   : > { %v12884_v42 = vsub.f32 %v12844_v31, %v4064_v53  ;;  %v4088_v16 = vsel %vm1098_vm1, %v4078_v6, 0.0 }
 0xff9   : > { %v12888_v24 = vsub.f32 %v12847_v36, %v4063_v33  ;;  %v4054_v11 = vpop.xlane.xlu1 %4053  ;;  %4089 = vadd.xlane.f32.xlu1 %v4088_v16  ;;  %v4085_v37 = vsel %vm1098_vm1, %v4077_v1, 0.0  ;;  %v7773_v16 = vld [vmem:[#allocation8 + $0x1] ss:$0 sm:$0xff] }
 0xffa   : > { %v4066_v13 = vmul.f32 0.03125, %v4054_v11  ;;  %v4051_v15 = vpop.xlane.xlu0 %4050  ;;  %4086 = vadd.xlane.f32.xlu0 %v4085_v37  ;;  %v4080_v0 = vmul.f32 %v12884_v42, %v12884_v42 }
 0xffb   : > { %v4065_v29 = vmul.f32 0.03125, %v4051_v15  ;;  %v4079_v2 = vmul.f32 %v12888_v24, %v12888_v24 }
 0xffc   : > { %v12896_v60 = vsub.f32 %v12854_v26, %v4066_v13  ;;  %v4094_v34 = vsel %vm1098_vm1, %v4080_v0, 0.0  ;;  %v7774_v0 = vld [vmem:[#allocation10 + $0x1] ss:$0 sm:$0xff] }
 0xffd   : > { %v12900_v43 = vsub.f32 %v12857_v63, %v4065_v29  ;;  %4095 = vadd.xlane.f32.xlu1 %v4094_v34  ;;  %v4091_v56 = vsel %vm1098_vm1, %v4079_v2, 0.0 }
 0xffe   : > { %4092 = vadd.xlane.f32.xlu0 %v4091_v56  ;;  %v4082_v46 = vmul.f32 %v12896_v60, %v12896_v60 }
 0xfff   : > { %v4081_v39 = vmul.f32 %v12900_v43, %v12900_v43 }
0x1000   : > { %v4100_v35 = vsel %vm1098_vm1, %v4082_v46, 0.0 }
0x1001   : > { %4101 = vadd.xlane.f32.xlu1 %v4100_v35  ;;  %v4097_v10 = vsel %vm1098_vm1, %v4081_v39, 0.0 }
0x1002   : > { %4098 = vadd.xlane.f32.xlu0 %v4097_v10 }
0x1028   : > { %v4060_v27 = vpop.xlane.xlu1 %4059 }
0x1029   : > { %v4068_v59 = vmul.f32 0.03125, %v4060_v27  ;;  %v4057_v40 = vpop.xlane.xlu0 %4056 }
0x102a   : > { %v4067_v14 = vmul.f32 0.03125, %v4057_v40 }
0x102b   : > { %v12910_v25 = vsub.f32 %v12864_v45, %v4068_v59 }
0x102c   : > { %v12913_v8 = vsub.f32 %v12867_v41, %v4067_v14 }
0x102d   : > { %v4084_v28 = vmul.f32 %v12910_v25, %v12910_v25 }
0x102e   : > { %v4083_v50 = vmul.f32 %v12913_v8, %v12913_v8 }
0x102f   : > { %v4106_v20 = vsel %vm1098_vm1, %v4084_v28, 0.0 }
0x1030   : > { %4107 = vadd.xlane.f32.xlu1 %v4106_v20  ;;  %v4103_v38 = vsel %vm1098_vm1, %v4083_v50, 0.0 }
0x1031   : > { %4104 = vadd.xlane.f32.xlu0 %v4103_v38 }
0x1086   : > { %v4090_v44 = vpop.xlane.xlu1 %4089 }
0x1087   : > { %v4110_v55 = vmul.f32 0.03125, %v4090_v44  ;;  %v4087_v21 = vpop.xlane.xlu0 %4086 }
0x1088   : > { %v4109_v61 = vmul.f32 0.03125, %v4087_v21 }
0x1089   : > { %v4118_v19 = vadd.f32 1e-06, %v4110_v55 }
0x108a   : > { %v4117_v22 = vadd.f32 1e-06, %v4109_v61  ;;  %v4096_v58 = vpop.xlane.xlu1 %4095 }
0x108b   : > { %10341 = vrsqrt.f32 %v4118_v19  ;;  %v4112_v57 = vmul.f32 0.03125, %v4096_v58  ;;  %v4093_v62 = vpop.xlane.xlu0 %4092 }
0x108c   : > { %10343 = vrsqrt.f32 %v4117_v22  ;;  %v4111_v9 = vmul.f32 0.03125, %v4093_v62  ;;  %v7775_v22 = vld [vmem:[#allocation13 + $0x1] ss:$0 sm:$0xff] }
0x108d   : > { %v4120_v5 = vadd.f32 1e-06, %v4112_v57 }
0x108e   : > { %v4119_v32 = vadd.f32 1e-06, %v4111_v9  ;;  %v4102_v7 = vpop.xlane.xlu1 %4101 }
0x108f   : > { %10345 = vrsqrt.f32 %v4120_v5  ;;  %v4114_v17 = vmul.f32 0.03125, %v4102_v7  ;;  %v4099_v53 = vpop.xlane.xlu0 %4098 }
0x1090   : > { %10347 = vrsqrt.f32 %v4119_v32  ;;  %v4113_v54 = vmul.f32 0.03125, %v4099_v53 }
0x1091   : > { %v4122_v6 = vadd.f32 1e-06, %v4114_v17 }
0x1092   : > { %v4121_v33 = vadd.f32 1e-06, %v4113_v54 }
0x1093   : > { %10349 = vrsqrt.f32 %v4122_v6 }
0x1094   : > { %10351 = vrsqrt.f32 %v4121_v33 }
0x1095   : > { %v10342_v1 = vpop.eup %10341 }
0x1096   : > { %v10344_v11 = vpop.eup %10343  ;;  %v4134_v37 = vmul.f32 %v10342_v1, %v12874_v30 }
0x1097   : > { %v4133_v13 = vmul.f32 %v10344_v11, %v12877_v4 }
0x1098   : > { %v4148_v15 = vmul.f32 %v7773_v16, %v4134_v37 }
0x1099   : > { %v10346_v29 = vpop.eup %10345  ;;  %v4147_v2 = vmul.f32 %v7773_v16, %v4133_v13 }
0x109a   : > { %v10348_v34 = vpop.eup %10347  ;;  %v4136_v56 = vmul.f32 %v10346_v29, %v12884_v42  ;;  %v4162_v35 = vadd.f32 %v7774_v0, %v4148_v15 }
0x109b   : > { %v4161_v46 = vadd.f32 %v7774_v0, %v4147_v2  ;;  %v4135_v39 = vmul.f32 %v10348_v34, %v12888_v24 }
0x109c   : > { %v4150_v10 = vmul.f32 %v7773_v16, %v4136_v56 }
0x109d   : > { %v10350_v51 = vpop.eup %10349  ;;  %8727 = vmatprep.mubr.msk.f32.mxu1 %vm1098_vm1, %v4161_v46  ;;  %v4149_v3 = vmul.f32 %v7773_v16, %v4135_v39 }
0x109e   : > { %v10352_v18 = vpop.eup %10351  ;;  %8728 = vmatmul.mubr.msk.f32.vlgmr.msra.gmra.mrb[56].mxu1 %vm1098_vm1, %v4162_v35  ;;  %v4138_v30 = vmul.f32 %v10350_v51, %v12896_v60  ;;  %v4164_v23 = vadd.f32 %v7774_v0, %v4150_v10 }
0x109f   : > { %v4163_v4 = vadd.f32 %v7774_v0, %v4149_v3  ;;  %v4137_v12 = vmul.f32 %v10352_v18, %v12900_v43 }
0x10a0   : > { %v4152_v48 = vmul.f32 %v7773_v16, %v4138_v30 }
0x10a1   : > { %8730 = vmatprep.mubr.msk.f32.mxu1 %vm1098_vm1, %v4163_v4  ;;  %v4151_v42 = vmul.f32 %v7773_v16, %v4137_v12 }
0x10a2   : > { %8731 = vmatmul.mubr.msk.f32.gmra.mrb[58].mxu1 %vm1098_vm1, %v4164_v23  ;;  %v4166_v27 = vadd.f32 %v7774_v0, %v4152_v48 }
0x10a3   : > { %v4165_v24 = vadd.f32 %v7774_v0, %v4151_v42 }
0x10a5   : > { %8733 = vmatprep.mubr.msk.f32.mxu1 %vm1098_vm1, %v4165_v24 }
0x10a6   : > { %8734 = vmatmul.mubr.msk.f32.gmra.mrb[60].mxu1 %vm1098_vm1, %v4166_v27 }
0x10bd   : > { %v4108_v59 = vpop.xlane.xlu1 %4107 }
0x10be   : > { %v4116_v40 = vmul.f32 0.03125, %v4108_v59  ;;  %v4105_v14 = vpop.xlane.xlu0 %4104 }
0x10bf   : > { %v4115_v60 = vmul.f32 0.03125, %v4105_v14 }
0x10c0   : > { %v4124_v28 = vadd.f32 1e-06, %v4116_v40 }
0x10c1   : > { %v4123_v50 = vadd.f32 1e-06, %v4115_v60 }
0x10c2   : > { %10353 = vrsqrt.f32 %v4124_v28 }
0x10c3   : > { %10355 = vrsqrt.f32 %v4123_v50 }
0x10cc   : > { %v10354_v43 = vpop.eup %10353 }
0x10cd   : > { %v10356_v20 = vpop.eup %10355  ;;  %v4140_v38 = vmul.f32 %v10354_v43, %v12910_v25 }
0x10ce   : > { %v4139_v44 = vmul.f32 %v10356_v20, %v12913_v8 }
0x10cf   : > { %v4154_v55 = vmul.f32 %v7773_v16, %v4140_v38 }
0x10d0   : > { %v4153_v21 = vmul.f32 %v7773_v16, %v4139_v44 }
0x10d1   : > { %v4168_v19 = vadd.f32 %v7774_v0, %v4154_v55 }
0x10d2   : > { %v4167_v61 = vadd.f32 %v7774_v0, %v4153_v21 }
0x10d4   : > { %8736 = vmatprep.mubr.msk.f32.mxu1 %vm1098_vm1, %v4167_v61 }
0x10d5   : > { %8737 = vmatmul.mubr.msk.f32.gmra.mrb[62].mxu1 %vm1098_vm1, %v4168_v19 }
0x1171   : > { %v8729_v58 = vpop.f32.mrb[56].mxu1 }
0x1172   : > { %v12937_v57 = vadd.f32 %v8729_v58, %v7775_v22  ;;  %v4272_v62 = vpop.f32.mrb[57].mxu1 }
0x1173   : > { %v12939_v9 = vadd.f32 %v7775_v22, %v4272_v62 }
0x1175   : > { %v8732_v5 = vpop.f32.mrb[58].mxu1  ;;  %8755 = vmatprep.mubr.msk.f32.mxu0 %vm1396_vm2, %v12939_v9  ;;  %v12945_v25 = vpack.i.bf16 %v12937_v57, %v12939_v9 }
0x1176   : > { %v12947_v8 = vadd.f32 %v8732_v5, %v7775_v22  ;;  %v4282_v32 = vpop.f32.mrb[59].mxu1 }
0x1177   : > { %v12949_v7 = vadd.f32 %v7775_v22, %v4282_v32  ;;  %10006 = vrot.lane.b32.xlu0 %v12945_v25, %s11229_s8 }
0x1179   : > { %v8735_v17 = vpop.f32.mrb[60].mxu1  ;;  %v12955_v53 = vpack.i.bf16 %v12947_v8, %v12949_v7 }
0x117a   : > { %v12957_v54 = vadd.f32 %v8735_v17, %v7775_v22  ;;  %v4292_v6 = vpop.f32.mrb[61].mxu1 }
0x117b   : > { %v12959_v33 = vadd.f32 %v7775_v22, %v4292_v6  ;;  %10011 = vrot.lane.b32.xlu1 %v12955_v53, %s11229_s8 }
0x117d   : > { %v12965_v1 = vpack.i.bf16 %v12957_v54, %v12959_v33 }
0x117f   : > { %10016 = vrot.lane.b32.xlu1 %v12965_v1, %s11229_s8 }
0x11a8   : > { %v8738_v16 = vpop.f32.mrb[62].mxu1 }
0x11a9   : > { %v12969_v11 = vadd.f32 %v8738_v16, %v7775_v22  ;;  %v4302_v37 = vpop.f32.mrb[63].mxu1 }
0x11aa   : > { %v12971_v13 = vadd.f32 %v7775_v22, %v4302_v37 }
0x11ac   : > { %v12975_v15 = vpack.i.bf16 %v12969_v11, %v12971_v13 }
0x11ae   : > { %10021 = vrot.lane.b32.xlu1 %v12975_v15, %s11229_s8  ;;  %s917_s8 = scalar_lea.vmem [#allocation34], %s7604_s16 }
0x11e9   : > { %v10007_v0 = vpop.permute.xlu0 %10006 }
0x11ea   : > { %v10009_v29 = vunpack.i.h.bf16 %v10007_v0  ;;  %v10008_v2 = vunpack.i.l.bf16 %v10007_v0 }
0x11ec   : > { %v9333_v34 = vpack.c.bf16 %v10009_v29, %v10008_v2 }
0x11ed   : > { %v10012_v56 = vpop.permute.xlu1 %10011 }
0x11ee   : > { %v10014_v46 = vunpack.i.h.bf16 %v10012_v56  ;;  %v10013_v39 = vunpack.i.l.bf16 %v10012_v56  ;;  %9335 = vmatprep.subr.msk.bf16.mxu0 %vm12144_vm3, %v9333_v34 }
0x11ef   : > { %9338 = vmatpush3.bf16.xpose.msk.msra.mxu0 %vm12144_vm3, %v9333_v34 }
0x11f0   : > { %v9339_v35 = vpack.c.bf16 %v10014_v46, %v10013_v39 }
0x11f1   : > { %v10017_v10 = vpop.permute.xlu1 %10016 }
0x11f2   : > { %v10019_v51 = vunpack.i.h.bf16 %v10017_v10  ;;  %v10018_v3 = vunpack.i.l.bf16 %v10017_v10  ;;  %9341 = vmatprep.subr.msk.bf16.mxu0 %vm12144_vm3, %v9339_v35 }
0x11f4   : > { %v9345_v18 = vpack.c.bf16 %v10019_v51, %v10018_v3 }
0x11f7   : > { %9344 = vmatpush3.bf16.xpose.msk.msra.mxu0 %vm12144_vm3, %v9339_v35 }
0x11f8   : > { %9347 = vmatprep.subr.msk.bf16.mxu0 %vm12144_vm3, %v9345_v18 }
0x11ff   : > { %9350 = vmatpush3.bf16.xpose.msk.msra.mxu0 %vm12144_vm3, %v9345_v18 }
0x1220   : > { %v10022_v30 = vpop.permute.xlu1 %10021 }
0x1221   : > { %v10024_v4 = vunpack.i.h.bf16 %v10022_v30  ;;  %v10023_v12 = vunpack.i.l.bf16 %v10022_v30 }
0x1223   : > { %v9351_v23 = vpack.c.bf16 %v10024_v4, %v10023_v12 }
0x1225   : > { %9353 = vmatprep.subr.msk.bf16.mxu0 %vm12144_vm3, %v9351_v23 }
0x1226   : > { %9356 = vmatpush3.bf16.xpose.msk.msra.mxu0 %vm12144_vm3, %v9351_v23 }
0x122d   : > { %8756 = vmatmul.mubr.msk.f32.vlgmr.msra.gmra.mrb[56].mxu0 %vm1396_vm2, %v12937_v57 }
0x122e   : > { %8758 = vmatprep.mubr.msk.f32.mxu0 %vm1396_vm2, %v12949_v7 }
0x1231   : > { %8759 = vmatmul.mubr.msk.f32.gmra.mrb[58].mxu0 %vm1396_vm2, %v12947_v8 }
0x1232   : > { %8761 = vmatprep.mubr.msk.f32.mxu0 %vm1396_vm2, %v12959_v33 }
0x1235   : > { %8762 = vmatmul.mubr.msk.f32.gmra.mrb[60].mxu0 %vm1396_vm2, %v12957_v54 }
0x1236   : > { %8764 = vmatprep.mubr.msk.f32.mxu0 %vm1396_vm2, %v12971_v13 }
0x1239   : > { %8765 = vmatmul.mubr.msk.f32.gmra.mrb[62].mxu0 %vm1396_vm2, %v12969_v11 }
0x1300   : > { %v8757_v48 = vpop.f32.mrb[56].mxu0 }
0x1301   : > { %v4433_v42 = vpop.f32.mrb[57].mxu0  ;;  %v4475_v24 = vsel %vm966_vm0, %v8757_v48, -inf }
0x1302   : > { %4476 = vmax.xlane.f32.xlu1 %v4475_v24  ;;  %v4472_v27 = vsel %vm966_vm0, %v4433_v42, -inf }
0x1303   : > { %4473 = vmax.xlane.f32.xlu0 %v4472_v27 }
0x1304   : > { %v8760_v59 = vpop.f32.mrb[58].mxu0 }
0x1305   : > { %v4443_v40 = vpop.f32.mrb[59].mxu0  ;;  %v4481_v14 = vsel %vm966_vm0, %v8760_v59, -inf }
0x1306   : > { %v4478_v43 = vsel %vm966_vm0, %v4443_v40, -inf }
0x1307   : > { %4482 = vmax.xlane.f32.xlu0 %v4481_v14 }
0x1308   : > { %v8763_v60 = vpop.f32.mrb[60].mxu0 }
0x1309   : > { %v4453_v28 = vpop.f32.mrb[61].mxu0  ;;  %v4487_v50 = vsel %vm966_vm0, %v8763_v60, -inf }
0x130a   : > { %4488 = vmax.xlane.f32.xlu1 %v4487_v50  ;;  %v4484_v55 = vsel %vm966_vm0, %v4453_v28, -inf }
0x130b   : > { %4479 = vmax.xlane.f32.xlu0 %v4478_v43 }
0x130c   : > { %v13014_v20 = vpop.f32.mrb[62].mxu0 }
0x130d   : > { %v13016_v38 = vpop.f32.mrb[63].mxu0  ;;  %v4493_v44 = vsel %vm966_vm0, %v13014_v20, -inf }
0x130e   : > { %4494 = vmax.xlane.f32.xlu1 %v4493_v44  ;;  %v4490_v21 = vsel %vm966_vm0, %v13016_v38, -inf }
0x130f   : > { %4485 = vmax.xlane.f32.xlu0 %v4484_v55 }
0x1313   : > { %4491 = vmax.xlane.f32.xlu0 %v4490_v21 }
0x131f   : > { %10031 = vrot.lane.b32.xlu1 %v12955_v53, %s11234_s2 }
0x1323   : > { %10036 = vrot.lane.b32.xlu1 %v12965_v1, %s11234_s2 }
0x1327   : > { %10041 = vrot.lane.b32.xlu1 %v12975_v15, %s11234_s2 }
0x1329   : > { %10026 = vrot.lane.b32.xlu0 %v12945_v25, %s11234_s2  ;;  %s13884_s2 = sld [smem:[#allocation66_spill]] }
0x132b   : > { %10051 = vrot.lane.b32.xlu1 %v12955_v53, %s11230_s30 }
0x132d   : > { %10046 = vrot.lane.b32.xlu0 %v12945_v25, %s11230_s30 }
0x138f   : > { %v4477_v61 = vpop.xlane.xlu1 %4476 }
0x1390   : > { %v4497_v19 = vsub.f32 %v8757_v48, %v4477_v61  ;;  %v4474_v22 = vpop.xlane.xlu0 %4473 }
0x1391   : > { %v4496_v58 = vsub.f32 %v4433_v42, %v4474_v22 }
0x1392   : > { %v4506_v62 = vmul.f32 1.442695, %v4497_v19 }
0x1393   : > { %v4504_v5 = vmul.f32 1.442695, %v4496_v58 }
0x1394   : > { %10357 = vpow2.f32 %v4506_v62  ;;  %v4483_v32 = vpop.xlane.xlu0 %4482 }
0x1395   : > { %10359 = vpow2.f32 %v4504_v5  ;;  %v4499_v17 = vsub.f32 %v8760_v59, %v4483_v32 }
0x1397   : > { %v4510_v6 = vmul.f32 1.442695, %v4499_v17  ;;  %v4489_v16 = vpop.xlane.xlu1 %4488 }
0x1398   : > { %v4501_v37 = vsub.f32 %v8763_v60, %v4489_v16  ;;  %v4480_v0 = vpop.xlane.xlu0 %4479 }
0x1399   : > { %10361 = vpow2.f32 %v4510_v6  ;;  %v4498_v29 = vsub.f32 %v4443_v40, %v4480_v0 }
0x139a   : > { %v4514_v2 = vmul.f32 1.442695, %v4501_v37 }
0x139b   : > { %v4508_v34 = vmul.f32 1.442695, %v4498_v29  ;;  %v4495_v56 = vpop.xlane.xlu1 %4494 }
0x139c   : > { %v4486_v46 = vpop.xlane.xlu0 %4485  ;;  %v4503_v0 = vsub.f32 %v13014_v20, %v4495_v56 }
0x139d   : > { %10363 = vpow2.f32 %v4508_v34  ;;  %v4500_v39 = vsub.f32 %v4453_v28, %v4486_v46 }
0x139e   : > { %v13035_v35 = vpop.eup %10357  ;;  %10365 = vpow2.f32 %v4514_v2  ;;  %v4518_v29 = vmul.f32 1.442695, %v4503_v0 }
0x139f   : > { %v13037_v10 = vpop.eup %10359  ;;  %v4512_v51 = vmul.f32 1.442695, %v4500_v39  ;;  %v10032_v3 = vpop.permute.xlu1 %10031  ;;  %v4523_v18 = vsel %vm966_vm0, %v13035_v35, 0.0 }
0x13a0   : > { %4524 = vadd.xlane.f32.xlu1 %v4523_v18  ;;  %v4492_v30 = vpop.xlane.xlu0 %4491  ;;  %v4520_v4 = vsel %vm966_vm0, %v13037_v10, 0.0  ;;  %v10034_v24 = vunpack.i.h.bf16 %v10032_v3  ;;  %v10033_v27 = vunpack.i.l.bf16 %v10032_v3 }
0x13a1   : > { %4521 = vadd.xlane.f32.xlu0 %v4520_v4  ;;  %10367 = vpow2.f32 %v4512_v51  ;;  %v4502_v2 = vsub.f32 %v13016_v38, %v4492_v30 }
0x13a2   : > { %v9361_v55 = vpack.c.bf16 %v10034_v24, %v10033_v27  ;;  %10369 = vpow2.f32 %v4518_v29 }
0x13a3   : > { %v13043_v12 = vpop.eup %10361  ;;  %v10037_v23 = vpop.permute.xlu1 %10036  ;;  %v4516_v34 = vmul.f32 1.442695, %v4502_v2 }
0x13a4   : > { %v10027_v48 = vpop.permute.xlu0 %10026  ;;  %v4529_v42 = vsel %vm966_vm0, %v13043_v12, 0.0  ;;  %v10039_v43 = vunpack.i.h.bf16 %v10037_v23  ;;  %v10038_v44 = vunpack.i.l.bf16 %v10037_v23 }
0x13a5   : > { %v10029_v59 = vunpack.i.h.bf16 %v10027_v48  ;;  %v10028_v40 = vunpack.i.l.bf16 %v10027_v48  ;;  %4530 = vadd.xlane.f32.xlu1 %v4529_v42  ;;  %10371 = vpow2.f32 %v4516_v34 }
0x13a6   : > { %v9365_v62 = vpack.c.bf16 %v10039_v43, %v10038_v44 }
0x13a7   : > { %v13047_v14 = vpop.eup %10363  ;;  %v9357_v60 = vpack.c.bf16 %v10029_v59, %v10028_v40  ;;  %v10042_v21 = vpop.permute.xlu1 %10041 }
0x13a8   : > { %v4526_v28 = vsel %vm966_vm0, %v13047_v14, 0.0  ;;  %v13051_v50 = vpop.eup %10365  ;;  %v10044_v22 = vunpack.i.h.bf16 %v10042_v21  ;;  %v10043_v58 = vunpack.i.l.bf16 %v10042_v21  ;;  %v10047_v5 = vpop.permute.xlu0 %10046 }
0x13a9   : > { %4527 = vadd.xlane.f32.xlu0 %v4526_v28  ;;  %9358 = vmatprep.subr.bf16.mxu1 %v9357_v60  ;;  %v4535_v61 = vsel %vm966_vm0, %v13051_v50, 0.0  ;;  %v10049_v17 = vunpack.i.h.bf16 %v10047_v5  ;;  %v10048_v6 = vunpack.i.l.bf16 %v10047_v5 }
0x13aa   : > { %9360 = vmatpush3.bf16.msra.mxu1 %v9357_v60  ;;  %v9369_v16 = vpack.c.bf16 %v10044_v22, %v10043_v58 }
0x13ab   : > { %9362 = vmatprep.subr.bf16.mxu1 %v9361_v55  ;;  %v13055_v19 = vpop.eup %10367  ;;  %v9373_v37 = vpack.c.bf16 %v10049_v17, %v10048_v6  ;;  %v10052_v39 = vpop.permute.xlu1 %10051 }
0x13ac   : > { %v4532_v32 = vsel %vm966_vm0, %v13055_v19, 0.0  ;;  %v13077_v46 = vpop.eup %10369  ;;  %v10054_v48 = vunpack.i.h.bf16 %v10052_v39  ;;  %v10053_v42 = vunpack.i.l.bf16 %v10052_v39 }
0x13ad   : > { %4536 = vadd.xlane.f32.xlu0 %v4535_v61  ;;  %v4541_v20 = vsel %vm966_vm0, %v13077_v46, 0.0 }
0x13ae   : > { %9364 = vmatpush3.bf16.msra.mxu1 %v9361_v55  ;;  %v9379_v40 = vpack.c.bf16 %v10054_v48, %v10053_v42 }
0x13af   : > { %9366 = vmatprep.subr.bf16.mxu1 %v9365_v62  ;;  %v13083_v38 = vpop.eup %10371 }
0x13b0   : > { %v4538_v56 = vsel %vm966_vm0, %v13083_v38, 0.0 }
0x13b1   : > { %4533 = vadd.xlane.f32.xlu0 %v4532_v32 }
0x13b2   : > { %9368 = vmatpush3.bf16.msra.mxu1 %v9365_v62 }
0x13b3   : > { %9370 = vmatprep.subr.bf16.mxu1 %v9369_v16 }
0x13b6   : > { %10061 = vrot.lane.b32.xlu1 %v12975_v15, %s11230_s30  ;;  %9372 = vmatpush3.bf16.msra.mxu1 %v9369_v16 }
0x13b7   : > { %9375 = vmatprep.subr.msk.bf16.mxu1 %vm12144_vm3, %v9373_v37 }
0x13ba   : > { %4717 = vrot.lane.b32.xlu1 %v12937_v57, %s11231_s9 }
0x13c7   : > { %10056 = vrot.lane.b32.xlu0 %v12965_v1, %s11230_s30  ;;  %s7304_s30 = sshll.u32 %s917_s8, 4  ;;  %s13707_s30 = int_to_ptr.vmem [resolvable:$true] %s7304_s30 }
0x13cb   : > { %4715 = vrot.lane.b32.xlu0 %v12939_v9, %s11231_s9 }
0x13cf   : > { %4719 = vrot.lane.b32.xlu0 %v12949_v7, %s11231_s9 }
0x13d3   : > { %4723 = vrot.lane.b32.xlu0 %v12959_v33, %s11231_s9 }
0x13d7   : > { %4727 = vrot.lane.b32.xlu0 %v12971_v13, %s11231_s9 }
0x13db   : > { %10066 = vrot.lane.b32.xlu0 %v12945_v25, %s11232_s5 }
0x13de   : > { %4542 = vadd.xlane.f32.xlu1 %v4541_v20 }
0x13df   : > { %10076 = vrot.lane.b32.xlu0 %v12965_v1, %s11232_s5 }
0x13e2   : > { %4539 = vadd.xlane.f32.xlu1 %v4538_v56 }
0x13e3   : > { %5385 = vrot.lane.b32.xlu0 %v12939_v9, %s11233_s6 }
0x13e7   : > { %5389 = vrot.lane.b32.xlu0 %v12949_v7, %s11233_s6 }
0x13eb   : > { %5393 = vrot.lane.b32.xlu0 %v12959_v33, %s11233_s6 }
0x13ef   : > { %5397 = vrot.lane.b32.xlu0 %v12971_v13, %s11233_s6 }
0x13f3   : > { %4721 = vrot.lane.b32.xlu1 %v12947_v8, %s11231_s9 }
0x13f7   : > { %4725 = vrot.lane.b32.xlu1 %v12957_v54, %s11231_s9 }
0x13fb   : > { %4729 = vrot.lane.b32.xlu1 %v12969_v11, %s11231_s9  ;;  %s7946_s9 = sshll.u32 %s13862_s0, 8  ;;  %s11240_s0 = smov [#allocation34]  }
0x13ff   : > { %10071 = vrot.lane.b32.xlu1 %v12955_v53, %s11232_s5 }
0x1403   : > { %10081 = vrot.lane.b32.xlu1 %v12975_v15, %s11232_s5 }
0x1407   : > { %5387 = vrot.lane.b32.xlu1 %v12937_v57, %s11233_s6 }
0x140b   : > { %5391 = vrot.lane.b32.xlu1 %v12947_v8, %s11233_s6 }
0x140f   : > { %5395 = vrot.lane.b32.xlu1 %v12957_v54, %s11233_s6 }
0x1413   : > { %5399 = vrot.lane.b32.xlu1 %v12969_v11, %s11233_s6 }
0x142d   : > { %v4525_v51 = vpop.xlane.xlu1 %4524 }
0x142e   : > { %10373 = vrcp.f32 %v4525_v51  ;;  %v4522_v3 = vpop.xlane.xlu0 %4521 }
0x142f   : > { %10375 = vrcp.f32 %v4522_v3 }
0x1432   : > { %v4531_v18 = vpop.xlane.xlu1 %4530 }
0x1433   : > { %10377 = vrcp.f32 %v4531_v18 }
0x1436   : > { %v4528_v30 = vpop.xlane.xlu0 %4527  ;;  %v10062_v22 = vpop.permute.xlu1 %10061 }
0x1437   : > { %10379 = vrcp.f32 %v4528_v30  ;;  %v10063_v32 = vunpack.i.l.bf16 %v10062_v22 }
0x1438   : > { %v10374_v4 = vpop.eup %10373 }
0x1439   : > { %v10376_v23 = vpop.eup %10375  ;;  %v4553_v59 = vmul.f32 %v10374_v4, %v13035_v35 }
0x143a   : > { %v4537_v24 = vpop.xlane.xlu0 %4536  ;;  %v4552_v27 = vmul.f32 %v10376_v23, %v13037_v10  ;;  %v4718_v34 = vpop.permute.xlu1 %4717 }
0x143b   : > { %10381 = vrcp.f32 %v4537_v24 }
0x143c   : > { %8783 = vmatprep.mubr.msk.f32.mxu1 %vm966_vm0, %v4552_v27 }
0x143d   : > { %8784 = vmatmul.mubr.msk.f32.vlgmr.msra.gmra.mrb[64].mxu1 %vm966_vm0, %v4553_v59  ;;  %v10378_v28 = vpop.eup %10377 }
0x143e   : > { %9378 = vmatpush3.bf16.xpose.msk.msra.mxu1 %vm12144_vm3, %v9373_v37  ;;  %v4534_v60 = vpop.xlane.xlu0 %4533  ;;  %v4555_v21 = vmul.f32 %v10378_v28, %v13043_v12 }
0x143f   : > { %10383 = vrcp.f32 %v4534_v60  ;;  %9381 = vmatprep.subr.msk.bf16.mxu1 %vm12144_vm3, %v9379_v40 }
0x1441   : > { %v10380_v43 = vpop.eup %10379 }
0x1442   : > { %v10057_v44 = vpop.permute.xlu0 %10056  ;;  %v4554_v10 = vmul.f32 %v10380_v43, %v13047_v14  ;;  %v10064_v14 = vunpack.i.h.bf16 %v10062_v22 }
0x1443   : > { %v10059_v35 = vunpack.i.h.bf16 %v10057_v44  ;;  %v10058_v55 = vunpack.i.l.bf16 %v10057_v44 }
0x1444   : > { %8786 = vmatprep.mubr.msk.f32.mxu1 %vm966_vm0, %v4554_v10  ;;  %v9391_v16 = vpack.c.bf16 %v10064_v14, %v10063_v32 }
0x1445   : > { %v9385_v61 = vpack.c.bf16 %v10059_v35, %v10058_v55  ;;  %8787 = vmatmul.mubr.msk.f32.gmra.mrb[66].mxu1 %vm966_vm0, %v4555_v21  ;;  %v10382_v62 = vpop.eup %10381 }
0x1446   : > { %9384 = vmatpush3.bf16.xpose.msk.msra.mxu1 %vm12144_vm3, %v9379_v40  ;;  %v4716_v58 = vpop.permute.xlu0 %4715  ;;  %v4557_v6 = vmul.f32 %v10382_v62, %v13051_v50 }
0x1447   : > { %9387 = vmatprep.subr.msk.bf16.mxu1 %vm12144_vm3, %v9385_v61 }
0x1449   : > { %v10384_v5 = vpop.eup %10383 }
0x144a   : > { %v4720_v17 = vpop.permute.xlu0 %4719  ;;  %v4556_v12 = vmul.f32 %v10384_v5, %v13055_v19 }
0x144c   : > { %8789 = vmatprep.mubr.msk.f32.mxu1 %vm966_vm0, %v4556_v12 }
0x144d   : > { %8790 = vmatmul.mubr.msk.f32.gmra.mrb[68].mxu1 %vm966_vm0, %v4557_v6 }
0x144e   : > { %9390 = vmatpush3.bf16.xpose.msk.msra.mxu1 %vm12144_vm3, %v9385_v61  ;;  %v4724_v37 = vpop.permute.xlu0 %4723 }
0x144f   : > { %9393 = vmatprep.subr.msk.bf16.mxu1 %vm12144_vm3, %v9391_v16 }
0x1452   : > { %v4728_v0 = vpop.permute.xlu0 %4727 }
0x1456   : > { %9396 = vmatpush3.bf16.xpose.msk.msra.mxu1 %vm12144_vm3, %v9391_v16  ;;  %v10067_v29 = vpop.permute.xlu0 %10066 }
0x1457   : > { %v10069_v19 = vunpack.i.h.bf16 %v10067_v29  ;;  %v10068_v2 = vunpack.i.l.bf16 %v10067_v29 }
0x1459   : > { %v9413_v50 = vpack.c.bf16 %v10069_v19, %v10068_v2 }
0x145a   : > { %v10077_v59 = vpop.permute.xlu0 %10076 }
0x145b   : > { %9415 = vmatprep.subr.msk.bf16.mxu1 %vm12144_vm3, %v9413_v50 }
0x145e   : > { %v5386_v28 = vpop.permute.xlu0 %5385 }
0x1462   : > { %v5390_v55 = vpop.permute.xlu0 %5389 }
0x1466   : > { %v5394_v61 = vpop.permute.xlu0 %5393 }
0x146b   : > { %v4543_v20 = vpop.xlane.xlu1 %4542 }
0x146c   : > { %10385 = vrcp.f32 %v4543_v20 }
0x146f   : > { %v4540_v56 = vpop.xlane.xlu1 %4539 }
0x1470   : > { %10387 = vrcp.f32 %v4540_v56 }
0x1473   : > { %v4722_v39 = vpop.permute.xlu1 %4721 }
0x1476   : > { %v10386_v3 = vpop.eup %10385 }
0x1477   : > { %v4726_v51 = vpop.permute.xlu1 %4725  ;;  %v4559_v23 = vmul.f32 %v10386_v3, %v13077_v46  ;;  %v10079_v46 = vunpack.i.h.bf16 %v10077_v59 }
0x147a   : > { %v10388_v18 = vpop.eup %10387 }
0x147b   : > { %v4730_v30 = vpop.permute.xlu1 %4729  ;;  %v4558_v4 = vmul.f32 %v10388_v18, %v13083_v38  ;;  %v10078_v38 = vunpack.i.l.bf16 %v10077_v59 }
0x147d   : > { %8792 = vmatprep.mubr.msk.f32.mxu1 %vm966_vm0, %v4558_v4  ;;  %v9425_v40 = vpack.c.bf16 %v10079_v46, %v10078_v38 }
0x147e   : > { %8793 = vmatmul.mubr.msk.f32.gmra.mrb[70].mxu1 %vm966_vm0, %v4559_v23 }
0x147f   : > { %v10072_v48 = vpop.permute.xlu1 %10071  ;;  %8811 = vmatprep.mubr.msk.f32.mxu1 %vm1396_vm2, %v4716_v58  ;;  %v5398_v58 = vpop.permute.xlu0 %5397 }
0x1480   : > { %v10074_v42 = vunpack.i.h.bf16 %v10072_v48  ;;  %v10073_v24 = vunpack.i.l.bf16 %v10072_v48 }
0x1482   : > { %v9419_v27 = vpack.c.bf16 %v10074_v42, %v10073_v24  ;;  %8812 = vmatmul.mubr.msk.f32.vlgmr.msra.gmra.mrb[72].mxu1 %vm1396_vm2, %v4718_v34 }
0x1483   : > { %9418 = vmatpush3.bf16.xpose.msk.msra.mxu1 %vm12144_vm3, %v9413_v50  ;;  %8814 = vmatprep.mubr.msk.f32.mxu1 %vm1396_vm2, %v4720_v17  ;;  %v10082_v60 = vpop.permute.xlu1 %10081 }
0x1484   : > { %9421 = vmatprep.subr.msk.bf16.mxu1 %vm12144_vm3, %v9419_v27  ;;  %v10084_v43 = vunpack.i.h.bf16 %v10082_v60  ;;  %v10083_v44 = vunpack.i.l.bf16 %v10082_v60 }
0x1486   : > { %8815 = vmatmul.mubr.msk.f32.gmra.mrb[74].mxu1 %vm1396_vm2, %v4722_v39  ;;  %v9431_v10 = vpack.c.bf16 %v10084_v43, %v10083_v44 }
0x1487   : > { %8817 = vmatprep.mubr.msk.f32.mxu1 %vm1396_vm2, %v4724_v37  ;;  %v5388_v35 = vpop.permute.xlu1 %5387 }
0x148a   : > { %8818 = vmatmul.mubr.msk.f32.gmra.mrb[76].mxu1 %vm1396_vm2, %v4726_v51 }
0x148b   : > { %9424 = vmatpush3.bf16.xpose.msk.msra.mxu1 %vm12144_vm3, %v9419_v27  ;;  %8820 = vmatprep.mubr.msk.f32.mxu1 %vm1396_vm2, %v4728_v0  ;;  %v5392_v21 = vpop.permute.xlu1 %5391 }
0x148c   : > { %9427 = vmatprep.subr.msk.bf16.mxu1 %vm12144_vm3, %v9425_v40 }
0x148e   : > { %8821 = vmatmul.mubr.msk.f32.gmra.mrb[78].mxu1 %vm1396_vm2, %v4730_v30 }
0x148f   : > { %8895 = vmatprep.mubr.msk.f32.mxu1 %vm1396_vm2, %v5386_v28  ;;  %v5396_v22 = vpop.permute.xlu1 %5395 }
0x1493   : > { %9430 = vmatpush3.bf16.xpose.msk.msra.mxu1 %vm12144_vm3, %v9425_v40  ;;  %v5400_v62 = vpop.permute.xlu1 %5399 }
0x1494   : > { %9433 = vmatprep.subr.msk.bf16.mxu1 %vm12144_vm3, %v9431_v10 }
0x149b   : > { %9436 = vmatpush3.bf16.xpose.msk.msra.mxu1 %vm12144_vm3, %v9431_v10 }
0x14a2   : > { %8896 = vmatmul.mubr.msk.f32.vlgmr.msra.gmra.mrb[80].mxu1 %vm1396_vm2, %v5388_v35 }
0x14a3   : > { %8898 = vmatprep.mubr.msk.f32.mxu1 %vm1396_vm2, %v5390_v55 }
0x14a6   : > { %8899 = vmatmul.mubr.msk.f32.gmra.mrb[82].mxu1 %vm1396_vm2, %v5392_v21 }
0x14a7   : > { %8901 = vmatprep.mubr.msk.f32.mxu1 %vm1396_vm2, %v5394_v61 }
0x14aa   : > { %8902 = vmatmul.mubr.msk.f32.gmra.mrb[84].mxu1 %vm1396_vm2, %v5396_v22 }
0x14ab   : > { %8904 = vmatprep.mubr.msk.f32.mxu1 %vm1396_vm2, %v5398_v58 }
0x14ae   : > { %8905 = vmatmul.mubr.msk.f32.gmra.mrb[86].mxu1 %vm1396_vm2, %v5400_v62 }
0x1510   : > { %v13177_v5 = vpop.f32.mrb[64].mxu1 }
0x1511   : > { %v13179_v14 = vpop.f32.mrb[65].mxu1 }
0x1518   : > { %v13181_v32 = vpop.f32.mrb[66].mxu1 }
0x1519   : > { %v13183_v17 = vpop.f32.mrb[67].mxu1 }
0x1520   : > { %v13185_v12 = vpop.f32.mrb[68].mxu1 }
0x1521   : > { %v13187_v6 = vpop.f32.mrb[69].mxu1 }
0x1551   : > { %v13189_v16 = vpop.f32.mrb[70].mxu1 }
0x1552   : > { %v13191_v37 = vpop.f32.mrb[71].mxu1 }
0x1555   : > { %v8813_v0 = vpop.f32.mrb[72].mxu1 }
0x1556   : > { %v4845_v29 = vpop.f32.mrb[73].mxu1  ;;  %v4887_v19 = vsel %vm966_vm0, %v8813_v0, -inf }
0x1557   : > { %4888 = vmax.xlane.f32.xlu1 %v4887_v19  ;;  %v4884_v2 = vsel %vm966_vm0, %v4845_v29, -inf }
0x1558   : > { %4885 = vmax.xlane.f32.xlu0 %v4884_v2 }
0x1559   : > { %v8816_v50 = vpop.f32.mrb[74].mxu1 }
0x155a   : > { %v4855_v34 = vpop.f32.mrb[75].mxu1  ;;  %v4893_v20 = vsel %vm966_vm0, %v8816_v50, -inf }
0x155b   : > { %v4890_v3 = vsel %vm966_vm0, %v4855_v34, -inf }
0x155c   : > { %4894 = vmax.xlane.f32.xlu0 %v4893_v20 }
0x155d   : > { %v8819_v56 = vpop.f32.mrb[76].mxu1 }
0x155e   : > { %v4865_v39 = vpop.f32.mrb[77].mxu1  ;;  %v4899_v51 = vsel %vm966_vm0, %v8819_v56, -inf }
0x155f   : > { %4900 = vmax.xlane.f32.xlu1 %v4899_v51  ;;  %v4896_v23 = vsel %vm966_vm0, %v4865_v39, -inf }
0x1560   : > { %4891 = vmax.xlane.f32.xlu0 %v4890_v3 }
0x1561   : > { %v8822_v18 = vpop.f32.mrb[78].mxu1 }
0x1562   : > { %v4875_v30 = vpop.f32.mrb[79].mxu1  ;;  %v4905_v4 = vsel %vm966_vm0, %v8822_v18, -inf }
0x1563   : > { %4906 = vmax.xlane.f32.xlu1 %v4905_v4  ;;  %v4902_v48 = vsel %vm966_vm0, %v4875_v30, -inf }
0x1564   : > { %4897 = vmax.xlane.f32.xlu0 %v4896_v23 }
0x1568   : > { %4903 = vmax.xlane.f32.xlu0 %v4902_v48 }
0x1574   : > { %10091 = vrot.lane.b32.xlu1 %v12955_v53, %s11235_s22 }
0x1575   : > { %v13203_v42 = vpop.f32.mrb[80].mxu1 }
0x1576   : > { %v13205_v24 = vpop.f32.mrb[81].mxu1 }
0x1579   : > { %v13207_v27 = vpop.f32.mrb[82].mxu1 }
0x157a   : > { %v13209_v59 = vpop.f32.mrb[83].mxu1 }
0x157d   : > { %v13211_v46 = vpop.f32.mrb[84].mxu1 }
0x157e   : > { %v13213_v38 = vpop.f32.mrb[85].mxu1  ;;  %10086 = vrot.lane.b32.xlu0 %v12945_v25, %s11235_s22 }
0x1581   : > { %v13217_v40 = vpop.f32.mrb[86].mxu1 }
0x1582   : > { %v13219_v60 = vpop.f32.mrb[87].mxu1 }
0x15e4   : > { %v4889_v28 = vpop.xlane.xlu1 %4888 }
0x15e5   : > { %v4909_v43 = vsub.f32 %v8813_v0, %v4889_v28  ;;  %v4886_v44 = vpop.xlane.xlu0 %4885 }
0x15e6   : > { %v4908_v10 = vsub.f32 %v4845_v29, %v4886_v44 }
0x15e7   : > { %v4918_v35 = vmul.f32 1.442695, %v4909_v43 }
0x15e8   : > { %v4916_v55 = vmul.f32 1.442695, %v4908_v10 }
0x15e9   : > { %10389 = vpow2.f32 %v4918_v35  ;;  %v4895_v21 = vpop.xlane.xlu0 %4894 }
0x15ea   : > { %10391 = vpow2.f32 %v4916_v55  ;;  %v4911_v61 = vsub.f32 %v8816_v50, %v4895_v21 }
0x15ec   : > { %v4922_v22 = vmul.f32 1.442695, %v4911_v61  ;;  %v4901_v58 = vpop.xlane.xlu1 %4900 }
0x15ed   : > { %v4913_v62 = vsub.f32 %v8819_v56, %v4901_v58  ;;  %v4892_v19 = vpop.xlane.xlu0 %4891 }
0x15ee   : > { %10393 = vpow2.f32 %v4922_v22  ;;  %v4910_v2 = vsub.f32 %v4855_v34, %v4892_v19 }
0x15ef   : > { %v4926_v20 = vmul.f32 1.442695, %v4913_v62 }
0x15f0   : > { %v4920_v51 = vmul.f32 1.442695, %v4910_v2  ;;  %v4907_v3 = vpop.xlane.xlu1 %4906 }
0x15f1   : > { %10395 = vpow2.f32 %v4926_v20  ;;  %v4915_v4 = vsub.f32 %v8822_v18, %v4907_v3  ;;  %v4898_v0 = vpop.xlane.xlu0 %4897 }
0x15f2   : > { %10397 = vpow2.f32 %v4920_v51  ;;  %v4912_v29 = vsub.f32 %v4865_v39, %v4898_v0 }
0x15f3   : > { %v13221_v23 = vpop.eup %10389  ;;  %v4930_v48 = vmul.f32 1.442695, %v4915_v4 }
0x15f4   : > { %v13223_v28 = vpop.eup %10391  ;;  %v4924_v50 = vmul.f32 1.442695, %v4912_v29  ;;  %v4935_v56 = vsel %vm966_vm0, %v13221_v23, 0.0  ;;  %v10092_v39 = vpop.permute.xlu1 %10091 }
0x15f5   : > { %10399 = vpow2.f32 %v4930_v48  ;;  %4936 = vadd.xlane.f32.xlu1 %v4935_v56  ;;  %v4904_v34 = vpop.xlane.xlu0 %4903  ;;  %v4932_v43 = vsel %vm966_vm0, %v13223_v28, 0.0  ;;  %v10094_v58 = vunpack.i.h.bf16 %v10092_v39  ;;  %v10093_v62 = vunpack.i.l.bf16 %v10092_v39 }
0x15f6   : > { %10401 = vpow2.f32 %v4924_v50  ;;  %v4914_v18 = vsub.f32 %v4875_v30, %v4904_v34  ;;  %4933 = vadd.xlane.f32.xlu0 %v4932_v43 }
0x15f7   : > { %v9401_v3 = vpack.c.bf16 %v10094_v58, %v10093_v62 }
0x15f8   : > { %v13229_v44 = vpop.eup %10393  ;;  %v4928_v10 = vmul.f32 1.442695, %v4914_v18 }
0x15f9   : > { %v10087_v35 = vpop.permute.xlu0 %10086  ;;  %v4941_v55 = vsel %vm966_vm0, %v13229_v44, 0.0 }
0x15fa   : > { %10403 = vpow2.f32 %v4928_v10  ;;  %v10089_v21 = vunpack.i.h.bf16 %v10087_v35  ;;  %v10088_v61 = vunpack.i.l.bf16 %v10087_v35  ;;  %4942 = vadd.xlane.f32.xlu1 %v4941_v55 }
0x15fb   : > { %v13233_v22 = vpop.eup %10395 }
0x15fc   : > { %v13235_v19 = vpop.eup %10397  ;;  %v9397_v30 = vpack.c.bf16 %v10089_v21, %v10088_v61  ;;  %v4947_v2 = vsel %vm966_vm0, %v13233_v22, 0.0 }
0x15fd   : > { %v4938_v20 = vsel %vm966_vm0, %v13235_v19, 0.0 }
0x15fe   : > { %4948 = vadd.xlane.f32.xlu1 %v4947_v2  ;;  %4939 = vadd.xlane.f32.xlu0 %v4938_v20 }
0x15ff   : > { %v13241_v51 = vpop.eup %10399  ;;  %9398 = vmatprep.subr.bf16.mxu0 %v9397_v30 }
0x1600   : > { %v13243_v4 = vpop.eup %10401  ;;  %9400 = vmatpush3.bf16.msra.mxu0 %v9397_v30  ;;  %v4953_v0 = vsel %vm966_vm0, %v13241_v51, 0.0 }
0x1601   : > { %9402 = vmatprep.subr.bf16.mxu0 %v9401_v3  ;;  %v4944_v29 = vsel %vm966_vm0, %v13243_v4, 0.0 }
0x1602   : > { %4954 = vadd.xlane.f32.xlu1 %v4953_v0  ;;  %4945 = vadd.xlane.f32.xlu0 %v4944_v29 }
0x1604   : > { %v13249_v48 = vpop.eup %10403  ;;  %9404 = vmatpush3.bf16.msra.mxu0 %v9401_v3 }
0x1605   : > { %v4950_v50 = vsel %vm966_vm0, %v13249_v48, 0.0 }
0x1606   : > { %4951 = vadd.xlane.f32.xlu1 %v4950_v50 }
0x1617   : > { %10101 = vrot.lane.b32.xlu1 %v12975_v15, %s11235_s22 }
0x1618   : > { %10096 = vrot.lane.b32.xlu0 %v12965_v1, %s11235_s22  ;;  %s13712_s22 = scalar_lea.hbm %s13884_s2, %s7946_s9 }
0x161b   : > { %10111 = vrot.lane.b32.xlu1 %v12955_v53, %s11236_s23 }
0x161c   : > { %10106 = vrot.lane.b32.xlu0 %v12945_v25, %s11236_s23 }
0x161f   : > { %10121 = vrot.lane.b32.xlu1 %v12975_v15, %s11236_s23 }
0x1620   : > { %10116 = vrot.lane.b32.xlu0 %v12965_v1, %s11236_s23  ;;  %s7291_s23 = scalar_lea.sflag [#allocation4], %s11876_s27 }
0x1623   : > { %5936 = vrot.lane.b32.xlu1 %v12937_v57, %s11237_s25  ;;  %v5554_v57 = vsel %vm966_vm0, %v13205_v24, -inf }
0x1624   : > { %5934 = vrot.lane.b32.xlu0 %v12939_v9, %s11237_s25  ;;  %v5560_v9 = vsel %vm966_vm0, %v13209_v59, -inf }
0x1627   : > { %5940 = vrot.lane.b32.xlu1 %v12947_v8, %s11237_s25  ;;  %v5557_v8 = vsel %vm966_vm0, %v13203_v42, -inf }
0x1628   : > { %5938 = vrot.lane.b32.xlu0 %v12949_v7, %s11237_s25  ;;  %v5563_v7 = vsel %vm966_vm0, %v13207_v27, -inf }
0x162b   : > { %5944 = vrot.lane.b32.xlu1 %v12957_v54, %s11237_s25  ;;  %v5569_v54 = vsel %vm966_vm0, %v13211_v46, -inf }
0x162c   : > { %5942 = vrot.lane.b32.xlu0 %v12959_v33, %s11237_s25  ;;  %v5566_v33 = vsel %vm966_vm0, %v13213_v38, -inf }
0x162f   : > { %5948 = vrot.lane.b32.xlu1 %v12969_v11, %s11237_s25  ;;  %v5575_v11 = vsel %vm966_vm0, %v13217_v40, -inf }
0x1630   : > { %5946 = vrot.lane.b32.xlu0 %v12971_v13, %s11237_s25  ;;  %v5572_v13 = vsel %vm966_vm0, %v13219_v60, -inf  ;;  %s11095_s25 = scalar_lea.vmem %s13707_s30, 256 }
0x1631   : > { %p11096_p2 = scmp.ne.s32.totalorder %s13707_s30, %s11095_s25 }
0x1633   : > { %p11097_p10 = pnand %p11096_p2, %p13885_p7 }
0x1635   : > { %p11098_p1 = pneg %p11097_p10 }
0x164f   : > { %5555 = vmax.xlane.f32.xlu0 %v5554_v57 }
0x1653   : > { %5561 = vmax.xlane.f32.xlu0 %v5560_v9  ;;  %5558 = vmax.xlane.f32.xlu1 %v5557_v8 }
0x1657   : > { %5564 = vmax.xlane.f32.xlu0 %v5563_v7  ;;  %5570 = vmax.xlane.f32.xlu1 %v5569_v54 }
0x165b   : > { %5567 = vmax.xlane.f32.xlu0 %v5566_v33  ;;  %5576 = vmax.xlane.f32.xlu1 %v5575_v11 }
0x165f   : > { %5573 = vmax.xlane.f32.xlu0 %v5572_v13 }
0x166c   : > { %10131 = vrot.lane.b32.xlu1 %v12955_v53, %s11238_s20 }
0x1675   : > { %10126 = vrot.lane.b32.xlu0 %v12945_v25, %s11238_s20 }
0x1682   : > { %v4937_v56 = vpop.xlane.xlu1 %4936 }
0x1683   : > { %v4934_v34 = vpop.xlane.xlu0 %4933 }
0x1684   : > { %10405 = vrcp.f32 %v4934_v34 }
0x1685   : > { %10407 = vrcp.f32 %v4937_v56 }
0x1687   : > { %v4943_v43 = vpop.xlane.xlu1 %4942 }
0x168b   : > { %v4949_v18 = vpop.xlane.xlu1 %4948  ;;  %v4940_v39 = vpop.xlane.xlu0 %4939 }
0x168c   : > { %10409 = vrcp.f32 %v4940_v39 }
0x168d   : > { %10411 = vrcp.f32 %v4943_v43 }
0x168e   : > { %v10406_v10 = vpop.eup %10405 }
0x168f   : > { %v4955_v35 = vpop.xlane.xlu1 %4954  ;;  %v4946_v55 = vpop.xlane.xlu0 %4945  ;;  %v4964_v21 = vmul.f32 %v10406_v10, %v13223_v28 }
0x1690   : > { %10413 = vrcp.f32 %v4946_v55  ;;  %v10408_v8 = vpop.eup %10407 }
0x1691   : > { %8839 = vmatprep.mubr.msk.f32.mxu0 %vm966_vm0, %v4964_v21  ;;  %10415 = vrcp.f32 %v4949_v18  ;;  %v4965_v56 = vmul.f32 %v10408_v8, %v13221_v23 }
0x1693   : > { %v4952_v61 = vpop.xlane.xlu1 %4951  ;;  %v10097_v58 = vpop.permute.xlu0 %10096 }
0x1694   : > { %v10099_v62 = vunpack.i.h.bf16 %v10097_v58  ;;  %v10098_v30 = vunpack.i.l.bf16 %v10097_v58  ;;  %10417 = vrcp.f32 %v4952_v61 }
0x1695   : > { %10419 = vrcp.f32 %v4955_v35 }
0x1696   : > { %v9405_v2 = vpack.c.bf16 %v10099_v62, %v10098_v30  ;;  %v10410_v33 = vpop.eup %10409 }
0x1697   : > { %v10102_v20 = vpop.permute.xlu1 %10101  ;;  %v10107_v3 = vpop.permute.xlu0 %10106  ;;  %v4966_v39 = vmul.f32 %v10410_v33, %v13235_v19 }
0x1698   : > { %v10104_v0 = vunpack.i.h.bf16 %v10102_v20  ;;  %v10103_v29 = vunpack.i.l.bf16 %v10102_v20  ;;  %v10109_v50 = vunpack.i.h.bf16 %v10107_v3  ;;  %v10108_v57 = vunpack.i.l.bf16 %v10107_v3  ;;  %9406 = vmatprep.subr.bf16.mxu0 %v9405_v2  ;;  %v10412_v43 = vpop.eup %10411 }
0x1699   : > { %9408 = vmatpush3.bf16.msra.mxu0 %v9405_v2  ;;  %v4967_v35 = vmul.f32 %v10412_v43, %v13229_v44 }
0x169a   : > { %v9409_v28 = vpack.c.bf16 %v10104_v0, %v10103_v29  ;;  %v9453_v9 = vpack.c.bf16 %v10109_v50, %v10108_v57  ;;  %v10414_v10 = vpop.eup %10413 }
0x169b   : > { %v10112_v7 = vpop.permute.xlu1 %10111  ;;  %v10117_v54 = vpop.permute.xlu0 %10116  ;;  %v4968_v61 = vmul.f32 %v10414_v10, %v13243_v4 }
0x169c   : > { %v10114_v11 = vunpack.i.h.bf16 %v10112_v7  ;;  %v10113_v13 = vunpack.i.l.bf16 %v10112_v7  ;;  %9410 = vmatprep.subr.bf16.mxu0 %v9409_v28  ;;  %9455 = vmatprep.subr.msk.bf16.mxu1 %vm12144_vm3, %v9453_v9  ;;  %v10119_v55 = vunpack.i.h.bf16 %v10117_v54  ;;  %v10118_v21 = vunpack.i.l.bf16 %v10117_v54  ;;  %v10416_v23 = vpop.eup %10415 }
0x169d   : > { %9412 = vmatpush3.bf16.msra.mxu0 %v9409_v28  ;;  %9458 = vmatpush3.bf16.xpose.msk.msra.mxu1 %vm12144_vm3, %v9453_v9  ;;  %v4969_v30 = vmul.f32 %v10416_v23, %v13233_v22 }
0x169e   : > { %v9459_v34 = vpack.c.bf16 %v10114_v11, %v10113_v13  ;;  %v10418_v58 = vpop.eup %10417  ;;  %v9465_v62 = vpack.c.bf16 %v10119_v55, %v10118_v21 }
0x169f   : > { %v5935_v18 = vpop.permute.xlu0 %5934  ;;  %v10122_v19 = vpop.permute.xlu1 %10121  ;;  %v4970_v44 = vmul.f32 %v10418_v58, %v13249_v48 }
0x16a0   : > { %8840 = vmatmul.mubr.msk.f32.vlgmr.msra.gmra.mrb[64].mxu0 %vm966_vm0, %v4965_v56  ;;  %9461 = vmatprep.subr.msk.bf16.mxu1 %vm12144_vm3, %v9459_v34  ;;  %v10420_v2 = vpop.eup %10419  ;;  %v10124_v20 = vunpack.i.h.bf16 %v10122_v19  ;;  %v10123_v4 = vunpack.i.l.bf16 %v10122_v19 }
0x16a1   : > { %8965 = vmatprep.mubr.msk.f32.mxu1 %vm1396_vm2, %v5935_v18  ;;  %8842 = vmatprep.mubr.msk.f32.mxu0 %vm966_vm0, %v4966_v39  ;;  %v4971_v3 = vmul.f32 %v10420_v2, %v13241_v51  ;;  %v5126_v2 = vld [vmem:[#allocation14 + $0x28] sm:$0xff] }
0x16a2   : > { %v9471_v0 = vpack.c.bf16 %v10124_v20, %v10123_v4  ;;  %8851 = vmatprep.subr.mxu0 %v5126_v2  ;;  %v4714_v20 = vld [vmem:[#allocation14 + $0x20] sm:$0xff] }
0x16a3   : > { %v5937_v22 = vpop.permute.xlu1 %5936  ;;  %v5939_v48 = vpop.permute.xlu0 %5938  ;;  %8852 = vmatpush3.msra.mxu0 %v5126_v2 }
0x16a4   : > { %8843 = vmatmul.mubr.msk.f32.gmra.mrb[66].mxu0 %vm966_vm0, %v4967_v35  ;;  %8865 = vmatprep.subr.mxu0 %v4714_v20 }
0x16a5   : > { %8845 = vmatprep.mubr.msk.f32.mxu0 %vm966_vm0, %v4968_v61  ;;  %9464 = vmatpush3.bf16.xpose.msk.msra.mxu1 %vm12144_vm3, %v9459_v34 }
0x16a6   : > { %9467 = vmatprep.subr.msk.bf16.mxu1 %vm12144_vm3, %v9465_v62 }
0x16a7   : > { %v5941_v29 = vpop.permute.xlu1 %5940  ;;  %v5943_v51 = vpop.permute.xlu0 %5942 }
0x16a8   : > { %8846 = vmatmul.mubr.msk.f32.gmra.mrb[68].mxu0 %vm966_vm0, %v4969_v30 }
0x16a9   : > { %8848 = vmatprep.mubr.msk.f32.mxu0 %vm966_vm0, %v4970_v44 }
0x16ab   : > { %v5945_v50 = vpop.permute.xlu1 %5944  ;;  %v5947_v57 = vpop.permute.xlu0 %5946 }
0x16ac   : > { %8849 = vmatmul.mubr.msk.f32.gmra.mrb[70].mxu0 %vm966_vm0, %v4971_v3 }
0x16ad   : > { %9470 = vmatpush3.bf16.xpose.msk.msra.mxu1 %vm12144_vm3, %v9465_v62 }
0x16ae   : > { %9473 = vmatprep.subr.msk.bf16.mxu1 %vm12144_vm3, %v9471_v0 }
0x16af   : > { %v5949_v28 = vpop.permute.xlu1 %5948 }
0x16b5   : > { %9476 = vmatpush3.bf16.xpose.msk.msra.mxu1 %vm12144_vm3, %v9471_v0 }
0x16bc   : > { %8966 = vmatmul.mubr.msk.f32.vlgmr.msra.gmra.mrb[88].mxu1 %vm1396_vm2, %v5937_v22 }
0x16bd   : > { %8968 = vmatprep.mubr.msk.f32.mxu1 %vm1396_vm2, %v5939_v48 }
0x16c0   : > { %8969 = vmatmul.mubr.msk.f32.gmra.mrb[90].mxu1 %vm1396_vm2, %v5941_v29 }
0x16c1   : > { %8971 = vmatprep.mubr.msk.f32.mxu1 %vm1396_vm2, %v5943_v51 }
0x16c4   : > { %8972 = vmatmul.mubr.msk.f32.gmra.mrb[92].mxu1 %vm1396_vm2, %v5945_v50 }
0x16c5   : > { %8974 = vmatprep.mubr.msk.f32.mxu1 %vm1396_vm2, %v5947_v57 }
0x16c8   : > { %8975 = vmatmul.mubr.msk.f32.gmra.mrb[94].mxu1 %vm1396_vm2, %v5949_v28 }
0x16dc   : > { %v5556_v49 = vpop.xlane.xlu0 %5555 }
0x16dd   : > { %v5578_v9 = vsub.f32 %v13205_v24, %v5556_v49 }
0x16df   : > { %v5586_v8 = vmul.f32 1.442695, %v5578_v9 }
0x16e0   : > { %v5559_v7 = vpop.xlane.xlu1 %5558  ;;  %v5562_v54 = vpop.xlane.xlu0 %5561 }
0x16e1   : > { %10421 = vpow2.f32 %v5586_v8  ;;  %v5579_v33 = vsub.f32 %v13203_v42, %v5559_v7  ;;  %v5580_v11 = vsub.f32 %v13209_v59, %v5562_v54 }
0x16e3   : > { %v5588_v13 = vmul.f32 1.442695, %v5579_v33  ;;  %v5590_v56 = vmul.f32 1.442695, %v5580_v11 }
0x16e4   : > { %v5571_v34 = vpop.xlane.xlu1 %5570  ;;  %v5565_v43 = vpop.xlane.xlu0 %5564 }
0x16e5   : > { %10423 = vpow2.f32 %v5588_v13  ;;  %v5583_v18 = vsub.f32 %v13211_v46, %v5571_v34  ;;  %v5581_v39 = vsub.f32 %v13207_v27, %v5565_v43 }
0x16e6   : > { %10425 = vpow2.f32 %v5590_v56 }
0x16e7   : > { %v5592_v10 = vmul.f32 1.442695, %v5581_v39  ;;  %v5596_v24 = vmul.f32 1.442695, %v5583_v18 }
0x16e8   : > { %v5577_v55 = vpop.xlane.xlu1 %5576  ;;  %v5568_v21 = vpop.xlane.xlu0 %5567 }
0x16e9   : > { %v5585_v35 = vsub.f32 %v13217_v40, %v5577_v55  ;;  %v5582_v42 = vsub.f32 %v13213_v38, %v5568_v21  ;;  %10427 = vpow2.f32 %v5592_v10 }
0x16ea   : > { %10429 = vpow2.f32 %v5596_v24 }
0x16eb   : > { %v13348_v59 = vpop.eup %10421  ;;  %v5594_v23 = vmul.f32 1.442695, %v5582_v42  ;;  %v5600_v61 = vmul.f32 1.442695, %v5585_v35 }
0x16ec   : > { %v5574_v58 = vpop.xlane.xlu0 %5573  ;;  %v5602_v46 = vsel %vm966_vm0, %v13348_v59, 0.0  ;;  %v10132_v11 = vpop.permute.xlu1 %10131 }
0x16ed   : > { %v5584_v27 = vsub.f32 %v13219_v60, %v5574_v58  ;;  %5603 = vadd.xlane.f32.xlu0 %v5602_v46  ;;  %10431 = vpow2.f32 %v5594_v23  ;;  %v10134_v10 = vunpack.i.h.bf16 %v10132_v11  ;;  %v10133_v24 = vunpack.i.l.bf16 %v10132_v11 }
0x16ee   : > { %10433 = vpow2.f32 %v5600_v61 }
0x16ef   : > { %v13353_v62 = vpop.eup %10423  ;;  %v5598_v38 = vmul.f32 1.442695, %v5584_v27  ;;  %v9441_v35 = vpack.c.bf16 %v10134_v10, %v10133_v24 }
0x16f0   : > { %v13355_v19 = vpop.eup %10425  ;;  %v5605_v40 = vsel %vm966_vm0, %v13353_v62, 0.0  ;;  %v10127_v57 = vpop.permute.xlu0 %10126 }
0x16f1   : > { %5606 = vadd.xlane.f32.xlu1 %v5605_v40  ;;  %v5608_v30 = vsel %vm966_vm0, %v13355_v19, 0.0  ;;  %10435 = vpow2.f32 %v5598_v38  ;;  %v10129_v28 = vunpack.i.h.bf16 %v10127_v57  ;;  %v10128_v49 = vunpack.i.l.bf16 %v10127_v57 }
0x16f2   : > { %5609 = vadd.xlane.f32.xlu0 %v5608_v30 }
0x16f3   : > { %v13361_v44 = vpop.eup %10427  ;;  %v9437_v7 = vpack.c.bf16 %v10129_v28, %v10128_v49 }
0x16f4   : > { %v5611_v60 = vsel %vm966_vm0, %v13361_v44, 0.0  ;;  %v13365_v4 = vpop.eup %10429 }
0x16f5   : > { %5612 = vadd.xlane.f32.xlu1 %v5611_v60  ;;  %v5617_v0 = vsel %vm966_vm0, %v13365_v4, 0.0 }
0x16f7   : > { %v13367_v3 = vpop.eup %10431 }
0x16f8   : > { %v5614_v22 = vsel %vm966_vm0, %v13367_v3, 0.0  ;;  %v13373_v48 = vpop.eup %10433 }
0x16f9   : > { %5618 = vadd.xlane.f32.xlu1 %v5617_v0  ;;  %5615 = vadd.xlane.f32.xlu0 %v5614_v22  ;;  %v5623_v29 = vsel %vm966_vm0, %v13373_v48, 0.0 }
0x16fb   : > { %v13377_v51 = vpop.eup %10435 }
0x16fc   : > { %v5620_v50 = vsel %vm966_vm0, %v13377_v51, 0.0 }
0x16fd   : > { %5624 = vadd.xlane.f32.xlu1 %v5623_v29 }
0x1701   : > { %5621 = vadd.xlane.f32.xlu1 %v5620_v50 }
0x170f   : > { %10136 = vrot.lane.b32.xlu0 %v12965_v1, %s11238_s20 }
0x1712   : > { %10141 = vrot.lane.b32.xlu1 %v12975_v15, %s11238_s20  ;;  %s11099_s20 = sshll.u32 %s11240_s0, 4  ;;  %s11100_s20 = int_to_ptr.vmem [resolvable:$false] %s11099_s20 }
0x1713   : > { %p11102_p11 = scmp.lt.s32.totalorder %s13707_s30, %s11100_s20 }
0x1773   : > { %v8841_v9 = vpop.f32.mrb[64].mxu0 }
0x1774   : > { %v5086_v8 = vpop.f32.mrb[65].mxu0 }
0x1775   : > { %8853 = vmatprep.mubr.msk.f32.mxu0 %vm1396_vm2, %v5086_v8 }
0x1776   : > { %8854 = vmatmul.mubr.msk.f32.vlgmr.msra.gmra.mrb[72].mxu0 %vm1396_vm2, %v8841_v9 }
0x1777   : > { %8866 = vmatpush3.msra.mxu0 %v4714_v20  ;;  %v8844_v54 = vpop.f32.mrb[66].mxu0 }
0x1778   : > { %9438 = vmatprep.subr.bf16.mxu0 %v9437_v7  ;;  %v5096_v33 = vpop.f32.mrb[67].mxu0 }
0x1779   : > { %8856 = vmatprep.mubr.msk.f32.mxu0 %vm1396_vm2, %v5096_v33 }
0x177a   : > { %8857 = vmatmul.mubr.msk.f32.gmra.mrb[74].mxu0 %vm1396_vm2, %v8844_v54  ;;  %v5604_v34 = vpop.xlane.xlu0 %5603 }
0x177b   : > { %v8847_v13 = vpop.f32.mrb[68].mxu0  ;;  %10437 = vrcp.f32 %v5604_v34 }
0x177c   : > { %v5106_v56 = vpop.f32.mrb[69].mxu0 }
0x177d   : > { %8859 = vmatprep.mubr.msk.f32.mxu0 %vm1396_vm2, %v5106_v56 }
0x177e   : > { %v5607_v43 = vpop.xlane.xlu1 %5606  ;;  %8860 = vmatmul.mubr.msk.f32.gmra.mrb[76].mxu0 %vm1396_vm2, %v8847_v13 }
0x177f   : > { %v8850_v18 = vpop.f32.mrb[70].mxu0  ;;  %v5610_v55 = vpop.xlane.xlu0 %5609  ;;  %10439 = vrcp.f32 %v5607_v43 }
0x1780   : > { %v5116_v39 = vpop.f32.mrb[71].mxu0  ;;  %10441 = vrcp.f32 %v5610_v55 }
0x1781   : > { %8862 = vmatprep.mubr.msk.f32.mxu0 %vm1396_vm2, %v5116_v39 }
0x1782   : > { %8863 = vmatmul.mubr.msk.f32.gmra.mrb[78].mxu0 %vm1396_vm2, %v8850_v18  ;;  %v5613_v21 = vpop.xlane.xlu1 %5612 }
0x1783   : > { %8867 = vmatprep.mubr.msk.f32.mxu0 %vm1396_vm2, %v13179_v14  ;;  %10443 = vrcp.f32 %v5613_v21 }
0x1786   : > { %8868 = vmatmul.mubr.msk.f32.vlgmr.msra.gmra.mrb[72].mxu0 %vm1396_vm2, %v13177_v5  ;;  %v5619_v42 = vpop.xlane.xlu1 %5618  ;;  %v5616_v23 = vpop.xlane.xlu0 %5615 }
0x1787   : > { %9440 = vmatpush3.bf16.msra.mxu0 %v9437_v7  ;;  %8870 = vmatprep.mubr.msk.f32.mxu0 %vm1396_vm2, %v13183_v17  ;;  %v10438_v5 = vpop.eup %10437  ;;  %10445 = vrcp.f32 %v5616_v23 }
0x1788   : > { %9442 = vmatprep.subr.bf16.mxu0 %v9441_v35  ;;  %10447 = vrcp.f32 %v5619_v42 }
0x178a   : > { %8871 = vmatmul.mubr.msk.f32.gmra.mrb[74].mxu0 %vm1396_vm2, %v13181_v32  ;;  %v5625_v61 = vpop.xlane.xlu1 %5624  ;;  %v10137_v58 = vpop.permute.xlu0 %10136 }
0x178b   : > { %9444 = vmatpush3.bf16.msra.mxu0 %v9441_v35  ;;  %8873 = vmatprep.mubr.msk.f32.mxu0 %vm1396_vm2, %v13187_v6  ;;  %v10139_v14 = vunpack.i.h.bf16 %v10137_v58  ;;  %v10138_v46 = vunpack.i.l.bf16 %v10137_v58 }
0x178d   : > { %v9445_v27 = vpack.c.bf16 %v10139_v14, %v10138_v46 }
0x178e   : > { %8874 = vmatmul.mubr.msk.f32.gmra.mrb[76].mxu0 %vm1396_vm2, %v13185_v12  ;;  %v5622_v17 = vpop.xlane.xlu1 %5621  ;;  %v5634_v12 = vmul.f32 %v10438_v5, %v13348_v59  ;;  %v10440_v59 = vpop.eup %10439 }
0x178f   : > { %8876 = vmatprep.mubr.msk.f32.mxu0 %vm1396_vm2, %v13191_v37  ;;  %v13407_v32 = vpop.f32.mrb[88].mxu1  ;;  %9446 = vmatprep.subr.bf16.mxu0 %v9445_v27  ;;  %10449 = vrcp.f32 %v5622_v17  ;;  %v10442_v50 = vpop.eup %10441  ;;  %v5635_v49 = vmul.f32 %v10440_v59, %v13353_v62 }
0x1790   : > { %v13409_v38 = vpop.f32.mrb[89].mxu1  ;;  %v6106_v6 = vsel %vm966_vm0, %v13407_v32, -inf  ;;  %9448 = vmatpush3.bf16.msra.mxu0 %v9445_v27  ;;  %10451 = vrcp.f32 %v5625_v61  ;;  %v10444_v9 = vpop.eup %10443  ;;  %v5636_v7 = vmul.f32 %v10442_v50, %v13355_v19 }
0x1791   : > { %6107 = vmax.xlane.f32.xlu1 %v6106_v6  ;;  %v6103_v40 = vsel %vm966_vm0, %v13409_v38, -inf  ;;  %v10446_v54 = vpop.eup %10445  ;;  %v5637_v62 = vmul.f32 %v10444_v9, %v13361_v44 }
0x1792   : > { %6104 = vmax.xlane.f32.xlu0 %v6103_v40  ;;  %8877 = vmatmul.mubr.msk.f32.gmra.mrb[78].mxu0 %vm1396_vm2, %v13189_v16  ;;  %v10142_v37 = vpop.permute.xlu1 %10141  ;;  %v10448_v56 = vpop.eup %10447  ;;  %v5638_v34 = vmul.f32 %v10446_v54, %v13367_v3  ;;  %v5796_v3 = vld [vmem:[#allocation14 + $0x30] sm:$0xff] }
0x1793   : > { %8923 = vmatprep.mubr.msk.f32.mxu0 %vm966_vm0, %v5634_v12  ;;  %v13419_v30 = vpop.f32.mrb[90].mxu1  ;;  %v10144_v2 = vunpack.i.h.bf16 %v10142_v37  ;;  %v10143_v60 = vunpack.i.l.bf16 %v10142_v37  ;;  %v5639_v18 = vmul.f32 %v10448_v56, %v13365_v4 }
0x1794   : > { %v6074_v20 = vpop.f32.mrb[91].mxu1  ;;  %v6112_v28 = vsel %vm966_vm0, %v13419_v30, -inf }
0x1795   : > { %v6109_v0 = vsel %vm966_vm0, %v6074_v20, -inf  ;;  %v9449_v22 = vpack.c.bf16 %v10144_v2, %v10143_v60 }
0x1796   : > { %6110 = vmax.xlane.f32.xlu0 %v6109_v0 }
0x1797   : > { %v8973_v29 = vpop.f32.mrb[92].mxu1  ;;  %9450 = vmatprep.subr.bf16.mxu0 %v9449_v22 }
0x1798   : > { %v13422_v57 = vpop.f32.mrb[93].mxu1  ;;  %v6118_v16 = vsel %vm966_vm0, %v8973_v29, -inf  ;;  %9452 = vmatpush3.bf16.msra.mxu0 %v9449_v22 }
0x1799   : > { %6119 = vmax.xlane.f32.xlu1 %v6118_v16  ;;  %v6115_v13 = vsel %vm966_vm0, %v13422_v57, -inf  ;;  %v10450_v19 = vpop.eup %10449  ;;  %8935 = vmatprep.subr.mxu0 %v5796_v3 }
0x179a   : > { %6113 = vmax.xlane.f32.xlu0 %v6112_v28  ;;  %v10452_v39 = vpop.eup %10451  ;;  %v5640_v10 = vmul.f32 %v10450_v19, %v13377_v51 }
0x179b   : > { %v8976_v8 = vpop.f32.mrb[94].mxu1  ;;  %8924 = vmatmul.mubr.msk.f32.vlgmr.msra.gmra.mrb[80].mxu0 %vm966_vm0, %v5635_v49  ;;  %v5641_v44 = vmul.f32 %v10452_v39, %v13373_v48 }
0x179c   : > { %v13430_v33 = vpop.f32.mrb[95].mxu1  ;;  %v6124_v11 = vsel %vm966_vm0, %v8976_v8, -inf  ;;  %8926 = vmatprep.mubr.msk.f32.mxu0 %vm966_vm0, %v5636_v7  ;;  %8936 = vmatpush3.msra.mxu0 %v5796_v3 }
0x179d   : > { %6125 = vmax.xlane.f32.xlu1 %v6124_v11  ;;  %v6121_v43 = vsel %vm966_vm0, %v13430_v33, -inf }
0x179e   : > { %6116 = vmax.xlane.f32.xlu0 %v6115_v13 }
0x179f   : > { %8927 = vmatmul.mubr.msk.f32.gmra.mrb[82].mxu0 %vm966_vm0, %v5637_v62 }
0x17a0   : > { %8929 = vmatprep.mubr.msk.f32.mxu0 %vm966_vm0, %v5638_v34 }
0x17a2   : > { %6122 = vmax.xlane.f32.xlu0 %v6121_v43 }
0x17a3   : > { %8930 = vmatmul.mubr.msk.f32.gmra.mrb[84].mxu0 %vm966_vm0, %v5639_v18 }
0x17a4   : > { %8932 = vmatprep.mubr.msk.f32.mxu0 %vm966_vm0, %v5640_v10 }
0x17a7   : > { %8933 = vmatmul.mubr.msk.f32.gmra.mrb[86].mxu0 %vm966_vm0, %v5641_v44 }
0x17ae   : > { %10151 = vrot.lane.b32.xlu1 %v12955_v53, %s11239_s24 }
0x17b8   : > { %10146 = vrot.lane.b32.xlu0 %v12945_v25, %s11239_s24 }
0x181e   : > { %v6108_v4 = vpop.xlane.xlu1 %6107 }
0x181f   : > { %v6128_v51 = vsub.f32 %v13407_v32, %v6108_v4  ;;  %v6105_v24 = vpop.xlane.xlu0 %6104 }
0x1820   : > { %v6127_v55 = vsub.f32 %v13409_v38, %v6105_v24 }
0x1821   : > { %v6137_v21 = vmul.f32 1.442695, %v6128_v51 }
0x1822   : > { %v6135_v35 = vmul.f32 1.442695, %v6127_v55 }
0x1823   : > { %10453 = vpow2.f32 %v6137_v21  ;;  %v6111_v48 = vpop.xlane.xlu0 %6110 }
0x1824   : > { %10455 = vpow2.f32 %v6135_v35  ;;  %v6129_v42 = vsub.f32 %v6074_v20, %v6111_v48 }
0x1826   : > { %v6139_v23 = vmul.f32 1.442695, %v6129_v42  ;;  %v6120_v53 = vpop.xlane.xlu1 %6119 }
0x1827   : > { %v6132_v61 = vsub.f32 %v8973_v29, %v6120_v53  ;;  %v6114_v58 = vpop.xlane.xlu0 %6113 }
0x1828   : > { %10457 = vpow2.f32 %v6139_v23  ;;  %v6130_v25 = vsub.f32 %v13419_v30, %v6114_v58 }
0x1829   : > { %v6145_v14 = vmul.f32 1.442695, %v6132_v61 }
0x182a   : > { %v6141_v46 = vmul.f32 1.442695, %v6130_v25  ;;  %v6126_v5 = vpop.xlane.xlu1 %6125 }
0x182b   : > { %v6134_v27 = vsub.f32 %v8976_v8, %v6126_v5  ;;  %v6117_v17 = vpop.xlane.xlu0 %6116 }
0x182c   : > { %10459 = vpow2.f32 %v6141_v46  ;;  %v6131_v32 = vsub.f32 %v13422_v57, %v6117_v17 }
0x182d   : > { %v13456_v38 = vpop.eup %10453  ;;  %10461 = vpow2.f32 %v6145_v14  ;;  %v6149_v40 = vmul.f32 1.442695, %v6134_v27 }
0x182e   : > { %v13458_v6 = vpop.eup %10455  ;;  %v6143_v12 = vmul.f32 1.442695, %v6131_v32  ;;  %v6154_v37 = vsel %vm966_vm0, %v13456_v38, 0.0  ;;  %v10152_v62 = vpop.permute.xlu1 %10151 }
0x182f   : > { %6155 = vadd.xlane.f32.xlu1 %v6154_v37  ;;  %v6123_v30 = vpop.xlane.xlu0 %6122  ;;  %v6151_v2 = vsel %vm966_vm0, %v13458_v6, 0.0  ;;  %v10154_v56 = vunpack.i.h.bf16 %v10152_v62  ;;  %v10153_v34 = vunpack.i.l.bf16 %v10152_v62 }
0x1830   : > { %10463 = vpow2.f32 %v6143_v12  ;;  %v6133_v60 = vsub.f32 %v13430_v33, %v6123_v30  ;;  %6152 = vadd.xlane.f32.xlu0 %v6151_v2 }
0x1831   : > { %10465 = vpow2.f32 %v6149_v40  ;;  %v9481_v18 = vpack.c.bf16 %v10154_v56, %v10153_v34 }
0x1832   : > { %v13465_v20 = vpop.eup %10457  ;;  %v6147_v0 = vmul.f32 1.442695, %v6133_v60 }
0x1833   : > { %v10147_v22 = vpop.permute.xlu0 %10146  ;;  %v6157_v59 = vsel %vm966_vm0, %v13465_v20, 0.0 }
0x1834   : > { %v10149_v29 = vunpack.i.h.bf16 %v10147_v22  ;;  %v10148_v50 = vunpack.i.l.bf16 %v10147_v22  ;;  %6158 = vadd.xlane.f32.xlu0 %v6157_v59  ;;  %10467 = vpow2.f32 %v6147_v0 }
0x1836   : > { %v13469_v57 = vpop.eup %10459  ;;  %v9477_v16 = vpack.c.bf16 %v10149_v29, %v10148_v50 }
0x1837   : > { %v6160_v28 = vsel %vm966_vm0, %v13469_v57, 0.0  ;;  %v13473_v49 = vpop.eup %10461 }
0x1838   : > { %6161 = vadd.xlane.f32.xlu1 %v6160_v28  ;;  %9478 = vmatprep.subr.bf16.mxu0 %v9477_v16  ;;  %v6166_v8 = vsel %vm966_vm0, %v13473_v49, 0.0 }
0x183a   : > { %v13475_v9 = vpop.eup %10463 }
0x183b   : > { %v6163_v7 = vsel %vm966_vm0, %v13475_v9, 0.0  ;;  %v13481_v54 = vpop.eup %10465 }
0x183c   : > { %6167 = vadd.xlane.f32.xlu1 %v6166_v8  ;;  %6164 = vadd.xlane.f32.xlu0 %v6163_v7  ;;  %v6172_v33 = vsel %vm966_vm0, %v13481_v54, 0.0 }
0x183e   : > { %v13485_v11 = vpop.eup %10467 }
0x183f   : > { %v6169_v13 = vsel %vm966_vm0, %v13485_v11, 0.0 }
0x1840   : > { %6173 = vadd.xlane.f32.xlu1 %v6172_v33 }
0x1844   : > { %6170 = vadd.xlane.f32.xlu1 %v6169_v13 }
0x1852   : > { %10156 = vrot.lane.b32.xlu0 %v12965_v1, %s11239_s24 }
0x1855   : > { %10161 = vrot.lane.b32.xlu1 %v12975_v15, %s11239_s24  ;;  %s11101_s24 = scalar_lea.vmem %s11100_s20, 512 }
0x1856   : > { %p11103_p12 = scmp.lt.s32.totalorder %s11101_s24, %s11095_s25 }
0x1858   : > { %p11104_p13 = por %p11103_p12, %p11102_p11 }
0x185a   : > { %p11105_p8 = pnand %p11104_p13, %p11098_p1 }
0x186e   : > { %v8925_v19 = vpop.f32.mrb[80].mxu0 }
0x186f   : > { %v5756_v43 = vpop.f32.mrb[81].mxu0 }
0x1870   : > { %8937 = vmatprep.mubr.msk.f32.mxu0 %vm1396_vm2, %v5756_v43 }
0x1871   : > { %8938 = vmatmul.mubr.msk.f32.vlgmr.msra.gmra.mrb[72].mxu0 %vm1396_vm2, %v8925_v19 }
0x1872   : > { %9480 = vmatpush3.bf16.msra.mxu0 %v9477_v16  ;;  %v8928_v39 = vpop.f32.mrb[82].mxu0 }
0x1873   : > { %9482 = vmatprep.subr.bf16.mxu0 %v9481_v18  ;;  %v5766_v10 = vpop.f32.mrb[83].mxu0 }
0x1874   : > { %8940 = vmatprep.mubr.msk.f32.mxu0 %vm1396_vm2, %v5766_v10 }
0x1875   : > { %8941 = vmatmul.mubr.msk.f32.gmra.mrb[74].mxu0 %vm1396_vm2, %v8928_v39 }
0x1876   : > { %9484 = vmatpush3.bf16.msra.mxu0 %v9481_v18  ;;  %v8931_v1 = vpop.f32.mrb[84].mxu0 }
0x1877   : > { %v5776_v15 = vpop.f32.mrb[85].mxu0 }
0x1878   : > { %8943 = vmatprep.mubr.msk.f32.mxu0 %vm1396_vm2, %v5776_v15 }
0x1879   : > { %8944 = vmatmul.mubr.msk.f32.gmra.mrb[76].mxu0 %vm1396_vm2, %v8931_v1 }
0x187a   : > { %v8934_v44 = vpop.f32.mrb[86].mxu0 }
0x187b   : > { %v5786_v3 = vpop.f32.mrb[87].mxu0 }
0x187c   : > { %8946 = vmatprep.mubr.msk.f32.mxu0 %vm1396_vm2, %v5786_v3 }
0x187d   : > { %8947 = vmatmul.mubr.msk.f32.gmra.mrb[78].mxu0 %vm1396_vm2, %v8934_v44 }
0x18bc   : > { %v6156_v51 = vpop.xlane.xlu1 %6155 }
0x18bd   : > { %v6153_v4 = vpop.xlane.xlu0 %6152 }
0x18be   : > { %10469 = vrcp.f32 %v6153_v4 }
0x18bf   : > { %10471 = vrcp.f32 %v6156_v51 }
0x18c1   : > { %v6159_v24 = vpop.xlane.xlu0 %6158 }
0x18c2   : > { %10473 = vrcp.f32 %v6159_v24 }
0x18c5   : > { %v6162_v55 = vpop.xlane.xlu1 %6161 }
0x18c6   : > { %10475 = vrcp.f32 %v6162_v55 }
0x18c8   : > { %v10470_v21 = vpop.eup %10469 }
0x18c9   : > { %v6168_v35 = vpop.xlane.xlu1 %6167  ;;  %v6165_v48 = vpop.xlane.xlu0 %6164  ;;  %v6183_v42 = vmul.f32 %v10470_v21, %v13458_v6  ;;  %v6345_v6 = vld [vmem:[#allocation14 + $0x38] sm:$0xff] }
0x18ca   : > { %10477 = vrcp.f32 %v6165_v48  ;;  %v10472_v32 = vpop.eup %10471 }
0x18cb   : > { %8993 = vmatprep.mubr.msk.f32.mxu0 %vm966_vm0, %v6183_v42  ;;  %10479 = vrcp.f32 %v6168_v35  ;;  %v6184_v12 = vmul.f32 %v10472_v32, %v13456_v38 }
0x18cc   : > { %v10474_v40 = vpop.eup %10473 }
0x18cd   : > { %v6174_v23 = vpop.xlane.xlu1 %6173  ;;  %v10157_v53 = vpop.permute.xlu0 %10156  ;;  %v6185_v30 = vmul.f32 %v10474_v40, %v13465_v20 }
0x18ce   : > { %v10159_v61 = vunpack.i.h.bf16 %v10157_v53  ;;  %v10158_v58 = vunpack.i.l.bf16 %v10157_v53 }
0x18d0   : > { %v9485_v25 = vpack.c.bf16 %v10159_v61, %v10158_v58  ;;  %v10476_v37 = vpop.eup %10475 }
0x18d1   : > { %v6171_v14 = vpop.xlane.xlu1 %6170  ;;  %v6186_v60 = vmul.f32 %v10476_v37, %v13469_v57 }
0x18d2   : > { %9486 = vmatprep.subr.bf16.mxu0 %v9485_v25  ;;  %10481 = vrcp.f32 %v6171_v14 }
0x18d3   : > { %9488 = vmatpush3.bf16.msra.mxu0 %v9485_v25  ;;  %10483 = vrcp.f32 %v6174_v23 }
0x18d4   : > { %v10478_v2 = vpop.eup %10477 }
0x18d5   : > { %v10162_v46 = vpop.permute.xlu1 %10161  ;;  %v10480_v0 = vpop.eup %10479  ;;  %v6187_v22 = vmul.f32 %v10478_v2, %v13475_v9 }
0x18d6   : > { %v10164_v5 = vunpack.i.h.bf16 %v10162_v46  ;;  %v10163_v27 = vunpack.i.l.bf16 %v10162_v46  ;;  %v6188_v38 = vmul.f32 %v10480_v0, %v13473_v49 }
0x18d8   : > { %v9489_v17 = vpack.c.bf16 %v10164_v5, %v10163_v27 }
0x18da   : > { %9490 = vmatprep.subr.bf16.mxu0 %v9489_v17 }
0x18db   : > { %9492 = vmatpush3.bf16.msra.mxu0 %v9489_v17 }
0x18dc   : > { %9005 = vmatprep.subr.mxu0 %v6345_v6  ;;  %v10482_v59 = vpop.eup %10481 }
0x18dd   : > { %v10484_v29 = vpop.eup %10483  ;;  %v6189_v20 = vmul.f32 %v10482_v59, %v13485_v11  ;;  %v7912_v11 = vld [vmem:[#allocation16 + $0x1] ss:$0 sm:$0xff] }
0x18de   : > { %8994 = vmatmul.mubr.msk.f32.vlgmr.msra.gmra.mrb[88].mxu0 %vm966_vm0, %v6184_v12  ;;  %v6190_v50 = vmul.f32 %v10484_v29, %v13481_v54 }
0x18df   : > { %8996 = vmatprep.mubr.msk.f32.mxu0 %vm966_vm0, %v6185_v30  ;;  %9006 = vmatpush3.msra.mxu0 %v6345_v6 }
0x18e2   : > { %8997 = vmatmul.mubr.msk.f32.gmra.mrb[90].mxu0 %vm966_vm0, %v6186_v60 }
0x18e3   : > { %8999 = vmatprep.mubr.msk.f32.mxu0 %vm966_vm0, %v6187_v22 }
0x18e6   : > { %9000 = vmatmul.mubr.msk.f32.gmra.mrb[92].mxu0 %vm966_vm0, %v6188_v38 }
0x18e7   : > { %9002 = vmatprep.mubr.msk.f32.mxu0 %vm966_vm0, %v6189_v20 }
0x18ea   : > { %9003 = vmatmul.mubr.msk.f32.gmra.mrb[94].mxu0 %vm966_vm0, %v6190_v50 }
0x19b1   : > { %v8995_v57 = vpop.f32.mrb[88].mxu0 }
0x19b2   : > { %v6305_v16 = vpop.f32.mrb[89].mxu0 }
0x19b3   : > { %9007 = vmatprep.mubr.msk.f32.mxu0 %vm1396_vm2, %v6305_v16 }
0x19b4   : > { %9008 = vmatmul.mubr.msk.f32.vlgmr.msra.gmra.mrb[72].mxu0 %vm1396_vm2, %v8995_v57 }
0x19b5   : > { %v8998_v28 = vpop.f32.mrb[90].mxu0 }
0x19b6   : > { %v6315_v9 = vpop.f32.mrb[91].mxu0 }
0x19b7   : > { %9010 = vmatprep.mubr.msk.f32.mxu0 %vm1396_vm2, %v6315_v9 }
0x19b8   : > { %9011 = vmatmul.mubr.msk.f32.gmra.mrb[74].mxu0 %vm1396_vm2, %v8998_v28 }
0x19b9   : > { %v9001_v49 = vpop.f32.mrb[92].mxu0 }
0x19ba   : > { %v6325_v8 = vpop.f32.mrb[93].mxu0 }
0x19bb   : > { %9013 = vmatprep.mubr.msk.f32.mxu0 %vm1396_vm2, %v6325_v8 }
0x19bc   : > { %9014 = vmatmul.mubr.msk.f32.gmra.mrb[76].mxu0 %vm1396_vm2, %v9001_v49 }
0x19bd   : > { %v9004_v7 = vpop.f32.mrb[94].mxu0 }
0x19be   : > { %v6335_v54 = vpop.f32.mrb[95].mxu0 }
0x19bf   : > { %9016 = vmatprep.mubr.msk.f32.mxu0 %vm1396_vm2, %v6335_v54 }
0x19c0   : > { %9017 = vmatmul.mubr.msk.f32.gmra.mrb[78].mxu0 %vm1396_vm2, %v9004_v7 }
0x1a87   : > { %v9009_v33 = vpop.f32.mrb[72].mxu0 }
0x1a88   : > { %v6484_v13 = vadd.f32 %v9009_v33, %v12834_v47  ;;  %v6436_v62 = vpop.f32.mrb[73].mxu0 }
0x1a89   : > { %v6483_v56 = vadd.f32 %v6436_v62, %v12837_v52 }
0x1a8a   : > { %v13527_v34 = vadd.f32 %v7912_v11, %v6484_v13 }
0x1a8b   : > { %v13529_v19 = vadd.f32 %v7912_v11, %v6483_v56  ;;  %v9012_v43 = vpop.f32.mrb[74].mxu0 }
0x1a8c   : > { %v6486_v18 = vadd.f32 %v9012_v43, %v12844_v31  ;;  %v6446_v39 = vpop.f32.mrb[75].mxu0  ;;  %v6514_v10 = vsel %vm1098_vm1, %v13527_v34, 0.0 }
0x1a8d   : > { %v6485_v1 = vadd.f32 %v6446_v39, %v12847_v36  ;;  %6515 = vadd.xlane.f32.xlu1 %v6514_v10  ;;  %v6511_v47 = vsel %vm1098_vm1, %v13529_v19, 0.0 }
0x1a8e   : > { %v13537_v15 = vadd.f32 %v7912_v11, %v6486_v18  ;;  %6512 = vadd.xlane.f32.xlu0 %v6511_v47  ;;  %v6645_v47 = vld [vmem:[#allocation20 + $0x28] sm:$0xff] }
0x1a8f   : > { %v9015_v52 = vpop.f32.mrb[76].mxu0  ;;  %v13542_v4 = vadd.f32 %v7912_v11, %v6485_v1  ;;  %v6644_v1 = vld [vmem:[#allocation20 + $0x20] sm:$0xff] }
0x1a90   : > { %v6488_v44 = vadd.f32 %v9015_v52, %v12854_v26  ;;  %v6456_v3 = vpop.f32.mrb[77].mxu0  ;;  %v6520_v31 = vsel %vm1098_vm1, %v13537_v15, 0.0  ;;  %v9493_v52 = vpack.c.bf16 %v6645_v47, %v6644_v1 }
0x1a91   : > { %v6487_v51 = vadd.f32 %v6456_v3, %v12857_v63  ;;  %v6517_v42 = vsel %vm1098_vm1, %v13542_v4, 0.0  ;;  %v6647_v3 = vld [vmem:[#allocation20 + $0x38] sm:$0xff] }
0x1a92   : > { %v13545_v24 = vadd.f32 %v7912_v11, %v6488_v44  ;;  %6521 = vadd.xlane.f32.xlu0 %v6520_v31  ;;  %9494 = vmatprep.subr.bf16.mxu1 %v9493_v52  ;;  %v6646_v44 = vld [vmem:[#allocation20 + $0x30] sm:$0xff] }
0x1a93   : > { %v9018_v36 = vpop.f32.mrb[78].mxu0  ;;  %v13550_v48 = vadd.f32 %v7912_v11, %v6487_v51  ;;  %9496 = vmatpush3.bf16.msra.mxu1 %v9493_v52  ;;  %v9497_v31 = vpack.c.bf16 %v6647_v3, %v6646_v44 }
0x1a94   : > { %v6490_v55 = vadd.f32 %v9018_v36, %v12864_v45  ;;  %v6466_v21 = vpop.f32.mrb[79].mxu0  ;;  %v6526_v35 = vsel %vm1098_vm1, %v13545_v24, 0.0 }
0x1a95   : > { %v6489_v26 = vadd.f32 %v6466_v21, %v12867_v41  ;;  %6527 = vadd.xlane.f32.xlu1 %v6526_v35  ;;  %v6523_v45 = vsel %vm1098_vm1, %v13550_v48, 0.0  ;;  %9498 = vmatprep.subr.bf16.mxu1 %v9497_v31 }
0x1a96   : > { %v13555_v23 = vadd.f32 %v7912_v11, %v6490_v55  ;;  %6518 = vadd.xlane.f32.xlu0 %v6517_v42 }
0x1a97   : > { %v13559_v53 = vadd.f32 %v7912_v11, %v6489_v26  ;;  %9500 = vmatpush3.bf16.msra.mxu1 %v9497_v31 }
0x1a98   : > { %v6532_v63 = vsel %vm1098_vm1, %v13555_v23, 0.0 }
0x1a99   : > { %6533 = vadd.xlane.f32.xlu1 %v6532_v63  ;;  %v6529_v41 = vsel %vm1098_vm1, %v13559_v53, 0.0 }
0x1a9a   : > { %6524 = vadd.xlane.f32.xlu0 %v6523_v45 }
0x1a9e   : > { %6530 = vadd.xlane.f32.xlu0 %v6529_v41 }
0x1b1a   : > { %v6516_v61 = vpop.xlane.xlu1 %6515 }
0x1b1b   : > { %v6536_v58 = vmul.f32 0.03125, %v6516_v61  ;;  %v6513_v25 = vpop.xlane.xlu0 %6512 }
0x1b1c   : > { %v6535_v14 = vmul.f32 0.03125, %v6513_v25 }
0x1b1d   : > { %v13566_v46 = vsub.f32 %v13527_v34, %v6536_v58 }
0x1b1e   : > { %v13569_v5 = vsub.f32 %v13529_v19, %v6535_v14 }
0x1b1f   : > { %v6522_v27 = vpop.xlane.xlu0 %6521  ;;  %v6552_v17 = vmul.f32 %v13566_v46, %v13566_v46 }
0x1b20   : > { %v6538_v32 = vmul.f32 0.03125, %v6522_v27  ;;  %v6551_v6 = vmul.f32 %v13569_v5, %v13569_v5 }
0x1b21   : > { %v6562_v40 = vsel %vm1098_vm1, %v6552_v17, 0.0 }
0x1b22   : > { %v13577_v12 = vsub.f32 %v13537_v15, %v6538_v32  ;;  %v6528_v37 = vpop.xlane.xlu1 %6527  ;;  %6563 = vadd.xlane.f32.xlu1 %v6562_v40  ;;  %v6559_v30 = vsel %vm1098_vm1, %v6551_v6, 0.0 }
0x1b23   : > { %v6540_v2 = vmul.f32 0.03125, %v6528_v37  ;;  %v6519_v60 = vpop.xlane.xlu0 %6518  ;;  %6560 = vadd.xlane.f32.xlu0 %v6559_v30  ;;  %v7913_v30 = vld [vmem:[#allocation17 + $0x1] ss:$0 sm:$0xff] }
0x1b24   : > { %v6537_v0 = vmul.f32 0.03125, %v6519_v60  ;;  %v6554_v22 = vmul.f32 %v13577_v12, %v13577_v12 }
0x1b25   : > { %v13583_v59 = vsub.f32 %v13545_v24, %v6540_v2 }
0x1b26   : > { %v13586_v38 = vsub.f32 %v13542_v4, %v6537_v0  ;;  %v6534_v29 = vpop.xlane.xlu1 %6533  ;;  %v6568_v20 = vsel %vm1098_vm1, %v6554_v22, 0.0 }
0x1b27   : > { %v6542_v50 = vmul.f32 0.03125, %v6534_v29  ;;  %v6525_v57 = vpop.xlane.xlu0 %6524  ;;  %6569 = vadd.xlane.f32.xlu1 %v6568_v20  ;;  %v6556_v16 = vmul.f32 %v13583_v59, %v13583_v59 }
0x1b28   : > { %v6539_v28 = vmul.f32 0.03125, %v6525_v57  ;;  %v6553_v9 = vmul.f32 %v13586_v38, %v13586_v38 }
0x1b29   : > { %v13594_v49 = vsub.f32 %v13555_v23, %v6542_v50  ;;  %v6574_v8 = vsel %vm1098_vm1, %v6556_v16, 0.0  ;;  %v7914_v50 = vld [vmem:[#allocation19 + $0x1] ss:$0 sm:$0xff] }
0x1b2a   : > { %v13598_v7 = vsub.f32 %v13550_v48, %v6539_v28  ;;  %v6565_v54 = vsel %vm1098_vm1, %v6553_v9, 0.0 }
0x1b2b   : > { %6575 = vadd.xlane.f32.xlu1 %v6574_v8  ;;  %6566 = vadd.xlane.f32.xlu0 %v6565_v54  ;;  %v6531_v33 = vpop.xlane.xlu0 %6530  ;;  %v6558_v11 = vmul.f32 %v13594_v49, %v13594_v49 }
0x1b2c   : > { %v6541_v13 = vmul.f32 0.03125, %v6531_v33  ;;  %v6555_v62 = vmul.f32 %v13598_v7, %v13598_v7 }
0x1b2d   : > { %v6580_v56 = vsel %vm1098_vm1, %v6558_v11, 0.0 }
0x1b2e   : > { %v13607_v43 = vsub.f32 %v13559_v53, %v6541_v13  ;;  %v6571_v18 = vsel %vm1098_vm1, %v6555_v62, 0.0 }
0x1b2f   : > { %6581 = vadd.xlane.f32.xlu1 %v6580_v56  ;;  %6572 = vadd.xlane.f32.xlu0 %v6571_v18 }
0x1b30   : > { %v6557_v39 = vmul.f32 %v13607_v43, %v13607_v43 }
0x1b32   : > { %v6577_v10 = vsel %vm1098_vm1, %v6557_v39, 0.0 }
0x1b33   : > { %6578 = vadd.xlane.f32.xlu0 %v6577_v10 }
0x1baf   : > { %v6564_v51 = vpop.xlane.xlu1 %6563 }
0x1bb0   : > { %v6584_v36 = vmul.f32 0.03125, %v6564_v51  ;;  %v6561_v55 = vpop.xlane.xlu0 %6560 }
0x1bb1   : > { %v6583_v21 = vmul.f32 0.03125, %v6561_v55 }
0x1bb2   : > { %v6592_v35 = vadd.f32 1e-06, %v6584_v36 }
0x1bb3   : > { %v6591_v26 = vadd.f32 1e-06, %v6583_v21  ;;  %v6826_v21 = vld [vmem:[#allocation23 + $0x40] sm:$0xff] }
0x1bb4   : > { %10485 = vrsqrt.f32 %v6592_v35  ;;  %v6570_v42 = vpop.xlane.xlu1 %6569  ;;  %v6827_v35 = vld [vmem:[#allocation23 + $0x48] sm:$0xff] }
0x1bb5   : > { %10487 = vrsqrt.f32 %v6591_v26  ;;  %v6586_v63 = vmul.f32 0.03125, %v6570_v42  ;;  %v9501_v26 = vpack.c.bf16 %v6827_v35, %v6826_v21  ;;  %v6829_v42 = vld [vmem:[#allocation23 + $0x58] sm:$0xff] }
0x1bb7   : > { %v6594_v45 = vadd.f32 1e-06, %v6586_v63  ;;  %9502 = vmatprep.subr.bf16.mxu1 %v9501_v26 }
0x1bb8   : > { %v6576_v41 = vpop.xlane.xlu1 %6575  ;;  %v6567_v61 = vpop.xlane.xlu0 %6566 }
0x1bb9   : > { %10489 = vrsqrt.f32 %v6594_v45  ;;  %v6588_v58 = vmul.f32 0.03125, %v6576_v41  ;;  %v6585_v25 = vmul.f32 0.03125, %v6567_v61  ;;  %v6830_v45 = vld [vmem:[#allocation23 + $0x60] sm:$0xff]  ;;  %v6831_v41 = vld [vmem:[#allocation23 + $0x68] sm:$0xff] }
0x1bba   : > { %v9509_v61 = vpack.c.bf16 %v6831_v41, %v6830_v45 }
0x1bbb   : > { %v6596_v14 = vadd.f32 1e-06, %v6588_v58  ;;  %v6593_v27 = vadd.f32 1e-06, %v6585_v25  ;;  %v6832_v58 = vld [vmem:[#allocation23 + $0x70] sm:$0xff]  ;;  %v6833_v25 = vld [vmem:[#allocation23 + $0x78] sm:$0xff] }
0x1bbc   : > { %v6582_v17 = vpop.xlane.xlu1 %6581  ;;  %v6573_v32 = vpop.xlane.xlu0 %6572 }
0x1bbd   : > { %10491 = vrsqrt.f32 %v6596_v14  ;;  %v6590_v6 = vmul.f32 0.03125, %v6582_v17  ;;  %v6587_v40 = vmul.f32 0.03125, %v6573_v32  ;;  %v9513_v14 = vpack.c.bf16 %v6833_v25, %v6832_v58 }
0x1bbe   : > { %v10486_v37 = vpop.eup %10485  ;;  %10493 = vrsqrt.f32 %v6593_v27  ;;  %v7915_v27 = vld [vmem:[#allocation22 + $0x1] ss:$0 sm:$0xff] }
0x1bbf   : > { %v10488_v2 = vpop.eup %10487  ;;  %v6608_v60 = vmul.f32 %v10486_v37, %v13566_v46  ;;  %v6598_v0 = vadd.f32 1e-06, %v6590_v6  ;;  %v6595_v22 = vadd.f32 1e-06, %v6587_v40 }
0x1bc0   : > { %v6579_v29 = vpop.xlane.xlu0 %6578  ;;  %v6607_v20 = vmul.f32 %v10488_v2, %v13569_v5 }
0x1bc1   : > { %v6622_v57 = vmul.f32 %v7913_v30, %v6608_v60  ;;  %10495 = vrsqrt.f32 %v6598_v0  ;;  %v6589_v16 = vmul.f32 0.03125, %v6579_v29 }
0x1bc2   : > { %10497 = vrsqrt.f32 %v6595_v22  ;;  %v6621_v28 = vmul.f32 %v7913_v30, %v6607_v20 }
0x1bc3   : > { %v10490_v9 = vpop.eup %10489  ;;  %v6597_v8 = vadd.f32 1e-06, %v6589_v16  ;;  %v6636_v33 = vadd.f32 %v7914_v50, %v6622_v57 }
0x1bc4   : > { %v6635_v54 = vadd.f32 %v7914_v50, %v6621_v28  ;;  %v6610_v46 = vmul.f32 %v10490_v9, %v13577_v12 }
0x1bc5   : > { %10499 = vrsqrt.f32 %v6597_v8 }
0x1bc6   : > { %9027 = vmatprep.mubr.msk.f32.mxu1 %vm1098_vm1, %v6635_v54  ;;  %v6624_v62 = vmul.f32 %v7913_v30, %v6610_v46 }
0x1bc7   : > { %v10492_v11 = vpop.eup %10491  ;;  %9028 = vmatmul.mubr.msk.f32.vlgmr.msra.gmra.mrb[96].mxu1 %vm1098_vm1, %v6636_v33 }
0x1bc8   : > { %v10494_v13 = vpop.eup %10493  ;;  %v6612_v56 = vmul.f32 %v10492_v11, %v13583_v59  ;;  %v6638_v52 = vadd.f32 %v7914_v50, %v6624_v62  ;;  %9504 = vmatpush3.bf16.msra.mxu1 %v9501_v26 }
0x1bc9   : > { %v6609_v5 = vmul.f32 %v10494_v13, %v13586_v38 }
0x1bca   : > { %v6626_v44 = vmul.f32 %v7913_v30, %v6612_v56 }
0x1bcb   : > { %v10496_v18 = vpop.eup %10495  ;;  %v6623_v39 = vmul.f32 %v7913_v30, %v6609_v5 }
0x1bcc   : > { %v10498_v10 = vpop.eup %10497  ;;  %v6614_v3 = vmul.f32 %v10496_v18, %v13594_v49  ;;  %v6640_v59 = vadd.f32 %v7914_v50, %v6626_v44 }
0x1bcd   : > { %v6637_v1 = vadd.f32 %v7914_v50, %v6623_v39  ;;  %v6611_v47 = vmul.f32 %v10498_v10, %v13598_v7 }
0x1bce   : > { %v6628_v55 = vmul.f32 %v7913_v30, %v6614_v3 }
0x1bcf   : > { %v10500_v12 = vpop.eup %10499  ;;  %9030 = vmatprep.mubr.msk.f32.mxu1 %vm1098_vm1, %v6637_v1  ;;  %v6625_v31 = vmul.f32 %v7913_v30, %v6611_v47 }
0x1bd0   : > { %9031 = vmatmul.mubr.msk.f32.gmra.mrb[98].mxu1 %vm1098_vm1, %v6638_v52  ;;  %v6613_v38 = vmul.f32 %v10500_v12, %v13607_v43  ;;  %v6642_v49 = vadd.f32 %v7914_v50, %v6628_v55  ;;  %v6828_v43 = vld [vmem:[#allocation23 + $0x50] sm:$0xff] }
0x1bd1   : > { %v6639_v51 = vadd.f32 %v7914_v50, %v6625_v31  ;;  %v9505_v63 = vpack.c.bf16 %v6829_v42, %v6828_v43 }
0x1bd2   : > { %v6627_v36 = vmul.f32 %v7913_v30, %v6613_v38 }
0x1bd3   : > { %9033 = vmatprep.mubr.msk.f32.mxu1 %vm1098_vm1, %v6639_v51  ;;  %9506 = vmatprep.subr.bf16.mxu1 %v9505_v63 }
0x1bd4   : > { %9034 = vmatmul.mubr.msk.f32.gmra.mrb[100].mxu1 %vm1098_vm1, %v6640_v59  ;;  %v6641_v7 = vadd.f32 %v7914_v50, %v6627_v36 }
0x1bd5   : > { %9508 = vmatpush3.bf16.msra.mxu1 %v9505_v63 }
0x1bd6   : > { %9036 = vmatprep.mubr.msk.f32.mxu1 %vm1098_vm1, %v6641_v7  ;;  %9510 = vmatprep.subr.bf16.mxu1 %v9509_v61 }
0x1bd8   : > { %9037 = vmatmul.mubr.msk.f32.gmra.mrb[102].mxu1 %vm1098_vm1, %v6642_v49 }
0x1bd9   : > { %9512 = vmatpush3.bf16.msra.mxu1 %v9509_v61 }
0x1bda   : > { %9514 = vmatprep.subr.bf16.mxu1 %v9513_v14 }
0x1bdd   : > { %9516 = vmatpush3.bf16.msra.mxu1 %v9513_v14 }
0x1c9a   : > { %v9029_v17 = vpop.f32.mrb[96].mxu1 }
0x1c9b   : > { %v6752_v32 = vadd.f32 %v9029_v17, %v7915_v27  ;;  %v6746_v6 = vpop.f32.mrb[97].mxu1  ;;  %v7924_v17 = vld [vmem:[#allocation25 + $0x1] ss:$0 sm:$0xff] }
0x1c9c   : > { %v6747_v40 = vadd.f32 %v7915_v27, %v6746_v6 }
0x1c9d   : > { %v6794_v37 = vmul.f32 0.70710677, %v6752_v32  ;;  %v6786_v62 = vmul.f32 0.5, %v6752_v32 }
0x1c9e   : > { %v6793_v30 = vmul.f32 0.70710677, %v6747_v40  ;;  %v6785_v46 = vmul.f32 0.5, %v6747_v40 }
0x1c9f   : > { %10501 = verf.f32 %v6794_v37 }
0x1ca0   : > { %10503 = verf.f32 %v6793_v30 }
0x1ca3   : > { %v9032_v2 = vpop.f32.mrb[98].mxu1 }
0x1ca4   : > { %v6762_v60 = vadd.f32 %v9032_v2, %v7915_v27  ;;  %v6756_v0 = vpop.f32.mrb[99].mxu1 }
0x1ca5   : > { %v6757_v22 = vadd.f32 %v7915_v27, %v6756_v0 }
0x1ca6   : > { %v6796_v29 = vmul.f32 0.70710677, %v6762_v60  ;;  %v6788_v51 = vmul.f32 0.5, %v6762_v60 }
0x1ca7   : > { %v6795_v20 = vmul.f32 0.70710677, %v6757_v22  ;;  %v9035_v50 = vpop.f32.mrb[100].mxu1  ;;  %v6787_v31 = vmul.f32 0.5, %v6757_v22 }
0x1ca8   : > { %10505 = verf.f32 %v6796_v29  ;;  %v6772_v57 = vadd.f32 %v9035_v50, %v7915_v27  ;;  %v6766_v16 = vpop.f32.mrb[101].mxu1 }
0x1ca9   : > { %v10502_v28 = vpop.eup %10501  ;;  %10507 = verf.f32 %v6795_v20  ;;  %v6767_v9 = vadd.f32 %v7915_v27, %v6766_v16 }
0x1caa   : > { %v10504_v8 = vpop.eup %10503  ;;  %v6810_v54 = vadd.f32 1.0, %v10502_v28  ;;  %v6798_v33 = vmul.f32 0.70710677, %v6772_v57  ;;  %v6790_v26 = vmul.f32 0.5, %v6772_v57 }
0x1cab   : > { %v6809_v11 = vadd.f32 1.0, %v10504_v8  ;;  %v6797_v13 = vmul.f32 0.70710677, %v6767_v9  ;;  %v9038_v5 = vpop.f32.mrb[102].mxu1  ;;  %v6789_v21 = vmul.f32 0.5, %v6767_v9 }
0x1cac   : > { %10509 = verf.f32 %v6798_v33  ;;  %v6782_v56 = vadd.f32 %v9038_v5, %v7915_v27  ;;  %v6776_v18 = vpop.f32.mrb[103].mxu1  ;;  %v6818_v1 = vmul.f32 %v6810_v54, %v6786_v62 }
0x1cad   : > { %v6817_v39 = vmul.f32 %v6809_v11, %v6785_v46  ;;  %10511 = verf.f32 %v6797_v13  ;;  %v6777_v10 = vadd.f32 %v7915_v27, %v6776_v18 }
0x1cae   : > { %v6800_v47 = vmul.f32 0.70710677, %v6782_v56  ;;  %v6792_v25 = vmul.f32 0.5, %v6782_v56 }
0x1caf   : > { %v6799_v52 = vmul.f32 0.70710677, %v6777_v10  ;;  %9055 = vmatprep.mubr.msk.f32.mxu1 %vm966_vm0, %v6817_v39  ;;  %v6791_v61 = vmul.f32 0.5, %v6777_v10 }
0x1cb0   : > { %10513 = verf.f32 %v6800_v47  ;;  %9056 = vmatmul.mubr.msk.f32.vlgmr.msra.gmra.mrb[104].mxu1 %vm966_vm0, %v6818_v1 }
0x1cb1   : > { %10515 = verf.f32 %v6799_v52 }
0x1cb2   : > { %v10506_v44 = vpop.eup %10505 }
0x1cb3   : > { %v10508_v3 = vpop.eup %10507  ;;  %v6812_v12 = vadd.f32 1.0, %v10506_v44 }
0x1cb4   : > { %v6811_v38 = vadd.f32 1.0, %v10508_v3 }
0x1cb5   : > { %v6820_v7 = vmul.f32 %v6812_v12, %v6788_v51 }
0x1cb6   : > { %v10510_v59 = vpop.eup %10509  ;;  %v6819_v36 = vmul.f32 %v6811_v38, %v6787_v31 }
0x1cb7   : > { %v10512_v55 = vpop.eup %10511  ;;  %v6814_v49 = vadd.f32 1.0, %v10510_v59 }
0x1cb8   : > { %v6813_v35 = vadd.f32 1.0, %v10512_v55  ;;  %9058 = vmatprep.mubr.msk.f32.mxu1 %vm966_vm0, %v6819_v36 }
0x1cb9   : > { %9059 = vmatmul.mubr.msk.f32.gmra.mrb[106].mxu1 %vm966_vm0, %v6820_v7  ;;  %v6822_v45 = vmul.f32 %v6814_v49, %v6790_v26 }
0x1cba   : > { %v10514_v43 = vpop.eup %10513  ;;  %v6821_v42 = vmul.f32 %v6813_v35, %v6789_v21 }
0x1cbb   : > { %v10516_v63 = vpop.eup %10515  ;;  %v6816_v41 = vadd.f32 1.0, %v10514_v43 }
0x1cbc   : > { %v6815_v58 = vadd.f32 1.0, %v10516_v63  ;;  %9061 = vmatprep.mubr.msk.f32.mxu1 %vm966_vm0, %v6821_v42 }
0x1cbd   : > { %9062 = vmatmul.mubr.msk.f32.gmra.mrb[108].mxu1 %vm966_vm0, %v6822_v45  ;;  %v6824_v27 = vmul.f32 %v6816_v41, %v6792_v25 }
0x1cbe   : > { %v6823_v14 = vmul.f32 %v6815_v58, %v6791_v61 }
0x1cc0   : > { %9064 = vmatprep.mubr.msk.f32.mxu1 %vm966_vm0, %v6823_v14 }
0x1cc1   : > { %9065 = vmatmul.mubr.msk.f32.gmra.mrb[110].mxu1 %vm966_vm0, %v6824_v27 }
0x1d83   : > { %v9057_v32 = vpop.f32.mrb[104].mxu1 }
0x1d84   : > { %v6938_v6 = vadd.f32 %v9057_v32, %v7924_v17  ;;  %v6932_v40 = vpop.f32.mrb[105].mxu1 }
0x1d85   : > { %v6933_v37 = vadd.f32 %v7924_v17, %v6932_v40 }
0x1d86   : > { %v6972_v30 = vadd.f32 %v6938_v6, %v13527_v34 }
0x1d87   : > { %v6971_v2 = vadd.f32 %v6933_v37, %v13529_v19 }
0x1d88   : > { %v6984_v60 = vsel %vm1098_vm1, %v6972_v30, 0.0 }
0x1d89   : > { %6985 = vadd.xlane.f32.xlu1 %v6984_v60  ;;  %v6981_v0 = vsel %vm1098_vm1, %v6971_v2, 0.0 }
0x1d8a   : > { %6982 = vadd.xlane.f32.xlu0 %v6981_v0 }
0x1d8c   : > { %v9060_v22 = vpop.f32.mrb[106].mxu1 }
0x1d8d   : > { %v6948_v29 = vadd.f32 %v9060_v22, %v7924_v17  ;;  %v6942_v20 = vpop.f32.mrb[107].mxu1  ;;  %v7113_v22 = vld [vmem:[#allocation29] sm:$0xff] }
0x1d8e   : > { %v6943_v50 = vadd.f32 %v7924_v17, %v6942_v20  ;;  %9083 = vmatprep.mubr.msk.f32.mxu0 %vm966_vm0, %v7113_v22  ;;  %v7196_v22 = vld [vmem:[#allocation31] sm:$0xff] }
0x1d8f   : > { %v6974_v57 = vadd.f32 %v6948_v29, %v13537_v15 }
0x1d90   : > { %v6973_v16 = vadd.f32 %v6943_v50, %v13542_v4  ;;  %v9063_v28 = vpop.f32.mrb[108].mxu1 }
0x1d91   : > { %v6958_v9 = vadd.f32 %v9063_v28, %v7924_v17  ;;  %v6952_v8 = vpop.f32.mrb[109].mxu1  ;;  %v6990_v34 = vsel %vm1098_vm1, %v6974_v57, 0.0 }
0x1d92   : > { %v6953_v19 = vadd.f32 %v7924_v17, %v6952_v8  ;;  %6991 = vadd.xlane.f32.xlu1 %v6990_v34  ;;  %v6987_v54 = vsel %vm1098_vm1, %v6973_v16, 0.0 }
0x1d93   : > { %v6976_v33 = vadd.f32 %v6958_v9, %v13545_v24  ;;  %6988 = vadd.xlane.f32.xlu0 %v6987_v54 }
0x1d94   : > { %v6975_v46 = vadd.f32 %v6953_v19, %v13550_v48  ;;  %v9066_v11 = vpop.f32.mrb[110].mxu1 }
0x1d95   : > { %v6968_v13 = vadd.f32 %v9066_v11, %v7924_v17  ;;  %v6962_v5 = vpop.f32.mrb[111].mxu1  ;;  %v6996_v15 = vsel %vm1098_vm1, %v6976_v33, 0.0 }
0x1d96   : > { %v6963_v4 = vadd.f32 %v7924_v17, %v6962_v5  ;;  %6997 = vadd.xlane.f32.xlu1 %v6996_v15  ;;  %v6993_v62 = vsel %vm1098_vm1, %v6975_v46, 0.0 }
0x1d97   : > { %v6978_v56 = vadd.f32 %v6968_v13, %v13555_v23  ;;  %6994 = vadd.xlane.f32.xlu0 %v6993_v62 }
0x1d98   : > { %v6977_v18 = vadd.f32 %v6963_v4, %v13559_v53  ;;  %v7933_v4 = vld [vmem:[#allocation26] ss:$0 sm:$0xff] }
0x1d99   : > { %v7002_v39 = vsel %vm1098_vm1, %v6978_v56, 0.0 }
0x1d9a   : > { %7003 = vadd.xlane.f32.xlu1 %v7002_v39  ;;  %v6999_v24 = vsel %vm1098_vm1, %v6977_v18, 0.0 }
0x1d9b   : > { %7000 = vadd.xlane.f32.xlu0 %v6999_v24 }
0x1e16   : > { %v6986_v48 = vpop.xlane.xlu1 %6985 }
0x1e17   : > { %v7006_v10 = vmul.f32 0.03125, %v6986_v48  ;;  %v6983_v1 = vpop.xlane.xlu0 %6982  ;;  %v7934_v48 = vld [vmem:[#allocation28] ss:$0 sm:$0xff] }
0x1e18   : > { %v7005_v47 = vmul.f32 0.03125, %v6983_v1 }
0x1e19   : > { %v13653_v52 = vsub.f32 %v6972_v30, %v7006_v10 }
0x1e1a   : > { %v13655_v44 = vsub.f32 %v6971_v2, %v7005_v47 }
0x1e1b   : > { %v7022_v23 = vmul.f32 %v13653_v52, %v13653_v52 }
0x1e1c   : > { %v7021_v53 = vmul.f32 %v13655_v44, %v13655_v44 }
0x1e1d   : > { %v7032_v3 = vsel %vm1098_vm1, %v7022_v23, 0.0 }
0x1e1e   : > { %7033 = vadd.xlane.f32.xlu1 %v7032_v3  ;;  %v7029_v12 = vsel %vm1098_vm1, %v7021_v53, 0.0 }
0x1e1f   : > { %v6992_v31 = vpop.xlane.xlu1 %6991  ;;  %7030 = vadd.xlane.f32.xlu0 %v7029_v12 }
0x1e20   : > { %v7008_v38 = vmul.f32 0.03125, %v6992_v31  ;;  %v6989_v51 = vpop.xlane.xlu0 %6988 }
0x1e21   : > { %v7007_v59 = vmul.f32 0.03125, %v6989_v51 }
0x1e22   : > { %v13663_v36 = vsub.f32 %v6974_v57, %v7008_v38 }
0x1e23   : > { %v13665_v55 = vsub.f32 %v6973_v16, %v7007_v59  ;;  %v6998_v7 = vpop.xlane.xlu1 %6997 }
0x1e24   : > { %v7010_v49 = vmul.f32 0.03125, %v6998_v7  ;;  %v6995_v21 = vpop.xlane.xlu0 %6994  ;;  %v7024_v35 = vmul.f32 %v13663_v36, %v13663_v36 }
0x1e25   : > { %v7009_v26 = vmul.f32 0.03125, %v6995_v21  ;;  %v7023_v43 = vmul.f32 %v13665_v55, %v13665_v55 }
0x1e26   : > { %v13671_v42 = vsub.f32 %v6976_v33, %v7010_v49  ;;  %v7038_v63 = vsel %vm1098_vm1, %v7024_v35, 0.0 }
0x1e27   : > { %v13674_v45 = vsub.f32 %v6975_v46, %v7009_v26  ;;  %7039 = vadd.xlane.f32.xlu1 %v7038_v63  ;;  %v7004_v41 = vpop.xlane.xlu1 %7003  ;;  %v7035_v61 = vsel %vm1098_vm1, %v7023_v43, 0.0 }
0x1e28   : > { %v7012_v58 = vmul.f32 0.03125, %v7004_v41  ;;  %7036 = vadd.xlane.f32.xlu0 %v7035_v61  ;;  %v7001_v25 = vpop.xlane.xlu0 %7000  ;;  %v7026_v14 = vmul.f32 %v13671_v42, %v13671_v42 }
0x1e29   : > { %v7011_v27 = vmul.f32 0.03125, %v7001_v25  ;;  %v7025_v17 = vmul.f32 %v13674_v45, %v13674_v45 }
0x1e2a   : > { %v13681_v32 = vsub.f32 %v6978_v56, %v7012_v58  ;;  %v7044_v6 = vsel %vm1098_vm1, %v7026_v14, 0.0 }
0x1e2b   : > { %v13684_v40 = vsub.f32 %v6977_v18, %v7011_v27  ;;  %7045 = vadd.xlane.f32.xlu1 %v7044_v6  ;;  %v7041_v37 = vsel %vm1098_vm1, %v7025_v17, 0.0 }
0x1e2c   : > { %7042 = vadd.xlane.f32.xlu0 %v7041_v37  ;;  %v7028_v30 = vmul.f32 %v13681_v32, %v13681_v32 }
0x1e2d   : > { %v7027_v2 = vmul.f32 %v13684_v40, %v13684_v40 }
0x1e2e   : > { %v7050_v60 = vsel %vm1098_vm1, %v7028_v30, 0.0 }
0x1e2f   : > { %7051 = vadd.xlane.f32.xlu1 %v7050_v60  ;;  %v7047_v0 = vsel %vm1098_vm1, %v7027_v2, 0.0 }
0x1e30   : > { %7048 = vadd.xlane.f32.xlu0 %v7047_v0 }
0x1eab   : > { %v7034_v29 = vpop.xlane.xlu1 %7033 }
0x1eac   : > { %v7054_v20 = vmul.f32 0.03125, %v7034_v29  ;;  %v7031_v50 = vpop.xlane.xlu0 %7030  ;;  %v7197_v29 = vld [vmem:[#allocation31 + $0x8] sm:$0xff] }
0x1ead   : > { %v7053_v57 = vmul.f32 0.03125, %v7031_v50  ;;  %v9533_v50 = vpack.c.bf16 %v7197_v29, %v7196_v22 }
0x1eae   : > { %v7062_v16 = vadd.f32 1e-06, %v7054_v20 }
0x1eaf   : > { %v7061_v28 = vadd.f32 1e-06, %v7053_v57  ;;  %v7198_v57 = vld [vmem:[#allocation31 + $0x10] sm:$0xff] }
0x1eb0   : > { %10517 = vrsqrt.f32 %v7062_v16  ;;  %v7199_v16 = vld [vmem:[#allocation31 + $0x18] sm:$0xff] }
0x1eb1   : > { %10519 = vrsqrt.f32 %v7061_v28 }
0x1eb4   : > { %v7040_v9 = vpop.xlane.xlu1 %7039 }
0x1eb5   : > { %v7056_v8 = vmul.f32 0.03125, %v7040_v9  ;;  %v7037_v34 = vpop.xlane.xlu0 %7036 }
0x1eb6   : > { %v7055_v19 = vmul.f32 0.03125, %v7037_v34 }
0x1eb7   : > { %v7064_v54 = vadd.f32 1e-06, %v7056_v8  ;;  %v7937_v8 = vld [vmem:[#allocation32] ss:$0 sm:$0xff] }
0x1eb8   : > { %v7063_v33 = vadd.f32 1e-06, %v7055_v19  ;;  %v7046_v46 = vpop.xlane.xlu1 %7045 }
0x1eb9   : > { %10521 = vrsqrt.f32 %v7064_v54  ;;  %v7058_v11 = vmul.f32 0.03125, %v7046_v46  ;;  %v7043_v13 = vpop.xlane.xlu0 %7042 }
0x1eba   : > { %v10518_v5 = vpop.eup %10517  ;;  %10523 = vrsqrt.f32 %v7063_v33  ;;  %v7057_v15 = vmul.f32 0.03125, %v7043_v13 }
0x1ebb   : > { %v10520_v62 = vpop.eup %10519  ;;  %v7066_v56 = vadd.f32 1e-06, %v7058_v11  ;;  %v7078_v18 = vmul.f32 %v10518_v5, %v13653_v52 }
0x1ebc   : > { %v7065_v39 = vadd.f32 1e-06, %v7057_v15  ;;  %v7052_v24 = vpop.xlane.xlu1 %7051  ;;  %v7077_v10 = vmul.f32 %v10520_v62, %v13655_v44 }
0x1ebd   : > { %10525 = vrsqrt.f32 %v7066_v56  ;;  %v7060_v1 = vmul.f32 0.03125, %v7052_v24  ;;  %v7049_v47 = vpop.xlane.xlu0 %7048  ;;  %v7092_v23 = vmul.f32 %v7933_v4, %v7078_v18 }
0x1ebe   : > { %10527 = vrsqrt.f32 %v7065_v39  ;;  %v7059_v53 = vmul.f32 0.03125, %v7049_v47  ;;  %v7091_v3 = vmul.f32 %v7933_v4, %v7077_v10 }
0x1ebf   : > { %v7068_v12 = vadd.f32 1e-06, %v7060_v1  ;;  %v7106_v31 = vadd.f32 %v7934_v48, %v7092_v23 }
0x1ec0   : > { %v7067_v38 = vadd.f32 1e-06, %v7059_v53  ;;  %v7105_v51 = vadd.f32 %v7934_v48, %v7091_v3 }
0x1ec1   : > { %10529 = vrsqrt.f32 %v7068_v12 }
0x1ec2   : > { %10531 = vrsqrt.f32 %v7067_v38  ;;  %v9517_v59 = vpack.c.bf16 %v7106_v31, %v7105_v51 }
0x1ec3   : > { %v10522_v52 = vpop.eup %10521 }
0x1ec4   : > { %v10524_v7 = vpop.eup %10523  ;;  %9518 = vmatprep.subr.bf16.mxu0 %v9517_v59  ;;  %v7080_v49 = vmul.f32 %v10522_v52, %v13663_v36 }
0x1ec5   : > { %9520 = vmatpush3.bf16.msra.mxu0 %v9517_v59  ;;  %v7079_v44 = vmul.f32 %v10524_v7, %v13665_v55 }
0x1ec6   : > { %v7094_v21 = vmul.f32 %v7933_v4, %v7080_v49 }
0x1ec7   : > { %v10526_v35 = vpop.eup %10525  ;;  %v7093_v26 = vmul.f32 %v7933_v4, %v7079_v44 }
0x1ec8   : > { %v10528_v43 = vpop.eup %10527  ;;  %v7108_v63 = vadd.f32 %v7934_v48, %v7094_v21  ;;  %v7082_v41 = vmul.f32 %v10526_v35, %v13671_v42 }
0x1ec9   : > { %v7107_v61 = vadd.f32 %v7934_v48, %v7093_v26  ;;  %v7081_v58 = vmul.f32 %v10528_v43, %v13674_v45 }
0x1eca   : > { %v7096_v25 = vmul.f32 %v7933_v4, %v7082_v41 }
0x1ecb   : > { %v10530_v14 = vpop.eup %10529  ;;  %v9521_v27 = vpack.c.bf16 %v7108_v63, %v7107_v61  ;;  %v7095_v17 = vmul.f32 %v7933_v4, %v7081_v58 }
0x1ecc   : > { %v10532_v6 = vpop.eup %10531  ;;  %v7110_v37 = vadd.f32 %v7934_v48, %v7096_v25  ;;  %v7084_v36 = vmul.f32 %v10530_v14, %v13681_v32  ;;  %v7114_v32 = vld [vmem:[#allocation29 + $0x8] sm:$0xff] }
0x1ecd   : > { %9522 = vmatprep.subr.bf16.mxu0 %v9521_v27  ;;  %v7109_v55 = vadd.f32 %v7934_v48, %v7095_v17  ;;  %v7083_v30 = vmul.f32 %v10532_v6, %v13684_v40  ;;  %v9537_v40 = vpack.c.bf16 %v7199_v16, %v7198_v57 }
0x1ece   : > { %9524 = vmatpush3.bf16.msra.mxu0 %v9521_v27  ;;  %v7098_v2 = vmul.f32 %v7933_v4, %v7084_v36 }
0x1ecf   : > { %v9525_v60 = vpack.c.bf16 %v7110_v37, %v7109_v55  ;;  %v7097_v0 = vmul.f32 %v7933_v4, %v7083_v30 }
0x1ed0   : > { %v7112_v42 = vadd.f32 %v7934_v48, %v7098_v2 }
0x1ed1   : > { %9526 = vmatprep.subr.bf16.mxu0 %v9525_v60  ;;  %v7111_v45 = vadd.f32 %v7934_v48, %v7097_v0 }
0x1ed2   : > { %9528 = vmatpush3.bf16.msra.mxu0 %v9525_v60 }
0x1ed3   : > { %v9529_v20 = vpack.c.bf16 %v7112_v42, %v7111_v45 }
0x1ed5   : > { %9530 = vmatprep.subr.bf16.mxu0 %v9529_v20 }
0x1ed6   : > { %9532 = vmatpush3.bf16.msra.mxu0 %v9529_v20 }
0x1ed7   : > { %9534 = vmatprep.subr.bf16.mxu0 %v9533_v50 }
0x1ed9   : > { %9084 = vmatmul.mubr.msk.f32.vlgmr.msra.gmra.mrb[96].mxu0 %vm966_vm0, %v7114_v32 }
0x1eda   : > { %9536 = vmatpush3.bf16.msra.mxu0 %v9533_v50 }
0x1edb   : > { %9538 = vmatprep.subr.bf16.mxu0 %v9537_v40 }
0x1ede   : > { %9540 = vmatpush3.bf16.msra.mxu0 %v9537_v40 }
0x1fac   : > { %v9085_v28 = vpop.f32.mrb[96].mxu0 }
0x1fad   : > { %v7187_v9 = vpop.f32.mrb[97].mxu0 }
0x1fae   : > { %9094 = vmatprep.mubr.msk.f32.mxu0 %vm1098_vm1, %v7187_v9 }
0x1faf   : > { %9095 = vmatmul.mubr.msk.f32.vlgmr.msra.gmra.mrb[98].mxu0 %vm1098_vm1, %v9085_v28 }
0x2082   : > { %v9096_v34 = vpop.f32.mrb[98].mxu0 }
0x2083   : > { %v7285_v19 = vadd.f32 %v9096_v34, %v7937_v8  ;;  %v7279_v54 = vpop.f32.mrb[99].mxu0 }
0x2084   : > { %v7280_v33 = vadd.f32 %v7937_v8, %v7279_v54 }
0x2085   : > { %7289 = vst [vmem:[%s917_s8 + $0x8] sm:$0xff] %v7285_v19 }
0x2086   : > { %7288 = vst [vmem:[%s917_s8] sm:$0xff] %v7280_v33 }
0x2087   : > { %11108 = shalt.err (!%p11105_p8)
}
0x2088   : > { %s11109_s16 = scalar_lea.hbm %s13712_s22, 256  ;;  %s11113_s5 = scalar_lea.hbm %s13884_s2, 512 }
0x2089   : > { %p11110_p6 = scmp.ne.s32.totalorder %s13712_s22, %s11109_s16  ;;  %p11114_p3 = scmp.lt.u32.totalorder %s13712_s22, %s13884_s2 }
0x208a   : > { %p11115_p0 = scmp.lt.u32.totalorder %s11113_s5, %s11109_s16  ;;  %p11117_p2 = scmp.lt.u32.totalorder %s11109_s16, %s13712_s22 }
0x208b   : > { %p11111_p9 = pnand %p11110_p6, %p13885_p7 }
0x208c   : > { %p11116_p5 = por %p11115_p0, %p11114_p3 }
0x208d   : > { %p11112_p4 = pneg %p11111_p9 }
0x208e   : > { %p11118_p10 = por %p11117_p2, %p11116_p5 }
0x2090   : > { %p11119_p1 = pnand %p11118_p10, %p11112_p4 }
0x2092   : > { %11122 = shalt.err (!%p11119_p1)
}
0x2093   : > { %s11241_s25 = smov 128   ;;  %s11242_s20 = smov 8  }
0x2094   : > { %9667 = dma.vmem_to_hbm [thread:$0]  (%p13885_p7), %s13707_s30, 256, %s13712_s22, %s7291_s23, %s11241_s25, %s11241_s25, %s11242_s20  }
0x2095 PF: > { %s13886_s24 = sld [smem:[#allocation47_spill]]  ;;  %s13887_s8 = sld [smem:[#allocation50_spill]] }
0x2096   : > { %p13888_p11 = scmp.ne.s32.totalorder %s13855_s26, 0 }
0x209b   : > { %s7319_s9 = sand.u32 1, %s13886_s24   ;;  %p13889_p12 = scmp.ge.s32.totalorder %s13887_s8, 2 }
0x209c   : > { %s7320_s16 = scalar_lea.sflag [#allocation4], %s7319_s9 }
0x209d   : > { %p9732_p13 = pnand %p13889_p12, %p13888_p11 }
0x209f   : > { %11184 = dma.done.wait (!%p9732_p13), %s7320_s16, 256  }
0x20a0   : > { %11186 = vsyncadd (!%p9732_p13), %s7320_s16, 4294967040  ;;  %s13890_s1 = sld [smem:[#allocation48_spill]]  ;;  %s13891_s22 = sld [smem:[#allocation49_spill]] }
0x20a1   : > { %p43_p8 = scmp.ge.s32.totalorder %s11802_s4, 4   ;;  %s13892_s23 = smov %s11814_s3 }
0x20a2   : > { %s13893_s24 = smov %s11802_s4 }
0x20a3   :  { %45 = sbr.rel (!%p43_p8) target bundleno = 30 (0x1e), region = 239 }
0x20aa   :  { %7325 = vsyncpa [#allocation3], 1 }
0x20ab   :  { %7327 = vsyncpa [#allocation3 + $0x1], 1 }
0x20ac   :  { %7328 = vsyncpa [#allocation6], 1 }
0x20ad   :  { %7329 = vsyncpa [#allocation9], 1 }
0x20ae   :  { %7330 = vsyncpa [#allocation12], 1 }
0x20af   :  { %7331 = vsyncpa [#allocation15], 1 }
0x20b0   :  { %7332 = vsyncpa [#allocation18], 1 }
0x20b1   :  { %7333 = vsyncpa [#allocation21], 1 }
0x20b2   :  { %7334 = vsyncpa [#allocation24], 1 }
0x20b3   :  { %7335 = vsyncpa [#allocation27], 1 }
0x20b4   :  { %7336 = vsyncpa [#allocation30], 1 }
0x20b5   :  { %7337 = vsyncpa [#allocation33], 1 }
0x20b6   :  { %7338 = vsyncpa [#allocation4], 1 }
0x20b7   :  { %7340 = vsyncpa [#allocation4 + $0x1], 1 }

</bundles_post_ra>
